<compile_context>
chip_gen: v6e
topology: v6e:2x2x1
jax: 0.10.0
libtpu: 0.0.40
codegen_flags: <defaults>
</compile_context>

<pallas_src>
import functools

import jax
import jax.numpy as jnp
import numpy as np
from jax.experimental import pallas as pl
from jax.experimental.pallas import tpu as pltpu

# Geometry implied by the PyTorch module (fc1 expects 16*4*4 = 256 features -> 28x28x1 in).
IMG = 28            # input spatial size, 1 channel
C1 = 16             # conv1 output channels
C2 = 16             # conv2 output channels
H1 = 12             # pooled conv1 spatial size
H2 = 4              # pooled conv2 spatial size
K1 = 144            # conv1 contraction: 5 rows * 28 cols = 140, padded to a multiple of 8
XW = 896            # flattened image lane width, 784 padded so every 144-wide band fits
NPAD = 128          # lane-dense padded class count


# ----------------------------------------------------------------------------
# Fused Pallas kernel: the whole network for one batch tile
# ----------------------------------------------------------------------------
def _net_kernel(x_ref, r1_ref, c2_ref, wf_ref, b1_ref, b2_ref, bf_ref, out_ref, h1_ref):
    """x_ref  : (TB, 896)       bf16  flattened 28x28 images (lane = 28*row + col, zero pad)
    r1_ref : (2, 144, 192)   bf16  conv1 row-band weights, one per pool column offset q
    c2_ref : (10, 192, 64)   bf16  conv2 weights, index 5*q + kh (pool col offset, row tap)
    wf_ref : (4, 64, 128)    bf16  fc weights per pooled conv2 row, classes padded to 128
    b1_ref : (1, 192) f32 ; b2_ref : (1, 64) f32 ; bf_ref : (1, 128) f32 (pad lanes -1e30)
    out_ref: (TB, 128)       f32   log-probs (lanes >= num_classes sliced off outside)
    h1_ref : (12, TB, 192)   bf16  VMEM scratch: pooled+relu'd conv1 activation rows
    """
    # Hoist the small, grid-invariant weight loads out of the unrolled loops.
    r1 = [r1_ref[q] for q in range(2)]
    c2 = [c2_ref[k] for k in range(10)]
    wf = [wf_ref[i] for i in range(H2)]
    b1 = b1_ref[...]
    b2 = b2_ref[...]

    # ---- layer 1: conv1(1->16, 5x5) + 2x2 max-pool + relu, one pooled row at a time ----
    for i in range(H1):
        m = None
        for p in range(2):                                     # pool row offset
            # image rows 2i+p .. 2i+p+4 as one lane band (built in-kernel, no XLA im2col)
            band = x_ref[:, pl.ds(IMG * (2 * i + p), K1)]      # (TB, 144) bf16
            for q in range(2):                                 # pool column offset
                y = jnp.dot(band, r1[q], preferred_element_type=jnp.float32)   # (TB, 192)
                m = y if m is None else jnp.maximum(m, y)
        h1_ref[i] = jnp.maximum(m + b1, 0.0).astype(jnp.bfloat16)

    # ---- layer 2 + fc + log_softmax (h1 never leaves VMEM) ----
    z = None
    for ip in range(H2):                                       # pooled conv2 output row
        m = None
        for p in range(2):                                     # pool row offset
            for q in range(2):                                 # pool column offset
                acc = None
                for kh in range(5):                            # conv2 row tap
                    y = jnp.dot(h1_ref[2 * ip + p + kh], c2[5 * q + kh],
                                preferred_element_type=jnp.float32)            # (TB, 64)
                    acc = y if acc is None else acc + y
                m = acc if m is None else jnp.maximum(m, acc)
        h2_row = jnp.maximum(m + b2, 0.0).astype(jnp.bfloat16)                 # (TB, 64)
        zi = jnp.dot(h2_row, wf[ip], preferred_element_type=jnp.float32)       # (TB, 128)
        z = zi if z is None else z + zi

    z = z + bf_ref[...]                                        # padded classes get -1e30
    mx = jnp.max(z, axis=-1, keepdims=True)
    lse = jnp.log(jnp.sum(jnp.exp(z - mx), axis=-1, keepdims=True))
    out_ref[...] = z - mx - lse


# ----------------------------------------------------------------------------
# pallas_call wrapper
# ----------------------------------------------------------------------------
def _batch_tiling(batch):
    """Batch tile (multiple of 16, clamped to [16, 64]) and a grid of >= 2 steps (v7x)."""
    tb = min(64, max(16, 16 * ((batch + 31) // 32)))
    n_tiles = max(2, -(-batch // tb))
    return tb, n_tiles


@functools.partial(jax.jit, static_argnames=("num_classes",))
def net_forward(x_nchw, packed, num_classes=10):
    """Forward pass of Net: (B, 1, 28, 28) NCHW -> (B, num_classes) log-probs."""
    B = x_nchw.shape[0]
    tb, n_tiles = _batch_tiling(B)
    bp = tb * n_tiles

    # Only glue: flatten to (B, 784), cast to bf16 and zero-pad lanes/batch.  Same bytes as
    # the input -- all patch construction happens inside the kernel.
    x = x_nchw.reshape(B, IMG * IMG).astype(jnp.bfloat16)
    x = jnp.pad(x, ((0, bp - B), (0, XW - IMG * IMG)))

    logp = pl.pallas_call(
        _net_kernel,
        out_shape=jax.ShapeDtypeStruct((bp, NPAD), jnp.float32),
        grid=(n_tiles,),
        in_specs=[
            pl.BlockSpec((tb, XW), lambda i: (i, 0)),
            pl.BlockSpec((2, K1, H1 * C1), lambda i: (0, 0, 0)),
            pl.BlockSpec((10, H1 * C1, H2 * C2), lambda i: (0, 0, 0)),
            pl.BlockSpec((H2, H2 * C2, NPAD), lambda i: (0, 0, 0)),
            pl.BlockSpec((1, H1 * C1), lambda i: (0, 0)),
            pl.BlockSpec((1, H2 * C2), lambda i: (0, 0)),
            pl.BlockSpec((1, NPAD), lambda i: (0, 0)),
        ],
        out_specs=pl.BlockSpec((tb, NPAD), lambda i: (i, 0)),
        scratch_shapes=[pltpu.VMEM((H1, tb, H1 * C1), jnp.bfloat16)],
        compiler_params=pltpu.CompilerParams(dimension_semantics=("parallel",)),
    )(x, packed["r1"], packed["c2"], packed["wf"], packed["b1"], packed["b2"], packed["bf"])
    return logp[:B, :num_classes]


# ----------------------------------------------------------------------------
# Parameter prep (eager, numpy; runs once off the hot path)
# ----------------------------------------------------------------------------
def init_params(key, num_classes=10):
    k1, k2, k3, k4, k5, k6 = jax.random.split(key, 6)
    return {
        "w1": jax.random.normal(k1, (16, 1, 5, 5), jnp.float32) * (1.0 / 5.0),
        "b1": jax.random.normal(k2, (16,), jnp.float32) * 0.1,
        "w2": jax.random.normal(k3, (16, 16, 5, 5), jnp.float32) * (1.0 / 20.0),
        "b2": jax.random.normal(k4, (16,), jnp.float32) * 0.1,
        "wf": jax.random.normal(k5, (num_classes, 256), jnp.float32) * (1.0 / 16.0),
        "bf": jax.random.normal(k6, (num_classes,), jnp.float32) * 0.1,
    }


def pack_params(params, num_classes=10):
    """Repack PyTorch-layout weights into the Toeplitz-style matrices the kernel uses."""
    w1 = np.asarray(params["w1"], np.float32)        # (16, 1, 5, 5)   OIHW
    b1 = np.asarray(params["b1"], np.float32)
    w2 = np.asarray(params["w2"], np.float32)        # (16, 16, 5, 5)  OIHW
    b2 = np.asarray(params["b2"], np.float32)
    wf = np.asarray(params["wf"], np.float32)        # (nc, 256)
    bf = np.asarray(params["bf"], np.float32)

    # conv1 row-band matrix: r1[q, 28*kh + (2j+q+kw), 16*j + co] = w1[co, 0, kh, kw]
    r1 = np.zeros((2, K1, H1 * C1), np.float32)
    for q in range(2):
        for kh in range(5):
            for j in range(H1):
                for kw in range(5):
                    r1[q, IMG * kh + 2 * j + q + kw, 16 * j:16 * j + 16] = w1[:, 0, kh, kw]

    # conv2 per-row-tap matrix: c2[5q+kh, 16*(2jp+q+kw) + ci, 16*jp + co] = w2[co, ci, kh, kw]
    c2 = np.zeros((10, H1 * C1, H2 * C2), np.float32)
    for q in range(2):
        for kh in range(5):
            for jp in range(H2):
                for kw in range(5):
                    j = 2 * jp + q + kw
                    for ci in range(C2):
                        c2[5 * q + kh, 16 * j + ci, 16 * jp:16 * jp + 16] = w2[:, ci, kh, kw]

    # fc weight per pooled conv2 row, folding PyTorch's NCHW flatten (co*16 + ip*4 + jp)
    # and padding the class dim to a lane-dense 128.
    wf4 = wf.reshape(num_classes, C2, H2, H2)        # (n, co, ip, jp)
    wf4 = np.transpose(wf4, (2, 3, 1, 0)).reshape(H2, H2 * C2, num_classes)
    wf4 = np.pad(wf4, ((0, 0), (0, 0), (0, NPAD - num_classes)))

    bft = np.full((1, NPAD), -1e30, np.float32)      # padded logits -> exp() == 0 exactly
    bft[0, :num_classes] = bf

    return {
        "r1": jnp.asarray(r1, jnp.bfloat16),
        "c2": jnp.asarray(c2, jnp.bfloat16),
        "wf": jnp.asarray(wf4, jnp.bfloat16),
        "b1": jnp.asarray(np.tile(b1, H1)[None, :]),            # (1, 192), lane = 16*j + co
        "b2": jnp.asarray(np.tile(b2, H2)[None, :]),            # (1, 64)
        "bf": jnp.asarray(bft),                                  # (1, 128)
    }


# ----------------------------------------------------------------------------
# Pure-JAX f32 reference mirroring the PyTorch forward (sanity check)
# ----------------------------------------------------------------------------
def reference_forward(x_nchw, params):
    def conv(x, w, b):
        y = jax.lax.conv_general_dilated(
            x, w, (1, 1), "VALID", dimension_numbers=("NCHW", "OIHW", "NCHW"))
        return y + b[None, :, None, None]

    def pool2(x):
        b, c, h, w = x.shape
        return jnp.max(x.reshape(b, c, h // 2, 2, w // 2, 2), axis=(3, 5))

    h = jnp.maximum(pool2(conv(x_nchw, params["w1"], params["b1"])), 0.0)
    h = jnp.maximum(pool2(conv(h, params["w2"], params["b2"])), 0.0)
    h = h.reshape(h.shape[0], -1)
    z = h @ params["wf"].T + params["bf"]
    return jax.nn.log_softmax(z, axis=1)


if __name__ == "__main__":
    key = jax.random.PRNGKey(0)
    kx, kp = jax.random.split(key)
    x = jax.random.normal(kx, (2, 1, 28, 28), jnp.float32)   # NCHW like PyTorch
    params = init_params(kp, num_classes=10)
    packed = pack_params(params, num_classes=10)

    out = jax.block_until_ready(net_forward(x, packed))
    assert out.shape == (2, 10), out.shape

    ref = jax.block_until_ready(reference_forward(x, params))
    err = float(jnp.max(jnp.abs(out - ref)))
    # bf16 MXU operands (f32 accumulation) -> loosened tolerance vs the pure-f32 reference.
    assert err < 1e-1, f"max |err| = {err}"

    print("KERNEL_OK")
</pallas_src>

<mosaic_0001>
module attributes {stable_mosaic.version = 11 : i64} {
  func.func @_net_kernel(%arg0: i32, %arg1: memref<16x896xbf16, #tpu.memory_space<vmem>>, %arg2: memref<2x144x192xbf16, #tpu.memory_space<vmem>>, %arg3: memref<10x192x64xbf16, #tpu.memory_space<vmem>>, %arg4: memref<4x64x128xbf16, #tpu.memory_space<vmem>>, %arg5: memref<1x192xf32, #tpu.memory_space<vmem>>, %arg6: memref<1x64xf32, #tpu.memory_space<vmem>>, %arg7: memref<1x128xf32, #tpu.memory_space<vmem>>, %arg8: memref<16x128xf32, #tpu.memory_space<vmem>>, %arg9: memref<12x16x192xbf16, #tpu.memory_space<vmem>>) attributes {dimension_semantics = [#tpu.dimension_semantics<parallel>], iteration_bounds = array<i64: 2>, scalar_prefetch = 0 : i64, scratch_operands = 1 : i64, tpu.core_type = #tpu.core_type<tc>, window_params = [{transform_indices = @transform_0, window_bounds = array<i64: 16, 896>}, {pipeline_mode = #tpu.pipeline_mode<synchronous>, transform_indices = @transform_1, window_bounds = array<i64: 2, 144, 192>}, {pipeline_mode = #tpu.pipeline_mode<synchronous>, transform_indices = @transform_2, window_bounds = array<i64: 10, 192, 64>}, {pipeline_mode = #tpu.pipeline_mode<synchronous>, transform_indices = @transform_3, window_bounds = array<i64: 4, 64, 128>}, {pipeline_mode = #tpu.pipeline_mode<synchronous>, transform_indices = @transform_4, window_bounds = array<i64: 1, 192>}, {pipeline_mode = #tpu.pipeline_mode<synchronous>, transform_indices = @transform_5, window_bounds = array<i64: 1, 64>}, {pipeline_mode = #tpu.pipeline_mode<synchronous>, transform_indices = @transform_6, window_bounds = array<i64: 1, 128>}, {transform_indices = @transform_7, window_bounds = array<i64: 16, 128>}]} {
    %c0 = arith.constant 0 : index
    %c0_0 = arith.constant 0 : index
    %c0_1 = arith.constant 0 : index
    %0 = vector.load %arg2[%c0, %c0_0, %c0_1] : memref<2x144x192xbf16, #tpu.memory_space<vmem>>, vector<1x144x192xbf16>
    %1 = vector.shape_cast %0 : vector<1x144x192xbf16> to vector<144x192xbf16>
    %c1 = arith.constant 1 : index
    %c0_2 = arith.constant 0 : index
    %c0_3 = arith.constant 0 : index
    %2 = vector.load %arg2[%c1, %c0_2, %c0_3] : memref<2x144x192xbf16, #tpu.memory_space<vmem>>, vector<1x144x192xbf16>
    %3 = vector.shape_cast %2 : vector<1x144x192xbf16> to vector<144x192xbf16>
    %c0_4 = arith.constant 0 : index
    %c0_5 = arith.constant 0 : index
    %c0_6 = arith.constant 0 : index
    %4 = vector.load %arg3[%c0_4, %c0_5, %c0_6] : memref<10x192x64xbf16, #tpu.memory_space<vmem>>, vector<1x192x64xbf16>
    %5 = vector.shape_cast %4 : vector<1x192x64xbf16> to vector<192x64xbf16>
    %c1_7 = arith.constant 1 : index
    %c0_8 = arith.constant 0 : index
    %c0_9 = arith.constant 0 : index
    %6 = vector.load %arg3[%c1_7, %c0_8, %c0_9] : memref<10x192x64xbf16, #tpu.memory_space<vmem>>, vector<1x192x64xbf16>
    %7 = vector.shape_cast %6 : vector<1x192x64xbf16> to vector<192x64xbf16>
    %c2 = arith.constant 2 : index
    %c0_10 = arith.constant 0 : index
    %c0_11 = arith.constant 0 : index
    %8 = vector.load %arg3[%c2, %c0_10, %c0_11] : memref<10x192x64xbf16, #tpu.memory_space<vmem>>, vector<1x192x64xbf16>
    %9 = vector.shape_cast %8 : vector<1x192x64xbf16> to vector<192x64xbf16>
    %c3 = arith.constant 3 : index
    %c0_12 = arith.constant 0 : index
    %c0_13 = arith.constant 0 : index
    %10 = vector.load %arg3[%c3, %c0_12, %c0_13] : memref<10x192x64xbf16, #tpu.memory_space<vmem>>, vector<1x192x64xbf16>
    %11 = vector.shape_cast %10 : vector<1x192x64xbf16> to vector<192x64xbf16>
    %c4 = arith.constant 4 : index
    %c0_14 = arith.constant 0 : index
    %c0_15 = arith.constant 0 : index
    %12 = vector.load %arg3[%c4, %c0_14, %c0_15] : memref<10x192x64xbf16, #tpu.memory_space<vmem>>, vector<1x192x64xbf16>
    %13 = vector.shape_cast %12 : vector<1x192x64xbf16> to vector<192x64xbf16>
    %c5 = arith.constant 5 : index
    %c0_16 = arith.constant 0 : index
    %c0_17 = arith.constant 0 : index
    %14 = vector.load %arg3[%c5, %c0_16, %c0_17] : memref<10x192x64xbf16, #tpu.memory_space<vmem>>, vector<1x192x64xbf16>
    %15 = vector.shape_cast %14 : vector<1x192x64xbf16> to vector<192x64xbf16>
    %c6 = arith.constant 6 : index
    %c0_18 = arith.constant 0 : index
    %c0_19 = arith.constant 0 : index
    %16 = vector.load %arg3[%c6, %c0_18, %c0_19] : memref<10x192x64xbf16, #tpu.memory_space<vmem>>, vector<1x192x64xbf16>
    %17 = vector.shape_cast %16 : vector<1x192x64xbf16> to vector<192x64xbf16>
    %c7 = arith.constant 7 : index
    %c0_20 = arith.constant 0 : index
    %c0_21 = arith.constant 0 : index
    %18 = vector.load %arg3[%c7, %c0_20, %c0_21] : memref<10x192x64xbf16, #tpu.memory_space<vmem>>, vector<1x192x64xbf16>
    %19 = vector.shape_cast %18 : vector<1x192x64xbf16> to vector<192x64xbf16>
    %c8 = arith.constant 8 : index
    %c0_22 = arith.constant 0 : index
    %c0_23 = arith.constant 0 : index
    %20 = vector.load %arg3[%c8, %c0_22, %c0_23] : memref<10x192x64xbf16, #tpu.memory_space<vmem>>, vector<1x192x64xbf16>
    %21 = vector.shape_cast %20 : vector<1x192x64xbf16> to vector<192x64xbf16>
    %c9 = arith.constant 9 : index
    %c0_24 = arith.constant 0 : index
    %c0_25 = arith.constant 0 : index
    %22 = vector.load %arg3[%c9, %c0_24, %c0_25] : memref<10x192x64xbf16, #tpu.memory_space<vmem>>, vector<1x192x64xbf16>
    %23 = vector.shape_cast %22 : vector<1x192x64xbf16> to vector<192x64xbf16>
    %c0_26 = arith.constant 0 : index
    %c0_27 = arith.constant 0 : index
    %c0_28 = arith.constant 0 : index
    %24 = vector.load %arg4[%c0_26, %c0_27, %c0_28] : memref<4x64x128xbf16, #tpu.memory_space<vmem>>, vector<1x64x128xbf16>
    %25 = vector.shape_cast %24 : vector<1x64x128xbf16> to vector<64x128xbf16>
    %c1_29 = arith.constant 1 : index
    %c0_30 = arith.constant 0 : index
    %c0_31 = arith.constant 0 : index
    %26 = vector.load %arg4[%c1_29, %c0_30, %c0_31] : memref<4x64x128xbf16, #tpu.memory_space<vmem>>, vector<1x64x128xbf16>
    %27 = vector.shape_cast %26 : vector<1x64x128xbf16> to vector<64x128xbf16>
    %c2_32 = arith.constant 2 : index
    %c0_33 = arith.constant 0 : index
    %c0_34 = arith.constant 0 : index
    %28 = vector.load %arg4[%c2_32, %c0_33, %c0_34] : memref<4x64x128xbf16, #tpu.memory_space<vmem>>, vector<1x64x128xbf16>
    %29 = vector.shape_cast %28 : vector<1x64x128xbf16> to vector<64x128xbf16>
    %c3_35 = arith.constant 3 : index
    %c0_36 = arith.constant 0 : index
    %c0_37 = arith.constant 0 : index
    %30 = vector.load %arg4[%c3_35, %c0_36, %c0_37] : memref<4x64x128xbf16, #tpu.memory_space<vmem>>, vector<1x64x128xbf16>
    %31 = vector.shape_cast %30 : vector<1x64x128xbf16> to vector<64x128xbf16>
    %c0_38 = arith.constant 0 : index
    %c0_39 = arith.constant 0 : index
    %32 = vector.load %arg5[%c0_38, %c0_39] : memref<1x192xf32, #tpu.memory_space<vmem>>, vector<1x192xf32>
    %c0_40 = arith.constant 0 : index
    %c0_41 = arith.constant 0 : index
    %33 = vector.load %arg6[%c0_40, %c0_41] : memref<1x64xf32, #tpu.memory_space<vmem>>, vector<1x64xf32>
    %c0_42 = arith.constant 0 : index
    %c0_43 = arith.constant 0 : index
    %34 = vector.load %arg1[%c0_42, %c0_43] : memref<16x896xbf16, #tpu.memory_space<vmem>>, vector<16x144xbf16>
    %cst = arith.constant dense<0.000000e+00> : vector<16x192xf32>
    %35 = tpu.matmul %34, %1, %cst {dimension_numbers = #tpu.dot_dimension_numbers<[1], [0], [0], [1], [0, 0, 1, 1], [], []>} : vector<16x144xbf16>, vector<144x192xbf16>, vector<16x192xf32> -> vector<16x192xf32>
    %cst_44 = arith.constant dense<0.000000e+00> : vector<16x192xf32>
    %36 = tpu.matmul %34, %3, %cst_44 {dimension_numbers = #tpu.dot_dimension_numbers<[1], [0], [0], [1], [0, 0, 1, 1], [], []>} : vector<16x144xbf16>, vector<144x192xbf16>, vector<16x192xf32> -> vector<16x192xf32>
    %37 = arith.maximumf %35, %36 : vector<16x192xf32>
    %c0_45 = arith.constant 0 : index
    %c28 = arith.constant 28 : index
    %38 = vector.load %arg1[%c0_45, %c28] : memref<16x896xbf16, #tpu.memory_space<vmem>>, vector<16x144xbf16>
    %cst_46 = arith.constant dense<0.000000e+00> : vector<16x192xf32>
    %39 = tpu.matmul %38, %1, %cst_46 {dimension_numbers = #tpu.dot_dimension_numbers<[1], [0], [0], [1], [0, 0, 1, 1], [], []>} : vector<16x144xbf16>, vector<144x192xbf16>, vector<16x192xf32> -> vector<16x192xf32>
    %40 = arith.maximumf %37, %39 : vector<16x192xf32>
    %cst_47 = arith.constant dense<0.000000e+00> : vector<16x192xf32>
    %41 = tpu.matmul %38, %3, %cst_47 {dimension_numbers = #tpu.dot_dimension_numbers<[1], [0], [0], [1], [0, 0, 1, 1], [], []>} : vector<16x144xbf16>, vector<144x192xbf16>, vector<16x192xf32> -> vector<16x192xf32>
    %42 = arith.maximumf %40, %41 : vector<16x192xf32>
    %43 = vector.broadcast %32 : vector<1x192xf32> to vector<16x192xf32>
    %44 = arith.addf %42, %43 : vector<16x192xf32>
    %cst_48 = arith.constant 0.000000e+00 : f32
    %45 = vector.broadcast %cst_48 : f32 to vector<16x192xf32>
    %46 = arith.maximumf %44, %45 : vector<16x192xf32>
    %47 = arith.truncf %46 : vector<16x192xf32> to vector<16x192xbf16>
    %c0_49 = arith.constant 0 : index
    %c0_50 = arith.constant 0 : index
    %c0_51 = arith.constant 0 : index
    %48 = vector.load %arg9[%c0_49, %c0_50, %c0_51] : memref<12x16x192xbf16, #tpu.memory_space<vmem>>, vector<1x16x192xbf16>
    %49 = vector.shape_cast %48 : vector<1x16x192xbf16> to vector<16x192xbf16>
    %50 = vector.shape_cast %47 : vector<16x192xbf16> to vector<1x16x192xbf16>
    tpu.vector_store %arg9[%c0_49, %c0_50, %c0_51], %50 {strides = array<i32>} : memref<12x16x192xbf16, #tpu.memory_space<vmem>>, vector<1x16x192xbf16>,
    %c0_52 = arith.constant 0 : index
    %c56 = arith.constant 56 : index
    %51 = vector.load %arg1[%c0_52, %c56] : memref<16x896xbf16, #tpu.memory_space<vmem>>, vector<16x144xbf16>
    %cst_53 = arith.constant dense<0.000000e+00> : vector<16x192xf32>
    %52 = tpu.matmul %51, %1, %cst_53 {dimension_numbers = #tpu.dot_dimension_numbers<[1], [0], [0], [1], [0, 0, 1, 1], [], []>} : vector<16x144xbf16>, vector<144x192xbf16>, vector<16x192xf32> -> vector<16x192xf32>
    %cst_54 = arith.constant dense<0.000000e+00> : vector<16x192xf32>
    %53 = tpu.matmul %51, %3, %cst_54 {dimension_numbers = #tpu.dot_dimension_numbers<[1], [0], [0], [1], [0, 0, 1, 1], [], []>} : vector<16x144xbf16>, vector<144x192xbf16>, vector<16x192xf32> -> vector<16x192xf32>
    %54 = arith.maximumf %52, %53 : vector<16x192xf32>
    %c0_55 = arith.constant 0 : index
    %c84 = arith.constant 84 : index
    %55 = vector.load %arg1[%c0_55, %c84] : memref<16x896xbf16, #tpu.memory_space<vmem>>, vector<16x144xbf16>
    %cst_56 = arith.constant dense<0.000000e+00> : vector<16x192xf32>
    %56 = tpu.matmul %55, %1, %cst_56 {dimension_numbers = #tpu.dot_dimension_numbers<[1], [0], [0], [1], [0, 0, 1, 1], [], []>} : vector<16x144xbf16>, vector<144x192xbf16>, vector<16x192xf32> -> vector<16x192xf32>
    %57 = arith.maximumf %54, %56 : vector<16x192xf32>
    %cst_57 = arith.constant dense<0.000000e+00> : vector<16x192xf32>
    %58 = tpu.matmul %55, %3, %cst_57 {dimension_numbers = #tpu.dot_dimension_numbers<[1], [0], [0], [1], [0, 0, 1, 1], [], []>} : vector<16x144xbf16>, vector<144x192xbf16>, vector<16x192xf32> -> vector<16x192xf32>
    %59 = arith.maximumf %57, %58 : vector<16x192xf32>
    %60 = vector.broadcast %32 : vector<1x192xf32> to vector<16x192xf32>
    %61 = arith.addf %59, %60 : vector<16x192xf32>
    %cst_58 = arith.constant 0.000000e+00 : f32
    %62 = vector.broadcast %cst_58 : f32 to vector<16x192xf32>
    %63 = arith.maximumf %61, %62 : vector<16x192xf32>
    %64 = arith.truncf %63 : vector<16x192xf32> to vector<16x192xbf16>
    %c1_59 = arith.constant 1 : index
    %c0_60 = arith.constant 0 : index
    %c0_61 = arith.constant 0 : index
    %65 = vector.load %arg9[%c1_59, %c0_60, %c0_61] : memref<12x16x192xbf16, #tpu.memory_space<vmem>>, vector<1x16x192xbf16>
    %66 = vector.shape_cast %65 : vector<1x16x192xbf16> to vector<16x192xbf16>
    %67 = vector.shape_cast %64 : vector<16x192xbf16> to vector<1x16x192xbf16>
    tpu.vector_store %arg9[%c1_59, %c0_60, %c0_61], %67 {strides = array<i32>} : memref<12x16x192xbf16, #tpu.memory_space<vmem>>, vector<1x16x192xbf16>,
    %c0_62 = arith.constant 0 : index
    %c112 = arith.constant 112 : index
    %68 = vector.load %arg1[%c0_62, %c112] : memref<16x896xbf16, #tpu.memory_space<vmem>>, vector<16x144xbf16>
    %cst_63 = arith.constant dense<0.000000e+00> : vector<16x192xf32>
    %69 = tpu.matmul %68, %1, %cst_63 {dimension_numbers = #tpu.dot_dimension_numbers<[1], [0], [0], [1], [0, 0, 1, 1], [], []>} : vector<16x144xbf16>, vector<144x192xbf16>, vector<16x192xf32> -> vector<16x192xf32>
    %cst_64 = arith.constant dense<0.000000e+00> : vector<16x192xf32>
    %70 = tpu.matmul %68, %3, %cst_64 {dimension_numbers = #tpu.dot_dimension_numbers<[1], [0], [0], [1], [0, 0, 1, 1], [], []>} : vector<16x144xbf16>, vector<144x192xbf16>, vector<16x192xf32> -> vector<16x192xf32>
    %71 = arith.maximumf %69, %70 : vector<16x192xf32>
    %c0_65 = arith.constant 0 : index
    %c140 = arith.constant 140 : index
    %72 = vector.load %arg1[%c0_65, %c140] : memref<16x896xbf16, #tpu.memory_space<vmem>>, vector<16x144xbf16>
    %cst_66 = arith.constant dense<0.000000e+00> : vector<16x192xf32>
    %73 = tpu.matmul %72, %1, %cst_66 {dimension_numbers = #tpu.dot_dimension_numbers<[1], [0], [0], [1], [0, 0, 1, 1], [], []>} : vector<16x144xbf16>, vector<144x192xbf16>, vector<16x192xf32> -> vector<16x192xf32>
    %74 = arith.maximumf %71, %73 : vector<16x192xf32>
    %cst_67 = arith.constant dense<0.000000e+00> : vector<16x192xf32>
    %75 = tpu.matmul %72, %3, %cst_67 {dimension_numbers = #tpu.dot_dimension_numbers<[1], [0], [0], [1], [0, 0, 1, 1], [], []>} : vector<16x144xbf16>, vector<144x192xbf16>, vector<16x192xf32> -> vector<16x192xf32>
    %76 = arith.maximumf %74, %75 : vector<16x192xf32>
    %77 = vector.broadcast %32 : vector<1x192xf32> to vector<16x192xf32>
    %78 = arith.addf %76, %77 : vector<16x192xf32>
    %cst_68 = arith.constant 0.000000e+00 : f32
    %79 = vector.broadcast %cst_68 : f32 to vector<16x192xf32>
    %80 = arith.maximumf %78, %79 : vector<16x192xf32>
    %81 = arith.truncf %80 : vector<16x192xf32> to vector<16x192xbf16>
    %c2_69 = arith.constant 2 : index
    %c0_70 = arith.constant 0 : index
    %c0_71 = arith.constant 0 : index
    %82 = vector.load %arg9[%c2_69, %c0_70, %c0_71] : memref<12x16x192xbf16, #tpu.memory_space<vmem>>, vector<1x16x192xbf16>
    %83 = vector.shape_cast %82 : vector<1x16x192xbf16> to vector<16x192xbf16>
    %84 = vector.shape_cast %81 : vector<16x192xbf16> to vector<1x16x192xbf16>
    tpu.vector_store %arg9[%c2_69, %c0_70, %c0_71], %84 {strides = array<i32>} : memref<12x16x192xbf16, #tpu.memory_space<vmem>>, vector<1x16x192xbf16>,
    %c0_72 = arith.constant 0 : index
    %c168 = arith.constant 168 : index
    %85 = vector.load %arg1[%c0_72, %c168] : memref<16x896xbf16, #tpu.memory_space<vmem>>, vector<16x144xbf16>
    %cst_73 = arith.constant dense<0.000000e+00> : vector<16x192xf32>
    %86 = tpu.matmul %85, %1, %cst_73 {dimension_numbers = #tpu.dot_dimension_numbers<[1], [0], [0], [1], [0, 0, 1, 1], [], []>} : vector<16x144xbf16>, vector<144x192xbf16>, vector<16x192xf32> -> vector<16x192xf32>
    %cst_74 = arith.constant dense<0.000000e+00> : vector<16x192xf32>
    %87 = tpu.matmul %85, %3, %cst_74 {dimension_numbers = #tpu.dot_dimension_numbers<[1], [0], [0], [1], [0, 0, 1, 1], [], []>} : vector<16x144xbf16>, vector<144x192xbf16>, vector<16x192xf32> -> vector<16x192xf32>
    %88 = arith.maximumf %86, %87 : vector<16x192xf32>
    %c0_75 = arith.constant 0 : index
    %c196 = arith.constant 196 : index
    %89 = vector.load %arg1[%c0_75, %c196] : memref<16x896xbf16, #tpu.memory_space<vmem>>, vector<16x144xbf16>
    %cst_76 = arith.constant dense<0.000000e+00> : vector<16x192xf32>
    %90 = tpu.matmul %89, %1, %cst_76 {dimension_numbers = #tpu.dot_dimension_numbers<[1], [0], [0], [1], [0, 0, 1, 1], [], []>} : vector<16x144xbf16>, vector<144x192xbf16>, vector<16x192xf32> -> vector<16x192xf32>
    %91 = arith.maximumf %88, %90 : vector<16x192xf32>
    %cst_77 = arith.constant dense<0.000000e+00> : vector<16x192xf32>
    %92 = tpu.matmul %89, %3, %cst_77 {dimension_numbers = #tpu.dot_dimension_numbers<[1], [0], [0], [1], [0, 0, 1, 1], [], []>} : vector<16x144xbf16>, vector<144x192xbf16>, vector<16x192xf32> -> vector<16x192xf32>
    %93 = arith.maximumf %91, %92 : vector<16x192xf32>
    %94 = vector.broadcast %32 : vector<1x192xf32> to vector<16x192xf32>
    %95 = arith.addf %93, %94 : vector<16x192xf32>
    %cst_78 = arith.constant 0.000000e+00 : f32
    %96 = vector.broadcast %cst_78 : f32 to vector<16x192xf32>
    %97 = arith.maximumf %95, %96 : vector<16x192xf32>
    %98 = arith.truncf %97 : vector<16x192xf32> to vector<16x192xbf16>
    %c3_79 = arith.constant 3 : index
    %c0_80 = arith.constant 0 : index
    %c0_81 = arith.constant 0 : index
    %99 = vector.load %arg9[%c3_79, %c0_80, %c0_81] : memref<12x16x192xbf16, #tpu.memory_space<vmem>>, vector<1x16x192xbf16>
    %100 = vector.shape_cast %99 : vector<1x16x192xbf16> to vector<16x192xbf16>
    %101 = vector.shape_cast %98 : vector<16x192xbf16> to vector<1x16x192xbf16>
    tpu.vector_store %arg9[%c3_79, %c0_80, %c0_81], %101 {strides = array<i32>} : memref<12x16x192xbf16, #tpu.memory_space<vmem>>, vector<1x16x192xbf16>,
    %c0_82 = arith.constant 0 : index
    %c224 = arith.constant 224 : index
    %102 = vector.load %arg1[%c0_82, %c224] : memref<16x896xbf16, #tpu.memory_space<vmem>>, vector<16x144xbf16>
    %cst_83 = arith.constant dense<0.000000e+00> : vector<16x192xf32>
    %103 = tpu.matmul %102, %1, %cst_83 {dimension_numbers = #tpu.dot_dimension_numbers<[1], [0], [0], [1], [0, 0, 1, 1], [], []>} : vector<16x144xbf16>, vector<144x192xbf16>, vector<16x192xf32> -> vector<16x192xf32>
    %cst_84 = arith.constant dense<0.000000e+00> : vector<16x192xf32>
    %104 = tpu.matmul %102, %3, %cst_84 {dimension_numbers = #tpu.dot_dimension_numbers<[1], [0], [0], [1], [0, 0, 1, 1], [], []>} : vector<16x144xbf16>, vector<144x192xbf16>, vector<16x192xf32> -> vector<16x192xf32>
    %105 = arith.maximumf %103, %104 : vector<16x192xf32>
    %c0_85 = arith.constant 0 : index
    %c252 = arith.constant 252 : index
    %106 = vector.load %arg1[%c0_85, %c252] : memref<16x896xbf16, #tpu.memory_space<vmem>>, vector<16x144xbf16>
    %cst_86 = arith.constant dense<0.000000e+00> : vector<16x192xf32>
    %107 = tpu.matmul %106, %1, %cst_86 {dimension_numbers = #tpu.dot_dimension_numbers<[1], [0], [0], [1], [0, 0, 1, 1], [], []>} : vector<16x144xbf16>, vector<144x192xbf16>, vector<16x192xf32> -> vector<16x192xf32>
    %108 = arith.maximumf %105, %107 : vector<16x192xf32>
    %cst_87 = arith.constant dense<0.000000e+00> : vector<16x192xf32>
    %109 = tpu.matmul %106, %3, %cst_87 {dimension_numbers = #tpu.dot_dimension_numbers<[1], [0], [0], [1], [0, 0, 1, 1], [], []>} : vector<16x144xbf16>, vector<144x192xbf16>, vector<16x192xf32> -> vector<16x192xf32>
    %110 = arith.maximumf %108, %109 : vector<16x192xf32>
    %111 = vector.broadcast %32 : vector<1x192xf32> to vector<16x192xf32>
    %112 = arith.addf %110, %111 : vector<16x192xf32>
    %cst_88 = arith.constant 0.000000e+00 : f32
    %113 = vector.broadcast %cst_88 : f32 to vector<16x192xf32>
    %114 = arith.maximumf %112, %113 : vector<16x192xf32>
    %115 = arith.truncf %114 : vector<16x192xf32> to vector<16x192xbf16>
    %c4_89 = arith.constant 4 : index
    %c0_90 = arith.constant 0 : index
    %c0_91 = arith.constant 0 : index
    %116 = vector.load %arg9[%c4_89, %c0_90, %c0_91] : memref<12x16x192xbf16, #tpu.memory_space<vmem>>, vector<1x16x192xbf16>
    %117 = vector.shape_cast %116 : vector<1x16x192xbf16> to vector<16x192xbf16>
    %118 = vector.shape_cast %115 : vector<16x192xbf16> to vector<1x16x192xbf16>
    tpu.vector_store %arg9[%c4_89, %c0_90, %c0_91], %118 {strides = array<i32>} : memref<12x16x192xbf16, #tpu.memory_space<vmem>>, vector<1x16x192xbf16>,
    %c0_92 = arith.constant 0 : index
    %c280 = arith.constant 280 : index
    %119 = vector.load %arg1[%c0_92, %c280] : memref<16x896xbf16, #tpu.memory_space<vmem>>, vector<16x144xbf16>
    %cst_93 = arith.constant dense<0.000000e+00> : vector<16x192xf32>
    %120 = tpu.matmul %119, %1, %cst_93 {dimension_numbers = #tpu.dot_dimension_numbers<[1], [0], [0], [1], [0, 0, 1, 1], [], []>} : vector<16x144xbf16>, vector<144x192xbf16>, vector<16x192xf32> -> vector<16x192xf32>
    %cst_94 = arith.constant dense<0.000000e+00> : vector<16x192xf32>
    %121 = tpu.matmul %119, %3, %cst_94 {dimension_numbers = #tpu.dot_dimension_numbers<[1], [0], [0], [1], [0, 0, 1, 1], [], []>} : vector<16x144xbf16>, vector<144x192xbf16>, vector<16x192xf32> -> vector<16x192xf32>
    %122 = arith.maximumf %120, %121 : vector<16x192xf32>
    %c0_95 = arith.constant 0 : index
    %c308 = arith.constant 308 : index
    %123 = vector.load %arg1[%c0_95, %c308] : memref<16x896xbf16, #tpu.memory_space<vmem>>, vector<16x144xbf16>
    %cst_96 = arith.constant dense<0.000000e+00> : vector<16x192xf32>
    %124 = tpu.matmul %123, %1, %cst_96 {dimension_numbers = #tpu.dot_dimension_numbers<[1], [0], [0], [1], [0, 0, 1, 1], [], []>} : vector<16x144xbf16>, vector<144x192xbf16>, vector<16x192xf32> -> vector<16x192xf32>
    %125 = arith.maximumf %122, %124 : vector<16x192xf32>
    %cst_97 = arith.constant dense<0.000000e+00> : vector<16x192xf32>
    %126 = tpu.matmul %123, %3, %cst_97 {dimension_numbers = #tpu.dot_dimension_numbers<[1], [0], [0], [1], [0, 0, 1, 1], [], []>} : vector<16x144xbf16>, vector<144x192xbf16>, vector<16x192xf32> -> vector<16x192xf32>
    %127 = arith.maximumf %125, %126 : vector<16x192xf32>
    %128 = vector.broadcast %32 : vector<1x192xf32> to vector<16x192xf32>
    %129 = arith.addf %127, %128 : vector<16x192xf32>
    %cst_98 = arith.constant 0.000000e+00 : f32
    %130 = vector.broadcast %cst_98 : f32 to vector<16x192xf32>
    %131 = arith.maximumf %129, %130 : vector<16x192xf32>
    %132 = arith.truncf %131 : vector<16x192xf32> to vector<16x192xbf16>
    %c5_99 = arith.constant 5 : index
    %c0_100 = arith.constant 0 : index
    %c0_101 = arith.constant 0 : index
    %133 = vector.load %arg9[%c5_99, %c0_100, %c0_101] : memref<12x16x192xbf16, #tpu.memory_space<vmem>>, vector<1x16x192xbf16>
    %134 = vector.shape_cast %133 : vector<1x16x192xbf16> to vector<16x192xbf16>
    %135 = vector.shape_cast %132 : vector<16x192xbf16> to vector<1x16x192xbf16>
    tpu.vector_store %arg9[%c5_99, %c0_100, %c0_101], %135 {strides = array<i32>} : memref<12x16x192xbf16, #tpu.memory_space<vmem>>, vector<1x16x192xbf16>,
    %c0_102 = arith.constant 0 : index
    %c336 = arith.constant 336 : index
    %136 = vector.load %arg1[%c0_102, %c336] : memref<16x896xbf16, #tpu.memory_space<vmem>>, vector<16x144xbf16>
    %cst_103 = arith.constant dense<0.000000e+00> : vector<16x192xf32>
    %137 = tpu.matmul %136, %1, %cst_103 {dimension_numbers = #tpu.dot_dimension_numbers<[1], [0], [0], [1], [0, 0, 1, 1], [], []>} : vector<16x144xbf16>, vector<144x192xbf16>, vector<16x192xf32> -> vector<16x192xf32>
    %cst_104 = arith.constant dense<0.000000e+00> : vector<16x192xf32>
    %138 = tpu.matmul %136, %3, %cst_104 {dimension_numbers = #tpu.dot_dimension_numbers<[1], [0], [0], [1], [0, 0, 1, 1], [], []>} : vector<16x144xbf16>, vector<144x192xbf16>, vector<16x192xf32> -> vector<16x192xf32>
    %139 = arith.maximumf %137, %138 : vector<16x192xf32>
    %c0_105 = arith.constant 0 : index
    %c364 = arith.constant 364 : index
    %140 = vector.load %arg1[%c0_105, %c364] : memref<16x896xbf16, #tpu.memory_space<vmem>>, vector<16x144xbf16>
    %cst_106 = arith.constant dense<0.000000e+00> : vector<16x192xf32>
    %141 = tpu.matmul %140, %1, %cst_106 {dimension_numbers = #tpu.dot_dimension_numbers<[1], [0], [0], [1], [0, 0, 1, 1], [], []>} : vector<16x144xbf16>, vector<144x192xbf16>, vector<16x192xf32> -> vector<16x192xf32>
    %142 = arith.maximumf %139, %141 : vector<16x192xf32>
    %cst_107 = arith.constant dense<0.000000e+00> : vector<16x192xf32>
    %143 = tpu.matmul %140, %3, %cst_107 {dimension_numbers = #tpu.dot_dimension_numbers<[1], [0], [0], [1], [0, 0, 1, 1], [], []>} : vector<16x144xbf16>, vector<144x192xbf16>, vector<16x192xf32> -> vector<16x192xf32>
    %144 = arith.maximumf %142, %143 : vector<16x192xf32>
    %145 = vector.broadcast %32 : vector<1x192xf32> to vector<16x192xf32>
    %146 = arith.addf %144, %145 : vector<16x192xf32>
    %cst_108 = arith.constant 0.000000e+00 : f32
    %147 = vector.broadcast %cst_108 : f32 to vector<16x192xf32>
    %148 = arith.maximumf %146, %147 : vector<16x192xf32>
    %149 = arith.truncf %148 : vector<16x192xf32> to vector<16x192xbf16>
    %c6_109 = arith.constant 6 : index
    %c0_110 = arith.constant 0 : index
    %c0_111 = arith.constant 0 : index
    %150 = vector.load %arg9[%c6_109, %c0_110, %c0_111] : memref<12x16x192xbf16, #tpu.memory_space<vmem>>, vector<1x16x192xbf16>
    %151 = vector.shape_cast %150 : vector<1x16x192xbf16> to vector<16x192xbf16>
    %152 = vector.shape_cast %149 : vector<16x192xbf16> to vector<1x16x192xbf16>
    tpu.vector_store %arg9[%c6_109, %c0_110, %c0_111], %152 {strides = array<i32>} : memref<12x16x192xbf16, #tpu.memory_space<vmem>>, vector<1x16x192xbf16>,
    %c0_112 = arith.constant 0 : index
    %c392 = arith.constant 392 : index
    %153 = vector.load %arg1[%c0_112, %c392] : memref<16x896xbf16, #tpu.memory_space<vmem>>, vector<16x144xbf16>
    %cst_113 = arith.constant dense<0.000000e+00> : vector<16x192xf32>
    %154 = tpu.matmul %153, %1, %cst_113 {dimension_numbers = #tpu.dot_dimension_numbers<[1], [0], [0], [1], [0, 0, 1, 1], [], []>} : vector<16x144xbf16>, vector<144x192xbf16>, vector<16x192xf32> -> vector<16x192xf32>
    %cst_114 = arith.constant dense<0.000000e+00> : vector<16x192xf32>
    %155 = tpu.matmul %153, %3, %cst_114 {dimension_numbers = #tpu.dot_dimension_numbers<[1], [0], [0], [1], [0, 0, 1, 1], [], []>} : vector<16x144xbf16>, vector<144x192xbf16>, vector<16x192xf32> -> vector<16x192xf32>
    %156 = arith.maximumf %154, %155 : vector<16x192xf32>
    %c0_115 = arith.constant 0 : index
    %c420 = arith.constant 420 : index
    %157 = vector.load %arg1[%c0_115, %c420] : memref<16x896xbf16, #tpu.memory_space<vmem>>, vector<16x144xbf16>
    %cst_116 = arith.constant dense<0.000000e+00> : vector<16x192xf32>
    %158 = tpu.matmul %157, %1, %cst_116 {dimension_numbers = #tpu.dot_dimension_numbers<[1], [0], [0], [1], [0, 0, 1, 1], [], []>} : vector<16x144xbf16>, vector<144x192xbf16>, vector<16x192xf32> -> vector<16x192xf32>
    %159 = arith.maximumf %156, %158 : vector<16x192xf32>
    %cst_117 = arith.constant dense<0.000000e+00> : vector<16x192xf32>
    %160 = tpu.matmul %157, %3, %cst_117 {dimension_numbers = #tpu.dot_dimension_numbers<[1], [0], [0], [1], [0, 0, 1, 1], [], []>} : vector<16x144xbf16>, vector<144x192xbf16>, vector<16x192xf32> -> vector<16x192xf32>
    %161 = arith.maximumf %159, %160 : vector<16x192xf32>
    %162 = vector.broadcast %32 : vector<1x192xf32> to vector<16x192xf32>
    %163 = arith.addf %161, %162 : vector<16x192xf32>
    %cst_118 = arith.constant 0.000000e+00 : f32
    %164 = vector.broadcast %cst_118 : f32 to vector<16x192xf32>
    %165 = arith.maximumf %163, %164 : vector<16x192xf32>
    %166 = arith.truncf %165 : vector<16x192xf32> to vector<16x192xbf16>
    %c7_119 = arith.constant 7 : index
    %c0_120 = arith.constant 0 : index
    %c0_121 = arith.constant 0 : index
    %167 = vector.load %arg9[%c7_119, %c0_120, %c0_121] : memref<12x16x192xbf16, #tpu.memory_space<vmem>>, vector<1x16x192xbf16>
    %168 = vector.shape_cast %167 : vector<1x16x192xbf16> to vector<16x192xbf16>
    %169 = vector.shape_cast %166 : vector<16x192xbf16> to vector<1x16x192xbf16>
    tpu.vector_store %arg9[%c7_119, %c0_120, %c0_121], %169 {strides = array<i32>} : memref<12x16x192xbf16, #tpu.memory_space<vmem>>, vector<1x16x192xbf16>,
    %c0_122 = arith.constant 0 : index
    %c448 = arith.constant 448 : index
    %170 = vector.load %arg1[%c0_122, %c448] : memref<16x896xbf16, #tpu.memory_space<vmem>>, vector<16x144xbf16>
    %cst_123 = arith.constant dense<0.000000e+00> : vector<16x192xf32>
    %171 = tpu.matmul %170, %1, %cst_123 {dimension_numbers = #tpu.dot_dimension_numbers<[1], [0], [0], [1], [0, 0, 1, 1], [], []>} : vector<16x144xbf16>, vector<144x192xbf16>, vector<16x192xf32> -> vector<16x192xf32>
    %cst_124 = arith.constant dense<0.000000e+00> : vector<16x192xf32>
    %172 = tpu.matmul %170, %3, %cst_124 {dimension_numbers = #tpu.dot_dimension_numbers<[1], [0], [0], [1], [0, 0, 1, 1], [], []>} : vector<16x144xbf16>, vector<144x192xbf16>, vector<16x192xf32> -> vector<16x192xf32>
    %173 = arith.maximumf %171, %172 : vector<16x192xf32>
    %c0_125 = arith.constant 0 : index
    %c476 = arith.constant 476 : index
    %174 = vector.load %arg1[%c0_125, %c476] : memref<16x896xbf16, #tpu.memory_space<vmem>>, vector<16x144xbf16>
    %cst_126 = arith.constant dense<0.000000e+00> : vector<16x192xf32>
    %175 = tpu.matmul %174, %1, %cst_126 {dimension_numbers = #tpu.dot_dimension_numbers<[1], [0], [0], [1], [0, 0, 1, 1], [], []>} : vector<16x144xbf16>, vector<144x192xbf16>, vector<16x192xf32> -> vector<16x192xf32>
    %176 = arith.maximumf %173, %175 : vector<16x192xf32>
    %cst_127 = arith.constant dense<0.000000e+00> : vector<16x192xf32>
    %177 = tpu.matmul %174, %3, %cst_127 {dimension_numbers = #tpu.dot_dimension_numbers<[1], [0], [0], [1], [0, 0, 1, 1], [], []>} : vector<16x144xbf16>, vector<144x192xbf16>, vector<16x192xf32> -> vector<16x192xf32>
    %178 = arith.maximumf %176, %177 : vector<16x192xf32>
    %179 = vector.broadcast %32 : vector<1x192xf32> to vector<16x192xf32>
    %180 = arith.addf %178, %179 : vector<16x192xf32>
    %cst_128 = arith.constant 0.000000e+00 : f32
    %181 = vector.broadcast %cst_128 : f32 to vector<16x192xf32>
    %182 = arith.maximumf %180, %181 : vector<16x192xf32>
    %183 = arith.truncf %182 : vector<16x192xf32> to vector<16x192xbf16>
    %c8_129 = arith.constant 8 : index
    %c0_130 = arith.constant 0 : index
    %c0_131 = arith.constant 0 : index
    %184 = vector.load %arg9[%c8_129, %c0_130, %c0_131] : memref<12x16x192xbf16, #tpu.memory_space<vmem>>, vector<1x16x192xbf16>
    %185 = vector.shape_cast %184 : vector<1x16x192xbf16> to vector<16x192xbf16>
    %186 = vector.shape_cast %183 : vector<16x192xbf16> to vector<1x16x192xbf16>
    tpu.vector_store %arg9[%c8_129, %c0_130, %c0_131], %186 {strides = array<i32>} : memref<12x16x192xbf16, #tpu.memory_space<vmem>>, vector<1x16x192xbf16>,
    %c0_132 = arith.constant 0 : index
    %c504 = arith.constant 504 : index
    %187 = vector.load %arg1[%c0_132, %c504] : memref<16x896xbf16, #tpu.memory_space<vmem>>, vector<16x144xbf16>
    %cst_133 = arith.constant dense<0.000000e+00> : vector<16x192xf32>
    %188 = tpu.matmul %187, %1, %cst_133 {dimension_numbers = #tpu.dot_dimension_numbers<[1], [0], [0], [1], [0, 0, 1, 1], [], []>} : vector<16x144xbf16>, vector<144x192xbf16>, vector<16x192xf32> -> vector<16x192xf32>
    %cst_134 = arith.constant dense<0.000000e+00> : vector<16x192xf32>
    %189 = tpu.matmul %187, %3, %cst_134 {dimension_numbers = #tpu.dot_dimension_numbers<[1], [0], [0], [1], [0, 0, 1, 1], [], []>} : vector<16x144xbf16>, vector<144x192xbf16>, vector<16x192xf32> -> vector<16x192xf32>
    %190 = arith.maximumf %188, %189 : vector<16x192xf32>
    %c0_135 = arith.constant 0 : index
    %c532 = arith.constant 532 : index
    %191 = vector.load %arg1[%c0_135, %c532] : memref<16x896xbf16, #tpu.memory_space<vmem>>, vector<16x144xbf16>
    %cst_136 = arith.constant dense<0.000000e+00> : vector<16x192xf32>
    %192 = tpu.matmul %191, %1, %cst_136 {dimension_numbers = #tpu.dot_dimension_numbers<[1], [0], [0], [1], [0, 0, 1, 1], [], []>} : vector<16x144xbf16>, vector<144x192xbf16>, vector<16x192xf32> -> vector<16x192xf32>
    %193 = arith.maximumf %190, %192 : vector<16x192xf32>
    %cst_137 = arith.constant dense<0.000000e+00> : vector<16x192xf32>
    %194 = tpu.matmul %191, %3, %cst_137 {dimension_numbers = #tpu.dot_dimension_numbers<[1], [0], [0], [1], [0, 0, 1, 1], [], []>} : vector<16x144xbf16>, vector<144x192xbf16>, vector<16x192xf32> -> vector<16x192xf32>
    %195 = arith.maximumf %193, %194 : vector<16x192xf32>
    %196 = vector.broadcast %32 : vector<1x192xf32> to vector<16x192xf32>
    %197 = arith.addf %195, %196 : vector<16x192xf32>
    %cst_138 = arith.constant 0.000000e+00 : f32
    %198 = vector.broadcast %cst_138 : f32 to vector<16x192xf32>
    %199 = arith.maximumf %197, %198 : vector<16x192xf32>
    %200 = arith.truncf %199 : vector<16x192xf32> to vector<16x192xbf16>
    %c9_139 = arith.constant 9 : index
    %c0_140 = arith.constant 0 : index
    %c0_141 = arith.constant 0 : index
    %201 = vector.load %arg9[%c9_139, %c0_140, %c0_141] : memref<12x16x192xbf16, #tpu.memory_space<vmem>>, vector<1x16x192xbf16>
    %202 = vector.shape_cast %201 : vector<1x16x192xbf16> to vector<16x192xbf16>
    %203 = vector.shape_cast %200 : vector<16x192xbf16> to vector<1x16x192xbf16>
    tpu.vector_store %arg9[%c9_139, %c0_140, %c0_141], %203 {strides = array<i32>} : memref<12x16x192xbf16, #tpu.memory_space<vmem>>, vector<1x16x192xbf16>,
    %c0_142 = arith.constant 0 : index
    %c560 = arith.constant 560 : index
    %204 = vector.load %arg1[%c0_142, %c560] : memref<16x896xbf16, #tpu.memory_space<vmem>>, vector<16x144xbf16>
    %cst_143 = arith.constant dense<0.000000e+00> : vector<16x192xf32>
    %205 = tpu.matmul %204, %1, %cst_143 {dimension_numbers = #tpu.dot_dimension_numbers<[1], [0], [0], [1], [0, 0, 1, 1], [], []>} : vector<16x144xbf16>, vector<144x192xbf16>, vector<16x192xf32> -> vector<16x192xf32>
    %cst_144 = arith.constant dense<0.000000e+00> : vector<16x192xf32>
    %206 = tpu.matmul %204, %3, %cst_144 {dimension_numbers = #tpu.dot_dimension_numbers<[1], [0], [0], [1], [0, 0, 1, 1], [], []>} : vector<16x144xbf16>, vector<144x192xbf16>, vector<16x192xf32> -> vector<16x192xf32>
    %207 = arith.maximumf %205, %206 : vector<16x192xf32>
    %c0_145 = arith.constant 0 : index
    %c588 = arith.constant 588 : index
    %208 = vector.load %arg1[%c0_145, %c588] : memref<16x896xbf16, #tpu.memory_space<vmem>>, vector<16x144xbf16>
    %cst_146 = arith.constant dense<0.000000e+00> : vector<16x192xf32>
    %209 = tpu.matmul %208, %1, %cst_146 {dimension_numbers = #tpu.dot_dimension_numbers<[1], [0], [0], [1], [0, 0, 1, 1], [], []>} : vector<16x144xbf16>, vector<144x192xbf16>, vector<16x192xf32> -> vector<16x192xf32>
    %210 = arith.maximumf %207, %209 : vector<16x192xf32>
    %cst_147 = arith.constant dense<0.000000e+00> : vector<16x192xf32>
    %211 = tpu.matmul %208, %3, %cst_147 {dimension_numbers = #tpu.dot_dimension_numbers<[1], [0], [0], [1], [0, 0, 1, 1], [], []>} : vector<16x144xbf16>, vector<144x192xbf16>, vector<16x192xf32> -> vector<16x192xf32>
    %212 = arith.maximumf %210, %211 : vector<16x192xf32>
    %213 = vector.broadcast %32 : vector<1x192xf32> to vector<16x192xf32>
    %214 = arith.addf %212, %213 : vector<16x192xf32>
    %cst_148 = arith.constant 0.000000e+00 : f32
    %215 = vector.broadcast %cst_148 : f32 to vector<16x192xf32>
    %216 = arith.maximumf %214, %215 : vector<16x192xf32>
    %217 = arith.truncf %216 : vector<16x192xf32> to vector<16x192xbf16>
    %c10 = arith.constant 10 : index
    %c0_149 = arith.constant 0 : index
    %c0_150 = arith.constant 0 : index
    %218 = vector.load %arg9[%c10, %c0_149, %c0_150] : memref<12x16x192xbf16, #tpu.memory_space<vmem>>, vector<1x16x192xbf16>
    %219 = vector.shape_cast %218 : vector<1x16x192xbf16> to vector<16x192xbf16>
    %220 = vector.shape_cast %217 : vector<16x192xbf16> to vector<1x16x192xbf16>
    tpu.vector_store %arg9[%c10, %c0_149, %c0_150], %220 {strides = array<i32>} : memref<12x16x192xbf16, #tpu.memory_space<vmem>>, vector<1x16x192xbf16>,
    %c0_151 = arith.constant 0 : index
    %c616 = arith.constant 616 : index
    %221 = vector.load %arg1[%c0_151, %c616] : memref<16x896xbf16, #tpu.memory_space<vmem>>, vector<16x144xbf16>
    %cst_152 = arith.constant dense<0.000000e+00> : vector<16x192xf32>
    %222 = tpu.matmul %221, %1, %cst_152 {dimension_numbers = #tpu.dot_dimension_numbers<[1], [0], [0], [1], [0, 0, 1, 1], [], []>} : vector<16x144xbf16>, vector<144x192xbf16>, vector<16x192xf32> -> vector<16x192xf32>
    %cst_153 = arith.constant dense<0.000000e+00> : vector<16x192xf32>
    %223 = tpu.matmul %221, %3, %cst_153 {dimension_numbers = #tpu.dot_dimension_numbers<[1], [0], [0], [1], [0, 0, 1, 1], [], []>} : vector<16x144xbf16>, vector<144x192xbf16>, vector<16x192xf32> -> vector<16x192xf32>
    %224 = arith.maximumf %222, %223 : vector<16x192xf32>
    %c0_154 = arith.constant 0 : index
    %c644 = arith.constant 644 : index
    %225 = vector.load %arg1[%c0_154, %c644] : memref<16x896xbf16, #tpu.memory_space<vmem>>, vector<16x144xbf16>
    %cst_155 = arith.constant dense<0.000000e+00> : vector<16x192xf32>
    %226 = tpu.matmul %225, %1, %cst_155 {dimension_numbers = #tpu.dot_dimension_numbers<[1], [0], [0], [1], [0, 0, 1, 1], [], []>} : vector<16x144xbf16>, vector<144x192xbf16>, vector<16x192xf32> -> vector<16x192xf32>
    %227 = arith.maximumf %224, %226 : vector<16x192xf32>
    %cst_156 = arith.constant dense<0.000000e+00> : vector<16x192xf32>
    %228 = tpu.matmul %225, %3, %cst_156 {dimension_numbers = #tpu.dot_dimension_numbers<[1], [0], [0], [1], [0, 0, 1, 1], [], []>} : vector<16x144xbf16>, vector<144x192xbf16>, vector<16x192xf32> -> vector<16x192xf32>
    %229 = arith.maximumf %227, %228 : vector<16x192xf32>
    %230 = vector.broadcast %32 : vector<1x192xf32> to vector<16x192xf32>
    %231 = arith.addf %229, %230 : vector<16x192xf32>
    %cst_157 = arith.constant 0.000000e+00 : f32
    %232 = vector.broadcast %cst_157 : f32 to vector<16x192xf32>
    %233 = arith.maximumf %231, %232 : vector<16x192xf32>
    %234 = arith.truncf %233 : vector<16x192xf32> to vector<16x192xbf16>
    %c11 = arith.constant 11 : index
    %c0_158 = arith.constant 0 : index
    %c0_159 = arith.constant 0 : index
    %235 = vector.load %arg9[%c11, %c0_158, %c0_159] : memref<12x16x192xbf16, #tpu.memory_space<vmem>>, vector<1x16x192xbf16>
    %236 = vector.shape_cast %235 : vector<1x16x192xbf16> to vector<16x192xbf16>
    %237 = vector.shape_cast %234 : vector<16x192xbf16> to vector<1x16x192xbf16>
    tpu.vector_store %arg9[%c11, %c0_158, %c0_159], %237 {strides = array<i32>} : memref<12x16x192xbf16, #tpu.memory_space<vmem>>, vector<1x16x192xbf16>,
    %c0_160 = arith.constant 0 : index
    %c0_161 = arith.constant 0 : index
    %c0_162 = arith.constant 0 : index
    %238 = vector.load %arg9[%c0_160, %c0_161, %c0_162] : memref<12x16x192xbf16, #tpu.memory_space<vmem>>, vector<1x16x192xbf16>
    %239 = vector.shape_cast %238 : vector<1x16x192xbf16> to vector<16x192xbf16>
    %cst_163 = arith.constant dense<0.000000e+00> : vector<16x64xf32>
    %240 = tpu.matmul %239, %5, %cst_163 {dimension_numbers = #tpu.dot_dimension_numbers<[1], [0], [0], [1], [0, 0, 1, 1], [], []>} : vector<16x192xbf16>, vector<192x64xbf16>, vector<16x64xf32> -> vector<16x64xf32>
    %c1_164 = arith.constant 1 : index
    %c0_165 = arith.constant 0 : index
    %c0_166 = arith.constant 0 : index
    %241 = vector.load %arg9[%c1_164, %c0_165, %c0_166] : memref<12x16x192xbf16, #tpu.memory_space<vmem>>, vector<1x16x192xbf16>
    %242 = vector.shape_cast %241 : vector<1x16x192xbf16> to vector<16x192xbf16>
    %cst_167 = arith.constant dense<0.000000e+00> : vector<16x64xf32>
    %243 = tpu.matmul %242, %7, %cst_167 {dimension_numbers = #tpu.dot_dimension_numbers<[1], [0], [0], [1], [0, 0, 1, 1], [], []>} : vector<16x192xbf16>, vector<192x64xbf16>, vector<16x64xf32> -> vector<16x64xf32>
    %244 = arith.addf %240, %243 : vector<16x64xf32>
    %c2_168 = arith.constant 2 : index
    %c0_169 = arith.constant 0 : index
    %c0_170 = arith.constant 0 : index
    %245 = vector.load %arg9[%c2_168, %c0_169, %c0_170] : memref<12x16x192xbf16, #tpu.memory_space<vmem>>, vector<1x16x192xbf16>
    %246 = vector.shape_cast %245 : vector<1x16x192xbf16> to vector<16x192xbf16>
    %cst_171 = arith.constant dense<0.000000e+00> : vector<16x64xf32>
    %247 = tpu.matmul %246, %9, %cst_171 {dimension_numbers = #tpu.dot_dimension_numbers<[1], [0], [0], [1], [0, 0, 1, 1], [], []>} : vector<16x192xbf16>, vector<192x64xbf16>, vector<16x64xf32> -> vector<16x64xf32>
    %248 = arith.addf %244, %247 : vector<16x64xf32>
    %c3_172 = arith.constant 3 : index
    %c0_173 = arith.constant 0 : index
    %c0_174 = arith.constant 0 : index
    %249 = vector.load %arg9[%c3_172, %c0_173, %c0_174] : memref<12x16x192xbf16, #tpu.memory_space<vmem>>, vector<1x16x192xbf16>
    %250 = vector.shape_cast %249 : vector<1x16x192xbf16> to vector<16x192xbf16>
    %cst_175 = arith.constant dense<0.000000e+00> : vector<16x64xf32>
    %251 = tpu.matmul %250, %11, %cst_175 {dimension_numbers = #tpu.dot_dimension_numbers<[1], [0], [0], [1], [0, 0, 1, 1], [], []>} : vector<16x192xbf16>, vector<192x64xbf16>, vector<16x64xf32> -> vector<16x64xf32>
    %252 = arith.addf %248, %251 : vector<16x64xf32>
    %c4_176 = arith.constant 4 : index
    %c0_177 = arith.constant 0 : index
    %c0_178 = arith.constant 0 : index
    %253 = vector.load %arg9[%c4_176, %c0_177, %c0_178] : memref<12x16x192xbf16, #tpu.memory_space<vmem>>, vector<1x16x192xbf16>
    %254 = vector.shape_cast %253 : vector<1x16x192xbf16> to vector<16x192xbf16>
    %cst_179 = arith.constant dense<0.000000e+00> : vector<16x64xf32>
    %255 = tpu.matmul %254, %13, %cst_179 {dimension_numbers = #tpu.dot_dimension_numbers<[1], [0], [0], [1], [0, 0, 1, 1], [], []>} : vector<16x192xbf16>, vector<192x64xbf16>, vector<16x64xf32> -> vector<16x64xf32>
    %256 = arith.addf %252, %255 : vector<16x64xf32>
    %c0_180 = arith.constant 0 : index
    %c0_181 = arith.constant 0 : index
    %c0_182 = arith.constant 0 : index
    %257 = vector.load %arg9[%c0_180, %c0_181, %c0_182] : memref<12x16x192xbf16, #tpu.memory_space<vmem>>, vector<1x16x192xbf16>
    %258 = vector.shape_cast %257 : vector<1x16x192xbf16> to vector<16x192xbf16>
    %cst_183 = arith.constant dense<0.000000e+00> : vector<16x64xf32>
    %259 = tpu.matmul %258, %15, %cst_183 {dimension_numbers = #tpu.dot_dimension_numbers<[1], [0], [0], [1], [0, 0, 1, 1], [], []>} : vector<16x192xbf16>, vector<192x64xbf16>, vector<16x64xf32> -> vector<16x64xf32>
    %c1_184 = arith.constant 1 : index
    %c0_185 = arith.constant 0 : index
    %c0_186 = arith.constant 0 : index
    %260 = vector.load %arg9[%c1_184, %c0_185, %c0_186] : memref<12x16x192xbf16, #tpu.memory_space<vmem>>, vector<1x16x192xbf16>
    %261 = vector.shape_cast %260 : vector<1x16x192xbf16> to vector<16x192xbf16>
    %cst_187 = arith.constant dense<0.000000e+00> : vector<16x64xf32>
    %262 = tpu.matmul %261, %17, %cst_187 {dimension_numbers = #tpu.dot_dimension_numbers<[1], [0], [0], [1], [0, 0, 1, 1], [], []>} : vector<16x192xbf16>, vector<192x64xbf16>, vector<16x64xf32> -> vector<16x64xf32>
    %263 = arith.addf %259, %262 : vector<16x64xf32>
    %c2_188 = arith.constant 2 : index
    %c0_189 = arith.constant 0 : index
    %c0_190 = arith.constant 0 : index
    %264 = vector.load %arg9[%c2_188, %c0_189, %c0_190] : memref<12x16x192xbf16, #tpu.memory_space<vmem>>, vector<1x16x192xbf16>
    %265 = vector.shape_cast %264 : vector<1x16x192xbf16> to vector<16x192xbf16>
    %cst_191 = arith.constant dense<0.000000e+00> : vector<16x64xf32>
    %266 = tpu.matmul %265, %19, %cst_191 {dimension_numbers = #tpu.dot_dimension_numbers<[1], [0], [0], [1], [0, 0, 1, 1], [], []>} : vector<16x192xbf16>, vector<192x64xbf16>, vector<16x64xf32> -> vector<16x64xf32>
    %267 = arith.addf %263, %266 : vector<16x64xf32>
    %c3_192 = arith.constant 3 : index
    %c0_193 = arith.constant 0 : index
    %c0_194 = arith.constant 0 : index
    %268 = vector.load %arg9[%c3_192, %c0_193, %c0_194] : memref<12x16x192xbf16, #tpu.memory_space<vmem>>, vector<1x16x192xbf16>
    %269 = vector.shape_cast %268 : vector<1x16x192xbf16> to vector<16x192xbf16>
    %cst_195 = arith.constant dense<0.000000e+00> : vector<16x64xf32>
    %270 = tpu.matmul %269, %21, %cst_195 {dimension_numbers = #tpu.dot_dimension_numbers<[1], [0], [0], [1], [0, 0, 1, 1], [], []>} : vector<16x192xbf16>, vector<192x64xbf16>, vector<16x64xf32> -> vector<16x64xf32>
    %271 = arith.addf %267, %270 : vector<16x64xf32>
    %c4_196 = arith.constant 4 : index
    %c0_197 = arith.constant 0 : index
    %c0_198 = arith.constant 0 : index
    %272 = vector.load %arg9[%c4_196, %c0_197, %c0_198] : memref<12x16x192xbf16, #tpu.memory_space<vmem>>, vector<1x16x192xbf16>
    %273 = vector.shape_cast %272 : vector<1x16x192xbf16> to vector<16x192xbf16>
    %cst_199 = arith.constant dense<0.000000e+00> : vector<16x64xf32>
    %274 = tpu.matmul %273, %23, %cst_199 {dimension_numbers = #tpu.dot_dimension_numbers<[1], [0], [0], [1], [0, 0, 1, 1], [], []>} : vector<16x192xbf16>, vector<192x64xbf16>, vector<16x64xf32> -> vector<16x64xf32>
    %275 = arith.addf %271, %274 : vector<16x64xf32>
    %276 = arith.maximumf %256, %275 : vector<16x64xf32>
    %c1_200 = arith.constant 1 : index
    %c0_201 = arith.constant 0 : index
    %c0_202 = arith.constant 0 : index
    %277 = vector.load %arg9[%c1_200, %c0_201, %c0_202] : memref<12x16x192xbf16, #tpu.memory_space<vmem>>, vector<1x16x192xbf16>
    %278 = vector.shape_cast %277 : vector<1x16x192xbf16> to vector<16x192xbf16>
    %cst_203 = arith.constant dense<0.000000e+00> : vector<16x64xf32>
    %279 = tpu.matmul %278, %5, %cst_203 {dimension_numbers = #tpu.dot_dimension_numbers<[1], [0], [0], [1], [0, 0, 1, 1], [], []>} : vector<16x192xbf16>, vector<192x64xbf16>, vector<16x64xf32> -> vector<16x64xf32>
    %c2_204 = arith.constant 2 : index
    %c0_205 = arith.constant 0 : index
    %c0_206 = arith.constant 0 : index
    %280 = vector.load %arg9[%c2_204, %c0_205, %c0_206] : memref<12x16x192xbf16, #tpu.memory_space<vmem>>, vector<1x16x192xbf16>
    %281 = vector.shape_cast %280 : vector<1x16x192xbf16> to vector<16x192xbf16>
    %cst_207 = arith.constant dense<0.000000e+00> : vector<16x64xf32>
    %282 = tpu.matmul %281, %7, %cst_207 {dimension_numbers = #tpu.dot_dimension_numbers<[1], [0], [0], [1], [0, 0, 1, 1], [], []>} : vector<16x192xbf16>, vector<192x64xbf16>, vector<16x64xf32> -> vector<16x64xf32>
    %283 = arith.addf %279, %282 : vector<16x64xf32>
    %c3_208 = arith.constant 3 : index
    %c0_209 = arith.constant 0 : index
    %c0_210 = arith.constant 0 : index
    %284 = vector.load %arg9[%c3_208, %c0_209, %c0_210] : memref<12x16x192xbf16, #tpu.memory_space<vmem>>, vector<1x16x192xbf16>
    %285 = vector.shape_cast %284 : vector<1x16x192xbf16> to vector<16x192xbf16>
    %cst_211 = arith.constant dense<0.000000e+00> : vector<16x64xf32>
    %286 = tpu.matmul %285, %9, %cst_211 {dimension_numbers = #tpu.dot_dimension_numbers<[1], [0], [0], [1], [0, 0, 1, 1], [], []>} : vector<16x192xbf16>, vector<192x64xbf16>, vector<16x64xf32> -> vector<16x64xf32>
    %287 = arith.addf %283, %286 : vector<16x64xf32>
    %c4_212 = arith.constant 4 : index
    %c0_213 = arith.constant 0 : index
    %c0_214 = arith.constant 0 : index
    %288 = vector.load %arg9[%c4_212, %c0_213, %c0_214] : memref<12x16x192xbf16, #tpu.memory_space<vmem>>, vector<1x16x192xbf16>
    %289 = vector.shape_cast %288 : vector<1x16x192xbf16> to vector<16x192xbf16>
    %cst_215 = arith.constant dense<0.000000e+00> : vector<16x64xf32>
    %290 = tpu.matmul %289, %11, %cst_215 {dimension_numbers = #tpu.dot_dimension_numbers<[1], [0], [0], [1], [0, 0, 1, 1], [], []>} : vector<16x192xbf16>, vector<192x64xbf16>, vector<16x64xf32> -> vector<16x64xf32>
    %291 = arith.addf %287, %290 : vector<16x64xf32>
    %c5_216 = arith.constant 5 : index
    %c0_217 = arith.constant 0 : index
    %c0_218 = arith.constant 0 : index
    %292 = vector.load %arg9[%c5_216, %c0_217, %c0_218] : memref<12x16x192xbf16, #tpu.memory_space<vmem>>, vector<1x16x192xbf16>
    %293 = vector.shape_cast %292 : vector<1x16x192xbf16> to vector<16x192xbf16>
    %cst_219 = arith.constant dense<0.000000e+00> : vector<16x64xf32>
    %294 = tpu.matmul %293, %13, %cst_219 {dimension_numbers = #tpu.dot_dimension_numbers<[1], [0], [0], [1], [0, 0, 1, 1], [], []>} : vector<16x192xbf16>, vector<192x64xbf16>, vector<16x64xf32> -> vector<16x64xf32>
    %295 = arith.addf %291, %294 : vector<16x64xf32>
    %296 = arith.maximumf %276, %295 : vector<16x64xf32>
    %c1_220 = arith.constant 1 : index
    %c0_221 = arith.constant 0 : index
    %c0_222 = arith.constant 0 : index
    %297 = vector.load %arg9[%c1_220, %c0_221, %c0_222] : memref<12x16x192xbf16, #tpu.memory_space<vmem>>, vector<1x16x192xbf16>
    %298 = vector.shape_cast %297 : vector<1x16x192xbf16> to vector<16x192xbf16>
    %cst_223 = arith.constant dense<0.000000e+00> : vector<16x64xf32>
    %299 = tpu.matmul %298, %15, %cst_223 {dimension_numbers = #tpu.dot_dimension_numbers<[1], [0], [0], [1], [0, 0, 1, 1], [], []>} : vector<16x192xbf16>, vector<192x64xbf16>, vector<16x64xf32> -> vector<16x64xf32>
    %c2_224 = arith.constant 2 : index
    %c0_225 = arith.constant 0 : index
    %c0_226 = arith.constant 0 : index
    %300 = vector.load %arg9[%c2_224, %c0_225, %c0_226] : memref<12x16x192xbf16, #tpu.memory_space<vmem>>, vector<1x16x192xbf16>
    %301 = vector.shape_cast %300 : vector<1x16x192xbf16> to vector<16x192xbf16>
    %cst_227 = arith.constant dense<0.000000e+00> : vector<16x64xf32>
    %302 = tpu.matmul %301, %17, %cst_227 {dimension_numbers = #tpu.dot_dimension_numbers<[1], [0], [0], [1], [0, 0, 1, 1], [], []>} : vector<16x192xbf16>, vector<192x64xbf16>, vector<16x64xf32> -> vector<16x64xf32>
    %303 = arith.addf %299, %302 : vector<16x64xf32>
    %c3_228 = arith.constant 3 : index
    %c0_229 = arith.constant 0 : index
    %c0_230 = arith.constant 0 : index
    %304 = vector.load %arg9[%c3_228, %c0_229, %c0_230] : memref<12x16x192xbf16, #tpu.memory_space<vmem>>, vector<1x16x192xbf16>
    %305 = vector.shape_cast %304 : vector<1x16x192xbf16> to vector<16x192xbf16>
    %cst_231 = arith.constant dense<0.000000e+00> : vector<16x64xf32>
    %306 = tpu.matmul %305, %19, %cst_231 {dimension_numbers = #tpu.dot_dimension_numbers<[1], [0], [0], [1], [0, 0, 1, 1], [], []>} : vector<16x192xbf16>, vector<192x64xbf16>, vector<16x64xf32> -> vector<16x64xf32>
    %307 = arith.addf %303, %306 : vector<16x64xf32>
    %c4_232 = arith.constant 4 : index
    %c0_233 = arith.constant 0 : index
    %c0_234 = arith.constant 0 : index
    %308 = vector.load %arg9[%c4_232, %c0_233, %c0_234] : memref<12x16x192xbf16, #tpu.memory_space<vmem>>, vector<1x16x192xbf16>
    %309 = vector.shape_cast %308 : vector<1x16x192xbf16> to vector<16x192xbf16>
    %cst_235 = arith.constant dense<0.000000e+00> : vector<16x64xf32>
    %310 = tpu.matmul %309, %21, %cst_235 {dimension_numbers = #tpu.dot_dimension_numbers<[1], [0], [0], [1], [0, 0, 1, 1], [], []>} : vector<16x192xbf16>, vector<192x64xbf16>, vector<16x64xf32> -> vector<16x64xf32>
    %311 = arith.addf %307, %310 : vector<16x64xf32>
    %c5_236 = arith.constant 5 : index
    %c0_237 = arith.constant 0 : index
    %c0_238 = arith.constant 0 : index
    %312 = vector.load %arg9[%c5_236, %c0_237, %c0_238] : memref<12x16x192xbf16, #tpu.memory_space<vmem>>, vector<1x16x192xbf16>
    %313 = vector.shape_cast %312 : vector<1x16x192xbf16> to vector<16x192xbf16>
    %cst_239 = arith.constant dense<0.000000e+00> : vector<16x64xf32>
    %314 = tpu.matmul %313, %23, %cst_239 {dimension_numbers = #tpu.dot_dimension_numbers<[1], [0], [0], [1], [0, 0, 1, 1], [], []>} : vector<16x192xbf16>, vector<192x64xbf16>, vector<16x64xf32> -> vector<16x64xf32>
    %315 = arith.addf %311, %314 : vector<16x64xf32>
    %316 = arith.maximumf %296, %315 : vector<16x64xf32>
    %317 = vector.broadcast %33 : vector<1x64xf32> to vector<16x64xf32>
    %318 = arith.addf %316, %317 : vector<16x64xf32>
    %cst_240 = arith.constant 0.000000e+00 : f32
    %319 = vector.broadcast %cst_240 : f32 to vector<16x64xf32>
    %320 = arith.maximumf %318, %319 : vector<16x64xf32>
    %321 = arith.truncf %320 : vector<16x64xf32> to vector<16x64xbf16>
    %cst_241 = arith.constant dense<0.000000e+00> : vector<16x128xf32>
    %322 = tpu.matmul %321, %25, %cst_241 {dimension_numbers = #tpu.dot_dimension_numbers<[1], [0], [0], [1], [0, 0, 1, 1], [], []>} : vector<16x64xbf16>, vector<64x128xbf16>, vector<16x128xf32> -> vector<16x128xf32>
    %c2_242 = arith.constant 2 : index
    %c0_243 = arith.constant 0 : index
    %c0_244 = arith.constant 0 : index
    %323 = vector.load %arg9[%c2_242, %c0_243, %c0_244] : memref<12x16x192xbf16, #tpu.memory_space<vmem>>, vector<1x16x192xbf16>
    %324 = vector.shape_cast %323 : vector<1x16x192xbf16> to vector<16x192xbf16>
    %cst_245 = arith.constant dense<0.000000e+00> : vector<16x64xf32>
    %325 = tpu.matmul %324, %5, %cst_245 {dimension_numbers = #tpu.dot_dimension_numbers<[1], [0], [0], [1], [0, 0, 1, 1], [], []>} : vector<16x192xbf16>, vector<192x64xbf16>, vector<16x64xf32> -> vector<16x64xf32>
    %c3_246 = arith.constant 3 : index
    %c0_247 = arith.constant 0 : index
    %c0_248 = arith.constant 0 : index
    %326 = vector.load %arg9[%c3_246, %c0_247, %c0_248] : memref<12x16x192xbf16, #tpu.memory_space<vmem>>, vector<1x16x192xbf16>
    %327 = vector.shape_cast %326 : vector<1x16x192xbf16> to vector<16x192xbf16>
    %cst_249 = arith.constant dense<0.000000e+00> : vector<16x64xf32>
    %328 = tpu.matmul %327, %7, %cst_249 {dimension_numbers = #tpu.dot_dimension_numbers<[1], [0], [0], [1], [0, 0, 1, 1], [], []>} : vector<16x192xbf16>, vector<192x64xbf16>, vector<16x64xf32> -> vector<16x64xf32>
    %329 = arith.addf %325, %328 : vector<16x64xf32>
    %c4_250 = arith.constant 4 : index
    %c0_251 = arith.constant 0 : index
    %c0_252 = arith.constant 0 : index
    %330 = vector.load %arg9[%c4_250, %c0_251, %c0_252] : memref<12x16x192xbf16, #tpu.memory_space<vmem>>, vector<1x16x192xbf16>
    %331 = vector.shape_cast %330 : vector<1x16x192xbf16> to vector<16x192xbf16>
    %cst_253 = arith.constant dense<0.000000e+00> : vector<16x64xf32>
    %332 = tpu.matmul %331, %9, %cst_253 {dimension_numbers = #tpu.dot_dimension_numbers<[1], [0], [0], [1], [0, 0, 1, 1], [], []>} : vector<16x192xbf16>, vector<192x64xbf16>, vector<16x64xf32> -> vector<16x64xf32>
    %333 = arith.addf %329, %332 : vector<16x64xf32>
    %c5_254 = arith.constant 5 : index
    %c0_255 = arith.constant 0 : index
    %c0_256 = arith.constant 0 : index
    %334 = vector.load %arg9[%c5_254, %c0_255, %c0_256] : memref<12x16x192xbf16, #tpu.memory_space<vmem>>, vector<1x16x192xbf16>
    %335 = vector.shape_cast %334 : vector<1x16x192xbf16> to vector<16x192xbf16>
    %cst_257 = arith.constant dense<0.000000e+00> : vector<16x64xf32>
    %336 = tpu.matmul %335, %11, %cst_257 {dimension_numbers = #tpu.dot_dimension_numbers<[1], [0], [0], [1], [0, 0, 1, 1], [], []>} : vector<16x192xbf16>, vector<192x64xbf16>, vector<16x64xf32> -> vector<16x64xf32>
    %337 = arith.addf %333, %336 : vector<16x64xf32>
    %c6_258 = arith.constant 6 : index
    %c0_259 = arith.constant 0 : index
    %c0_260 = arith.constant 0 : index
    %338 = vector.load %arg9[%c6_258, %c0_259, %c0_260] : memref<12x16x192xbf16, #tpu.memory_space<vmem>>, vector<1x16x192xbf16>
    %339 = vector.shape_cast %338 : vector<1x16x192xbf16> to vector<16x192xbf16>
    %cst_261 = arith.constant dense<0.000000e+00> : vector<16x64xf32>
    %340 = tpu.matmul %339, %13, %cst_261 {dimension_numbers = #tpu.dot_dimension_numbers<[1], [0], [0], [1], [0, 0, 1, 1], [], []>} : vector<16x192xbf16>, vector<192x64xbf16>, vector<16x64xf32> -> vector<16x64xf32>
    %341 = arith.addf %337, %340 : vector<16x64xf32>
    %c2_262 = arith.constant 2 : index
    %c0_263 = arith.constant 0 : index
    %c0_264 = arith.constant 0 : index
    %342 = vector.load %arg9[%c2_262, %c0_263, %c0_264] : memref<12x16x192xbf16, #tpu.memory_space<vmem>>, vector<1x16x192xbf16>
    %343 = vector.shape_cast %342 : vector<1x16x192xbf16> to vector<16x192xbf16>
    %cst_265 = arith.constant dense<0.000000e+00> : vector<16x64xf32>
    %344 = tpu.matmul %343, %15, %cst_265 {dimension_numbers = #tpu.dot_dimension_numbers<[1], [0], [0], [1], [0, 0, 1, 1], [], []>} : vector<16x192xbf16>, vector<192x64xbf16>, vector<16x64xf32> -> vector<16x64xf32>
    %c3_266 = arith.constant 3 : index
    %c0_267 = arith.constant 0 : index
    %c0_268 = arith.constant 0 : index
    %345 = vector.load %arg9[%c3_266, %c0_267, %c0_268] : memref<12x16x192xbf16, #tpu.memory_space<vmem>>, vector<1x16x192xbf16>
    %346 = vector.shape_cast %345 : vector<1x16x192xbf16> to vector<16x192xbf16>
    %cst_269 = arith.constant dense<0.000000e+00> : vector<16x64xf32>
    %347 = tpu.matmul %346, %17, %cst_269 {dimension_numbers = #tpu.dot_dimension_numbers<[1], [0], [0], [1], [0, 0, 1, 1], [], []>} : vector<16x192xbf16>, vector<192x64xbf16>, vector<16x64xf32> -> vector<16x64xf32>
    %348 = arith.addf %344, %347 : vector<16x64xf32>
    %c4_270 = arith.constant 4 : index
    %c0_271 = arith.constant 0 : index
    %c0_272 = arith.constant 0 : index
    %349 = vector.load %arg9[%c4_270, %c0_271, %c0_272] : memref<12x16x192xbf16, #tpu.memory_space<vmem>>, vector<1x16x192xbf16>
    %350 = vector.shape_cast %349 : vector<1x16x192xbf16> to vector<16x192xbf16>
    %cst_273 = arith.constant dense<0.000000e+00> : vector<16x64xf32>
    %351 = tpu.matmul %350, %19, %cst_273 {dimension_numbers = #tpu.dot_dimension_numbers<[1], [0], [0], [1], [0, 0, 1, 1], [], []>} : vector<16x192xbf16>, vector<192x64xbf16>, vector<16x64xf32> -> vector<16x64xf32>
    %352 = arith.addf %348, %351 : vector<16x64xf32>
    %c5_274 = arith.constant 5 : index
    %c0_275 = arith.constant 0 : index
    %c0_276 = arith.constant 0 : index
    %353 = vector.load %arg9[%c5_274, %c0_275, %c0_276] : memref<12x16x192xbf16, #tpu.memory_space<vmem>>, vector<1x16x192xbf16>
    %354 = vector.shape_cast %353 : vector<1x16x192xbf16> to vector<16x192xbf16>
    %cst_277 = arith.constant dense<0.000000e+00> : vector<16x64xf32>
    %355 = tpu.matmul %354, %21, %cst_277 {dimension_numbers = #tpu.dot_dimension_numbers<[1], [0], [0], [1], [0, 0, 1, 1], [], []>} : vector<16x192xbf16>, vector<192x64xbf16>, vector<16x64xf32> -> vector<16x64xf32>
    %356 = arith.addf %352, %355 : vector<16x64xf32>
    %c6_278 = arith.constant 6 : index
    %c0_279 = arith.constant 0 : index
    %c0_280 = arith.constant 0 : index
    %357 = vector.load %arg9[%c6_278, %c0_279, %c0_280] : memref<12x16x192xbf16, #tpu.memory_space<vmem>>, vector<1x16x192xbf16>
    %358 = vector.shape_cast %357 : vector<1x16x192xbf16> to vector<16x192xbf16>
    %cst_281 = arith.constant dense<0.000000e+00> : vector<16x64xf32>
    %359 = tpu.matmul %358, %23, %cst_281 {dimension_numbers = #tpu.dot_dimension_numbers<[1], [0], [0], [1], [0, 0, 1, 1], [], []>} : vector<16x192xbf16>, vector<192x64xbf16>, vector<16x64xf32> -> vector<16x64xf32>
    %360 = arith.addf %356, %359 : vector<16x64xf32>
    %361 = arith.maximumf %341, %360 : vector<16x64xf32>
    %c3_282 = arith.constant 3 : index
    %c0_283 = arith.constant 0 : index
    %c0_284 = arith.constant 0 : index
    %362 = vector.load %arg9[%c3_282, %c0_283, %c0_284] : memref<12x16x192xbf16, #tpu.memory_space<vmem>>, vector<1x16x192xbf16>
    %363 = vector.shape_cast %362 : vector<1x16x192xbf16> to vector<16x192xbf16>
    %cst_285 = arith.constant dense<0.000000e+00> : vector<16x64xf32>
    %364 = tpu.matmul %363, %5, %cst_285 {dimension_numbers = #tpu.dot_dimension_numbers<[1], [0], [0], [1], [0, 0, 1, 1], [], []>} : vector<16x192xbf16>, vector<192x64xbf16>, vector<16x64xf32> -> vector<16x64xf32>
    %c4_286 = arith.constant 4 : index
    %c0_287 = arith.constant 0 : index
    %c0_288 = arith.constant 0 : index
    %365 = vector.load %arg9[%c4_286, %c0_287, %c0_288] : memref<12x16x192xbf16, #tpu.memory_space<vmem>>, vector<1x16x192xbf16>
    %366 = vector.shape_cast %365 : vector<1x16x192xbf16> to vector<16x192xbf16>
    %cst_289 = arith.constant dense<0.000000e+00> : vector<16x64xf32>
    %367 = tpu.matmul %366, %7, %cst_289 {dimension_numbers = #tpu.dot_dimension_numbers<[1], [0], [0], [1], [0, 0, 1, 1], [], []>} : vector<16x192xbf16>, vector<192x64xbf16>, vector<16x64xf32> -> vector<16x64xf32>
    %368 = arith.addf %364, %367 : vector<16x64xf32>
    %c5_290 = arith.constant 5 : index
    %c0_291 = arith.constant 0 : index
    %c0_292 = arith.constant 0 : index
    %369 = vector.load %arg9[%c5_290, %c0_291, %c0_292] : memref<12x16x192xbf16, #tpu.memory_space<vmem>>, vector<1x16x192xbf16>
    %370 = vector.shape_cast %369 : vector<1x16x192xbf16> to vector<16x192xbf16>
    %cst_293 = arith.constant dense<0.000000e+00> : vector<16x64xf32>
    %371 = tpu.matmul %370, %9, %cst_293 {dimension_numbers = #tpu.dot_dimension_numbers<[1], [0], [0], [1], [0, 0, 1, 1], [], []>} : vector<16x192xbf16>, vector<192x64xbf16>, vector<16x64xf32> -> vector<16x64xf32>
    %372 = arith.addf %368, %371 : vector<16x64xf32>
    %c6_294 = arith.constant 6 : index
    %c0_295 = arith.constant 0 : index
    %c0_296 = arith.constant 0 : index
    %373 = vector.load %arg9[%c6_294, %c0_295, %c0_296] : memref<12x16x192xbf16, #tpu.memory_space<vmem>>, vector<1x16x192xbf16>
    %374 = vector.shape_cast %373 : vector<1x16x192xbf16> to vector<16x192xbf16>
    %cst_297 = arith.constant dense<0.000000e+00> : vector<16x64xf32>
    %375 = tpu.matmul %374, %11, %cst_297 {dimension_numbers = #tpu.dot_dimension_numbers<[1], [0], [0], [1], [0, 0, 1, 1], [], []>} : vector<16x192xbf16>, vector<192x64xbf16>, vector<16x64xf32> -> vector<16x64xf32>
    %376 = arith.addf %372, %375 : vector<16x64xf32>
    %c7_298 = arith.constant 7 : index
    %c0_299 = arith.constant 0 : index
    %c0_300 = arith.constant 0 : index
    %377 = vector.load %arg9[%c7_298, %c0_299, %c0_300] : memref<12x16x192xbf16, #tpu.memory_space<vmem>>, vector<1x16x192xbf16>
    %378 = vector.shape_cast %377 : vector<1x16x192xbf16> to vector<16x192xbf16>
    %cst_301 = arith.constant dense<0.000000e+00> : vector<16x64xf32>
    %379 = tpu.matmul %378, %13, %cst_301 {dimension_numbers = #tpu.dot_dimension_numbers<[1], [0], [0], [1], [0, 0, 1, 1], [], []>} : vector<16x192xbf16>, vector<192x64xbf16>, vector<16x64xf32> -> vector<16x64xf32>
    %380 = arith.addf %376, %379 : vector<16x64xf32>
    %381 = arith.maximumf %361, %380 : vector<16x64xf32>
    %c3_302 = arith.constant 3 : index
    %c0_303 = arith.constant 0 : index
    %c0_304 = arith.constant 0 : index
    %382 = vector.load %arg9[%c3_302, %c0_303, %c0_304] : memref<12x16x192xbf16, #tpu.memory_space<vmem>>, vector<1x16x192xbf16>
    %383 = vector.shape_cast %382 : vector<1x16x192xbf16> to vector<16x192xbf16>
    %cst_305 = arith.constant dense<0.000000e+00> : vector<16x64xf32>
    %384 = tpu.matmul %383, %15, %cst_305 {dimension_numbers = #tpu.dot_dimension_numbers<[1], [0], [0], [1], [0, 0, 1, 1], [], []>} : vector<16x192xbf16>, vector<192x64xbf16>, vector<16x64xf32> -> vector<16x64xf32>
    %c4_306 = arith.constant 4 : index
    %c0_307 = arith.constant 0 : index
    %c0_308 = arith.constant 0 : index
    %385 = vector.load %arg9[%c4_306, %c0_307, %c0_308] : memref<12x16x192xbf16, #tpu.memory_space<vmem>>, vector<1x16x192xbf16>
    %386 = vector.shape_cast %385 : vector<1x16x192xbf16> to vector<16x192xbf16>
    %cst_309 = arith.constant dense<0.000000e+00> : vector<16x64xf32>
    %387 = tpu.matmul %386, %17, %cst_309 {dimension_numbers = #tpu.dot_dimension_numbers<[1], [0], [0], [1], [0, 0, 1, 1], [], []>} : vector<16x192xbf16>, vector<192x64xbf16>, vector<16x64xf32> -> vector<16x64xf32>
    %388 = arith.addf %384, %387 : vector<16x64xf32>
    %c5_310 = arith.constant 5 : index
    %c0_311 = arith.constant 0 : index
    %c0_312 = arith.constant 0 : index
    %389 = vector.load %arg9[%c5_310, %c0_311, %c0_312] : memref<12x16x192xbf16, #tpu.memory_space<vmem>>, vector<1x16x192xbf16>
    %390 = vector.shape_cast %389 : vector<1x16x192xbf16> to vector<16x192xbf16>
    %cst_313 = arith.constant dense<0.000000e+00> : vector<16x64xf32>
    %391 = tpu.matmul %390, %19, %cst_313 {dimension_numbers = #tpu.dot_dimension_numbers<[1], [0], [0], [1], [0, 0, 1, 1], [], []>} : vector<16x192xbf16>, vector<192x64xbf16>, vector<16x64xf32> -> vector<16x64xf32>
    %392 = arith.addf %388, %391 : vector<16x64xf32>
    %c6_314 = arith.constant 6 : index
    %c0_315 = arith.constant 0 : index
    %c0_316 = arith.constant 0 : index
    %393 = vector.load %arg9[%c6_314, %c0_315, %c0_316] : memref<12x16x192xbf16, #tpu.memory_space<vmem>>, vector<1x16x192xbf16>
    %394 = vector.shape_cast %393 : vector<1x16x192xbf16> to vector<16x192xbf16>
    %cst_317 = arith.constant dense<0.000000e+00> : vector<16x64xf32>
    %395 = tpu.matmul %394, %21, %cst_317 {dimension_numbers = #tpu.dot_dimension_numbers<[1], [0], [0], [1], [0, 0, 1, 1], [], []>} : vector<16x192xbf16>, vector<192x64xbf16>, vector<16x64xf32> -> vector<16x64xf32>
    %396 = arith.addf %392, %395 : vector<16x64xf32>
    %c7_318 = arith.constant 7 : index
    %c0_319 = arith.constant 0 : index
    %c0_320 = arith.constant 0 : index
    %397 = vector.load %arg9[%c7_318, %c0_319, %c0_320] : memref<12x16x192xbf16, #tpu.memory_space<vmem>>, vector<1x16x192xbf16>
    %398 = vector.shape_cast %397 : vector<1x16x192xbf16> to vector<16x192xbf16>
    %cst_321 = arith.constant dense<0.000000e+00> : vector<16x64xf32>
    %399 = tpu.matmul %398, %23, %cst_321 {dimension_numbers = #tpu.dot_dimension_numbers<[1], [0], [0], [1], [0, 0, 1, 1], [], []>} : vector<16x192xbf16>, vector<192x64xbf16>, vector<16x64xf32> -> vector<16x64xf32>
    %400 = arith.addf %396, %399 : vector<16x64xf32>
    %401 = arith.maximumf %381, %400 : vector<16x64xf32>
    %402 = vector.broadcast %33 : vector<1x64xf32> to vector<16x64xf32>
    %403 = arith.addf %401, %402 : vector<16x64xf32>
    %cst_322 = arith.constant 0.000000e+00 : f32
    %404 = vector.broadcast %cst_322 : f32 to vector<16x64xf32>
    %405 = arith.maximumf %403, %404 : vector<16x64xf32>
    %406 = arith.truncf %405 : vector<16x64xf32> to vector<16x64xbf16>
    %cst_323 = arith.constant dense<0.000000e+00> : vector<16x128xf32>
    %407 = tpu.matmul %406, %27, %cst_323 {dimension_numbers = #tpu.dot_dimension_numbers<[1], [0], [0], [1], [0, 0, 1, 1], [], []>} : vector<16x64xbf16>, vector<64x128xbf16>, vector<16x128xf32> -> vector<16x128xf32>
    %408 = arith.addf %322, %407 : vector<16x128xf32>
    %c4_324 = arith.constant 4 : index
    %c0_325 = arith.constant 0 : index
    %c0_326 = arith.constant 0 : index
    %409 = vector.load %arg9[%c4_324, %c0_325, %c0_326] : memref<12x16x192xbf16, #tpu.memory_space<vmem>>, vector<1x16x192xbf16>
    %410 = vector.shape_cast %409 : vector<1x16x192xbf16> to vector<16x192xbf16>
    %cst_327 = arith.constant dense<0.000000e+00> : vector<16x64xf32>
    %411 = tpu.matmul %410, %5, %cst_327 {dimension_numbers = #tpu.dot_dimension_numbers<[1], [0], [0], [1], [0, 0, 1, 1], [], []>} : vector<16x192xbf16>, vector<192x64xbf16>, vector<16x64xf32> -> vector<16x64xf32>
    %c5_328 = arith.constant 5 : index
    %c0_329 = arith.constant 0 : index
    %c0_330 = arith.constant 0 : index
    %412 = vector.load %arg9[%c5_328, %c0_329, %c0_330] : memref<12x16x192xbf16, #tpu.memory_space<vmem>>, vector<1x16x192xbf16>
    %413 = vector.shape_cast %412 : vector<1x16x192xbf16> to vector<16x192xbf16>
    %cst_331 = arith.constant dense<0.000000e+00> : vector<16x64xf32>
    %414 = tpu.matmul %413, %7, %cst_331 {dimension_numbers = #tpu.dot_dimension_numbers<[1], [0], [0], [1], [0, 0, 1, 1], [], []>} : vector<16x192xbf16>, vector<192x64xbf16>, vector<16x64xf32> -> vector<16x64xf32>
    %415 = arith.addf %411, %414 : vector<16x64xf32>
    %c6_332 = arith.constant 6 : index
    %c0_333 = arith.constant 0 : index
    %c0_334 = arith.constant 0 : index
    %416 = vector.load %arg9[%c6_332, %c0_333, %c0_334] : memref<12x16x192xbf16, #tpu.memory_space<vmem>>, vector<1x16x192xbf16>
    %417 = vector.shape_cast %416 : vector<1x16x192xbf16> to vector<16x192xbf16>
    %cst_335 = arith.constant dense<0.000000e+00> : vector<16x64xf32>
    %418 = tpu.matmul %417, %9, %cst_335 {dimension_numbers = #tpu.dot_dimension_numbers<[1], [0], [0], [1], [0, 0, 1, 1], [], []>} : vector<16x192xbf16>, vector<192x64xbf16>, vector<16x64xf32> -> vector<16x64xf32>
    %419 = arith.addf %415, %418 : vector<16x64xf32>
    %c7_336 = arith.constant 7 : index
    %c0_337 = arith.constant 0 : index
    %c0_338 = arith.constant 0 : index
    %420 = vector.load %arg9[%c7_336, %c0_337, %c0_338] : memref<12x16x192xbf16, #tpu.memory_space<vmem>>, vector<1x16x192xbf16>
    %421 = vector.shape_cast %420 : vector<1x16x192xbf16> to vector<16x192xbf16>
    %cst_339 = arith.constant dense<0.000000e+00> : vector<16x64xf32>
    %422 = tpu.matmul %421, %11, %cst_339 {dimension_numbers = #tpu.dot_dimension_numbers<[1], [0], [0], [1], [0, 0, 1, 1], [], []>} : vector<16x192xbf16>, vector<192x64xbf16>, vector<16x64xf32> -> vector<16x64xf32>
    %423 = arith.addf %419, %422 : vector<16x64xf32>
    %c8_340 = arith.constant 8 : index
    %c0_341 = arith.constant 0 : index
    %c0_342 = arith.constant 0 : index
    %424 = vector.load %arg9[%c8_340, %c0_341, %c0_342] : memref<12x16x192xbf16, #tpu.memory_space<vmem>>, vector<1x16x192xbf16>
    %425 = vector.shape_cast %424 : vector<1x16x192xbf16> to vector<16x192xbf16>
    %cst_343 = arith.constant dense<0.000000e+00> : vector<16x64xf32>
    %426 = tpu.matmul %425, %13, %cst_343 {dimension_numbers = #tpu.dot_dimension_numbers<[1], [0], [0], [1], [0, 0, 1, 1], [], []>} : vector<16x192xbf16>, vector<192x64xbf16>, vector<16x64xf32> -> vector<16x64xf32>
    %427 = arith.addf %423, %426 : vector<16x64xf32>
    %c4_344 = arith.constant 4 : index
    %c0_345 = arith.constant 0 : index
    %c0_346 = arith.constant 0 : index
    %428 = vector.load %arg9[%c4_344, %c0_345, %c0_346] : memref<12x16x192xbf16, #tpu.memory_space<vmem>>, vector<1x16x192xbf16>
    %429 = vector.shape_cast %428 : vector<1x16x192xbf16> to vector<16x192xbf16>
    %cst_347 = arith.constant dense<0.000000e+00> : vector<16x64xf32>
    %430 = tpu.matmul %429, %15, %cst_347 {dimension_numbers = #tpu.dot_dimension_numbers<[1], [0], [0], [1], [0, 0, 1, 1], [], []>} : vector<16x192xbf16>, vector<192x64xbf16>, vector<16x64xf32> -> vector<16x64xf32>
    %c5_348 = arith.constant 5 : index
    %c0_349 = arith.constant 0 : index
    %c0_350 = arith.constant 0 : index
    %431 = vector.load %arg9[%c5_348, %c0_349, %c0_350] : memref<12x16x192xbf16, #tpu.memory_space<vmem>>, vector<1x16x192xbf16>
    %432 = vector.shape_cast %431 : vector<1x16x192xbf16> to vector<16x192xbf16>
    %cst_351 = arith.constant dense<0.000000e+00> : vector<16x64xf32>
    %433 = tpu.matmul %432, %17, %cst_351 {dimension_numbers = #tpu.dot_dimension_numbers<[1], [0], [0], [1], [0, 0, 1, 1], [], []>} : vector<16x192xbf16>, vector<192x64xbf16>, vector<16x64xf32> -> vector<16x64xf32>
    %434 = arith.addf %430, %433 : vector<16x64xf32>
    %c6_352 = arith.constant 6 : index
    %c0_353 = arith.constant 0 : index
    %c0_354 = arith.constant 0 : index
    %435 = vector.load %arg9[%c6_352, %c0_353, %c0_354] : memref<12x16x192xbf16, #tpu.memory_space<vmem>>, vector<1x16x192xbf16>
    %436 = vector.shape_cast %435 : vector<1x16x192xbf16> to vector<16x192xbf16>
    %cst_355 = arith.constant dense<0.000000e+00> : vector<16x64xf32>
    %437 = tpu.matmul %436, %19, %cst_355 {dimension_numbers = #tpu.dot_dimension_numbers<[1], [0], [0], [1], [0, 0, 1, 1], [], []>} : vector<16x192xbf16>, vector<192x64xbf16>, vector<16x64xf32> -> vector<16x64xf32>
    %438 = arith.addf %434, %437 : vector<16x64xf32>
    %c7_356 = arith.constant 7 : index
    %c0_357 = arith.constant 0 : index
    %c0_358 = arith.constant 0 : index
    %439 = vector.load %arg9[%c7_356, %c0_357, %c0_358] : memref<12x16x192xbf16, #tpu.memory_space<vmem>>, vector<1x16x192xbf16>
    %440 = vector.shape_cast %439 : vector<1x16x192xbf16> to vector<16x192xbf16>
    %cst_359 = arith.constant dense<0.000000e+00> : vector<16x64xf32>
    %441 = tpu.matmul %440, %21, %cst_359 {dimension_numbers = #tpu.dot_dimension_numbers<[1], [0], [0], [1], [0, 0, 1, 1], [], []>} : vector<16x192xbf16>, vector<192x64xbf16>, vector<16x64xf32> -> vector<16x64xf32>
    %442 = arith.addf %438, %441 : vector<16x64xf32>
    %c8_360 = arith.constant 8 : index
    %c0_361 = arith.constant 0 : index
    %c0_362 = arith.constant 0 : index
    %443 = vector.load %arg9[%c8_360, %c0_361, %c0_362] : memref<12x16x192xbf16, #tpu.memory_space<vmem>>, vector<1x16x192xbf16>
    %444 = vector.shape_cast %443 : vector<1x16x192xbf16> to vector<16x192xbf16>
    %cst_363 = arith.constant dense<0.000000e+00> : vector<16x64xf32>
    %445 = tpu.matmul %444, %23, %cst_363 {dimension_numbers = #tpu.dot_dimension_numbers<[1], [0], [0], [1], [0, 0, 1, 1], [], []>} : vector<16x192xbf16>, vector<192x64xbf16>, vector<16x64xf32> -> vector<16x64xf32>
    %446 = arith.addf %442, %445 : vector<16x64xf32>
    %447 = arith.maximumf %427, %446 : vector<16x64xf32>
    %c5_364 = arith.constant 5 : index
    %c0_365 = arith.constant 0 : index
    %c0_366 = arith.constant 0 : index
    %448 = vector.load %arg9[%c5_364, %c0_365, %c0_366] : memref<12x16x192xbf16, #tpu.memory_space<vmem>>, vector<1x16x192xbf16>
    %449 = vector.shape_cast %448 : vector<1x16x192xbf16> to vector<16x192xbf16>
    %cst_367 = arith.constant dense<0.000000e+00> : vector<16x64xf32>
    %450 = tpu.matmul %449, %5, %cst_367 {dimension_numbers = #tpu.dot_dimension_numbers<[1], [0], [0], [1], [0, 0, 1, 1], [], []>} : vector<16x192xbf16>, vector<192x64xbf16>, vector<16x64xf32> -> vector<16x64xf32>
    %c6_368 = arith.constant 6 : index
    %c0_369 = arith.constant 0 : index
    %c0_370 = arith.constant 0 : index
    %451 = vector.load %arg9[%c6_368, %c0_369, %c0_370] : memref<12x16x192xbf16, #tpu.memory_space<vmem>>, vector<1x16x192xbf16>
    %452 = vector.shape_cast %451 : vector<1x16x192xbf16> to vector<16x192xbf16>
    %cst_371 = arith.constant dense<0.000000e+00> : vector<16x64xf32>
    %453 = tpu.matmul %452, %7, %cst_371 {dimension_numbers = #tpu.dot_dimension_numbers<[1], [0], [0], [1], [0, 0, 1, 1], [], []>} : vector<16x192xbf16>, vector<192x64xbf16>, vector<16x64xf32> -> vector<16x64xf32>
    %454 = arith.addf %450, %453 : vector<16x64xf32>
    %c7_372 = arith.constant 7 : index
    %c0_373 = arith.constant 0 : index
    %c0_374 = arith.constant 0 : index
    %455 = vector.load %arg9[%c7_372, %c0_373, %c0_374] : memref<12x16x192xbf16, #tpu.memory_space<vmem>>, vector<1x16x192xbf16>
    %456 = vector.shape_cast %455 : vector<1x16x192xbf16> to vector<16x192xbf16>
    %cst_375 = arith.constant dense<0.000000e+00> : vector<16x64xf32>
    %457 = tpu.matmul %456, %9, %cst_375 {dimension_numbers = #tpu.dot_dimension_numbers<[1], [0], [0], [1], [0, 0, 1, 1], [], []>} : vector<16x192xbf16>, vector<192x64xbf16>, vector<16x64xf32> -> vector<16x64xf32>
    %458 = arith.addf %454, %457 : vector<16x64xf32>
    %c8_376 = arith.constant 8 : index
    %c0_377 = arith.constant 0 : index
    %c0_378 = arith.constant 0 : index
    %459 = vector.load %arg9[%c8_376, %c0_377, %c0_378] : memref<12x16x192xbf16, #tpu.memory_space<vmem>>, vector<1x16x192xbf16>
    %460 = vector.shape_cast %459 : vector<1x16x192xbf16> to vector<16x192xbf16>
    %cst_379 = arith.constant dense<0.000000e+00> : vector<16x64xf32>
    %461 = tpu.matmul %460, %11, %cst_379 {dimension_numbers = #tpu.dot_dimension_numbers<[1], [0], [0], [1], [0, 0, 1, 1], [], []>} : vector<16x192xbf16>, vector<192x64xbf16>, vector<16x64xf32> -> vector<16x64xf32>
    %462 = arith.addf %458, %461 : vector<16x64xf32>
    %c9_380 = arith.constant 9 : index
    %c0_381 = arith.constant 0 : index
    %c0_382 = arith.constant 0 : index
    %463 = vector.load %arg9[%c9_380, %c0_381, %c0_382] : memref<12x16x192xbf16, #tpu.memory_space<vmem>>, vector<1x16x192xbf16>
    %464 = vector.shape_cast %463 : vector<1x16x192xbf16> to vector<16x192xbf16>
    %cst_383 = arith.constant dense<0.000000e+00> : vector<16x64xf32>
    %465 = tpu.matmul %464, %13, %cst_383 {dimension_numbers = #tpu.dot_dimension_numbers<[1], [0], [0], [1], [0, 0, 1, 1], [], []>} : vector<16x192xbf16>, vector<192x64xbf16>, vector<16x64xf32> -> vector<16x64xf32>
    %466 = arith.addf %462, %465 : vector<16x64xf32>
    %467 = arith.maximumf %447, %466 : vector<16x64xf32>
    %c5_384 = arith.constant 5 : index
    %c0_385 = arith.constant 0 : index
    %c0_386 = arith.constant 0 : index
    %468 = vector.load %arg9[%c5_384, %c0_385, %c0_386] : memref<12x16x192xbf16, #tpu.memory_space<vmem>>, vector<1x16x192xbf16>
    %469 = vector.shape_cast %468 : vector<1x16x192xbf16> to vector<16x192xbf16>
    %cst_387 = arith.constant dense<0.000000e+00> : vector<16x64xf32>
    %470 = tpu.matmul %469, %15, %cst_387 {dimension_numbers = #tpu.dot_dimension_numbers<[1], [0], [0], [1], [0, 0, 1, 1], [], []>} : vector<16x192xbf16>, vector<192x64xbf16>, vector<16x64xf32> -> vector<16x64xf32>
    %c6_388 = arith.constant 6 : index
    %c0_389 = arith.constant 0 : index
    %c0_390 = arith.constant 0 : index
    %471 = vector.load %arg9[%c6_388, %c0_389, %c0_390] : memref<12x16x192xbf16, #tpu.memory_space<vmem>>, vector<1x16x192xbf16>
    %472 = vector.shape_cast %471 : vector<1x16x192xbf16> to vector<16x192xbf16>
    %cst_391 = arith.constant dense<0.000000e+00> : vector<16x64xf32>
    %473 = tpu.matmul %472, %17, %cst_391 {dimension_numbers = #tpu.dot_dimension_numbers<[1], [0], [0], [1], [0, 0, 1, 1], [], []>} : vector<16x192xbf16>, vector<192x64xbf16>, vector<16x64xf32> -> vector<16x64xf32>
    %474 = arith.addf %470, %473 : vector<16x64xf32>
    %c7_392 = arith.constant 7 : index
    %c0_393 = arith.constant 0 : index
    %c0_394 = arith.constant 0 : index
    %475 = vector.load %arg9[%c7_392, %c0_393, %c0_394] : memref<12x16x192xbf16, #tpu.memory_space<vmem>>, vector<1x16x192xbf16>
    %476 = vector.shape_cast %475 : vector<1x16x192xbf16> to vector<16x192xbf16>
    %cst_395 = arith.constant dense<0.000000e+00> : vector<16x64xf32>
    %477 = tpu.matmul %476, %19, %cst_395 {dimension_numbers = #tpu.dot_dimension_numbers<[1], [0], [0], [1], [0, 0, 1, 1], [], []>} : vector<16x192xbf16>, vector<192x64xbf16>, vector<16x64xf32> -> vector<16x64xf32>
    %478 = arith.addf %474, %477 : vector<16x64xf32>
    %c8_396 = arith.constant 8 : index
    %c0_397 = arith.constant 0 : index
    %c0_398 = arith.constant 0 : index
    %479 = vector.load %arg9[%c8_396, %c0_397, %c0_398] : memref<12x16x192xbf16, #tpu.memory_space<vmem>>, vector<1x16x192xbf16>
    %480 = vector.shape_cast %479 : vector<1x16x192xbf16> to vector<16x192xbf16>
    %cst_399 = arith.constant dense<0.000000e+00> : vector<16x64xf32>
    %481 = tpu.matmul %480, %21, %cst_399 {dimension_numbers = #tpu.dot_dimension_numbers<[1], [0], [0], [1], [0, 0, 1, 1], [], []>} : vector<16x192xbf16>, vector<192x64xbf16>, vector<16x64xf32> -> vector<16x64xf32>
    %482 = arith.addf %478, %481 : vector<16x64xf32>
    %c9_400 = arith.constant 9 : index
    %c0_401 = arith.constant 0 : index
    %c0_402 = arith.constant 0 : index
    %483 = vector.load %arg9[%c9_400, %c0_401, %c0_402] : memref<12x16x192xbf16, #tpu.memory_space<vmem>>, vector<1x16x192xbf16>
    %484 = vector.shape_cast %483 : vector<1x16x192xbf16> to vector<16x192xbf16>
    %cst_403 = arith.constant dense<0.000000e+00> : vector<16x64xf32>
    %485 = tpu.matmul %484, %23, %cst_403 {dimension_numbers = #tpu.dot_dimension_numbers<[1], [0], [0], [1], [0, 0, 1, 1], [], []>} : vector<16x192xbf16>, vector<192x64xbf16>, vector<16x64xf32> -> vector<16x64xf32>
    %486 = arith.addf %482, %485 : vector<16x64xf32>
    %487 = arith.maximumf %467, %486 : vector<16x64xf32>
    %488 = vector.broadcast %33 : vector<1x64xf32> to vector<16x64xf32>
    %489 = arith.addf %487, %488 : vector<16x64xf32>
    %cst_404 = arith.constant 0.000000e+00 : f32
    %490 = vector.broadcast %cst_404 : f32 to vector<16x64xf32>
    %491 = arith.maximumf %489, %490 : vector<16x64xf32>
    %492 = arith.truncf %491 : vector<16x64xf32> to vector<16x64xbf16>
    %cst_405 = arith.constant dense<0.000000e+00> : vector<16x128xf32>
    %493 = tpu.matmul %492, %29, %cst_405 {dimension_numbers = #tpu.dot_dimension_numbers<[1], [0], [0], [1], [0, 0, 1, 1], [], []>} : vector<16x64xbf16>, vector<64x128xbf16>, vector<16x128xf32> -> vector<16x128xf32>
    %494 = arith.addf %408, %493 : vector<16x128xf32>
    %c6_406 = arith.constant 6 : index
    %c0_407 = arith.constant 0 : index
    %c0_408 = arith.constant 0 : index
    %495 = vector.load %arg9[%c6_406, %c0_407, %c0_408] : memref<12x16x192xbf16, #tpu.memory_space<vmem>>, vector<1x16x192xbf16>
    %496 = vector.shape_cast %495 : vector<1x16x192xbf16> to vector<16x192xbf16>
    %cst_409 = arith.constant dense<0.000000e+00> : vector<16x64xf32>
    %497 = tpu.matmul %496, %5, %cst_409 {dimension_numbers = #tpu.dot_dimension_numbers<[1], [0], [0], [1], [0, 0, 1, 1], [], []>} : vector<16x192xbf16>, vector<192x64xbf16>, vector<16x64xf32> -> vector<16x64xf32>
    %c7_410 = arith.constant 7 : index
    %c0_411 = arith.constant 0 : index
    %c0_412 = arith.constant 0 : index
    %498 = vector.load %arg9[%c7_410, %c0_411, %c0_412] : memref<12x16x192xbf16, #tpu.memory_space<vmem>>, vector<1x16x192xbf16>
    %499 = vector.shape_cast %498 : vector<1x16x192xbf16> to vector<16x192xbf16>
    %cst_413 = arith.constant dense<0.000000e+00> : vector<16x64xf32>
    %500 = tpu.matmul %499, %7, %cst_413 {dimension_numbers = #tpu.dot_dimension_numbers<[1], [0], [0], [1], [0, 0, 1, 1], [], []>} : vector<16x192xbf16>, vector<192x64xbf16>, vector<16x64xf32> -> vector<16x64xf32>
    %501 = arith.addf %497, %500 : vector<16x64xf32>
    %c8_414 = arith.constant 8 : index
    %c0_415 = arith.constant 0 : index
    %c0_416 = arith.constant 0 : index
    %502 = vector.load %arg9[%c8_414, %c0_415, %c0_416] : memref<12x16x192xbf16, #tpu.memory_space<vmem>>, vector<1x16x192xbf16>
    %503 = vector.shape_cast %502 : vector<1x16x192xbf16> to vector<16x192xbf16>
    %cst_417 = arith.constant dense<0.000000e+00> : vector<16x64xf32>
    %504 = tpu.matmul %503, %9, %cst_417 {dimension_numbers = #tpu.dot_dimension_numbers<[1], [0], [0], [1], [0, 0, 1, 1], [], []>} : vector<16x192xbf16>, vector<192x64xbf16>, vector<16x64xf32> -> vector<16x64xf32>
    %505 = arith.addf %501, %504 : vector<16x64xf32>
    %c9_418 = arith.constant 9 : index
    %c0_419 = arith.constant 0 : index
    %c0_420 = arith.constant 0 : index
    %506 = vector.load %arg9[%c9_418, %c0_419, %c0_420] : memref<12x16x192xbf16, #tpu.memory_space<vmem>>, vector<1x16x192xbf16>
    %507 = vector.shape_cast %506 : vector<1x16x192xbf16> to vector<16x192xbf16>
    %cst_421 = arith.constant dense<0.000000e+00> : vector<16x64xf32>
    %508 = tpu.matmul %507, %11, %cst_421 {dimension_numbers = #tpu.dot_dimension_numbers<[1], [0], [0], [1], [0, 0, 1, 1], [], []>} : vector<16x192xbf16>, vector<192x64xbf16>, vector<16x64xf32> -> vector<16x64xf32>
    %509 = arith.addf %505, %508 : vector<16x64xf32>
    %c10_422 = arith.constant 10 : index
    %c0_423 = arith.constant 0 : index
    %c0_424 = arith.constant 0 : index
    %510 = vector.load %arg9[%c10_422, %c0_423, %c0_424] : memref<12x16x192xbf16, #tpu.memory_space<vmem>>, vector<1x16x192xbf16>
    %511 = vector.shape_cast %510 : vector<1x16x192xbf16> to vector<16x192xbf16>
    %cst_425 = arith.constant dense<0.000000e+00> : vector<16x64xf32>
    %512 = tpu.matmul %511, %13, %cst_425 {dimension_numbers = #tpu.dot_dimension_numbers<[1], [0], [0], [1], [0, 0, 1, 1], [], []>} : vector<16x192xbf16>, vector<192x64xbf16>, vector<16x64xf32> -> vector<16x64xf32>
    %513 = arith.addf %509, %512 : vector<16x64xf32>
    %c6_426 = arith.constant 6 : index
    %c0_427 = arith.constant 0 : index
    %c0_428 = arith.constant 0 : index
    %514 = vector.load %arg9[%c6_426, %c0_427, %c0_428] : memref<12x16x192xbf16, #tpu.memory_space<vmem>>, vector<1x16x192xbf16>
    %515 = vector.shape_cast %514 : vector<1x16x192xbf16> to vector<16x192xbf16>
    %cst_429 = arith.constant dense<0.000000e+00> : vector<16x64xf32>
    %516 = tpu.matmul %515, %15, %cst_429 {dimension_numbers = #tpu.dot_dimension_numbers<[1], [0], [0], [1], [0, 0, 1, 1], [], []>} : vector<16x192xbf16>, vector<192x64xbf16>, vector<16x64xf32> -> vector<16x64xf32>
    %c7_430 = arith.constant 7 : index
    %c0_431 = arith.constant 0 : index
    %c0_432 = arith.constant 0 : index
    %517 = vector.load %arg9[%c7_430, %c0_431, %c0_432] : memref<12x16x192xbf16, #tpu.memory_space<vmem>>, vector<1x16x192xbf16>
    %518 = vector.shape_cast %517 : vector<1x16x192xbf16> to vector<16x192xbf16>
    %cst_433 = arith.constant dense<0.000000e+00> : vector<16x64xf32>
    %519 = tpu.matmul %518, %17, %cst_433 {dimension_numbers = #tpu.dot_dimension_numbers<[1], [0], [0], [1], [0, 0, 1, 1], [], []>} : vector<16x192xbf16>, vector<192x64xbf16>, vector<16x64xf32> -> vector<16x64xf32>
    %520 = arith.addf %516, %519 : vector<16x64xf32>
    %c8_434 = arith.constant 8 : index
    %c0_435 = arith.constant 0 : index
    %c0_436 = arith.constant 0 : index
    %521 = vector.load %arg9[%c8_434, %c0_435, %c0_436] : memref<12x16x192xbf16, #tpu.memory_space<vmem>>, vector<1x16x192xbf16>
    %522 = vector.shape_cast %521 : vector<1x16x192xbf16> to vector<16x192xbf16>
    %cst_437 = arith.constant dense<0.000000e+00> : vector<16x64xf32>
    %523 = tpu.matmul %522, %19, %cst_437 {dimension_numbers = #tpu.dot_dimension_numbers<[1], [0], [0], [1], [0, 0, 1, 1], [], []>} : vector<16x192xbf16>, vector<192x64xbf16>, vector<16x64xf32> -> vector<16x64xf32>
    %524 = arith.addf %520, %523 : vector<16x64xf32>
    %c9_438 = arith.constant 9 : index
    %c0_439 = arith.constant 0 : index
    %c0_440 = arith.constant 0 : index
    %525 = vector.load %arg9[%c9_438, %c0_439, %c0_440] : memref<12x16x192xbf16, #tpu.memory_space<vmem>>, vector<1x16x192xbf16>
    %526 = vector.shape_cast %525 : vector<1x16x192xbf16> to vector<16x192xbf16>
    %cst_441 = arith.constant dense<0.000000e+00> : vector<16x64xf32>
    %527 = tpu.matmul %526, %21, %cst_441 {dimension_numbers = #tpu.dot_dimension_numbers<[1], [0], [0], [1], [0, 0, 1, 1], [], []>} : vector<16x192xbf16>, vector<192x64xbf16>, vector<16x64xf32> -> vector<16x64xf32>
    %528 = arith.addf %524, %527 : vector<16x64xf32>
    %c10_442 = arith.constant 10 : index
    %c0_443 = arith.constant 0 : index
    %c0_444 = arith.constant 0 : index
    %529 = vector.load %arg9[%c10_442, %c0_443, %c0_444] : memref<12x16x192xbf16, #tpu.memory_space<vmem>>, vector<1x16x192xbf16>
    %530 = vector.shape_cast %529 : vector<1x16x192xbf16> to vector<16x192xbf16>
    %cst_445 = arith.constant dense<0.000000e+00> : vector<16x64xf32>
    %531 = tpu.matmul %530, %23, %cst_445 {dimension_numbers = #tpu.dot_dimension_numbers<[1], [0], [0], [1], [0, 0, 1, 1], [], []>} : vector<16x192xbf16>, vector<192x64xbf16>, vector<16x64xf32> -> vector<16x64xf32>
    %532 = arith.addf %528, %531 : vector<16x64xf32>
    %533 = arith.maximumf %513, %532 : vector<16x64xf32>
    %c7_446 = arith.constant 7 : index
    %c0_447 = arith.constant 0 : index
    %c0_448 = arith.constant 0 : index
    %534 = vector.load %arg9[%c7_446, %c0_447, %c0_448] : memref<12x16x192xbf16, #tpu.memory_space<vmem>>, vector<1x16x192xbf16>
    %535 = vector.shape_cast %534 : vector<1x16x192xbf16> to vector<16x192xbf16>
    %cst_449 = arith.constant dense<0.000000e+00> : vector<16x64xf32>
    %536 = tpu.matmul %535, %5, %cst_449 {dimension_numbers = #tpu.dot_dimension_numbers<[1], [0], [0], [1], [0, 0, 1, 1], [], []>} : vector<16x192xbf16>, vector<192x64xbf16>, vector<16x64xf32> -> vector<16x64xf32>
    %c8_450 = arith.constant 8 : index
    %c0_451 = arith.constant 0 : index
    %c0_452 = arith.constant 0 : index
    %537 = vector.load %arg9[%c8_450, %c0_451, %c0_452] : memref<12x16x192xbf16, #tpu.memory_space<vmem>>, vector<1x16x192xbf16>
    %538 = vector.shape_cast %537 : vector<1x16x192xbf16> to vector<16x192xbf16>
    %cst_453 = arith.constant dense<0.000000e+00> : vector<16x64xf32>
    %539 = tpu.matmul %538, %7, %cst_453 {dimension_numbers = #tpu.dot_dimension_numbers<[1], [0], [0], [1], [0, 0, 1, 1], [], []>} : vector<16x192xbf16>, vector<192x64xbf16>, vector<16x64xf32> -> vector<16x64xf32>
    %540 = arith.addf %536, %539 : vector<16x64xf32>
    %c9_454 = arith.constant 9 : index
    %c0_455 = arith.constant 0 : index
    %c0_456 = arith.constant 0 : index
    %541 = vector.load %arg9[%c9_454, %c0_455, %c0_456] : memref<12x16x192xbf16, #tpu.memory_space<vmem>>, vector<1x16x192xbf16>
    %542 = vector.shape_cast %541 : vector<1x16x192xbf16> to vector<16x192xbf16>
    %cst_457 = arith.constant dense<0.000000e+00> : vector<16x64xf32>
    %543 = tpu.matmul %542, %9, %cst_457 {dimension_numbers = #tpu.dot_dimension_numbers<[1], [0], [0], [1], [0, 0, 1, 1], [], []>} : vector<16x192xbf16>, vector<192x64xbf16>, vector<16x64xf32> -> vector<16x64xf32>
    %544 = arith.addf %540, %543 : vector<16x64xf32>
    %c10_458 = arith.constant 10 : index
    %c0_459 = arith.constant 0 : index
    %c0_460 = arith.constant 0 : index
    %545 = vector.load %arg9[%c10_458, %c0_459, %c0_460] : memref<12x16x192xbf16, #tpu.memory_space<vmem>>, vector<1x16x192xbf16>
    %546 = vector.shape_cast %545 : vector<1x16x192xbf16> to vector<16x192xbf16>
    %cst_461 = arith.constant dense<0.000000e+00> : vector<16x64xf32>
    %547 = tpu.matmul %546, %11, %cst_461 {dimension_numbers = #tpu.dot_dimension_numbers<[1], [0], [0], [1], [0, 0, 1, 1], [], []>} : vector<16x192xbf16>, vector<192x64xbf16>, vector<16x64xf32> -> vector<16x64xf32>
    %548 = arith.addf %544, %547 : vector<16x64xf32>
    %c11_462 = arith.constant 11 : index
    %c0_463 = arith.constant 0 : index
    %c0_464 = arith.constant 0 : index
    %549 = vector.load %arg9[%c11_462, %c0_463, %c0_464] : memref<12x16x192xbf16, #tpu.memory_space<vmem>>, vector<1x16x192xbf16>
    %550 = vector.shape_cast %549 : vector<1x16x192xbf16> to vector<16x192xbf16>
    %cst_465 = arith.constant dense<0.000000e+00> : vector<16x64xf32>
    %551 = tpu.matmul %550, %13, %cst_465 {dimension_numbers = #tpu.dot_dimension_numbers<[1], [0], [0], [1], [0, 0, 1, 1], [], []>} : vector<16x192xbf16>, vector<192x64xbf16>, vector<16x64xf32> -> vector<16x64xf32>
    %552 = arith.addf %548, %551 : vector<16x64xf32>
    %553 = arith.maximumf %533, %552 : vector<16x64xf32>
    %c7_466 = arith.constant 7 : index
    %c0_467 = arith.constant 0 : index
    %c0_468 = arith.constant 0 : index
    %554 = vector.load %arg9[%c7_466, %c0_467, %c0_468] : memref<12x16x192xbf16, #tpu.memory_space<vmem>>, vector<1x16x192xbf16>
    %555 = vector.shape_cast %554 : vector<1x16x192xbf16> to vector<16x192xbf16>
    %cst_469 = arith.constant dense<0.000000e+00> : vector<16x64xf32>
    %556 = tpu.matmul %555, %15, %cst_469 {dimension_numbers = #tpu.dot_dimension_numbers<[1], [0], [0], [1], [0, 0, 1, 1], [], []>} : vector<16x192xbf16>, vector<192x64xbf16>, vector<16x64xf32> -> vector<16x64xf32>
    %c8_470 = arith.constant 8 : index
    %c0_471 = arith.constant 0 : index
    %c0_472 = arith.constant 0 : index
    %557 = vector.load %arg9[%c8_470, %c0_471, %c0_472] : memref<12x16x192xbf16, #tpu.memory_space<vmem>>, vector<1x16x192xbf16>
    %558 = vector.shape_cast %557 : vector<1x16x192xbf16> to vector<16x192xbf16>
    %cst_473 = arith.constant dense<0.000000e+00> : vector<16x64xf32>
    %559 = tpu.matmul %558, %17, %cst_473 {dimension_numbers = #tpu.dot_dimension_numbers<[1], [0], [0], [1], [0, 0, 1, 1], [], []>} : vector<16x192xbf16>, vector<192x64xbf16>, vector<16x64xf32> -> vector<16x64xf32>
    %560 = arith.addf %556, %559 : vector<16x64xf32>
    %c9_474 = arith.constant 9 : index
    %c0_475 = arith.constant 0 : index
    %c0_476 = arith.constant 0 : index
    %561 = vector.load %arg9[%c9_474, %c0_475, %c0_476] : memref<12x16x192xbf16, #tpu.memory_space<vmem>>, vector<1x16x192xbf16>
    %562 = vector.shape_cast %561 : vector<1x16x192xbf16> to vector<16x192xbf16>
    %cst_477 = arith.constant dense<0.000000e+00> : vector<16x64xf32>
    %563 = tpu.matmul %562, %19, %cst_477 {dimension_numbers = #tpu.dot_dimension_numbers<[1], [0], [0], [1], [0, 0, 1, 1], [], []>} : vector<16x192xbf16>, vector<192x64xbf16>, vector<16x64xf32> -> vector<16x64xf32>
    %564 = arith.addf %560, %563 : vector<16x64xf32>
    %c10_478 = arith.constant 10 : index
    %c0_479 = arith.constant 0 : index
    %c0_480 = arith.constant 0 : index
    %565 = vector.load %arg9[%c10_478, %c0_479, %c0_480] : memref<12x16x192xbf16, #tpu.memory_space<vmem>>, vector<1x16x192xbf16>
    %566 = vector.shape_cast %565 : vector<1x16x192xbf16> to vector<16x192xbf16>
    %cst_481 = arith.constant dense<0.000000e+00> : vector<16x64xf32>
    %567 = tpu.matmul %566, %21, %cst_481 {dimension_numbers = #tpu.dot_dimension_numbers<[1], [0], [0], [1], [0, 0, 1, 1], [], []>} : vector<16x192xbf16>, vector<192x64xbf16>, vector<16x64xf32> -> vector<16x64xf32>
    %568 = arith.addf %564, %567 : vector<16x64xf32>
    %c11_482 = arith.constant 11 : index
    %c0_483 = arith.constant 0 : index
    %c0_484 = arith.constant 0 : index
    %569 = vector.load %arg9[%c11_482, %c0_483, %c0_484] : memref<12x16x192xbf16, #tpu.memory_space<vmem>>, vector<1x16x192xbf16>
    %570 = vector.shape_cast %569 : vector<1x16x192xbf16> to vector<16x192xbf16>
    %cst_485 = arith.constant dense<0.000000e+00> : vector<16x64xf32>
    %571 = tpu.matmul %570, %23, %cst_485 {dimension_numbers = #tpu.dot_dimension_numbers<[1], [0], [0], [1], [0, 0, 1, 1], [], []>} : vector<16x192xbf16>, vector<192x64xbf16>, vector<16x64xf32> -> vector<16x64xf32>
    %572 = arith.addf %568, %571 : vector<16x64xf32>
    %573 = arith.maximumf %553, %572 : vector<16x64xf32>
    %574 = vector.broadcast %33 : vector<1x64xf32> to vector<16x64xf32>
    %575 = arith.addf %573, %574 : vector<16x64xf32>
    %cst_486 = arith.constant 0.000000e+00 : f32
    %576 = vector.broadcast %cst_486 : f32 to vector<16x64xf32>
    %577 = arith.maximumf %575, %576 : vector<16x64xf32>
    %578 = arith.truncf %577 : vector<16x64xf32> to vector<16x64xbf16>
    %cst_487 = arith.constant dense<0.000000e+00> : vector<16x128xf32>
    %579 = tpu.matmul %578, %31, %cst_487 {dimension_numbers = #tpu.dot_dimension_numbers<[1], [0], [0], [1], [0, 0, 1, 1], [], []>} : vector<16x64xbf16>, vector<64x128xbf16>, vector<16x128xf32> -> vector<16x128xf32>
    %580 = arith.addf %494, %579 : vector<16x128xf32>
    %c0_488 = arith.constant 0 : index
    %c0_489 = arith.constant 0 : index
    %581 = vector.load %arg7[%c0_488, %c0_489] : memref<1x128xf32, #tpu.memory_space<vmem>>, vector<1x128xf32>
    %582 = vector.broadcast %581 : vector<1x128xf32> to vector<16x128xf32>
    %583 = arith.addf %580, %582 : vector<16x128xf32>
    %cst_490 = arith.constant dense<0xFF800000> : vector<16xf32>
    %584 = vector.multi_reduction <maximumf>, %583, %cst_490 [1] : vector<16x128xf32> to vector<16xf32>
    %585 = vector.shape_cast %584 : vector<16xf32> to vector<16x1xf32>
    %586 = vector.broadcast %585 : vector<16x1xf32> to vector<16x128xf32>
    %587 = arith.subf %583, %586 : vector<16x128xf32>
    %588 = math.exp %587 : vector<16x128xf32>
    %cst_491 = arith.constant dense<0.000000e+00> : vector<16xf32>
    %589 = vector.multi_reduction <add>, %588, %cst_491 [1] : vector<16x128xf32> to vector<16xf32>
    %590 = vector.shape_cast %589 : vector<16xf32> to vector<16x1xf32>
    %591 = math.log %590 : vector<16x1xf32>
    %592 = vector.broadcast %585 : vector<16x1xf32> to vector<16x128xf32>
    %593 = arith.subf %583, %592 : vector<16x128xf32>
    %594 = vector.broadcast %591 : vector<16x1xf32> to vector<16x128xf32>
    %595 = arith.subf %593, %594 : vector<16x128xf32>
    %c0_492 = arith.constant 0 : index
    %c0_493 = arith.constant 0 : index
    %596 = vector.load %arg8[%c0_492, %c0_493] : memref<16x128xf32, #tpu.memory_space<vmem>>, vector<16x128xf32>
    tpu.vector_store %arg8[%c0_492, %c0_493], %595 {strides = array<i32>} : memref<16x128xf32, #tpu.memory_space<vmem>>, vector<16x128xf32>,
    return
  }
  func.func @transform_0(%arg0: i32) -> (i32, i32) {
    %c0_i32 = arith.constant 0 : i32
    %c0_i32_0 = arith.constant 0 : i32
    return %arg0, %c0_i32 : i32, i32
  }
  func.func @transform_1(%arg0: i32) -> (i32, i32, i32) {
    %c0_i32 = arith.constant 0 : i32
    %c0_i32_0 = arith.constant 0 : i32
    %c0_i32_1 = arith.constant 0 : i32
    %c0_i32_2 = arith.constant 0 : i32
    return %c0_i32, %c0_i32_0, %c0_i32_1 : i32, i32, i32
  }
  func.func @transform_2(%arg0: i32) -> (i32, i32, i32) {
    %c0_i32 = arith.constant 0 : i32
    %c0_i32_0 = arith.constant 0 : i32
    %c0_i32_1 = arith.constant 0 : i32
    %c0_i32_2 = arith.constant 0 : i32
    return %c0_i32, %c0_i32_0, %c0_i32_1 : i32, i32, i32
  }
  func.func @transform_3(%arg0: i32) -> (i32, i32, i32) {
    %c0_i32 = arith.constant 0 : i32
    %c0_i32_0 = arith.constant 0 : i32
    %c0_i32_1 = arith.constant 0 : i32
    %c0_i32_2 = arith.constant 0 : i32
    return %c0_i32, %c0_i32_0, %c0_i32_1 : i32, i32, i32
  }
  func.func @transform_4(%arg0: i32) -> (i32, i32) {
    %c0_i32 = arith.constant 0 : i32
    %c0_i32_0 = arith.constant 0 : i32
    %c0_i32_1 = arith.constant 0 : i32
    return %c0_i32, %c0_i32_0 : i32, i32
  }
  func.func @transform_5(%arg0: i32) -> (i32, i32) {
    %c0_i32 = arith.constant 0 : i32
    %c0_i32_0 = arith.constant 0 : i32
    %c0_i32_1 = arith.constant 0 : i32
    return %c0_i32, %c0_i32_0 : i32, i32
  }
  func.func @transform_6(%arg0: i32) -> (i32, i32) {
    %c0_i32 = arith.constant 0 : i32
    %c0_i32_0 = arith.constant 0 : i32
    %c0_i32_1 = arith.constant 0 : i32
    return %c0_i32, %c0_i32_0 : i32, i32
  }
  func.func @transform_7(%arg0: i32) -> (i32, i32) {
    %c0_i32 = arith.constant 0 : i32
    %c0_i32_0 = arith.constant 0 : i32
    return %arg0, %c0_i32 : i32, i32
  }
}

</mosaic_0001>

<bundles_post_ra>
// kernel: net_forward.1
= control target key start
LH: loop header
LB: loop body
LE: loop exit
PB: predicated region body
PF: predicated region fallthrough
CT: control target
= control target key end

     0   :  { %s9978_s24 = smov 0   ;;  %s16680_s0 = inlined_call_operand.vmem [shape: bf16[32,896], index: 0, kind: input, shape index: {}]   ;;  %s16681_s1 = inlined_call_operand.vmem [shape: bf16[2,144,192], index: 1, kind: input, shape index: {}]   ;;  %s16682_s2 = inlined_call_operand.vmem [shape: bf16[10,192,64], index: 2, kind: input, shape index: {}]   ;;  %s16683_s3 = inlined_call_operand.vmem [shape: bf16[4,64,128], index: 3, kind: input, shape index: {}]   ;;  %s16684_s4 = inlined_call_operand.vmem [shape: f32[1,192], index: 4, kind: input, shape index: {}]   ;;  %s16685_s5 = inlined_call_operand.vmem [shape: f32[1,64], index: 5, kind: input, shape index: {}]   ;;  %s16686_s6 = inlined_call_operand.vmem [shape: f32[1,128], index: 6, kind: input, shape index: {}]   ;;  %s16687_s7 = inlined_call_operand.vmem [shape: f32[32,128], index: 7, kind: output, shape index: {}]  }
   0x1 LB: > { %s8379_s25 = sadd.s32 4294967295, %s9910_s24   ;;  %p8383_p0 = scmp.ge.s32.totalorder %s9910_s24, 1  ;;  %s9910_s24 = sphi %s9978_s24, %s17_s24  }
   0x2   : > { %p239_p1 = scmp.lt.s32.totalorder %s9910_s24, 3 }
   0x4   : > { %p240_p2 = pnand %p8383_p0, %p239_p1 }
   0x6   : > { %243 = sbr.rel (%p240_p2) target bundleno = 3990 (0xf96), region = 48 }
   0xb   : > { %s8384_s26 = sshll.u32 %s8379_s25, 1  ;;  %v9989_v0 = vld [vmem:[%s16681_s1 + $0x74] ss:$8 sps:$4 sm:$0xff]   ;;  %v9994_v1 = vld [vmem:[%s16681_s1 + $0x104] ss:$8 sps:$4 sm:$0xff]   ;;  %vm710_vm0 = vcmask 130048  }
   0xc   : > { %p273_p3 = scmp.lt.s32.totalorder %s8384_s26, 3  ;;  %714 = vmatprep.subr.bf16.mxu0 %v9989_v0  ;;  %v10000_v2 = vld [vmem:[%s16681_s1 + $0x70] ss:$8 sps:$4 sm:$0xff]   ;;  %v10005_v3 = vld [vmem:[%s16681_s1 + $0x100] ss:$8 sps:$4 sm:$0xff]   ;;  %847 = vmatprep.subr.bf16.mxu1 %v9994_v1  ;;  %s9912_s11 = smov 100  }
   0xd   : > { %v10013_v4 = vld [vmem:[%s16681_s1 + $0x64] ss:$8 sps:$4 sm:$0xff]   ;;  %715 = vmatpush1.bf16.msra.mxu0 %v10000_v2  ;;  %848 = vmatpush1.bf16.msra.mxu1 %v10005_v3  ;;  %v10020_v5 = vld [vmem:[%s16681_s1 + $0xf4] ss:$8 sps:$4 sm:$0xff]   ;;  %v10025_v6 = vld [vmem:[%s16681_s1 + $0x60] ss:$8 sps:$4 sm:$0xff]  }
   0xe   : > { %s17312_s26 = smov (!%p273_p3, %s8384_s26), 3  ;;  %716 = vmatprep.subr.bf16.mxu0 %v10013_v4  ;;  %v10032_v7 = vld [vmem:[%s16681_s1 + $0xf0] ss:$8 sps:$4 sm:$0xff]   ;;  %849 = vmatprep.subr.bf16.mxu1 %v10020_v5  ;;  %v10038_v8 = vld [vmem:[%s16681_s1 + $0x54] ss:$8 sps:$4 sm:$0xff]   ;;  %s9913_s12 = smov 72  }
   0xf   : > { %s9128_s18 = smul.u32 28, %s17312_s26  ;;  %v10048_v9 = vld [vmem:[%s16681_s1 + $0xe4] ss:$8 sps:$4 sm:$0xff]   ;;  %v10053_v10 = vld [vmem:[%s16681_s1 + $0x50] ss:$8 sps:$4 sm:$0xff]   ;;  %s9914_s13 = smov 44  }
  0x10   : > { %v10058_v11 = vld [vmem:[%s16681_s1 + $0xe0] ss:$8 sps:$4 sm:$0xff]   ;;  %v10073_v14 = vld [vmem:[%s16681_s1 + $0x44] ss:$8 sps:$4 sm:$0xff]   ;;  %v10078_v15 = vld [vmem:[%s16681_s1 + $0xd4] ss:$8 sps:$4 sm:$0xff]  }
  0x11   : > { %s10043_s27 = scalar_lea.vmem %s16680_s0, %s9128_s18  ;;  %717 = vmatpush1.bf16.msra.mxu0 %v10025_v6  ;;  %850 = vmatpush1.bf16.msra.mxu1 %v10032_v7  ;;  %v10083_v16 = vld [vmem:[%s16681_s1 + $0x40] ss:$8 sps:$4 sm:$0xff]   ;;  %v10092_v17 = vld [vmem:[%s16681_s1 + $0xd0] ss:$8 sps:$4 sm:$0xff]   ;;  %v10099_v18 = vld [vmem:[%s16681_s1 + $0x34] ss:$8 sps:$4 sm:$0xff]  }
  0x12   : > { %v10061_v12 = vld [vmem:[%s10043_s27] ss:$28 sps:$4 sm:$0xff]   ;;  %718 = vmatprep.subr.bf16.mxu0 %v10038_v8  ;;  %851 = vmatprep.subr.bf16.mxu1 %v10048_v9  ;;  %v10104_v19 = vld [vmem:[%s16681_s1 + $0xc4] ss:$8 sps:$4 sm:$0xff]   ;;  %v10109_v20 = vld [vmem:[%s16681_s1 + $0x30] ss:$8 sps:$4 sm:$0xff]  }
  0x13   : > { %v9165_v13 = vld [vmem:[%s10043_s27 + $0x4] ss:$28 sps:$4 sm:$0xff]   ;;  %894 = vrot.lane.b32.xlu0 %v10061_v12, %s9912_s11  ;;  %1044 = vrot.lane.b32.xlu1 %v10061_v12, %s9913_s12  ;;  %v10128_v23 = vld [vmem:[%s16681_s1 + $0xb4] ss:$8 sps:$4 sm:$0xff]   ;;  %s9915_s22 = smov 16   ;;  %s9916_s23 = smov 116  }
  0x14   : > { %8666 = vmatprep.mubr.msk.bf16.mxu0 %vm710_vm0, %v9165_v13  ;;  %8685 = vmatprep.mubr.msk.bf16.mxu1 %vm710_vm0, %v9165_v13  ;;  %v10116_v21 = vld [vmem:[%s16681_s1 + $0xc0] ss:$8 sps:$4 sm:$0xff]   ;;  %v10123_v22 = vld [vmem:[%s16681_s1 + $0x24] ss:$8 sps:$4 sm:$0xff]   ;;  %v10141_v25 = vld [vmem:[%s16681_s1 + $0xb0] ss:$8 sps:$4 sm:$0xff]  }
  0x15   : > { %719 = vmatpush1.bf16.msra.mxu0 %v10053_v10  ;;  %852 = vmatpush1.bf16.msra.mxu1 %v10058_v11  ;;  %v10133_v24 = vld [vmem:[%s16681_s1 + $0x20] ss:$8 sps:$4 sm:$0xff]   ;;  %v10146_v26 = vld [vmem:[%s16681_s1 + $0x14] ss:$8 sps:$4 sm:$0xff]   ;;  %v10153_v27 = vld [vmem:[%s16681_s1 + $0xa4] ss:$8 sps:$4 sm:$0xff]  }
  0x16   : > { %720 = vmatprep.subr.bf16.mxu0 %v10073_v14  ;;  %853 = vmatprep.subr.bf16.mxu1 %v10078_v15  ;;  %v10158_v28 = vld [vmem:[%s16681_s1 + $0x10] ss:$8 sps:$4 sm:$0xff]   ;;  %v10166_v29 = vld [vmem:[%s16681_s1 + $0xa0] ss:$8 sps:$4 sm:$0xff]   ;;  %v10173_v30 = vld [vmem:[%s16681_s1 + $0x4] ss:$8 sps:$4 sm:$0xff]  }
  0x17   : > { %896 = vrot.lane.b32.xlu0 %v9165_v13, %s9912_s11  ;;  %1046 = vrot.lane.b32.xlu1 %v9165_v13, %s9913_s12  ;;  %v10178_v31 = vld [vmem:[%s16681_s1 + $0x94] ss:$8 sps:$4 sm:$0xff]   ;;  %v10183_v32 = vld [vmem:[%s16681_s1] ss:$8 sps:$4 sm:$0xff]   ;;  %s9917_s25 = smov 88   ;;  %s9918_s28 = smov 60  }
  0x18   : > { %v10188_v33 = vld [vmem:[%s16681_s1 + $0x90] ss:$8 sps:$4 sm:$0xff]   ;;  %v10193_v34 = vld [vmem:[%s16681_s1 + $0x84] ss:$8 sps:$4 sm:$0xff]   ;;  %v10198_v35 = vld [vmem:[%s16681_s1 + $0x114] ss:$8 sps:$4 sm:$0xff]  }
  0x19   : > { %721 = vmatpush1.bf16.msra.mxu0 %v10083_v16  ;;  %854 = vmatpush1.bf16.msra.mxu1 %v10092_v17  ;;  %v10201_v36 = vld [vmem:[%s10043_s27 + $0x8] ss:$28 sps:$4 sm:$0xff]   ;;  %v10218_v39 = vld [vmem:[%s16681_s1 + $0x110] ss:$8 sps:$4 sm:$0xff]   ;;  %vm898_vm1 = vcmask 818176   ;;  %s9919_s29 = smov 32  }
  0x1a   : > { %722 = vmatprep.subr.bf16.mxu0 %v10099_v18  ;;  %855 = vmatprep.subr.bf16.mxu1 %v10104_v19  ;;  %v10204_v37 = vld [vmem:[%s10043_s27 + $0x4] ss:$28 sps:$4 sm:$0xff]   ;;  %vm1048_vm2 = vcmask 588800   ;;  %v10315_v45 = vld [vmem:[%s16681_s1 + $0x74] ss:$8 sps:$4 sm:$0xff]   ;;  %s9920_s11 = smov 4  }
  0x1b   : > { %1146 = vrot.lane.b32.xlu1 %v9165_v13, %s9914_s13  ;;  %1144 = vrot.lane.b32.xlu0 %v10061_v12, %s9914_s13  ;;  %v10213_v38 = vld [vmem:[%s16681_s1 + $0x80] ss:$8 sps:$4 sm:$0xff]   ;;  %v10321_v46 = vld [vmem:[%s16681_s1 + $0x104] ss:$8 sps:$4 sm:$0xff]   ;;  %vm1148_vm3 = vcmask 359424   ;;  %s9921_s8 = smov 104  }
  0x1c   : > { %v10328_v49 = vld [vmem:[%s16681_s1 + $0x70] ss:$8 sps:$4 sm:$0xff]   ;;  %v10334_v50 = vld [vmem:[%s16681_s1 + $0x100] ss:$8 sps:$4 sm:$0xff]   ;;  %v10340_v51 = vld [vmem:[%s16681_s1 + $0x64] ss:$8 sps:$4 sm:$0xff]  }
  0x1d   : > { %723 = vmatpush1.bf16.msra.mxu0 %v10109_v20  ;;  %856 = vmatpush1.bf16.msra.mxu1 %v10116_v21  ;;  %v9223_v52 = vld [vmem:[%s10043_s27 + $0xc] ss:$28 sps:$4 sm:$0xff]   ;;  %v10357_v54 = vld [vmem:[%s16681_s1 + $0xf0] ss:$8 sps:$4 sm:$0xff]   ;;  %v10396_v58 = vld [vmem:[%s16681_s1 + $0xf4] ss:$8 sps:$4 sm:$0xff]  }
  0x1e   : > { %724 = vmatprep.subr.bf16.mxu0 %v10123_v22  ;;  %857 = vmatprep.subr.bf16.mxu1 %v10128_v23  ;;  %v10351_v53 = vld [vmem:[%s16681_s1 + $0x60] ss:$8 sps:$4 sm:$0xff]   ;;  %v10406_v59 = vld [vmem:[%s16681_s1 + $0x54] ss:$8 sps:$4 sm:$0xff]   ;;  %v10412_v60 = vld [vmem:[%s16681_s1 + $0xe4] ss:$8 sps:$4 sm:$0xff]  }
  0x1f   : > { %1283 = vrot.lane.b32.xlu1 %v9165_v13, %s9915_s22  ;;  %1281 = vrot.lane.b32.xlu0 %v10061_v12, %s9915_s22  ;;  %v10416_v61 = vld [vmem:[%s10043_s27 + $0x8] ss:$28 sps:$4 sm:$0xff]   ;;  %v10426_v63 = vld [vmem:[%s16681_s1 + $0x50] ss:$8 sps:$4 sm:$0xff]   ;;  %s9922_s15 = smov 76   ;;  %vm1395_vm4 = vcmask 949248  }
  0x20   : > { %v10419_v62 = vld [vmem:[%s10043_s27 + $0xc] ss:$28 sps:$4 sm:$0xff]   ;;  %s9923_s22 = smov 48   ;;  %vm1532_vm5 = vcmask 719872   ;;  %vm1029_vm6 = vcmask 1043456   ;;  %vm1030_vm7 = vcmask 523268  }
  0x21   : > { %725 = vmatpush1.bf16.msra.mxu0 %v10133_v24  ;;  %858 = vmatpush1.bf16.msra.mxu1 %v10141_v25  ;;  %vm10703_vm8 = vmor %vm1030_vm7, %vm1029_vm6  ;;  %vm1632_vm9 = vcmask 490496   ;;  %vm1769_vm10 = vcmask 261120   ;;  %vm1888_vm11 = vcmask 31744   ;;  %s9926_s30 = smov 92   ;;  %vm2026_vm12 = vcmask 850944   ;;  %s9928_s9 = smov 36  }
  0x22   : > { %726 = vmatprep.subr.bf16.mxu0 %v10146_v26  ;;  %859 = vmatprep.subr.bf16.mxu1 %v10153_v27  ;;  %vm2126_vm13 = vcmask 621568   ;;  %vm2263_vm14 = vcmask 392192   ;;  %s9930_s17 = smov 108   ;;  %vm2363_vm15 = vcmask 162816   ;;  %vm3094_vm6 = vcmask 883712  }
  0x23   : > { %1393 = vrot.lane.b32.xlu1 %v10201_v36, %s9916_s23  ;;  %1391 = vrot.lane.b32.xlu0 %v10204_v37, %s9916_s23  ;;  %s9924_s23 = smov 20   ;;  %vm3231_vm7 = vcmask 654336  }
  0x25   : > { %727 = vmatpush1.bf16.msra.mxu0 %v10158_v28  ;;  %860 = vmatpush1.bf16.msra.mxu1 %v10166_v29 }
  0x26   : > { %728 = vmatprep.subr.bf16.mxu0 %v10173_v30  ;;  %861 = vmatprep.subr.bf16.mxu1 %v10178_v31 }
  0x27   : > { %1530 = vrot.lane.b32.xlu1 %v10201_v36, %s9917_s25  ;;  %1528 = vrot.lane.b32.xlu0 %v10204_v37, %s9917_s25  ;;  %s9931_s25 = smov 80  }
  0x29   : > { %729 = vmatpush1.bf16.msra.mxu0 %v10183_v32  ;;  %862 = vmatpush1.bf16.msra.mxu1 %v10188_v33 }
  0x2a   : > { %744 = vmatprep.subr.bf16.mxu0 %v10193_v34  ;;  %877 = vmatprep.subr.bf16.mxu1 %v10198_v35 }
  0x2b   : > { %1630 = vrot.lane.b32.xlu1 %v10201_v36, %s9918_s28  ;;  %1628 = vrot.lane.b32.xlu0 %v10204_v37, %s9918_s28  ;;  %s9932_s28 = smov 52  }
  0x2d   : > { %745 = vmatpush2.bf16.msra.mxu0 %v10213_v38  ;;  %878 = vmatpush2.bf16.msra.mxu1 %v10218_v39 }
  0x2e   : > { %904 = vmatprep.subr.bf16.mxu0 %v9989_v0  ;;  %951 = vmatprep.subr.bf16.mxu1 %v9994_v1 }
  0x2f   : > { %1767 = vrot.lane.b32.xlu1 %v10201_v36, %s9919_s29  ;;  %1765 = vrot.lane.b32.xlu0 %v10204_v37, %s9919_s29  ;;  %s9925_s29 = smov 120  }
  0x30   : > { %747 = vmatmul.mubr.bf16.vlgmr.msra.gmra.mxu0 %v10061_v12  ;;  %880 = vmatmul.mubr.bf16.vlgmr.msra.gmra.mxu1 %v10061_v12 }
  0x31   : > { %905 = vmatpush1.bf16.msra.mxu0 %v10000_v2  ;;  %952 = vmatpush1.bf16.msra.mxu1 %v10005_v3 }
  0x32   : > { %906 = vmatprep.subr.bf16.mxu0 %v10013_v4  ;;  %953 = vmatprep.subr.bf16.mxu1 %v10020_v5 }
  0x33   : > { %1884 = vrot.lane.b32.xlu0 %v10201_v36, %s9920_s11  ;;  %1886 = vrot.lane.b32.xlu1 %v9223_v52, %s9920_s11  ;;  %v999_v36 = vlaneseq }
  0x35   : > { %907 = vmatpush1.bf16.msra.mxu0 %v10025_v6  ;;  %954 = vmatpush1.bf16.msra.mxu1 %v10032_v7 }
  0x36   : > { %908 = vmatprep.subr.bf16.mxu0 %v10038_v8  ;;  %955 = vmatprep.subr.bf16.mxu1 %v10048_v9 }
  0x37   : > { %1882 = vrot.lane.b32.xlu0 %v10204_v37, %s9920_s11  ;;  %2022 = vrot.lane.b32.xlu1 %v10416_v61, %s9921_s8 }
  0x39   : > { %909 = vmatpush1.bf16.msra.mxu0 %v10053_v10  ;;  %956 = vmatpush1.bf16.msra.mxu1 %v10058_v11 }
  0x3a   : > { %910 = vmatprep.subr.bf16.mxu0 %v10073_v14  ;;  %957 = vmatprep.subr.bf16.mxu1 %v10078_v15 }
  0x3b   : > { %2024 = vrot.lane.b32.xlu0 %v10419_v62, %s9921_s8  ;;  %2122 = vrot.lane.b32.xlu1 %v10416_v61, %s9922_s15  ;;  %s9927_s8 = smov 64  }
  0x3d   : > { %911 = vmatpush1.bf16.msra.mxu0 %v10083_v16  ;;  %958 = vmatpush1.bf16.msra.mxu1 %v10092_v17 }
  0x3e   : > { %912 = vmatprep.subr.bf16.mxu0 %v10099_v18  ;;  %959 = vmatprep.subr.bf16.mxu1 %v10104_v19 }
  0x3f   : > { %2124 = vrot.lane.b32.xlu0 %v10419_v62, %s9922_s15  ;;  %2259 = vrot.lane.b32.xlu1 %v10416_v61, %s9923_s22 }
  0x41   : > { %913 = vmatpush1.bf16.msra.mxu0 %v10109_v20  ;;  %960 = vmatpush1.bf16.msra.mxu1 %v10116_v21 }
  0x42   : > { %914 = vmatprep.subr.bf16.mxu0 %v10123_v22  ;;  %961 = vmatprep.subr.bf16.mxu1 %v10128_v23 }
  0x43   : > { %2261 = vrot.lane.b32.xlu0 %v10419_v62, %s9923_s22  ;;  %2359 = vrot.lane.b32.xlu1 %v10416_v61, %s9924_s23  ;;  %s9929_s22 = smov 8  }
  0x45   : > { %915 = vmatpush1.bf16.msra.mxu0 %v10133_v24  ;;  %962 = vmatpush1.bf16.msra.mxu1 %v10141_v25 }
  0x46   : > { %916 = vmatprep.subr.bf16.mxu0 %v10146_v26  ;;  %963 = vmatprep.subr.bf16.mxu1 %v10153_v27 }
  0x47   : > { %2361 = vrot.lane.b32.xlu0 %v10419_v62, %s9924_s23 }
  0x49   : > { %917 = vmatpush1.bf16.msra.mxu0 %v10158_v28  ;;  %964 = vmatpush1.bf16.msra.mxu1 %v10166_v29 }
  0x4a   : > { %918 = vmatprep.subr.bf16.mxu0 %v10173_v30  ;;  %965 = vmatprep.subr.bf16.mxu1 %v10178_v31 }
  0x4d   : > { %919 = vmatpush1.bf16.msra.mxu0 %v10183_v32  ;;  %966 = vmatpush1.bf16.msra.mxu1 %v10188_v33 }
  0x4e   : > { %934 = vmatprep.subr.bf16.mxu0 %v10193_v34  ;;  %981 = vmatprep.subr.bf16.mxu1 %v10198_v35 }
  0x51   : > { %935 = vmatpush2.bf16.msra.mxu0 %v10213_v38  ;;  %982 = vmatpush2.bf16.msra.mxu1 %v10218_v39 }
  0x52   : > { %1054 = vmatprep.subr.bf16.mxu0 %v9989_v0  ;;  %1097 = vmatprep.subr.bf16.mxu1 %v9994_v1  ;;  %v10432_v0 = vld [vmem:[%s16681_s1 + $0xe0] ss:$8 sps:$4 sm:$0xff]   ;;  %v10438_v1 = vld [vmem:[%s16681_s1 + $0x44] ss:$8 sps:$4 sm:$0xff]  }
  0x85   : > { %v895_v40 = vpop.permute.xlu0 %894  ;;  %v1045_v41 = vpop.permute.xlu1 %1044 }
  0x89   : > { %v897_v42 = vpop.permute.xlu0 %896  ;;  %v1047_v44 = vpop.permute.xlu1 %1046 }
  0x8a   : > { %8686 = vmatprep.mubr.msk.bf16.mxu0 %vm710_vm0, %v897_v42  ;;  %8687 = vmatprep.mubr.msk.bf16.mxu1 %vm710_vm0, %v897_v42  ;;  %v899_v43 = vsel %vm898_vm1, %v895_v40, %v897_v42  ;;  %v1049_v47 = vsel %vm1048_vm2, %v1045_v41, %v1047_v44  ;;  %vm2500_vm1 = vcmask 982016   ;;  %vm2600_vm2 = vcmask 752640  }
  0x8b   : > { %937 = vmatmul.mubr.bf16.vlgmr.msra.gmra.mxu0 %v899_v43  ;;  %984 = vmatmul.mubr.bf16.vlgmr.msra.gmra.mxu1 %v899_v43 }
  0x8c   : > { %1055 = vmatpush1.bf16.msra.mxu0 %v10000_v2  ;;  %1098 = vmatpush1.bf16.msra.mxu1 %v10005_v3  ;;  %v10444_v2 = vld [vmem:[%s16681_s1 + $0xd4] ss:$8 sps:$4 sm:$0xff]   ;;  %v10450_v3 = vld [vmem:[%s16681_s1 + $0x40] ss:$8 sps:$4 sm:$0xff]  }
  0x8d   : > { %1056 = vmatprep.subr.bf16.mxu0 %v10013_v4  ;;  %1099 = vmatprep.subr.bf16.mxu1 %v10020_v5  ;;  %v1147_v48 = vpop.permute.xlu1 %1146  ;;  %v1145_v55 = vpop.permute.xlu0 %1144  ;;  %v10456_v4 = vld [vmem:[%s16681_s1 + $0xd0] ss:$8 sps:$4 sm:$0xff]  }
  0x8e   : > { %8692 = vmatprep.mubr.msk.bf16.mxu0 %vm710_vm0, %v1047_v44  ;;  %8693 = vmatprep.mubr.msk.bf16.mxu1 %vm710_vm0, %v1047_v44  ;;  %v1149_v56 = vsel %vm1148_vm3, %v1145_v55, %v1147_v48  ;;  %vm2737_vm3 = vcmask 523264  }
  0x90   : > { %1057 = vmatpush1.bf16.msra.mxu0 %v10025_v6  ;;  %1100 = vmatpush1.bf16.msra.mxu1 %v10032_v7  ;;  %v10468_v6 = vld [vmem:[%s16681_s1 + $0xc4] ss:$8 sps:$4 sm:$0xff]   ;;  %v10474_v7 = vld [vmem:[%s16681_s1 + $0x30] ss:$8 sps:$4 sm:$0xff]  }
  0x91   : > { %1058 = vmatprep.subr.bf16.mxu0 %v10038_v8  ;;  %1101 = vmatprep.subr.bf16.mxu1 %v10048_v9  ;;  %v1284_v57 = vpop.permute.xlu1 %1283  ;;  %v1282_v12 = vpop.permute.xlu0 %1281 }
  0x92   : > { %v1286_v13 = vsel %vm710_vm0, %v1282_v12, %v1284_v57 }
  0x94   : > { %1059 = vmatpush1.bf16.msra.mxu0 %v10053_v10  ;;  %1102 = vmatpush1.bf16.msra.mxu1 %v10058_v11 }
  0x95   : > { %1060 = vmatprep.subr.bf16.mxu0 %v10073_v14  ;;  %1103 = vmatprep.subr.bf16.mxu1 %v10078_v15 }
  0x98   : > { %1061 = vmatpush1.bf16.msra.mxu0 %v10083_v16  ;;  %1104 = vmatpush1.bf16.msra.mxu1 %v10092_v17 }
  0x99   : > { %1062 = vmatprep.subr.bf16.mxu0 %v10099_v18  ;;  %1105 = vmatprep.subr.bf16.mxu1 %v10104_v19 }
  0x9c   : > { %1063 = vmatpush1.bf16.msra.mxu0 %v10109_v20  ;;  %1106 = vmatpush1.bf16.msra.mxu1 %v10116_v21 }
  0x9d   : > { %1064 = vmatprep.subr.bf16.mxu0 %v10123_v22  ;;  %1107 = vmatprep.subr.bf16.mxu1 %v10128_v23 }
  0xa0   : > { %1065 = vmatpush1.bf16.msra.mxu0 %v10133_v24  ;;  %1108 = vmatpush1.bf16.msra.mxu1 %v10141_v25 }
  0xa1   : > { %1066 = vmatprep.subr.bf16.mxu0 %v10146_v26  ;;  %1109 = vmatprep.subr.bf16.mxu1 %v10153_v27 }
  0xa4   : > { %1067 = vmatpush1.bf16.msra.mxu0 %v10158_v28  ;;  %1110 = vmatpush1.bf16.msra.mxu1 %v10166_v29 }
  0xa5   : > { %1068 = vmatprep.subr.bf16.mxu0 %v10173_v30  ;;  %1111 = vmatprep.subr.bf16.mxu1 %v10178_v31 }
  0xa8   : > { %1069 = vmatpush1.bf16.msra.mxu0 %v10183_v32  ;;  %1112 = vmatpush1.bf16.msra.mxu1 %v10188_v33 }
  0xa9   : > { %1084 = vmatprep.subr.bf16.mxu0 %v10193_v34  ;;  %1127 = vmatprep.subr.bf16.mxu1 %v10198_v35 }
  0xac   : > { %1085 = vmatpush2.bf16.msra.mxu0 %v10213_v38  ;;  %1128 = vmatpush2.bf16.msra.mxu1 %v10218_v39 }
  0xad   : > { %1154 = vmatprep.subr.bf16.mxu0 %v10315_v45  ;;  %1201 = vmatprep.subr.bf16.mxu1 %v10321_v46 }
  0xaf   : > { %1087 = vmatmul.mubr.bf16.vlgmr.msra.gmra.mxu0 %v1049_v47  ;;  %1130 = vmatmul.mubr.bf16.vlgmr.msra.gmra.mxu1 %v1049_v47  ;;  %v607_v47 = vld [vmem:[%s16684_s4] sm:$0x3] }
  0xb0   : > { %1155 = vmatpush1.bf16.msra.mxu0 %v10328_v49  ;;  %1202 = vmatpush1.bf16.msra.mxu1 %v10334_v50 }
  0xb1   : > { %1156 = vmatprep.subr.bf16.mxu0 %v10340_v51  ;;  %1203 = vmatprep.subr.bf16.mxu1 %v10020_v5  ;;  %v10462_v5 = vld [vmem:[%s16681_s1 + $0x34] ss:$8 sps:$4 sm:$0xff]  }
  0xb2   : > { %8694 = vmatprep.mubr.msk.bf16.mxu0 %vm710_vm0, %v1147_v48  ;;  %8695 = vmatprep.mubr.msk.bf16.mxu1 %vm710_vm0, %v1147_v48 }
  0xb4   : > { %1157 = vmatpush1.bf16.msra.mxu0 %v10351_v53  ;;  %1204 = vmatpush1.bf16.msra.mxu1 %v10357_v54 }
  0xb5   : > { %1158 = vmatprep.subr.bf16.mxu0 %v10038_v8  ;;  %1205 = vmatprep.subr.bf16.mxu1 %v10048_v9  ;;  %v10480_v8 = vld [vmem:[%s16681_s1 + $0xc0] ss:$8 sps:$4 sm:$0xff]   ;;  %v10486_v9 = vld [vmem:[%s16681_s1 + $0x24] ss:$8 sps:$4 sm:$0xff]  }
  0xb8   : > { %1159 = vmatpush1.bf16.msra.mxu0 %v10053_v10  ;;  %1206 = vmatpush1.bf16.msra.mxu1 %v10058_v11  ;;  %v10492_v10 = vld [vmem:[%s16681_s1 + $0xb4] ss:$8 sps:$4 sm:$0xff]   ;;  %v10498_v11 = vld [vmem:[%s16681_s1 + $0x20] ss:$8 sps:$4 sm:$0xff]  }
  0xb9   : > { %1160 = vmatprep.subr.bf16.mxu0 %v10073_v14  ;;  %1207 = vmatprep.subr.bf16.mxu1 %v10078_v15  ;;  %v1394_v14 = vpop.permute.xlu1 %1393  ;;  %v10545_v15 = vld [vmem:[%s16681_s1 + $0xb0] ss:$8 sps:$4 sm:$0xff]  }
  0xbc   : > { %1161 = vmatpush1.bf16.msra.mxu0 %v10083_v16  ;;  %1208 = vmatpush1.bf16.msra.mxu1 %v10092_v17  ;;  %v10551_v16 = vld [vmem:[%s16681_s1 + $0x14] ss:$8 sps:$4 sm:$0xff]   ;;  %v10557_v17 = vld [vmem:[%s16681_s1 + $0xa4] ss:$8 sps:$4 sm:$0xff]  }
  0xbd   : > { %1162 = vmatprep.subr.bf16.mxu0 %v10099_v18  ;;  %1209 = vmatprep.subr.bf16.mxu1 %v10104_v19  ;;  %v10563_v18 = vld [vmem:[%s16681_s1 + $0x10] ss:$8 sps:$4 sm:$0xff]   ;;  %v10569_v19 = vld [vmem:[%s16681_s1 + $0xa0] ss:$8 sps:$4 sm:$0xff]  }
  0xc0   : > { %1163 = vmatpush1.bf16.msra.mxu0 %v10109_v20  ;;  %1210 = vmatpush1.bf16.msra.mxu1 %v10116_v21  ;;  %v10575_v20 = vld [vmem:[%s16681_s1 + $0x4] ss:$8 sps:$4 sm:$0xff]   ;;  %v10581_v21 = vld [vmem:[%s16681_s1 + $0x94] ss:$8 sps:$4 sm:$0xff]  }
  0xc1   : > { %1164 = vmatprep.subr.bf16.mxu0 %v10123_v22  ;;  %1211 = vmatprep.subr.bf16.mxu1 %v10128_v23  ;;  %v10587_v22 = vld [vmem:[%s16681_s1] ss:$8 sps:$4 sm:$0xff]   ;;  %v10593_v23 = vld [vmem:[%s16681_s1 + $0x90] ss:$8 sps:$4 sm:$0xff]  }
  0xc4   : > { %1165 = vmatpush1.bf16.msra.mxu0 %v10133_v24  ;;  %1212 = vmatpush1.bf16.msra.mxu1 %v10141_v25  ;;  %v10599_v24 = vld [vmem:[%s16681_s1 + $0x84] ss:$8 sps:$4 sm:$0xff]  }
  0xc5   : > { %1166 = vmatprep.subr.bf16.mxu0 %v10146_v26  ;;  %1213 = vmatprep.subr.bf16.mxu1 %v10153_v27 }
  0xc8   : > { %1167 = vmatpush1.bf16.msra.mxu0 %v10158_v28  ;;  %1214 = vmatpush1.bf16.msra.mxu1 %v10166_v29 }
  0xc9   : > { %1168 = vmatprep.subr.bf16.mxu0 %v10173_v30  ;;  %1215 = vmatprep.subr.bf16.mxu1 %v10178_v31 }
  0xcc   : > { %1169 = vmatpush1.bf16.msra.mxu0 %v10183_v32  ;;  %1216 = vmatpush1.bf16.msra.mxu1 %v10188_v33 }
  0xcd   : > { %1184 = vmatprep.subr.bf16.mxu0 %v10193_v34  ;;  %1231 = vmatprep.subr.bf16.mxu1 %v10198_v35 }
  0xd0   : > { %1185 = vmatpush2.bf16.msra.mxu0 %v10213_v38  ;;  %1232 = vmatpush2.bf16.msra.mxu1 %v10218_v39 }
  0xd1   : > { %1291 = vmatprep.subr.bf16.mxu0 %v10315_v45  ;;  %1334 = vmatprep.subr.bf16.mxu1 %v10321_v46 }
  0xd3   : > { %1187 = vmatmul.mubr.bf16.vlgmr.msra.gmra.mxu0 %v1149_v56  ;;  %1234 = vmatmul.mubr.bf16.vlgmr.msra.gmra.mxu1 %v1149_v56 }
  0xd4   : > { %1292 = vmatpush1.bf16.msra.mxu0 %v10328_v49  ;;  %1335 = vmatpush1.bf16.msra.mxu1 %v10334_v50 }
  0xd5   : > { %1293 = vmatprep.subr.bf16.mxu0 %v10340_v51  ;;  %1336 = vmatprep.subr.bf16.mxu1 %v10396_v58 }
  0xd6   : > { %8700 = vmatprep.mubr.msk.bf16.mxu0 %vm710_vm0, %v1284_v57  ;;  %8701 = vmatprep.mubr.msk.bf16.mxu1 %vm710_vm0, %v1284_v57 }
  0xd8   : > { %1294 = vmatpush1.bf16.msra.mxu0 %v10351_v53  ;;  %1337 = vmatpush1.bf16.msra.mxu1 %v10357_v54 }
  0xd9   : > { %1295 = vmatprep.subr.bf16.mxu0 %v10406_v59  ;;  %1338 = vmatprep.subr.bf16.mxu1 %v10412_v60 }
  0xdc   : > { %1296 = vmatpush1.bf16.msra.mxu0 %v10426_v63  ;;  %1339 = vmatpush1.bf16.msra.mxu1 %v10432_v0 }
  0xdd   : > { %1297 = vmatprep.subr.bf16.mxu0 %v10438_v1  ;;  %1340 = vmatprep.subr.bf16.mxu1 %v10444_v2 }
  0xe0   : > { %1298 = vmatpush1.bf16.msra.mxu0 %v10450_v3  ;;  %1341 = vmatpush1.bf16.msra.mxu1 %v10456_v4 }
  0xe1   : > { %1299 = vmatprep.subr.bf16.mxu0 %v10462_v5  ;;  %1342 = vmatprep.subr.bf16.mxu1 %v10468_v6 }
  0xe4   : > { %1300 = vmatpush1.bf16.msra.mxu0 %v10474_v7  ;;  %1343 = vmatpush1.bf16.msra.mxu1 %v10480_v8 }
  0xe5   : > { %1301 = vmatprep.subr.bf16.mxu0 %v10486_v9  ;;  %1344 = vmatprep.subr.bf16.mxu1 %v10492_v10 }
  0xe8   : > { %1302 = vmatpush1.bf16.msra.mxu0 %v10498_v11  ;;  %1345 = vmatpush1.bf16.msra.mxu1 %v10141_v25  ;;  %v10605_v25 = vld [vmem:[%s16681_s1 + $0x114] ss:$8 sps:$4 sm:$0xff]  }
  0xe9   : > { %1303 = vmatprep.subr.bf16.mxu0 %v10146_v26  ;;  %1346 = vmatprep.subr.bf16.mxu1 %v10153_v27  ;;  %v1392_v26 = vpop.permute.xlu0 %1391  ;;  %v10611_v27 = vld [vmem:[%s16681_s1 + $0x80] ss:$8 sps:$4 sm:$0xff]  }
  0xec   : > { %1304 = vmatpush1.bf16.msra.mxu0 %v10158_v28  ;;  %1347 = vmatpush1.bf16.msra.mxu1 %v10166_v29  ;;  %v10617_v28 = vld [vmem:[%s16681_s1 + $0x110] ss:$8 sps:$4 sm:$0xff]   ;;  %v1396_v29 = vsel %vm1395_vm4, %v1392_v26, %v1394_v14  ;;  %vm2837_vm4 = vcmask 293888  }
  0xed   : > { %1305 = vmatprep.subr.bf16.mxu0 %v10173_v30  ;;  %1348 = vmatprep.subr.bf16.mxu1 %v10178_v31  ;;  %v1531_v30 = vpop.permute.xlu1 %1530  ;;  %v1529_v31 = vpop.permute.xlu0 %1528 }
  0xf0   : > { %1306 = vmatpush1.bf16.msra.mxu0 %v10183_v32  ;;  %1349 = vmatpush1.bf16.msra.mxu1 %v10188_v33  ;;  %v1533_v32 = vsel %vm1532_vm5, %v1529_v31, %v1531_v30  ;;  %v748_v33 = vpop.f32.mrf.mxu0  ;;  %vm2983_vm5 = vcmask 64512  }
  0xf1   : > { %1321 = vmatprep.subr.bf16.mxu0 %v10193_v34  ;;  %1364 = vmatprep.subr.bf16.mxu1 %v10198_v35  ;;  %v881_v34 = vpop.f32.mrf.mxu1  ;;  %v10662_v35 = vpop.permute.xlu1 %1630 }
  0xf2   : > { %v750_v37 = vpop.f32.mrf.mxu0  ;;  %v890_v48 = vmax.f32 %v748_v33, %v881_v34 }
  0xf4   : > { %1322 = vmatpush2.bf16.msra.mxu0 %v10213_v38  ;;  %1365 = vmatpush2.bf16.msra.mxu1 %v10218_v39  ;;  %v883_v38 = vpop.f32.mrf.mxu1  ;;  %v1000_v39 = vshrl.u32 %v999_v36, 7  ;;  %v752_v40 = vpop.f32.mrf.mxu0 }
  0xf5   : > { %1401 = vmatprep.subr.bf16.mxu0 %v10315_v45  ;;  %1448 = vmatprep.subr.bf16.mxu1 %v10321_v46  ;;  %v891_v57 = vmax.f32 %v750_v37, %v883_v38 }
  0xf6   : > { %v885_v41 = vpop.f32.mrf.mxu1  ;;  %v1001_v42 = vsub.s32 0, %v1000_v39  ;;  %v754_v43 = vpop.f32.mrf.mxu0  ;;  %v1005_v52 = vsub.s32 1, %v1000_v39 }
  0xf7   : > { %1324 = vmatmul.mubr.bf16.vlgmr.msra.gmra.mxu0 %v1286_v13  ;;  %1367 = vmatmul.mubr.bf16.vlgmr.msra.gmra.mxu1 %v1286_v13 }
  0xf8   : > { %1402 = vmatpush1.bf16.msra.mxu0 %v10328_v49  ;;  %1449 = vmatpush1.bf16.msra.mxu1 %v10334_v50  ;;  %v887_v44 = vpop.f32.mrf.mxu1  ;;  %v10685_v62 = vrot.slane %v607_v47, %v1001_v42 }
  0xf9   : > { %1403 = vmatprep.subr.bf16.mxu0 %v10340_v51  ;;  %1450 = vmatprep.subr.bf16.mxu1 %v10396_v58  ;;  %v893_v31 = vmax.f32 %v754_v43, %v887_v44 }
  0xfa   : > { %8704 = vmatprep.mubr.msk.bf16.mxu0 %vm710_vm0, %v1394_v14  ;;  %8705 = vmatprep.mubr.msk.bf16.mxu1 %vm710_vm0, %v1394_v14  ;;  %v892_v14 = vmax.f32 %v752_v40, %v885_v41 }
  0xfc   : > { %1404 = vmatpush1.bf16.msra.mxu0 %v10351_v53  ;;  %1451 = vmatpush1.bf16.msra.mxu1 %v10357_v54 }
  0xfd   : > { %1405 = vmatprep.subr.bf16.mxu0 %v10406_v59  ;;  %1452 = vmatprep.subr.bf16.mxu1 %v10412_v60 }
 0x100   : > { %1406 = vmatpush1.bf16.msra.mxu0 %v10426_v63  ;;  %1453 = vmatpush1.bf16.msra.mxu1 %v10432_v0 }
 0x101   : > { %1407 = vmatprep.subr.bf16.mxu0 %v10438_v1  ;;  %1454 = vmatprep.subr.bf16.mxu1 %v10444_v2 }
 0x104   : > { %1408 = vmatpush1.bf16.msra.mxu0 %v10450_v3  ;;  %1455 = vmatpush1.bf16.msra.mxu1 %v10456_v4 }
 0x105   : > { %1409 = vmatprep.subr.bf16.mxu0 %v10462_v5  ;;  %1456 = vmatprep.subr.bf16.mxu1 %v10468_v6 }
 0x108   : > { %1410 = vmatpush1.bf16.msra.mxu0 %v10474_v7  ;;  %1457 = vmatpush1.bf16.msra.mxu1 %v10480_v8 }
 0x109   : > { %1411 = vmatprep.subr.bf16.mxu0 %v10486_v9  ;;  %1458 = vmatprep.subr.bf16.mxu1 %v10492_v10 }
 0x10c   : > { %1412 = vmatpush1.bf16.msra.mxu0 %v10498_v11  ;;  %1459 = vmatpush1.bf16.msra.mxu1 %v10545_v15 }
 0x10d   : > { %1413 = vmatprep.subr.bf16.mxu0 %v10551_v16  ;;  %1460 = vmatprep.subr.bf16.mxu1 %v10557_v17 }
 0x110   : > { %1414 = vmatpush1.bf16.msra.mxu0 %v10563_v18  ;;  %1461 = vmatpush1.bf16.msra.mxu1 %v10569_v19 }
 0x111   : > { %1415 = vmatprep.subr.bf16.mxu0 %v10575_v20  ;;  %1462 = vmatprep.subr.bf16.mxu1 %v10581_v21 }
 0x114   : > { %1416 = vmatpush1.bf16.msra.mxu0 %v10587_v22  ;;  %1463 = vmatpush1.bf16.msra.mxu1 %v10593_v23 }
 0x115   : > { %1431 = vmatprep.subr.bf16.mxu0 %v10599_v24  ;;  %1478 = vmatprep.subr.bf16.mxu1 %v10605_v25 }
 0x118   : > { %1432 = vmatpush2.bf16.msra.mxu0 %v10611_v27  ;;  %1479 = vmatpush2.bf16.msra.mxu1 %v10617_v28 }
 0x119   : > { %1538 = vmatprep.subr.bf16.mxu0 %v10315_v45  ;;  %1581 = vmatprep.subr.bf16.mxu1 %v10321_v46 }
 0x11b   : > { %1434 = vmatmul.mubr.bf16.vlgmr.msra.gmra.mxu0 %v1396_v29  ;;  %1481 = vmatmul.mubr.bf16.vlgmr.msra.gmra.mxu1 %v1396_v29 }
 0x11c   : > { %1539 = vmatpush1.bf16.msra.mxu0 %v10328_v49  ;;  %1582 = vmatpush1.bf16.msra.mxu1 %v10334_v50 }
 0x11d   : > { %1540 = vmatprep.subr.bf16.mxu0 %v10340_v51  ;;  %1583 = vmatprep.subr.bf16.mxu1 %v10396_v58 }
 0x11e   : > { %8710 = vmatprep.mubr.msk.bf16.mxu0 %vm710_vm0, %v1531_v30  ;;  %8711 = vmatprep.mubr.msk.bf16.mxu1 %vm710_vm0, %v1531_v30  ;;  %v10691_v30 = vrot.slane %v607_v47, %v1005_v52  ;;  %v12620_v52 = vld [vmem:[%s16682_s2 + $0x308] sm:$0xff]  }
 0x120   : > { %1541 = vmatpush1.bf16.msra.mxu0 %v10351_v53  ;;  %1584 = vmatpush1.bf16.msra.mxu1 %v10357_v54 }
 0x121   : > { %1542 = vmatprep.subr.bf16.mxu0 %v10406_v59  ;;  %1585 = vmatprep.subr.bf16.mxu1 %v10412_v60 }
 0x124   : > { %1543 = vmatpush1.bf16.msra.mxu0 %v10426_v63  ;;  %1586 = vmatpush1.bf16.msra.mxu1 %v10432_v0 }
 0x125   : > { %1544 = vmatprep.subr.bf16.mxu0 %v10438_v1  ;;  %1587 = vmatprep.subr.bf16.mxu1 %v10444_v2 }
 0x128   : > { %1545 = vmatpush1.bf16.msra.mxu0 %v10450_v3  ;;  %1588 = vmatpush1.bf16.msra.mxu1 %v10456_v4 }
 0x129   : > { %1546 = vmatprep.subr.bf16.mxu0 %v10462_v5  ;;  %1589 = vmatprep.subr.bf16.mxu1 %v10468_v6 }
 0x12c   : > { %1547 = vmatpush1.bf16.msra.mxu0 %v10474_v7  ;;  %1590 = vmatpush1.bf16.msra.mxu1 %v10480_v8 }
 0x12d   : > { %1548 = vmatprep.subr.bf16.mxu0 %v10486_v9  ;;  %1591 = vmatprep.subr.bf16.mxu1 %v10492_v10 }
 0x130   : > { %1549 = vmatpush1.bf16.msra.mxu0 %v10498_v11  ;;  %1592 = vmatpush1.bf16.msra.mxu1 %v10545_v15 }
 0x131   : > { %1550 = vmatprep.subr.bf16.mxu0 %v10551_v16  ;;  %1593 = vmatprep.subr.bf16.mxu1 %v10557_v17 }
 0x134   : > { %1551 = vmatpush1.bf16.msra.mxu0 %v10563_v18  ;;  %1594 = vmatpush1.bf16.msra.mxu1 %v10569_v19 }
 0x135   : > { %1552 = vmatprep.subr.bf16.mxu0 %v10575_v20  ;;  %1595 = vmatprep.subr.bf16.mxu1 %v10581_v21 }
 0x138   : > { %1553 = vmatpush1.bf16.msra.mxu0 %v10587_v22  ;;  %1596 = vmatpush1.bf16.msra.mxu1 %v10593_v23 }
 0x139   : > { %1568 = vmatprep.subr.bf16.mxu0 %v10599_v24  ;;  %1611 = vmatprep.subr.bf16.mxu1 %v10605_v25 }
 0x13c   : > { %1569 = vmatpush2.bf16.msra.mxu0 %v10611_v27  ;;  %1612 = vmatpush2.bf16.msra.mxu1 %v10617_v28 }
 0x13d   : > { %1638 = vmatprep.subr.bf16.mxu0 %v10315_v45  ;;  %1685 = vmatprep.subr.bf16.mxu1 %v10321_v46 }
 0x13f   : > { %1571 = vmatmul.mubr.bf16.vlgmr.msra.gmra.mxu0 %v1533_v32  ;;  %1614 = vmatmul.mubr.bf16.vlgmr.msra.gmra.mxu1 %v1533_v32 }
 0x140   : > { %1639 = vmatpush1.bf16.msra.mxu0 %v10328_v49  ;;  %1686 = vmatpush1.bf16.msra.mxu1 %v10334_v50 }
 0x141   : > { %1640 = vmatprep.subr.bf16.mxu0 %v10340_v51  ;;  %1687 = vmatprep.subr.bf16.mxu1 %v10396_v58 }
 0x142   : > { %8712 = vmatprep.mubr.msk.bf16.mxu0 %vm710_vm0, %v10662_v35  ;;  %8713 = vmatprep.mubr.msk.bf16.mxu1 %vm710_vm0, %v10662_v35 }
 0x144   : > { %1641 = vmatpush1.bf16.msra.mxu0 %v10351_v53  ;;  %1688 = vmatpush1.bf16.msra.mxu1 %v10357_v54 }
 0x145   : > { %1642 = vmatprep.subr.bf16.mxu0 %v10406_v59  ;;  %1689 = vmatprep.subr.bf16.mxu1 %v10412_v60 }
 0x148   : > { %1643 = vmatpush1.bf16.msra.mxu0 %v10426_v63  ;;  %1690 = vmatpush1.bf16.msra.mxu1 %v10432_v0 }
 0x149   : > { %1644 = vmatprep.subr.bf16.mxu0 %v10438_v1  ;;  %1691 = vmatprep.subr.bf16.mxu1 %v10444_v2 }
 0x14b   : > { %v938_v55 = vpop.f32.mrf.mxu0  ;;  %v985_v56 = vpop.f32.mrf.mxu1 }
 0x14c   : > { %v947_v61 = vmax.f32 %v890_v48, %v938_v55  ;;  %1645 = vmatpush1.bf16.msra.mxu0 %v10450_v3  ;;  %1692 = vmatpush1.bf16.msra.mxu1 %v10456_v4 }
 0x14d   : > { %v940_v12 = vpop.f32.mrf.mxu0  ;;  %v987_v13 = vpop.f32.mrf.mxu1  ;;  %1646 = vmatprep.subr.bf16.mxu0 %v10462_v5  ;;  %1693 = vmatprep.subr.bf16.mxu1 %v10468_v6 }
 0x14e   : > { %v994_v26 = vmax.f32 %v947_v61, %v985_v56  ;;  %v948_v29 = vmax.f32 %v891_v57, %v940_v12 }
 0x14f   : > { %v942_v32 = vpop.f32.mrf.mxu0  ;;  %v989_v33 = vpop.f32.mrf.mxu1 }
 0x150   : > { %v1009_v34 = vadd.f32 %v10685_v62, %v994_v26  ;;  %v995_v36 = vmax.f32 %v948_v29, %v987_v13  ;;  %v949_v37 = vmax.f32 %v892_v14, %v942_v32  ;;  %1647 = vmatpush1.bf16.msra.mxu0 %v10474_v7  ;;  %1694 = vmatpush1.bf16.msra.mxu1 %v10480_v8  ;;  %v1629_v13 = vpop.permute.xlu0 %1628  ;;  %v1768_v26 = vpop.permute.xlu1 %1767  ;;  %v10741_v29 = vld [vmem:[%s10043_s27 + $0x10] ss:$28 sps:$4 sm:$0xff]  }
 0x151   : > { %v944_v38 = vpop.f32.mrf.mxu0  ;;  %1648 = vmatprep.subr.bf16.mxu0 %v10486_v9  ;;  %1695 = vmatprep.subr.bf16.mxu1 %v10492_v10  ;;  %v991_v42 = vpop.f32.mrf.mxu1  ;;  %v1633_v14 = vsel %vm1632_vm9, %v1629_v13, %v10662_v35  ;;  %v10738_v35 = vld [vmem:[%s10043_s27 + $0xc] ss:$28 sps:$4 sm:$0xff]   ;;  %vm3331_vm9 = vcmask 424960  }
 0x152   : > { %v1010_v39 = vadd.f32 %v10691_v30, %v995_v36  ;;  %v996_v40 = vmax.f32 %v949_v37, %v989_v33  ;;  %v950_v41 = vmax.f32 %v893_v31, %v944_v38  ;;  %v1013_v43 = vmax.f32 %v1009_v34, 0.0  ;;  %2496 = vrot.lane.b32.xlu1 %v10738_v35, %s9925_s29  ;;  %2498 = vrot.lane.b32.xlu0 %v10741_v29, %s9925_s29  ;;  %s9933_s29 = smov 24  }
 0x154   : > { %v1014_v44 = vmax.f32 %v1010_v39, 0.0  ;;  %v1011_v47 = vadd.f32 %v10685_v62, %v996_v40  ;;  %v997_v48 = vmax.f32 %v950_v41, %v991_v42  ;;  %1649 = vmatpush1.bf16.msra.mxu0 %v10498_v11  ;;  %1696 = vmatpush1.bf16.msra.mxu1 %v10545_v15  ;;  %v1766_v31 = vpop.permute.xlu0 %1765  ;;  %v1887_v33 = vpop.permute.xlu1 %1886 }
 0x155   : > { %1650 = vmatprep.subr.bf16.mxu0 %v10551_v16  ;;  %1697 = vmatprep.subr.bf16.mxu1 %v10557_v17  ;;  %v1770_v32 = vsel %vm1769_vm10, %v1766_v31, %v1768_v26  ;;  %vm3468_vm10 = vcmask 195584  }
 0x156   : > { %v9036_v55 = vpack.c.bf16 %v1014_v44, %v1013_v43  ;;  %v1012_v56 = vadd.f32 %v10691_v30, %v997_v48  ;;  %v1015_v57 = vmax.f32 %v1011_v47, 0.0  ;;  %2596 = vrot.lane.b32.xlu1 %v10738_v35, %s9926_s30  ;;  %2598 = vrot.lane.b32.xlu0 %v10741_v29, %s9926_s30  ;;  %s9934_s30 = smov 124  }
 0x158   : > { %1032 = vst.msk [vmem:[#allocation2] sm:$0xff] %vm10703_vm8, %v9036_v55  ;;  %v1016_v61 = vmax.f32 %v1012_v56, 0.0  ;;  %1651 = vmatpush1.bf16.msra.mxu0 %v10563_v18  ;;  %1698 = vmatpush1.bf16.msra.mxu1 %v10569_v19  ;;  %v10773_v37 = vpop.permute.xlu0 %1884 }
 0x159   : > { %1652 = vmatprep.subr.bf16.mxu0 %v10575_v20  ;;  %1699 = vmatprep.subr.bf16.mxu1 %v10581_v21  ;;  %v1890_v38 = vsel %vm1888_vm11, %v10773_v37, %v1887_v33 }
 0x15a   : > { %v9037_v12 = vpack.c.bf16 %v1016_v61, %v1015_v57  ;;  %2733 = vrot.lane.b32.xlu1 %v10738_v35, %s9927_s8  ;;  %2735 = vrot.lane.b32.xlu0 %v10741_v29, %s9927_s8 }
 0x15c   : > { %1033 = vst.msk [vmem:[#allocation2 + $0x8] sm:$0xff] %vm10703_vm8, %v9037_v12  ;;  %1653 = vmatpush1.bf16.msra.mxu0 %v10587_v22  ;;  %1700 = vmatpush1.bf16.msra.mxu1 %v10593_v23 }
 0x15d   : > { %1668 = vmatprep.subr.bf16.mxu0 %v10599_v24  ;;  %1715 = vmatprep.subr.bf16.mxu1 %v10605_v25 }
 0x15e   : > { %2833 = vrot.lane.b32.xlu1 %v10738_v35, %s9928_s9  ;;  %2835 = vrot.lane.b32.xlu0 %v10741_v29, %s9928_s9 }
 0x160   : > { %1669 = vmatpush2.bf16.msra.mxu0 %v10611_v27  ;;  %1716 = vmatpush2.bf16.msra.mxu1 %v10617_v28 }
 0x161   : > { %1775 = vmatprep.subr.bf16.mxu0 %v10315_v45  ;;  %1818 = vmatprep.subr.bf16.mxu1 %v10321_v46 }
 0x162   : > { %2979 = vrot.lane.b32.xlu1 %v10741_v29, %s9929_s22  ;;  %v10983_v29 = vld [vmem:[%s16681_s1 + $0xe4] ss:$8 sps:$4 sm:$0xff]  }
 0x163   : > { %1671 = vmatmul.mubr.bf16.vlgmr.msra.gmra.mxu0 %v1633_v14  ;;  %1718 = vmatmul.mubr.bf16.vlgmr.msra.gmra.mxu1 %v1633_v14 }
 0x164   : > { %1776 = vmatpush1.bf16.msra.mxu0 %v10328_v49  ;;  %1819 = vmatpush1.bf16.msra.mxu1 %v10334_v50 }
 0x165   : > { %1777 = vmatprep.subr.bf16.mxu0 %v10340_v51  ;;  %1820 = vmatprep.subr.bf16.mxu1 %v10396_v58 }
 0x166   : > { %8718 = vmatprep.mubr.msk.bf16.mxu0 %vm710_vm0, %v1768_v26  ;;  %8719 = vmatprep.mubr.msk.bf16.mxu1 %vm710_vm0, %v1768_v26 }
 0x167   : > { %2977 = vrot.lane.b32.xlu1 %v10738_v35, %s9929_s22  ;;  %v11008_v35 = vld [vmem:[%s16681_s1 + $0xd4] ss:$8 sps:$4 sm:$0xff]  }
 0x168   : > { %1778 = vmatpush1.bf16.msra.mxu0 %v10351_v53  ;;  %1821 = vmatpush1.bf16.msra.mxu1 %v10357_v54 }
 0x169   : > { %1779 = vmatprep.subr.bf16.mxu0 %v10406_v59  ;;  %1822 = vmatprep.subr.bf16.mxu1 %v10412_v60 }
 0x16c   : > { %1780 = vmatpush1.bf16.msra.mxu0 %v10426_v63  ;;  %1823 = vmatpush1.bf16.msra.mxu1 %v10432_v0 }
 0x16d   : > { %1781 = vmatprep.subr.bf16.mxu0 %v10438_v1  ;;  %1824 = vmatprep.subr.bf16.mxu1 %v10444_v2 }
 0x16f   : > { %v1088_v34 = vpop.f32.mrf.mxu0  ;;  %v1131_v36 = vpop.f32.mrf.mxu1 }
 0x170   : > { %1782 = vmatpush1.bf16.msra.mxu0 %v10450_v3  ;;  %1825 = vmatpush1.bf16.msra.mxu1 %v10456_v4  ;;  %v1140_v47 = vmax.f32 %v1088_v34, %v1131_v36 }
 0x171   : > { %1783 = vmatprep.subr.bf16.mxu0 %v10462_v5  ;;  %1826 = vmatprep.subr.bf16.mxu1 %v10468_v6  ;;  %v1090_v39 = vpop.f32.mrf.mxu0  ;;  %v1133_v40 = vpop.f32.mrf.mxu1 }
 0x172   : > { %v1141_v56 = vmax.f32 %v1090_v39, %v1133_v40 }
 0x173   : > { %v1092_v41 = vpop.f32.mrf.mxu0  ;;  %v1135_v42 = vpop.f32.mrf.mxu1 }
 0x174   : > { %1784 = vmatpush1.bf16.msra.mxu0 %v10474_v7  ;;  %1827 = vmatpush1.bf16.msra.mxu1 %v10480_v8  ;;  %v1142_v13 = vmax.f32 %v1092_v41, %v1135_v42 }
 0x175   : > { %1785 = vmatprep.subr.bf16.mxu0 %v10486_v9  ;;  %1828 = vmatprep.subr.bf16.mxu1 %v10492_v10  ;;  %v1094_v43 = vpop.f32.mrf.mxu0  ;;  %v1137_v44 = vpop.f32.mrf.mxu1 }
 0x176   : > { %v1143_v31 = vmax.f32 %v1094_v43, %v1137_v44 }
 0x178   : > { %1786 = vmatpush1.bf16.msra.mxu0 %v10498_v11  ;;  %1829 = vmatpush1.bf16.msra.mxu1 %v10545_v15 }
 0x179   : > { %1787 = vmatprep.subr.bf16.mxu0 %v10551_v16  ;;  %1830 = vmatprep.subr.bf16.mxu1 %v10557_v17 }
 0x17c   : > { %1788 = vmatpush1.bf16.msra.mxu0 %v10563_v18  ;;  %1831 = vmatpush1.bf16.msra.mxu1 %v10569_v19 }
 0x17d   : > { %1789 = vmatprep.subr.bf16.mxu0 %v10575_v20  ;;  %1832 = vmatprep.subr.bf16.mxu1 %v10581_v21 }
 0x180   : > { %1790 = vmatpush1.bf16.msra.mxu0 %v10587_v22  ;;  %1833 = vmatpush1.bf16.msra.mxu1 %v10593_v23 }
 0x181   : > { %1805 = vmatprep.subr.bf16.mxu0 %v10599_v24  ;;  %1848 = vmatprep.subr.bf16.mxu1 %v10605_v25 }
 0x184   : > { %1806 = vmatpush2.bf16.msra.mxu0 %v10611_v27  ;;  %1849 = vmatpush2.bf16.msra.mxu1 %v10617_v28 }
 0x185   : > { %1895 = vmatprep.subr.bf16.mxu0 %v10315_v45  ;;  %1942 = vmatprep.subr.bf16.mxu1 %v10321_v46 }
 0x187   : > { %1808 = vmatmul.mubr.bf16.vlgmr.msra.gmra.mxu0 %v1770_v32  ;;  %1851 = vmatmul.mubr.bf16.vlgmr.msra.gmra.mxu1 %v1770_v32 }
 0x188   : > { %1896 = vmatpush1.bf16.msra.mxu0 %v10328_v49  ;;  %1943 = vmatpush1.bf16.msra.mxu1 %v10334_v50 }
 0x189   : > { %1897 = vmatprep.subr.bf16.mxu0 %v10340_v51  ;;  %1944 = vmatprep.subr.bf16.mxu1 %v10396_v58 }
 0x18a   : > { %8723 = vmatprep.mubr.msk.bf16.mxu0 %vm710_vm0, %v1890_v38  ;;  %8724 = vmatprep.mubr.msk.bf16.mxu1 %vm710_vm0, %v1890_v38 }
 0x18c   : > { %1898 = vmatpush1.bf16.msra.mxu0 %v10351_v53  ;;  %1945 = vmatpush1.bf16.msra.mxu1 %v10357_v54 }
 0x18d   : > { %1899 = vmatprep.subr.bf16.mxu0 %v10406_v59  ;;  %1946 = vmatprep.subr.bf16.mxu1 %v10412_v60 }
 0x190   : > { %1900 = vmatpush1.bf16.msra.mxu0 %v10426_v63  ;;  %1947 = vmatpush1.bf16.msra.mxu1 %v10432_v0 }
 0x191   : > { %1901 = vmatprep.subr.bf16.mxu0 %v10438_v1  ;;  %1948 = vmatprep.subr.bf16.mxu1 %v10444_v2 }
 0x193   : > { %v1188_v48 = vpop.f32.mrf.mxu0  ;;  %v1235_v55 = vpop.f32.mrf.mxu1 }
 0x194   : > { %v1197_v57 = vmax.f32 %v1140_v47, %v1188_v48  ;;  %1902 = vmatpush1.bf16.msra.mxu0 %v10450_v3  ;;  %1949 = vmatpush1.bf16.msra.mxu1 %v10456_v4 }
 0x195   : > { %v1190_v61 = vpop.f32.mrf.mxu0  ;;  %v1237_v12 = vpop.f32.mrf.mxu1  ;;  %1903 = vmatprep.subr.bf16.mxu0 %v10462_v5  ;;  %1950 = vmatprep.subr.bf16.mxu1 %v10468_v6 }
 0x196   : > { %v1244_v14 = vmax.f32 %v1197_v57, %v1235_v55  ;;  %v1198_v26 = vmax.f32 %v1141_v56, %v1190_v61 }
 0x197   : > { %v1192_v32 = vpop.f32.mrf.mxu0  ;;  %v1239_v33 = vpop.f32.mrf.mxu1 }
 0x198   : > { %v1248_v34 = vadd.f32 %v1244_v14, %v10685_v62  ;;  %v1245_v36 = vmax.f32 %v1198_v26, %v1237_v12  ;;  %v1199_v38 = vmax.f32 %v1142_v13, %v1192_v32  ;;  %1904 = vmatpush1.bf16.msra.mxu0 %v10474_v7  ;;  %1951 = vmatpush1.bf16.msra.mxu1 %v10480_v8  ;;  %v1883_v14 = vpop.permute.xlu0 %1882 }
 0x199   : > { %v1194_v39 = vpop.f32.mrf.mxu0  ;;  %1905 = vmatprep.subr.bf16.mxu0 %v10486_v9  ;;  %1952 = vmatprep.subr.bf16.mxu1 %v10492_v10  ;;  %v1241_v43 = vpop.f32.mrf.mxu1  ;;  %v1889_v26 = vsel %vm1888_vm11, %v1883_v14, %v10773_v37  ;;  %v10921_v14 = vld [vmem:[%s16681_s1 + $0x74] ss:$8 sps:$4 sm:$0xff]  }
 0x19a   : > { %v1249_v40 = vadd.f32 %v1245_v36, %v10691_v30  ;;  %v1246_v41 = vmax.f32 %v1199_v38, %v1239_v33  ;;  %v1200_v42 = vmax.f32 %v1143_v31, %v1194_v39  ;;  %v1252_v44 = vmax.f32 %v1248_v34, 0.0  ;;  %v2023_v37 = vpop.permute.xlu1 %2022 }
 0x19c   : > { %v1253_v47 = vmax.f32 %v1249_v40, 0.0  ;;  %v1250_v48 = vadd.f32 %v1246_v41, %v10685_v62  ;;  %v1247_v55 = vmax.f32 %v1200_v42, %v1241_v43  ;;  %1906 = vmatpush1.bf16.msra.mxu0 %v10498_v11  ;;  %1953 = vmatpush1.bf16.msra.mxu1 %v10545_v15  ;;  %v2025_v31 = vpop.permute.xlu0 %2024 }
 0x19d   : > { %1907 = vmatprep.subr.bf16.mxu0 %v10551_v16  ;;  %1954 = vmatprep.subr.bf16.mxu1 %v10557_v17  ;;  %v2027_v32 = vsel %vm2026_vm12, %v2023_v37, %v2025_v31  ;;  %v10935_v37 = vld [vmem:[%s16681_s1 + $0x70] ss:$8 sps:$4 sm:$0xff]  }
 0x19e   : > { %v9038_v56 = vpack.c.bf16 %v1253_v47, %v1252_v44  ;;  %v1251_v57 = vadd.f32 %v1247_v55, %v10691_v30  ;;  %v1254_v61 = vmax.f32 %v1250_v48, 0.0 }
 0x1a0   : > { %1269 = vst.msk [vmem:[#allocation2 + $0x10] sm:$0xff] %vm10703_vm8, %v9038_v56  ;;  %v1255_v12 = vmax.f32 %v1251_v57, 0.0  ;;  %1908 = vmatpush1.bf16.msra.mxu0 %v10563_v18  ;;  %1955 = vmatpush1.bf16.msra.mxu1 %v10569_v19  ;;  %v10867_v36 = vpop.permute.xlu0 %2124 }
 0x1a1   : > { %1909 = vmatprep.subr.bf16.mxu0 %v10575_v20  ;;  %1956 = vmatprep.subr.bf16.mxu1 %v10581_v21 }
 0x1a2   : > { %v9039_v13 = vpack.c.bf16 %v1255_v12, %v1254_v61  ;;  %v2123_v12 = vpop.permute.xlu1 %2122 }
 0x1a4   : > { %1270 = vst.msk [vmem:[#allocation2 + $0x18] sm:$0xff] %vm10703_vm8, %v9039_v13  ;;  %1910 = vmatpush1.bf16.msra.mxu0 %v10587_v22  ;;  %1957 = vmatpush1.bf16.msra.mxu1 %v10593_v23  ;;  %v2127_v13 = vsel %vm2126_vm13, %v2123_v12, %v10867_v36 }
 0x1a5   : > { %1925 = vmatprep.subr.bf16.mxu0 %v10599_v24  ;;  %1972 = vmatprep.subr.bf16.mxu1 %v10605_v25 }
 0x1a8   : > { %1926 = vmatpush2.bf16.msra.mxu0 %v10611_v27  ;;  %1973 = vmatpush2.bf16.msra.mxu1 %v10617_v28 }
 0x1a9   : > { %2032 = vmatprep.subr.bf16.mxu0 %v10315_v45  ;;  %2075 = vmatprep.subr.bf16.mxu1 %v10321_v46 }
 0x1ab   : > { %1928 = vmatmul.mubr.bf16.vlgmr.msra.gmra.mxu0 %v1889_v26  ;;  %1975 = vmatmul.mubr.bf16.vlgmr.msra.gmra.mxu1 %v1889_v26  ;;  %v10927_v26 = vld [vmem:[%s16681_s1 + $0x104] ss:$8 sps:$4 sm:$0xff]  }
 0x1ac   : > { %2033 = vmatpush1.bf16.msra.mxu0 %v10328_v49  ;;  %2076 = vmatpush1.bf16.msra.mxu1 %v10334_v50 }
 0x1ad   : > { %2034 = vmatprep.subr.bf16.mxu0 %v10340_v51  ;;  %2077 = vmatprep.subr.bf16.mxu1 %v10396_v58 }
 0x1ae   : > { %8729 = vmatprep.mubr.msk.bf16.mxu0 %vm710_vm0, %v2025_v31  ;;  %8730 = vmatprep.mubr.msk.bf16.mxu1 %vm710_vm0, %v2025_v31  ;;  %v10930_v31 = vpop.permute.xlu0 %2261 }
 0x1b0   : > { %2035 = vmatpush1.bf16.msra.mxu0 %v10351_v53  ;;  %2078 = vmatpush1.bf16.msra.mxu1 %v10357_v54 }
 0x1b1   : > { %2036 = vmatprep.subr.bf16.mxu0 %v10406_v59  ;;  %2079 = vmatprep.subr.bf16.mxu1 %v10412_v60 }
 0x1b4   : > { %2037 = vmatpush1.bf16.msra.mxu0 %v10426_v63  ;;  %2080 = vmatpush1.bf16.msra.mxu1 %v10432_v0 }
 0x1b5   : > { %2038 = vmatprep.subr.bf16.mxu0 %v10438_v1  ;;  %2081 = vmatprep.subr.bf16.mxu1 %v10444_v2 }
 0x1b7   : > { %v1325_v33 = vpop.f32.mrf.mxu0  ;;  %v1368_v34 = vpop.f32.mrf.mxu1 }
 0x1b8   : > { %2039 = vmatpush1.bf16.msra.mxu0 %v10450_v3  ;;  %2082 = vmatpush1.bf16.msra.mxu1 %v10456_v4 }
 0x1b9   : > { %2040 = vmatprep.subr.bf16.mxu0 %v10462_v5  ;;  %2083 = vmatprep.subr.bf16.mxu1 %v10468_v6  ;;  %v1327_v38 = vpop.f32.mrf.mxu0  ;;  %v1370_v39 = vpop.f32.mrf.mxu1 }
 0x1bc   : > { %2041 = vmatpush1.bf16.msra.mxu0 %v10474_v7  ;;  %2084 = vmatpush1.bf16.msra.mxu1 %v10480_v8 }
 0x1bd   : > { %2042 = vmatprep.subr.bf16.mxu0 %v10486_v9  ;;  %2085 = vmatprep.subr.bf16.mxu1 %v10492_v10 }
 0x1c0   : > { %2043 = vmatpush1.bf16.msra.mxu0 %v10498_v11  ;;  %2086 = vmatpush1.bf16.msra.mxu1 %v10545_v15 }
 0x1c1   : > { %2044 = vmatprep.subr.bf16.mxu0 %v10551_v16  ;;  %2087 = vmatprep.subr.bf16.mxu1 %v10557_v17 }
 0x1c4   : > { %2045 = vmatpush1.bf16.msra.mxu0 %v10563_v18  ;;  %2088 = vmatpush1.bf16.msra.mxu1 %v10569_v19 }
 0x1c5   : > { %2046 = vmatprep.subr.bf16.mxu0 %v10575_v20  ;;  %2089 = vmatprep.subr.bf16.mxu1 %v10581_v21 }
 0x1c8   : > { %2047 = vmatpush1.bf16.msra.mxu0 %v10587_v22  ;;  %2090 = vmatpush1.bf16.msra.mxu1 %v10593_v23 }
 0x1c9   : > { %2062 = vmatprep.subr.bf16.mxu0 %v10599_v24  ;;  %2105 = vmatprep.subr.bf16.mxu1 %v10605_v25 }
 0x1cc   : > { %2063 = vmatpush2.bf16.msra.mxu0 %v10611_v27  ;;  %2106 = vmatpush2.bf16.msra.mxu1 %v10617_v28 }
 0x1cd   : > { %2132 = vmatprep.subr.bf16.mxu0 %v10315_v45  ;;  %2179 = vmatprep.subr.bf16.mxu1 %v10321_v46  ;;  %v1329_v45 = vpop.f32.mrf.mxu0  ;;  %v1372_v46 = vpop.f32.mrf.mxu1 }
 0x1cf   : > { %2065 = vmatmul.mubr.bf16.vlgmr.msra.gmra.mxu0 %v2027_v32  ;;  %2108 = vmatmul.mubr.bf16.vlgmr.msra.gmra.mxu1 %v2027_v32  ;;  %v10941_v32 = vld [vmem:[%s16681_s1 + $0x100] ss:$8 sps:$4 sm:$0xff]  }
 0x1d0   : > { %2133 = vmatpush1.bf16.msra.mxu0 %v10328_v49  ;;  %2180 = vmatpush1.bf16.msra.mxu1 %v10334_v50  ;;  %v1331_v49 = vpop.f32.mrf.mxu0  ;;  %v1374_v50 = vpop.f32.mrf.mxu1 }
 0x1d1   : > { %2134 = vmatprep.subr.bf16.mxu0 %v10340_v51  ;;  %2181 = vmatprep.subr.bf16.mxu1 %v10396_v58  ;;  %v1377_v51 = vmax.f32 %v1325_v33, %v1368_v34  ;;  %v1378_v58 = vmax.f32 %v1327_v38, %v1370_v39  ;;  %v1380_v41 = vmax.f32 %v1331_v49, %v1374_v50  ;;  %v10947_v33 = vld [vmem:[%s16681_s1 + $0x64] ss:$8 sps:$4 sm:$0xff]   ;;  %v10953_v34 = vld [vmem:[%s16681_s1 + $0xf4] ss:$8 sps:$4 sm:$0xff]   ;;  %v10965_v38 = vld [vmem:[%s16681_s1 + $0x60] ss:$8 sps:$4 sm:$0xff]  }
 0x1d2   : > { %8731 = vmatprep.mubr.msk.bf16.mxu0 %vm710_vm0, %v10867_v36  ;;  %8732 = vmatprep.mubr.msk.bf16.mxu1 %vm710_vm0, %v10867_v36  ;;  %v9230_v36 = vld [vmem:[%s10043_s27 + $0x14] ss:$28 sps:$4 sm:$0xff]   ;;  %v10996_v49 = vld [vmem:[%s16681_s1 + $0xe0] ss:$8 sps:$4 sm:$0xff]   ;;  %v11002_v50 = vld [vmem:[%s16681_s1 + $0x44] ss:$8 sps:$4 sm:$0xff]  }
 0x1d3   : > { %v10971_v39 = vld [vmem:[%s16681_s1 + $0xf0] ss:$8 sps:$4 sm:$0xff]   ;;  %2981 = vrot.lane.b32.xlu0 %v9230_v36, %s9929_s22 }
 0x1d4   : > { %2135 = vmatpush1.bf16.msra.mxu0 %v10351_v53  ;;  %2182 = vmatpush1.bf16.msra.mxu1 %v10357_v54 }
 0x1d5   : > { %2136 = vmatprep.subr.bf16.mxu0 %v10406_v59  ;;  %2183 = vmatprep.subr.bf16.mxu1 %v10412_v60 }
 0x1d8   : > { %2137 = vmatpush1.bf16.msra.mxu0 %v10426_v63  ;;  %2184 = vmatpush1.bf16.msra.mxu1 %v10432_v0  ;;  %v1379_v63 = vmax.f32 %v1329_v45, %v1372_v46  ;;  %v10977_v45 = vld [vmem:[%s16681_s1 + $0x54] ss:$8 sps:$4 sm:$0xff]   ;;  %v10990_v46 = vld [vmem:[%s16681_s1 + $0x50] ss:$8 sps:$4 sm:$0xff]  }
 0x1d9   : > { %2138 = vmatprep.subr.bf16.mxu0 %v10438_v1  ;;  %2185 = vmatprep.subr.bf16.mxu1 %v10444_v2 }
 0x1db   : > { %v1435_v53 = vpop.f32.mrf.mxu0  ;;  %v1482_v54 = vpop.f32.mrf.mxu1 }
 0x1dc   : > { %v1444_v59 = vmax.f32 %v1377_v51, %v1435_v53  ;;  %2139 = vmatpush1.bf16.msra.mxu0 %v10450_v3  ;;  %2186 = vmatpush1.bf16.msra.mxu1 %v10456_v4  ;;  %v11014_v51 = vld [vmem:[%s16681_s1 + $0x40] ss:$8 sps:$4 sm:$0xff]   ;;  %v11020_v53 = vld [vmem:[%s16681_s1 + $0xd0] ss:$8 sps:$4 sm:$0xff]  }
 0x1dd   : > { %v1437_v60 = vpop.f32.mrf.mxu0  ;;  %v1484_v40 = vpop.f32.mrf.mxu1  ;;  %2140 = vmatprep.subr.bf16.mxu0 %v10462_v5  ;;  %2187 = vmatprep.subr.bf16.mxu1 %v10468_v6 }
 0x1de   : > { %v1491_v0 = vmax.f32 %v1444_v59, %v1482_v54  ;;  %v1445_v1 = vmax.f32 %v1378_v58, %v1437_v60  ;;  %v11026_v54 = vld [vmem:[%s16681_s1 + $0x34] ss:$8 sps:$4 sm:$0xff]   ;;  %v11032_v58 = vld [vmem:[%s16681_s1 + $0xc4] ss:$8 sps:$4 sm:$0xff]   ;;  %v11038_v59 = vld [vmem:[%s16681_s1 + $0x30] ss:$8 sps:$4 sm:$0xff]  }
 0x1df   : > { %v1439_v2 = vpop.f32.mrf.mxu0  ;;  %v1486_v42 = vpop.f32.mrf.mxu1  ;;  %v11044_v60 = vld [vmem:[%s16681_s1 + $0xc0] ss:$8 sps:$4 sm:$0xff]  }
 0x1e0   : > { %v1495_v43 = vadd.f32 %v1491_v0, %v10685_v62  ;;  %v1492_v44 = vmax.f32 %v1445_v1, %v1484_v40  ;;  %v1446_v47 = vmax.f32 %v1379_v63, %v1439_v2  ;;  %2141 = vmatpush1.bf16.msra.mxu0 %v10474_v7  ;;  %2188 = vmatpush1.bf16.msra.mxu1 %v10480_v8  ;;  %v11050_v40 = vld [vmem:[%s16681_s1 + $0x24] ss:$8 sps:$4 sm:$0xff]   ;;  %v11056_v63 = vld [vmem:[%s16681_s1 + $0xb4] ss:$8 sps:$4 sm:$0xff]   ;;  %v11062_v0 = vld [vmem:[%s16681_s1 + $0x20] ss:$8 sps:$4 sm:$0xff]  }
 0x1e1   : > { %v1441_v3 = vpop.f32.mrf.mxu0  ;;  %2142 = vmatprep.subr.bf16.mxu0 %v10486_v9  ;;  %2189 = vmatprep.subr.bf16.mxu1 %v10492_v10  ;;  %v1488_v48 = vpop.f32.mrf.mxu1 }
 0x1e2   : > { %v1496_v4 = vadd.f32 %v1492_v44, %v10691_v30  ;;  %v1493_v5 = vmax.f32 %v1446_v47, %v1486_v42  ;;  %v1447_v6 = vmax.f32 %v1380_v41, %v1441_v3  ;;  %v1499_v55 = vmax.f32 %v1495_v43, 0.0 }
 0x1e4   : > { %v1500_v56 = vmax.f32 %v1496_v4, 0.0  ;;  %v1497_v57 = vadd.f32 %v1493_v5, %v10685_v62  ;;  %v1494_v61 = vmax.f32 %v1447_v6, %v1488_v48  ;;  %2143 = vmatpush1.bf16.msra.mxu0 %v10498_v11  ;;  %2190 = vmatpush1.bf16.msra.mxu1 %v10545_v15 }
 0x1e5   : > { %2144 = vmatprep.subr.bf16.mxu0 %v10551_v16  ;;  %2191 = vmatprep.subr.bf16.mxu1 %v10557_v17 }
 0x1e6   : > { %v9040_v7 = vpack.c.bf16 %v1500_v56, %v1499_v55  ;;  %v1498_v8 = vadd.f32 %v1494_v61, %v10691_v30  ;;  %v1501_v9 = vmax.f32 %v1497_v57, 0.0 }
 0x1e8   : > { %1516 = vst.msk [vmem:[#allocation2 + $0x20] sm:$0xff] %vm10703_vm8, %v9040_v7  ;;  %v1502_v10 = vmax.f32 %v1498_v8, 0.0  ;;  %2145 = vmatpush1.bf16.msra.mxu0 %v10563_v18  ;;  %2192 = vmatpush1.bf16.msra.mxu1 %v10569_v19 }
 0x1e9   : > { %2146 = vmatprep.subr.bf16.mxu0 %v10575_v20  ;;  %2193 = vmatprep.subr.bf16.mxu1 %v10581_v21 }
 0x1ea   : > { %v9041_v11 = vpack.c.bf16 %v1502_v10, %v1501_v9 }
 0x1ec   : > { %1517 = vst.msk [vmem:[#allocation2 + $0x28] sm:$0xff] %vm10703_vm8, %v9041_v11  ;;  %2147 = vmatpush1.bf16.msra.mxu0 %v10587_v22  ;;  %2194 = vmatpush1.bf16.msra.mxu1 %v10593_v23 }
 0x1ed   : > { %2162 = vmatprep.subr.bf16.mxu0 %v10599_v24  ;;  %2209 = vmatprep.subr.bf16.mxu1 %v10605_v25 }
 0x1f0   : > { %2163 = vmatpush2.bf16.msra.mxu0 %v10611_v27  ;;  %2210 = vmatpush2.bf16.msra.mxu1 %v10617_v28 }
 0x1f1   : > { %2269 = vmatprep.subr.bf16.mxu0 %v10921_v14  ;;  %2312 = vmatprep.subr.bf16.mxu1 %v10927_v26 }
 0x1f3   : > { %2165 = vmatmul.mubr.bf16.vlgmr.msra.gmra.mxu0 %v2127_v13  ;;  %2212 = vmatmul.mubr.bf16.vlgmr.msra.gmra.mxu1 %v2127_v13 }
 0x1f4   : > { %2270 = vmatpush1.bf16.msra.mxu0 %v10935_v37  ;;  %2313 = vmatpush1.bf16.msra.mxu1 %v10941_v32 }
 0x1f5   : > { %2271 = vmatprep.subr.bf16.mxu0 %v10947_v33  ;;  %2314 = vmatprep.subr.bf16.mxu1 %v10953_v34 }
 0x1f6   : > { %8737 = vmatprep.mubr.msk.bf16.mxu0 %vm710_vm0, %v10930_v31  ;;  %8738 = vmatprep.mubr.msk.bf16.mxu1 %vm710_vm0, %v10930_v31 }
 0x1f8   : > { %2272 = vmatpush1.bf16.msra.mxu0 %v10965_v38  ;;  %2315 = vmatpush1.bf16.msra.mxu1 %v10971_v39 }
 0x1f9   : > { %2273 = vmatprep.subr.bf16.mxu0 %v10977_v45  ;;  %2316 = vmatprep.subr.bf16.mxu1 %v10983_v29 }
 0x1fc   : > { %2274 = vmatpush1.bf16.msra.mxu0 %v10990_v46  ;;  %2317 = vmatpush1.bf16.msra.mxu1 %v10996_v49 }
 0x1fd   : > { %2275 = vmatprep.subr.bf16.mxu0 %v11002_v50  ;;  %2318 = vmatprep.subr.bf16.mxu1 %v11008_v35 }
 0x200   : > { %2276 = vmatpush1.bf16.msra.mxu0 %v11014_v51  ;;  %2319 = vmatpush1.bf16.msra.mxu1 %v11020_v53 }
 0x201   : > { %2277 = vmatprep.subr.bf16.mxu0 %v11026_v54  ;;  %2320 = vmatprep.subr.bf16.mxu1 %v11032_v58 }
 0x204   : > { %2278 = vmatpush1.bf16.msra.mxu0 %v11038_v59  ;;  %2321 = vmatpush1.bf16.msra.mxu1 %v11044_v60 }
 0x205   : > { %2279 = vmatprep.subr.bf16.mxu0 %v11050_v40  ;;  %2322 = vmatprep.subr.bf16.mxu1 %v11056_v63 }
 0x208   : > { %2280 = vmatpush1.bf16.msra.mxu0 %v11062_v0  ;;  %2323 = vmatpush1.bf16.msra.mxu1 %v10545_v15  ;;  %v2260_v15 = vpop.permute.xlu1 %2259 }
 0x209   : > { %2281 = vmatprep.subr.bf16.mxu0 %v10551_v16  ;;  %2324 = vmatprep.subr.bf16.mxu1 %v10557_v17  ;;  %v2264_v16 = vsel %vm2263_vm14, %v2260_v15, %v10930_v31  ;;  %v1572_v17 = vpop.f32.mrf.mxu0  ;;  %v11122_v15 = vld [vmem:[%s16681_s1 + $0xb0] ss:$8 sps:$4 sm:$0xff]  }
 0x20c   : > { %2282 = vmatpush1.bf16.msra.mxu0 %v10563_v18  ;;  %2325 = vmatpush1.bf16.msra.mxu1 %v10569_v19  ;;  %v1615_v18 = vpop.f32.mrf.mxu1  ;;  %v11081_v19 = vpop.permute.xlu0 %2361 }
 0x20d   : > { %2283 = vmatprep.subr.bf16.mxu0 %v10575_v20  ;;  %2326 = vmatprep.subr.bf16.mxu1 %v10581_v21  ;;  %v1574_v20 = vpop.f32.mrf.mxu0  ;;  %v1624_v1 = vmax.f32 %v1572_v17, %v1615_v18  ;;  %v11134_v17 = vld [vmem:[%s16681_s1 + $0xa4] ss:$8 sps:$4 sm:$0xff]  }
 0x20e   : > { %v1617_v21 = vpop.f32.mrf.mxu1 }
 0x20f   : > { %v1625_v42 = vmax.f32 %v1574_v20, %v1617_v21 }
 0x210   : > { %2284 = vmatpush1.bf16.msra.mxu0 %v10587_v22  ;;  %2327 = vmatpush1.bf16.msra.mxu1 %v10593_v23  ;;  %v11094_v22 = vld [vmem:[%s10043_s27 + $0x14] ss:$28 sps:$4 sm:$0xff]  }
 0x211   : > { %2299 = vmatprep.subr.bf16.mxu0 %v10599_v24  ;;  %2342 = vmatprep.subr.bf16.mxu1 %v10605_v25  ;;  %v11097_v23 = vld [vmem:[%s10043_s27 + $0x10] ss:$28 sps:$4 sm:$0xff]   ;;  %v1576_v24 = vpop.f32.mrf.mxu0  ;;  %v1619_v25 = vpop.f32.mrf.mxu1 }
 0x212   : > { %3092 = vrot.lane.b32.xlu1 %v11094_v22, %s9930_s17  ;;  %3090 = vrot.lane.b32.xlu0 %v11097_v23, %s9930_s17  ;;  %v1626_v3 = vmax.f32 %v1576_v24, %v1619_v25  ;;  %v11143_v25 = vld [vmem:[%s16681_s1 + $0x10] ss:$8 sps:$4 sm:$0xff]  }
 0x214   : > { %2300 = vmatpush2.bf16.msra.mxu0 %v10611_v27  ;;  %2343 = vmatpush2.bf16.msra.mxu1 %v10617_v28  ;;  %v1578_v27 = vpop.f32.mrf.mxu0  ;;  %v1621_v28 = vpop.f32.mrf.mxu1 }
 0x215   : > { %2369 = vmatprep.subr.bf16.mxu0 %v10921_v14  ;;  %2416 = vmatprep.subr.bf16.mxu1 %v10927_v26  ;;  %v1627_v6 = vmax.f32 %v1578_v27, %v1621_v28  ;;  %v11149_v27 = vld [vmem:[%s16681_s1 + $0xa0] ss:$8 sps:$4 sm:$0xff]   ;;  %v11155_v28 = vld [vmem:[%s16681_s1 + $0x4] ss:$8 sps:$4 sm:$0xff]  }
 0x216   : > { %3229 = vrot.lane.b32.xlu1 %v11094_v22, %s9931_s25  ;;  %3227 = vrot.lane.b32.xlu0 %v11097_v23, %s9931_s25 }
 0x217   : > { %2302 = vmatmul.mubr.bf16.vlgmr.msra.gmra.mxu0 %v2264_v16  ;;  %2345 = vmatmul.mubr.bf16.vlgmr.msra.gmra.mxu1 %v2264_v16  ;;  %v11128_v16 = vld [vmem:[%s16681_s1 + $0x14] ss:$8 sps:$4 sm:$0xff]  }
 0x218   : > { %2370 = vmatpush1.bf16.msra.mxu0 %v10935_v37  ;;  %2417 = vmatpush1.bf16.msra.mxu1 %v10941_v32 }
 0x219   : > { %2371 = vmatprep.subr.bf16.mxu0 %v10947_v33  ;;  %2418 = vmatprep.subr.bf16.mxu1 %v10953_v34 }
 0x21a   : > { %8739 = vmatprep.mubr.msk.bf16.mxu0 %vm710_vm0, %v11081_v19  ;;  %8740 = vmatprep.mubr.msk.bf16.mxu1 %vm710_vm0, %v11081_v19 }
 0x21b   : > { %3329 = vrot.lane.b32.xlu1 %v11094_v22, %s9932_s28  ;;  %3327 = vrot.lane.b32.xlu0 %v11097_v23, %s9932_s28  ;;  %s8387_s28 = sshll.u32 %s17312_s26, 3 }
 0x21c   : > { %2372 = vmatpush1.bf16.msra.mxu0 %v10965_v38  ;;  %2419 = vmatpush1.bf16.msra.mxu1 %v10971_v39 }
 0x21d   : > { %2373 = vmatprep.subr.bf16.mxu0 %v10977_v45  ;;  %2420 = vmatprep.subr.bf16.mxu1 %v10983_v29 }
 0x21f   : > { %3466 = vrot.lane.b32.xlu1 %v11094_v22, %s9933_s29  ;;  %3464 = vrot.lane.b32.xlu0 %v11097_v23, %s9933_s29 }
 0x220   : > { %2374 = vmatpush1.bf16.msra.mxu0 %v10990_v46  ;;  %2421 = vmatpush1.bf16.msra.mxu1 %v10996_v49 }
 0x221   : > { %2375 = vmatprep.subr.bf16.mxu0 %v11002_v50  ;;  %2422 = vmatprep.subr.bf16.mxu1 %v11008_v35 }
 0x223   : > { %v1672_v41 = vpop.f32.mrf.mxu0  ;;  %v1719_v2 = vpop.f32.mrf.mxu1 }
 0x224   : > { %v1681_v43 = vmax.f32 %v1624_v1, %v1672_v41  ;;  %2376 = vmatpush1.bf16.msra.mxu0 %v11014_v51  ;;  %2423 = vmatpush1.bf16.msra.mxu1 %v11020_v53  ;;  %v11161_v1 = vld [vmem:[%s16681_s1 + $0x94] ss:$8 sps:$4 sm:$0xff]  }
 0x225   : > { %v1674_v44 = vpop.f32.mrf.mxu0  ;;  %v1721_v47 = vpop.f32.mrf.mxu1  ;;  %2377 = vmatprep.subr.bf16.mxu0 %v11026_v54  ;;  %2424 = vmatprep.subr.bf16.mxu1 %v11032_v58 }
 0x226   : > { %v1728_v4 = vmax.f32 %v1681_v43, %v1719_v2  ;;  %v1682_v5 = vmax.f32 %v1625_v42, %v1674_v44  ;;  %v11169_v2 = vld [vmem:[%s16681_s1] ss:$8 sps:$4 sm:$0xff]   ;;  %v11175_v42 = vld [vmem:[%s16681_s1 + $0x90] ss:$8 sps:$4 sm:$0xff]   ;;  %v11181_v43 = vld [vmem:[%s16681_s1 + $0x84] ss:$8 sps:$4 sm:$0xff]  }
 0x227   : > { %v1676_v48 = vpop.f32.mrf.mxu0  ;;  %v1723_v55 = vpop.f32.mrf.mxu1  ;;  %v11187_v44 = vld [vmem:[%s16681_s1 + $0x114] ss:$8 sps:$4 sm:$0xff]  }
 0x228   : > { %v1732_v56 = vadd.f32 %v1728_v4, %v10685_v62  ;;  %v1729_v57 = vmax.f32 %v1682_v5, %v1721_v47  ;;  %v1683_v61 = vmax.f32 %v1626_v3, %v1676_v48  ;;  %2378 = vmatpush1.bf16.msra.mxu0 %v11038_v59  ;;  %2425 = vmatpush1.bf16.msra.mxu1 %v11044_v60  ;;  %v2360_v47 = vpop.permute.xlu1 %2359  ;;  %v11193_v3 = vld [vmem:[%s16681_s1 + $0x80] ss:$8 sps:$4 sm:$0xff]   ;;  %v11199_v4 = vld [vmem:[%s16681_s1 + $0x110] ss:$8 sps:$4 sm:$0xff]  }
 0x229   : > { %v1678_v7 = vpop.f32.mrf.mxu0  ;;  %2379 = vmatprep.subr.bf16.mxu0 %v11050_v40  ;;  %2426 = vmatprep.subr.bf16.mxu1 %v11056_v63  ;;  %v1725_v11 = vpop.f32.mrf.mxu1  ;;  %v2364_v5 = vsel %vm2363_vm15, %v2360_v47, %v11081_v19 }
 0x22a   : > { %v1733_v8 = vadd.f32 %v1729_v57, %v10691_v30  ;;  %v1730_v9 = vmax.f32 %v1683_v61, %v1723_v55  ;;  %v1684_v10 = vmax.f32 %v1627_v6, %v1678_v7  ;;  %v1736_v12 = vmax.f32 %v1732_v56, 0.0  ;;  %v2499_v6 = vpop.permute.xlu0 %2498 }
 0x22c   : > { %v1737_v13 = vmax.f32 %v1733_v8, 0.0  ;;  %v1734_v31 = vadd.f32 %v1730_v9, %v10685_v62  ;;  %v1731_v36 = vmax.f32 %v1684_v10, %v1725_v11  ;;  %2380 = vmatpush1.bf16.msra.mxu0 %v11062_v0  ;;  %2427 = vmatpush1.bf16.msra.mxu1 %v11122_v15  ;;  %v2497_v19 = vpop.permute.xlu1 %2496 }
 0x22d   : > { %2381 = vmatprep.subr.bf16.mxu0 %v11128_v16  ;;  %2428 = vmatprep.subr.bf16.mxu1 %v11134_v17  ;;  %v2501_v48 = vsel %vm2500_vm1, %v2497_v19, %v2499_v6 }
 0x22e   : > { %v9042_v18 = vpack.c.bf16 %v1737_v13, %v1736_v12  ;;  %v1735_v20 = vadd.f32 %v1731_v36, %v10691_v30  ;;  %v1738_v21 = vmax.f32 %v1734_v31, 0.0  ;;  %v11245_v57 = vpop.permute.xlu0 %2598 }
 0x230   : > { %1753 = vst.msk [vmem:[#allocation2 + $0x30] sm:$0xff] %vm10703_vm8, %v9042_v18  ;;  %v1739_v24 = vmax.f32 %v1735_v20, 0.0  ;;  %2382 = vmatpush1.bf16.msra.mxu0 %v11143_v25  ;;  %2429 = vmatpush1.bf16.msra.mxu1 %v11149_v27 }
 0x231   : > { %2383 = vmatprep.subr.bf16.mxu0 %v11155_v28  ;;  %2430 = vmatprep.subr.bf16.mxu1 %v11161_v1 }
 0x232   : > { %v9043_v41 = vpack.c.bf16 %v1739_v24, %v1738_v21 }
 0x234   : > { %1754 = vst.msk [vmem:[#allocation2 + $0x38] sm:$0xff] %vm10703_vm8, %v9043_v41  ;;  %2384 = vmatpush1.bf16.msra.mxu0 %v11169_v2  ;;  %2431 = vmatpush1.bf16.msra.mxu1 %v11175_v42 }
 0x235   : > { %2399 = vmatprep.subr.bf16.mxu0 %v11181_v43  ;;  %2446 = vmatprep.subr.bf16.mxu1 %v11187_v44 }
 0x238   : > { %2400 = vmatpush2.bf16.msra.mxu0 %v11193_v3  ;;  %2447 = vmatpush2.bf16.msra.mxu1 %v11199_v4 }
 0x239   : > { %2506 = vmatprep.subr.bf16.mxu0 %v10921_v14  ;;  %2549 = vmatprep.subr.bf16.mxu1 %v10927_v26 }
 0x23b   : > { %2402 = vmatmul.mubr.bf16.vlgmr.msra.gmra.mxu0 %v2364_v5  ;;  %2449 = vmatmul.mubr.bf16.vlgmr.msra.gmra.mxu1 %v2364_v5 }
 0x23c   : > { %2507 = vmatpush1.bf16.msra.mxu0 %v10935_v37  ;;  %2550 = vmatpush1.bf16.msra.mxu1 %v10941_v32 }
 0x23d   : > { %2508 = vmatprep.subr.bf16.mxu0 %v10947_v33  ;;  %2551 = vmatprep.subr.bf16.mxu1 %v10953_v34 }
 0x23e   : > { %8745 = vmatprep.mubr.msk.bf16.mxu0 %vm710_vm0, %v2499_v6  ;;  %8746 = vmatprep.mubr.msk.bf16.mxu1 %vm710_vm0, %v2499_v6 }
 0x240   : > { %2509 = vmatpush1.bf16.msra.mxu0 %v10965_v38  ;;  %2552 = vmatpush1.bf16.msra.mxu1 %v10971_v39 }
 0x241   : > { %2510 = vmatprep.subr.bf16.mxu0 %v10977_v45  ;;  %2553 = vmatprep.subr.bf16.mxu1 %v10983_v29 }
 0x244   : > { %2511 = vmatpush1.bf16.msra.mxu0 %v10990_v46  ;;  %2554 = vmatpush1.bf16.msra.mxu1 %v10996_v49 }
 0x245   : > { %2512 = vmatprep.subr.bf16.mxu0 %v11002_v50  ;;  %2555 = vmatprep.subr.bf16.mxu1 %v11008_v35 }
 0x247   : > { %v1809_v55 = vpop.f32.mrf.mxu0  ;;  %v1852_v56 = vpop.f32.mrf.mxu1 }
 0x248   : > { %2513 = vmatpush1.bf16.msra.mxu0 %v11014_v51  ;;  %2556 = vmatpush1.bf16.msra.mxu1 %v11020_v53  ;;  %v1861_v12 = vmax.f32 %v1809_v55, %v1852_v56 }
 0x249   : > { %2514 = vmatprep.subr.bf16.mxu0 %v11026_v54  ;;  %2557 = vmatprep.subr.bf16.mxu1 %v11032_v58  ;;  %v1811_v61 = vpop.f32.mrf.mxu0  ;;  %v1854_v7 = vpop.f32.mrf.mxu1 }
 0x24a   : > { %v1862_v36 = vmax.f32 %v1811_v61, %v1854_v7 }
 0x24b   : > { %v1813_v8 = vpop.f32.mrf.mxu0  ;;  %v1856_v9 = vpop.f32.mrf.mxu1 }
 0x24c   : > { %2515 = vmatpush1.bf16.msra.mxu0 %v11038_v59  ;;  %2558 = vmatpush1.bf16.msra.mxu1 %v11044_v60  ;;  %v1863_v24 = vmax.f32 %v1813_v8, %v1856_v9 }
 0x24d   : > { %2516 = vmatprep.subr.bf16.mxu0 %v11050_v40  ;;  %2559 = vmatprep.subr.bf16.mxu1 %v11056_v63  ;;  %v1815_v10 = vpop.f32.mrf.mxu0  ;;  %v1858_v11 = vpop.f32.mrf.mxu1 }
 0x24e   : > { %v1864_v5 = vmax.f32 %v1815_v10, %v1858_v11 }
 0x250   : > { %2517 = vmatpush1.bf16.msra.mxu0 %v11062_v0  ;;  %2560 = vmatpush1.bf16.msra.mxu1 %v11122_v15 }
 0x251   : > { %2518 = vmatprep.subr.bf16.mxu0 %v11128_v16  ;;  %2561 = vmatprep.subr.bf16.mxu1 %v11134_v17 }
 0x254   : > { %2519 = vmatpush1.bf16.msra.mxu0 %v11143_v25  ;;  %2562 = vmatpush1.bf16.msra.mxu1 %v11149_v27 }
 0x255   : > { %2520 = vmatprep.subr.bf16.mxu0 %v11155_v28  ;;  %2563 = vmatprep.subr.bf16.mxu1 %v11161_v1 }
 0x258   : > { %2521 = vmatpush1.bf16.msra.mxu0 %v11169_v2  ;;  %2564 = vmatpush1.bf16.msra.mxu1 %v11175_v42 }
 0x259   : > { %2536 = vmatprep.subr.bf16.mxu0 %v11181_v43  ;;  %2579 = vmatprep.subr.bf16.mxu1 %v11187_v44 }
 0x25c   : > { %2537 = vmatpush2.bf16.msra.mxu0 %v11193_v3  ;;  %2580 = vmatpush2.bf16.msra.mxu1 %v11199_v4 }
 0x25d   : > { %2606 = vmatprep.subr.bf16.mxu0 %v10921_v14  ;;  %2653 = vmatprep.subr.bf16.mxu1 %v10927_v26 }
 0x25f   : > { %2539 = vmatmul.mubr.bf16.vlgmr.msra.gmra.mxu0 %v2501_v48  ;;  %2582 = vmatmul.mubr.bf16.vlgmr.msra.gmra.mxu1 %v2501_v48 }
 0x260   : > { %2607 = vmatpush1.bf16.msra.mxu0 %v10935_v37  ;;  %2654 = vmatpush1.bf16.msra.mxu1 %v10941_v32 }
 0x261   : > { %2608 = vmatprep.subr.bf16.mxu0 %v10947_v33  ;;  %2655 = vmatprep.subr.bf16.mxu1 %v10953_v34 }
 0x262   : > { %8747 = vmatprep.mubr.msk.bf16.mxu0 %vm710_vm0, %v11245_v57  ;;  %8748 = vmatprep.mubr.msk.bf16.mxu1 %vm710_vm0, %v11245_v57 }
 0x264   : > { %2609 = vmatpush1.bf16.msra.mxu0 %v10965_v38  ;;  %2656 = vmatpush1.bf16.msra.mxu1 %v10971_v39 }
 0x265   : > { %2610 = vmatprep.subr.bf16.mxu0 %v10977_v45  ;;  %2657 = vmatprep.subr.bf16.mxu1 %v10983_v29 }
 0x268   : > { %2611 = vmatpush1.bf16.msra.mxu0 %v10990_v46  ;;  %2658 = vmatpush1.bf16.msra.mxu1 %v10996_v49 }
 0x269   : > { %2612 = vmatprep.subr.bf16.mxu0 %v11002_v50  ;;  %2659 = vmatprep.subr.bf16.mxu1 %v11008_v35 }
 0x26b   : > { %v1929_v13 = vpop.f32.mrf.mxu0  ;;  %v1976_v31 = vpop.f32.mrf.mxu1 }
 0x26c   : > { %v1938_v18 = vmax.f32 %v1861_v12, %v1929_v13  ;;  %2613 = vmatpush1.bf16.msra.mxu0 %v11014_v51  ;;  %2660 = vmatpush1.bf16.msra.mxu1 %v11020_v53 }
 0x26d   : > { %v1931_v20 = vpop.f32.mrf.mxu0  ;;  %v1978_v21 = vpop.f32.mrf.mxu1  ;;  %2614 = vmatprep.subr.bf16.mxu0 %v11026_v54  ;;  %2661 = vmatprep.subr.bf16.mxu1 %v11032_v58 }
 0x26e   : > { %v1985_v41 = vmax.f32 %v1938_v18, %v1976_v31  ;;  %v1939_v47 = vmax.f32 %v1862_v36, %v1931_v20 }
 0x26f   : > { %v1933_v6 = vpop.f32.mrf.mxu0  ;;  %v1980_v19 = vpop.f32.mrf.mxu1 }
 0x270   : > { %v1989_v48 = vadd.f32 %v1985_v41, %v10685_v62  ;;  %v1986_v55 = vmax.f32 %v1939_v47, %v1978_v21  ;;  %v1940_v56 = vmax.f32 %v1863_v24, %v1933_v6  ;;  %2615 = vmatpush1.bf16.msra.mxu0 %v11038_v59  ;;  %2662 = vmatpush1.bf16.msra.mxu1 %v11044_v60  ;;  %v2597_v41 = vpop.permute.xlu1 %2596 }
 0x271   : > { %v1935_v61 = vpop.f32.mrf.mxu0  ;;  %2616 = vmatprep.subr.bf16.mxu0 %v11050_v40  ;;  %2663 = vmatprep.subr.bf16.mxu1 %v11056_v63  ;;  %v1982_v10 = vpop.f32.mrf.mxu1  ;;  %v2601_v47 = vsel %vm2600_vm2, %v2597_v41, %v11245_v57 }
 0x272   : > { %v1990_v7 = vadd.f32 %v1986_v55, %v10691_v30  ;;  %v1987_v8 = vmax.f32 %v1940_v56, %v1980_v19  ;;  %v1941_v9 = vmax.f32 %v1864_v5, %v1935_v61  ;;  %v1993_v11 = vmax.f32 %v1989_v48, 0.0  ;;  %v2736_v5 = vpop.permute.xlu0 %2735  ;;  %v9234_v56 = vld [vmem:[%s10043_s27 + $0x18] ss:$28 sps:$4 sm:$0xff]  }
 0x273   : > { %v9236_v61 = vld [vmem:[%s10043_s27 + $0x14] ss:$28 sps:$4 sm:$0xff]   ;;  %3576 = vrot.lane.b32.xlu1 %v9234_v56, %s9934_s30  ;;  %s283_s27 = scalar_lea.vmem %s16687_s7, %s8387_s28 }
 0x274   : > { %v1994_v12 = vmax.f32 %v1990_v7, 0.0  ;;  %v1991_v13 = vadd.f32 %v1987_v8, %v10685_v62  ;;  %v1988_v31 = vmax.f32 %v1941_v9, %v1982_v10  ;;  %2617 = vmatpush1.bf16.msra.mxu0 %v11062_v0  ;;  %2664 = vmatpush1.bf16.msra.mxu1 %v11122_v15  ;;  %v2734_v22 = vpop.permute.xlu1 %2733 }
 0x275   : > { %2618 = vmatprep.subr.bf16.mxu0 %v11128_v16  ;;  %2665 = vmatprep.subr.bf16.mxu1 %v11134_v17  ;;  %v2738_v23 = vsel %vm2737_vm3, %v2734_v22, %v2736_v5 }
 0x276   : > { %v9044_v36 = vpack.c.bf16 %v1994_v12, %v1993_v11  ;;  %v1992_v18 = vadd.f32 %v1988_v31, %v10691_v30  ;;  %v1995_v20 = vmax.f32 %v1991_v13, 0.0  ;;  %v11339_v19 = vpop.permute.xlu0 %2835  ;;  %3574 = vrot.lane.b32.xlu0 %v9236_v61, %s9934_s30 }
 0x278   : > { %2010 = vst.msk [vmem:[#allocation2 + $0x40] sm:$0xff] %vm10703_vm8, %v9044_v36  ;;  %v1996_v21 = vmax.f32 %v1992_v18, 0.0  ;;  %2619 = vmatpush1.bf16.msra.mxu0 %v11143_v25  ;;  %2666 = vmatpush1.bf16.msra.mxu1 %v11149_v27 }
 0x279   : > { %2620 = vmatprep.subr.bf16.mxu0 %v11155_v28  ;;  %2667 = vmatprep.subr.bf16.mxu1 %v11161_v1 }
 0x27a   : > { %v9045_v24 = vpack.c.bf16 %v1996_v21, %v1995_v20 }
 0x27c   : > { %2011 = vst.msk [vmem:[#allocation2 + $0x48] sm:$0xff] %vm10703_vm8, %v9045_v24  ;;  %2621 = vmatpush1.bf16.msra.mxu0 %v11169_v2  ;;  %2668 = vmatpush1.bf16.msra.mxu1 %v11175_v42 }
 0x27d   : > { %2636 = vmatprep.subr.bf16.mxu0 %v11181_v43  ;;  %2683 = vmatprep.subr.bf16.mxu1 %v11187_v44 }
 0x280   : > { %2637 = vmatpush2.bf16.msra.mxu0 %v11193_v3  ;;  %2684 = vmatpush2.bf16.msra.mxu1 %v11199_v4 }
 0x281   : > { %2743 = vmatprep.subr.bf16.mxu0 %v10921_v14  ;;  %2786 = vmatprep.subr.bf16.mxu1 %v10927_v26 }
 0x283   : > { %2639 = vmatmul.mubr.bf16.vlgmr.msra.gmra.mxu0 %v2601_v47  ;;  %2686 = vmatmul.mubr.bf16.vlgmr.msra.gmra.mxu1 %v2601_v47 }
 0x284   : > { %2744 = vmatpush1.bf16.msra.mxu0 %v10935_v37  ;;  %2787 = vmatpush1.bf16.msra.mxu1 %v10941_v32 }
 0x285   : > { %2745 = vmatprep.subr.bf16.mxu0 %v10947_v33  ;;  %2788 = vmatprep.subr.bf16.mxu1 %v10953_v34 }
 0x286   : > { %8753 = vmatprep.mubr.msk.bf16.mxu0 %vm710_vm0, %v2736_v5  ;;  %8754 = vmatprep.mubr.msk.bf16.mxu1 %vm710_vm0, %v2736_v5 }
 0x288   : > { %2746 = vmatpush1.bf16.msra.mxu0 %v10965_v38  ;;  %2789 = vmatpush1.bf16.msra.mxu1 %v10971_v39 }
 0x289   : > { %2747 = vmatprep.subr.bf16.mxu0 %v10977_v45  ;;  %2790 = vmatprep.subr.bf16.mxu1 %v10983_v29 }
 0x28c   : > { %2748 = vmatpush1.bf16.msra.mxu0 %v10990_v46  ;;  %2791 = vmatpush1.bf16.msra.mxu1 %v10996_v49 }
 0x28d   : > { %2749 = vmatprep.subr.bf16.mxu0 %v11002_v50  ;;  %2792 = vmatprep.subr.bf16.mxu1 %v11008_v35 }
 0x28f   : > { %v2066_v57 = vpop.f32.mrf.mxu0  ;;  %v2109_v6 = vpop.f32.mrf.mxu1 }
 0x290   : > { %2750 = vmatpush1.bf16.msra.mxu0 %v11014_v51  ;;  %2793 = vmatpush1.bf16.msra.mxu1 %v11020_v53  ;;  %v2118_v11 = vmax.f32 %v2066_v57, %v2109_v6 }
 0x291   : > { %2751 = vmatprep.subr.bf16.mxu0 %v11026_v54  ;;  %2794 = vmatprep.subr.bf16.mxu1 %v11032_v58  ;;  %v2068_v48 = vpop.f32.mrf.mxu0  ;;  %v2111_v55 = vpop.f32.mrf.mxu1 }
 0x292   : > { %v2119_v31 = vmax.f32 %v2068_v48, %v2111_v55 }
 0x293   : > { %v2070_v7 = vpop.f32.mrf.mxu0  ;;  %v2113_v8 = vpop.f32.mrf.mxu1 }
 0x294   : > { %2752 = vmatpush1.bf16.msra.mxu0 %v11038_v59  ;;  %2795 = vmatpush1.bf16.msra.mxu1 %v11044_v60  ;;  %v2120_v21 = vmax.f32 %v2070_v7, %v2113_v8 }
 0x295   : > { %2753 = vmatprep.subr.bf16.mxu0 %v11050_v40  ;;  %2796 = vmatprep.subr.bf16.mxu1 %v11056_v63  ;;  %v2072_v9 = vpop.f32.mrf.mxu0  ;;  %v2115_v10 = vpop.f32.mrf.mxu1 }
 0x296   : > { %v2121_v47 = vmax.f32 %v2072_v9, %v2115_v10 }
 0x298   : > { %2754 = vmatpush1.bf16.msra.mxu0 %v11062_v0  ;;  %2797 = vmatpush1.bf16.msra.mxu1 %v11122_v15 }
 0x299   : > { %2755 = vmatprep.subr.bf16.mxu0 %v11128_v16  ;;  %2798 = vmatprep.subr.bf16.mxu1 %v11134_v17 }
 0x29c   : > { %2756 = vmatpush1.bf16.msra.mxu0 %v11143_v25  ;;  %2799 = vmatpush1.bf16.msra.mxu1 %v11149_v27 }
 0x29d   : > { %2757 = vmatprep.subr.bf16.mxu0 %v11155_v28  ;;  %2800 = vmatprep.subr.bf16.mxu1 %v11161_v1 }
 0x2a0   : > { %2758 = vmatpush1.bf16.msra.mxu0 %v11169_v2  ;;  %2801 = vmatpush1.bf16.msra.mxu1 %v11175_v42 }
 0x2a1   : > { %2773 = vmatprep.subr.bf16.mxu0 %v11181_v43  ;;  %2816 = vmatprep.subr.bf16.mxu1 %v11187_v44 }
 0x2a4   : > { %2774 = vmatpush2.bf16.msra.mxu0 %v11193_v3  ;;  %2817 = vmatpush2.bf16.msra.mxu1 %v11199_v4 }
 0x2a5   : > { %2843 = vmatprep.subr.bf16.mxu0 %v10921_v14  ;;  %2890 = vmatprep.subr.bf16.mxu1 %v10927_v26 }
 0x2a7   : > { %2776 = vmatmul.mubr.bf16.vlgmr.msra.gmra.mxu0 %v2738_v23  ;;  %2819 = vmatmul.mubr.bf16.vlgmr.msra.gmra.mxu1 %v2738_v23 }
 0x2a8   : > { %2844 = vmatpush1.bf16.msra.mxu0 %v10935_v37  ;;  %2891 = vmatpush1.bf16.msra.mxu1 %v10941_v32 }
 0x2a9   : > { %2845 = vmatprep.subr.bf16.mxu0 %v10947_v33  ;;  %2892 = vmatprep.subr.bf16.mxu1 %v10953_v34 }
 0x2aa   : > { %8755 = vmatprep.mubr.msk.bf16.mxu0 %vm710_vm0, %v11339_v19  ;;  %8756 = vmatprep.mubr.msk.bf16.mxu1 %vm710_vm0, %v11339_v19 }
 0x2ac   : > { %2846 = vmatpush1.bf16.msra.mxu0 %v10965_v38  ;;  %2893 = vmatpush1.bf16.msra.mxu1 %v10971_v39 }
 0x2ad   : > { %2847 = vmatprep.subr.bf16.mxu0 %v10977_v45  ;;  %2894 = vmatprep.subr.bf16.mxu1 %v10983_v29 }
 0x2b0   : > { %2848 = vmatpush1.bf16.msra.mxu0 %v10990_v46  ;;  %2895 = vmatpush1.bf16.msra.mxu1 %v10996_v49 }
 0x2b1   : > { %2849 = vmatprep.subr.bf16.mxu0 %v11002_v50  ;;  %2896 = vmatprep.subr.bf16.mxu1 %v11008_v35 }
 0x2b3   : > { %v2166_v12 = vpop.f32.mrf.mxu0  ;;  %v2213_v13 = vpop.f32.mrf.mxu1 }
 0x2b4   : > { %v2175_v36 = vmax.f32 %v2118_v11, %v2166_v12  ;;  %2850 = vmatpush1.bf16.msra.mxu0 %v11014_v51  ;;  %2897 = vmatpush1.bf16.msra.mxu1 %v11020_v53 }
 0x2b5   : > { %v2168_v18 = vpop.f32.mrf.mxu0  ;;  %v2215_v20 = vpop.f32.mrf.mxu1  ;;  %2851 = vmatprep.subr.bf16.mxu0 %v11026_v54  ;;  %2898 = vmatprep.subr.bf16.mxu1 %v11032_v58 }
 0x2b6   : > { %v2222_v24 = vmax.f32 %v2175_v36, %v2213_v13  ;;  %v2176_v41 = vmax.f32 %v2119_v31, %v2168_v18 }
 0x2b7   : > { %v2170_v5 = vpop.f32.mrf.mxu0  ;;  %v2217_v22 = vpop.f32.mrf.mxu1 }
 0x2b8   : > { %v2226_v23 = vadd.f32 %v2222_v24, %v10685_v62  ;;  %v2223_v57 = vmax.f32 %v2176_v41, %v2215_v20  ;;  %v2177_v6 = vmax.f32 %v2120_v21, %v2170_v5  ;;  %2852 = vmatpush1.bf16.msra.mxu0 %v11038_v59  ;;  %2899 = vmatpush1.bf16.msra.mxu1 %v11044_v60  ;;  %v2834_v20 = vpop.permute.xlu1 %2833  ;;  %v2982_v24 = vpop.permute.xlu0 %2981 }
 0x2b9   : > { %v2172_v48 = vpop.f32.mrf.mxu0  ;;  %2853 = vmatprep.subr.bf16.mxu0 %v11050_v40  ;;  %2900 = vmatprep.subr.bf16.mxu1 %v11056_v63  ;;  %v2219_v7 = vpop.f32.mrf.mxu1  ;;  %v2838_v21 = vsel %vm2837_vm4, %v2834_v20, %v11339_v19  ;;  %v11484_v20 = vld [vmem:[%s16681_s1 + $0x74] ss:$8 sps:$4 sm:$0xff]  }
 0x2ba   : > { %v2227_v55 = vadd.f32 %v2223_v57, %v10691_v30  ;;  %v2224_v56 = vmax.f32 %v2177_v6, %v2217_v22  ;;  %v2178_v61 = vmax.f32 %v2121_v47, %v2172_v48  ;;  %v2230_v8 = vmax.f32 %v2226_v23, 0.0 }
 0x2bc   : > { %v2231_v9 = vmax.f32 %v2227_v55, 0.0  ;;  %v2228_v10 = vadd.f32 %v2224_v56, %v10685_v62  ;;  %v2225_v11 = vmax.f32 %v2178_v61, %v2219_v7  ;;  %2854 = vmatpush1.bf16.msra.mxu0 %v11062_v0  ;;  %2901 = vmatpush1.bf16.msra.mxu1 %v11122_v15  ;;  %v2980_v41 = vpop.permute.xlu1 %2979 }
 0x2bd   : > { %2855 = vmatprep.subr.bf16.mxu0 %v11128_v16  ;;  %2902 = vmatprep.subr.bf16.mxu1 %v11134_v17  ;;  %v2985_v47 = vsel %vm2983_vm5, %v2980_v41, %v2982_v24 }
 0x2be   : > { %v9046_v12 = vpack.c.bf16 %v2231_v9, %v2230_v8  ;;  %v2229_v13 = vadd.f32 %v2225_v11, %v10691_v30  ;;  %v2232_v31 = vmax.f32 %v2228_v10, 0.0 }
 0x2c0   : > { %2247 = vst.msk [vmem:[#allocation2 + $0x50] sm:$0xff] %vm10703_vm8, %v9046_v12  ;;  %v2233_v36 = vmax.f32 %v2229_v13, 0.0  ;;  %2856 = vmatpush1.bf16.msra.mxu0 %v11143_v25  ;;  %2903 = vmatpush1.bf16.msra.mxu1 %v11149_v27  ;;  %v2978_v19 = vpop.permute.xlu1 %2977 }
 0x2c1   : > { %2857 = vmatprep.subr.bf16.mxu0 %v11155_v28  ;;  %2904 = vmatprep.subr.bf16.mxu1 %v11161_v1  ;;  %v2984_v23 = vsel %vm2983_vm5, %v2978_v19, %v2980_v41  ;;  %v11496_v41 = vld [vmem:[%s16681_s1 + $0x70] ss:$8 sps:$4 sm:$0xff]   ;;  %v11508_v19 = vld [vmem:[%s16681_s1 + $0x64] ss:$8 sps:$4 sm:$0xff]  }
 0x2c2   : > { %v9047_v18 = vpack.c.bf16 %v2233_v36, %v2232_v31  ;;  %v3091_v36 = vpop.permute.xlu0 %3090 }
 0x2c4   : > { %2248 = vst.msk [vmem:[#allocation2 + $0x58] sm:$0xff] %vm10703_vm8, %v9047_v18  ;;  %2858 = vmatpush1.bf16.msra.mxu0 %v11169_v2  ;;  %2905 = vmatpush1.bf16.msra.mxu1 %v11175_v42  ;;  %v11432_v57 = vpop.permute.xlu1 %3092 }
 0x2c5   : > { %2873 = vmatprep.subr.bf16.mxu0 %v11181_v43  ;;  %2920 = vmatprep.subr.bf16.mxu1 %v11187_v44  ;;  %v3095_v18 = vsel %vm3094_vm6, %v3091_v36, %v11432_v57 }
 0x2c8   : > { %2874 = vmatpush2.bf16.msra.mxu0 %v11193_v3  ;;  %2921 = vmatpush2.bf16.msra.mxu1 %v11199_v4  ;;  %v3230_v24 = vpop.permute.xlu1 %3229 }
 0x2c9   : > { %2990 = vmatprep.subr.bf16.mxu0 %v10921_v14  ;;  %3033 = vmatprep.subr.bf16.mxu1 %v10927_v26 }
 0x2cb   : > { %2876 = vmatmul.mubr.bf16.vlgmr.msra.gmra.mxu0 %v2838_v21  ;;  %2923 = vmatmul.mubr.bf16.vlgmr.msra.gmra.mxu1 %v2838_v21  ;;  %v11490_v21 = vld [vmem:[%s16681_s1 + $0x104] ss:$8 sps:$4 sm:$0xff]  }
 0x2cc   : > { %2991 = vmatpush1.bf16.msra.mxu0 %v10935_v37  ;;  %3034 = vmatpush1.bf16.msra.mxu1 %v10941_v32 }
 0x2cd   : > { %2992 = vmatprep.subr.bf16.mxu0 %v10947_v33  ;;  %3035 = vmatprep.subr.bf16.mxu1 %v10953_v34 }
 0x2ce   : > { %8762 = vmatprep.mubr.msk.bf16.mxu0 %vm710_vm0, %v2985_v47  ;;  %8763 = vmatprep.mubr.msk.bf16.mxu1 %vm710_vm0, %v2985_v47  ;;  %v11502_v47 = vld [vmem:[%s16681_s1 + $0x100] ss:$8 sps:$4 sm:$0xff]  }
 0x2d0   : > { %2993 = vmatpush1.bf16.msra.mxu0 %v10965_v38  ;;  %3036 = vmatpush1.bf16.msra.mxu1 %v10971_v39 }
 0x2d1   : > { %2994 = vmatprep.subr.bf16.mxu0 %v10977_v45  ;;  %3037 = vmatprep.subr.bf16.mxu1 %v10983_v29 }
 0x2d4   : > { %2995 = vmatpush1.bf16.msra.mxu0 %v10990_v46  ;;  %3038 = vmatpush1.bf16.msra.mxu1 %v10996_v49 }
 0x2d5   : > { %2996 = vmatprep.subr.bf16.mxu0 %v11002_v50  ;;  %3039 = vmatprep.subr.bf16.mxu1 %v11008_v35 }
 0x2d7   : > { %v2303_v5 = vpop.f32.mrf.mxu0  ;;  %v2346_v22 = vpop.f32.mrf.mxu1 }
 0x2d8   : > { %2997 = vmatpush1.bf16.msra.mxu0 %v11014_v51  ;;  %3040 = vmatpush1.bf16.msra.mxu1 %v11020_v53 }
 0x2d9   : > { %2998 = vmatprep.subr.bf16.mxu0 %v11026_v54  ;;  %3041 = vmatprep.subr.bf16.mxu1 %v11032_v58  ;;  %v2305_v6 = vpop.f32.mrf.mxu0  ;;  %v2348_v48 = vpop.f32.mrf.mxu1 }
 0x2dc   : > { %2999 = vmatpush1.bf16.msra.mxu0 %v11038_v59  ;;  %3042 = vmatpush1.bf16.msra.mxu1 %v11044_v60 }
 0x2dd   : > { %3000 = vmatprep.subr.bf16.mxu0 %v11050_v40  ;;  %3043 = vmatprep.subr.bf16.mxu1 %v11056_v63 }
 0x2e0   : > { %3001 = vmatpush1.bf16.msra.mxu0 %v11062_v0  ;;  %3044 = vmatpush1.bf16.msra.mxu1 %v11122_v15 }
 0x2e1   : > { %3002 = vmatprep.subr.bf16.mxu0 %v11128_v16  ;;  %3045 = vmatprep.subr.bf16.mxu1 %v11134_v17 }
 0x2e4   : > { %3003 = vmatpush1.bf16.msra.mxu0 %v11143_v25  ;;  %3046 = vmatpush1.bf16.msra.mxu1 %v11149_v27 }
 0x2e5   : > { %3004 = vmatprep.subr.bf16.mxu0 %v11155_v28  ;;  %3047 = vmatprep.subr.bf16.mxu1 %v11161_v1 }
 0x2e8   : > { %3005 = vmatpush1.bf16.msra.mxu0 %v11169_v2  ;;  %3048 = vmatpush1.bf16.msra.mxu1 %v11175_v42 }
 0x2e9   : > { %3020 = vmatprep.subr.bf16.mxu0 %v11181_v43  ;;  %3063 = vmatprep.subr.bf16.mxu1 %v11187_v44 }
 0x2ec   : > { %3021 = vmatpush2.bf16.msra.mxu0 %v11193_v3  ;;  %3064 = vmatpush2.bf16.msra.mxu1 %v11199_v4 }
 0x2ed   : > { %3100 = vmatprep.subr.bf16.mxu0 %v10921_v14  ;;  %3147 = vmatprep.subr.bf16.mxu1 %v10927_v26  ;;  %v2307_v14 = vpop.f32.mrf.mxu0  ;;  %v2350_v26 = vpop.f32.mrf.mxu1 }
 0x2ef   : > { %3023 = vmatmul.mubr.bf16.vlgmr.msra.gmra.mxu0 %v2984_v23  ;;  %3066 = vmatmul.mubr.bf16.vlgmr.msra.gmra.mxu1 %v2984_v23  ;;  %v11528_v23 = vld [vmem:[%s16681_s1 + $0xf0] ss:$8 sps:$4 sm:$0xff]  }
 0x2f0   : > { %3101 = vmatpush1.bf16.msra.mxu0 %v10935_v37  ;;  %3148 = vmatpush1.bf16.msra.mxu1 %v10941_v32  ;;  %v2309_v37 = vpop.f32.mrf.mxu0  ;;  %v2352_v32 = vpop.f32.mrf.mxu1 }
 0x2f1   : > { %3102 = vmatprep.subr.bf16.mxu0 %v10947_v33  ;;  %3149 = vmatprep.subr.bf16.mxu1 %v10953_v34  ;;  %v2355_v33 = vmax.f32 %v2303_v5, %v2346_v22  ;;  %v2358_v56 = vmax.f32 %v2309_v37, %v2352_v32  ;;  %v11514_v5 = vld [vmem:[%s16681_s1 + $0xf4] ss:$8 sps:$4 sm:$0xff]   ;;  %v11522_v22 = vld [vmem:[%s16681_s1 + $0x60] ss:$8 sps:$4 sm:$0xff]  }
 0x2f2   : > { %8766 = vmatprep.mubr.msk.bf16.mxu0 %vm710_vm0, %v11432_v57  ;;  %8767 = vmatprep.mubr.msk.bf16.mxu1 %vm710_vm0, %v11432_v57  ;;  %v11534_v57 = vld [vmem:[%s16681_s1 + $0x54] ss:$8 sps:$4 sm:$0xff]   ;;  %v11570_v32 = vld [vmem:[%s16681_s1 + $0x40] ss:$8 sps:$4 sm:$0xff]  }
 0x2f3   : > { %v11564_v37 = vld [vmem:[%s16681_s1 + $0xd4] ss:$8 sps:$4 sm:$0xff]  }
 0x2f4   : > { %3103 = vmatpush1.bf16.msra.mxu0 %v10965_v38  ;;  %3150 = vmatpush1.bf16.msra.mxu1 %v10971_v39  ;;  %v2356_v39 = vmax.f32 %v2305_v6, %v2348_v48  ;;  %v11540_v6 = vld [vmem:[%s16681_s1 + $0xe4] ss:$8 sps:$4 sm:$0xff]   ;;  %v11546_v48 = vld [vmem:[%s16681_s1 + $0x50] ss:$8 sps:$4 sm:$0xff]  }
 0x2f5   : > { %3104 = vmatprep.subr.bf16.mxu0 %v10977_v45  ;;  %3151 = vmatprep.subr.bf16.mxu1 %v10983_v29 }
 0x2f8   : > { %3105 = vmatpush1.bf16.msra.mxu0 %v10990_v46  ;;  %3152 = vmatpush1.bf16.msra.mxu1 %v10996_v49  ;;  %v2357_v46 = vmax.f32 %v2307_v14, %v2350_v26  ;;  %v11552_v14 = vld [vmem:[%s16681_s1 + $0xe0] ss:$8 sps:$4 sm:$0xff]   ;;  %v11558_v26 = vld [vmem:[%s16681_s1 + $0x44] ss:$8 sps:$4 sm:$0xff]  }
 0x2f9   : > { %3106 = vmatprep.subr.bf16.mxu0 %v11002_v50  ;;  %3153 = vmatprep.subr.bf16.mxu1 %v11008_v35 }
 0x2fb   : > { %v2403_v34 = vpop.f32.mrf.mxu0  ;;  %v2450_v38 = vpop.f32.mrf.mxu1 }
 0x2fc   : > { %v2412_v55 = vmax.f32 %v2355_v33, %v2403_v34  ;;  %3107 = vmatpush1.bf16.msra.mxu0 %v11014_v51  ;;  %3154 = vmatpush1.bf16.msra.mxu1 %v11020_v53  ;;  %v11576_v33 = vld [vmem:[%s16681_s1 + $0xd0] ss:$8 sps:$4 sm:$0xff]   ;;  %v11582_v34 = vld [vmem:[%s16681_s1 + $0x34] ss:$8 sps:$4 sm:$0xff]  }
 0x2fd   : > { %v2405_v45 = vpop.f32.mrf.mxu0  ;;  %v2452_v29 = vpop.f32.mrf.mxu1  ;;  %3108 = vmatprep.subr.bf16.mxu0 %v11026_v54  ;;  %3155 = vmatprep.subr.bf16.mxu1 %v11032_v58 }
 0x2fe   : > { %v2459_v49 = vmax.f32 %v2412_v55, %v2450_v38  ;;  %v2413_v50 = vmax.f32 %v2356_v39, %v2405_v45  ;;  %v11588_v38 = vld [vmem:[%s16681_s1 + $0xc4] ss:$8 sps:$4 sm:$0xff]   ;;  %v11594_v39 = vld [vmem:[%s16681_s1 + $0x30] ss:$8 sps:$4 sm:$0xff]   ;;  %v11600_v55 = vld [vmem:[%s16681_s1 + $0xc0] ss:$8 sps:$4 sm:$0xff]  }
 0x2ff   : > { %v2407_v35 = vpop.f32.mrf.mxu0  ;;  %v2454_v61 = vpop.f32.mrf.mxu1  ;;  %v11606_v45 = vld [vmem:[%s16681_s1 + $0x24] ss:$8 sps:$4 sm:$0xff]  }
 0x300   : > { %v2463_v7 = vadd.f32 %v2459_v49, %v10685_v62  ;;  %v2460_v8 = vmax.f32 %v2413_v50, %v2452_v29  ;;  %v2414_v9 = vmax.f32 %v2357_v46, %v2407_v35  ;;  %3109 = vmatpush1.bf16.msra.mxu0 %v11038_v59  ;;  %3156 = vmatpush1.bf16.msra.mxu1 %v11044_v60  ;;  %v11612_v29 = vld [vmem:[%s16681_s1 + $0xb4] ss:$8 sps:$4 sm:$0xff]   ;;  %v11618_v46 = vld [vmem:[%s16681_s1 + $0x20] ss:$8 sps:$4 sm:$0xff]  }
 0x301   : > { %v2409_v51 = vpop.f32.mrf.mxu0  ;;  %3110 = vmatprep.subr.bf16.mxu0 %v11050_v40  ;;  %3157 = vmatprep.subr.bf16.mxu1 %v11056_v63  ;;  %v2456_v10 = vpop.f32.mrf.mxu1 }
 0x302   : > { %v2464_v53 = vadd.f32 %v2460_v8, %v10691_v30  ;;  %v2461_v54 = vmax.f32 %v2414_v9, %v2454_v61  ;;  %v2415_v58 = vmax.f32 %v2358_v56, %v2409_v51  ;;  %v2467_v11 = vmax.f32 %v2463_v7, 0.0 }
 0x304   : > { %v2468_v12 = vmax.f32 %v2464_v53, 0.0  ;;  %v2465_v13 = vadd.f32 %v2461_v54, %v10685_v62  ;;  %v2462_v31 = vmax.f32 %v2415_v58, %v2456_v10  ;;  %3111 = vmatpush1.bf16.msra.mxu0 %v11062_v0  ;;  %3158 = vmatpush1.bf16.msra.mxu1 %v11122_v15 }
 0x305   : > { %3112 = vmatprep.subr.bf16.mxu0 %v11128_v16  ;;  %3159 = vmatprep.subr.bf16.mxu1 %v11134_v17 }
 0x306   : > { %v9048_v59 = vpack.c.bf16 %v2468_v12, %v2467_v11  ;;  %v2466_v60 = vadd.f32 %v2462_v31, %v10691_v30  ;;  %v2469_v40 = vmax.f32 %v2465_v13, 0.0 }
 0x308   : > { %2484 = vst.msk [vmem:[#allocation2 + $0x60] sm:$0xff] %vm10703_vm8, %v9048_v59  ;;  %v2470_v63 = vmax.f32 %v2466_v60, 0.0  ;;  %3113 = vmatpush1.bf16.msra.mxu0 %v11143_v25  ;;  %3160 = vmatpush1.bf16.msra.mxu1 %v11149_v27 }
 0x309   : > { %3114 = vmatprep.subr.bf16.mxu0 %v11155_v28  ;;  %3161 = vmatprep.subr.bf16.mxu1 %v11161_v1 }
 0x30a   : > { %v9049_v0 = vpack.c.bf16 %v2470_v63, %v2469_v40 }
 0x30c   : > { %2485 = vst.msk [vmem:[#allocation2 + $0x68] sm:$0xff] %vm10703_vm8, %v9049_v0  ;;  %3115 = vmatpush1.bf16.msra.mxu0 %v11169_v2  ;;  %3162 = vmatpush1.bf16.msra.mxu1 %v11175_v42 }
 0x30d   : > { %3130 = vmatprep.subr.bf16.mxu0 %v11181_v43  ;;  %3177 = vmatprep.subr.bf16.mxu1 %v11187_v44 }
 0x310   : > { %3131 = vmatpush2.bf16.msra.mxu0 %v11193_v3  ;;  %3178 = vmatpush2.bf16.msra.mxu1 %v11199_v4 }
 0x311   : > { %3237 = vmatprep.subr.bf16.mxu0 %v11484_v20  ;;  %3280 = vmatprep.subr.bf16.mxu1 %v11490_v21 }
 0x313   : > { %3133 = vmatmul.mubr.bf16.vlgmr.msra.gmra.mxu0 %v3095_v18  ;;  %3180 = vmatmul.mubr.bf16.vlgmr.msra.gmra.mxu1 %v3095_v18  ;;  %v11669_v18 = vld [vmem:[%s16681_s1 + $0xb0] ss:$8 sps:$4 sm:$0xff]  }
 0x314   : > { %3238 = vmatpush1.bf16.msra.mxu0 %v11496_v41  ;;  %3281 = vmatpush1.bf16.msra.mxu1 %v11502_v47 }
 0x315   : > { %3239 = vmatprep.subr.bf16.mxu0 %v11508_v19  ;;  %3282 = vmatprep.subr.bf16.mxu1 %v11514_v5 }
 0x316   : > { %8772 = vmatprep.mubr.msk.bf16.mxu0 %vm710_vm0, %v3230_v24  ;;  %8773 = vmatprep.mubr.msk.bf16.mxu1 %vm710_vm0, %v3230_v24 }
 0x318   : > { %3240 = vmatpush1.bf16.msra.mxu0 %v11522_v22  ;;  %3283 = vmatpush1.bf16.msra.mxu1 %v11528_v23 }
 0x319   : > { %3241 = vmatprep.subr.bf16.mxu0 %v11534_v57  ;;  %3284 = vmatprep.subr.bf16.mxu1 %v11540_v6 }
 0x31c   : > { %3242 = vmatpush1.bf16.msra.mxu0 %v11546_v48  ;;  %3285 = vmatpush1.bf16.msra.mxu1 %v11552_v14 }
 0x31d   : > { %3243 = vmatprep.subr.bf16.mxu0 %v11558_v26  ;;  %3286 = vmatprep.subr.bf16.mxu1 %v11564_v37 }
 0x320   : > { %3244 = vmatpush1.bf16.msra.mxu0 %v11570_v32  ;;  %3287 = vmatpush1.bf16.msra.mxu1 %v11576_v33 }
 0x321   : > { %3245 = vmatprep.subr.bf16.mxu0 %v11582_v34  ;;  %3288 = vmatprep.subr.bf16.mxu1 %v11588_v38 }
 0x324   : > { %3246 = vmatpush1.bf16.msra.mxu0 %v11594_v39  ;;  %3289 = vmatpush1.bf16.msra.mxu1 %v11600_v55 }
 0x325   : > { %3247 = vmatprep.subr.bf16.mxu0 %v11606_v45  ;;  %3290 = vmatprep.subr.bf16.mxu1 %v11612_v29 }
 0x328   : > { %3248 = vmatpush1.bf16.msra.mxu0 %v11618_v46  ;;  %3291 = vmatpush1.bf16.msra.mxu1 %v11122_v15  ;;  %v3228_v15 = vpop.permute.xlu0 %3227 }
 0x329   : > { %3249 = vmatprep.subr.bf16.mxu0 %v11128_v16  ;;  %3292 = vmatprep.subr.bf16.mxu1 %v11134_v17  ;;  %v3232_v16 = vsel %vm3231_vm7, %v3228_v15, %v3230_v24  ;;  %v2540_v17 = vpop.f32.mrf.mxu0  ;;  %v11675_v24 = vld [vmem:[%s16681_s1 + $0x14] ss:$8 sps:$4 sm:$0xff]   ;;  %v11681_v15 = vld [vmem:[%s16681_s1 + $0xa4] ss:$8 sps:$4 sm:$0xff]  }
 0x32c   : > { %3250 = vmatpush1.bf16.msra.mxu0 %v11143_v25  ;;  %3293 = vmatpush1.bf16.msra.mxu1 %v11149_v27  ;;  %v2583_v25 = vpop.f32.mrf.mxu1  ;;  %v11636_v27 = vpop.permute.xlu1 %3329 }
 0x32d   : > { %3251 = vmatprep.subr.bf16.mxu0 %v11155_v28  ;;  %3294 = vmatprep.subr.bf16.mxu1 %v11161_v1  ;;  %v2542_v28 = vpop.f32.mrf.mxu0 }
 0x32e   : > { %v2585_v1 = vpop.f32.mrf.mxu1 }
 0x32f   : > { %v2593_v50 = vmax.f32 %v2542_v28, %v2585_v1  ;;  %v11690_v1 = vld [vmem:[%s16681_s1 + $0x10] ss:$8 sps:$4 sm:$0xff]  }
 0x330   : > { %3252 = vmatpush1.bf16.msra.mxu0 %v11169_v2  ;;  %3295 = vmatpush1.bf16.msra.mxu1 %v11175_v42  ;;  %v2544_v2 = vpop.f32.mrf.mxu0  ;;  %v2587_v42 = vpop.f32.mrf.mxu1 }
 0x331   : > { %3267 = vmatprep.subr.bf16.mxu0 %v11181_v43  ;;  %3310 = vmatprep.subr.bf16.mxu1 %v11187_v44  ;;  %v2594_v7 = vmax.f32 %v2544_v2, %v2587_v42  ;;  %v11696_v2 = vld [vmem:[%s16681_s1 + $0xa0] ss:$8 sps:$4 sm:$0xff]   ;;  %v11702_v42 = vld [vmem:[%s16681_s1 + $0x4] ss:$8 sps:$4 sm:$0xff]  }
 0x332   : > { %v2546_v43 = vpop.f32.mrf.mxu0  ;;  %v2589_v44 = vpop.f32.mrf.mxu1 }
 0x333   : > { %v2595_v51 = vmax.f32 %v2546_v43, %v2589_v44  ;;  %v11708_v43 = vld [vmem:[%s16681_s1 + $0x94] ss:$8 sps:$4 sm:$0xff]  }
 0x334   : > { %3268 = vmatpush2.bf16.msra.mxu0 %v11193_v3  ;;  %3311 = vmatpush2.bf16.msra.mxu1 %v11199_v4  ;;  %v2592_v3 = vmax.f32 %v2540_v17, %v2583_v25 }
 0x335   : > { %3337 = vmatprep.subr.bf16.mxu0 %v11484_v20  ;;  %3384 = vmatprep.subr.bf16.mxu1 %v11490_v21 }
 0x337   : > { %3270 = vmatmul.mubr.bf16.vlgmr.msra.gmra.mxu0 %v3232_v16  ;;  %3313 = vmatmul.mubr.bf16.vlgmr.msra.gmra.mxu1 %v3232_v16 }
 0x338   : > { %3338 = vmatpush1.bf16.msra.mxu0 %v11496_v41  ;;  %3385 = vmatpush1.bf16.msra.mxu1 %v11502_v47 }
 0x339   : > { %3339 = vmatprep.subr.bf16.mxu0 %v11508_v19  ;;  %3386 = vmatprep.subr.bf16.mxu1 %v11514_v5 }
 0x33a   : > { %8774 = vmatprep.mubr.msk.bf16.mxu0 %vm710_vm0, %v11636_v27  ;;  %8775 = vmatprep.mubr.msk.bf16.mxu1 %vm710_vm0, %v11636_v27 }
 0x33c   : > { %3340 = vmatpush1.bf16.msra.mxu0 %v11522_v22  ;;  %3387 = vmatpush1.bf16.msra.mxu1 %v11528_v23 }
 0x33d   : > { %3341 = vmatprep.subr.bf16.mxu0 %v11534_v57  ;;  %3388 = vmatprep.subr.bf16.mxu1 %v11540_v6 }
 0x340   : > { %3342 = vmatpush1.bf16.msra.mxu0 %v11546_v48  ;;  %3389 = vmatpush1.bf16.msra.mxu1 %v11552_v14 }
 0x341   : > { %3343 = vmatprep.subr.bf16.mxu0 %v11558_v26  ;;  %3390 = vmatprep.subr.bf16.mxu1 %v11564_v37 }
 0x343   : > { %v2640_v4 = vpop.f32.mrf.mxu0  ;;  %v2687_v49 = vpop.f32.mrf.mxu1 }
 0x344   : > { %v2649_v56 = vmax.f32 %v2592_v3, %v2640_v4  ;;  %3344 = vmatpush1.bf16.msra.mxu0 %v11570_v32  ;;  %3391 = vmatpush1.bf16.msra.mxu1 %v11576_v33  ;;  %v11716_v3 = vld [vmem:[%s16681_s1] ss:$8 sps:$4 sm:$0xff]   ;;  %v11722_v4 = vld [vmem:[%s16681_s1 + $0x90] ss:$8 sps:$4 sm:$0xff]  }
 0x345   : > { %v2642_v35 = vpop.f32.mrf.mxu0  ;;  %v2689_v61 = vpop.f32.mrf.mxu1  ;;  %3345 = vmatprep.subr.bf16.mxu0 %v11582_v34  ;;  %3392 = vmatprep.subr.bf16.mxu1 %v11588_v38 }
 0x346   : > { %v2696_v8 = vmax.f32 %v2649_v56, %v2687_v49  ;;  %v2650_v9 = vmax.f32 %v2593_v50, %v2642_v35  ;;  %v11728_v49 = vld [vmem:[%s16681_s1 + $0x84] ss:$8 sps:$4 sm:$0xff]   ;;  %v11734_v50 = vld [vmem:[%s16681_s1 + $0x114] ss:$8 sps:$4 sm:$0xff]   ;;  %v3328_v56 = vpop.permute.xlu0 %3327  ;;  %v11740_v35 = vld [vmem:[%s16681_s1 + $0x80] ss:$8 sps:$4 sm:$0xff]  }
 0x347   : > { %v2644_v53 = vpop.f32.mrf.mxu0  ;;  %v2691_v54 = vpop.f32.mrf.mxu1 }
 0x348   : > { %v2700_v58 = vadd.f32 %v2696_v8, %v10685_v62  ;;  %v2697_v10 = vmax.f32 %v2650_v9, %v2689_v61  ;;  %v2651_v11 = vmax.f32 %v2594_v7, %v2644_v53  ;;  %3346 = vmatpush1.bf16.msra.mxu0 %v11594_v39  ;;  %3393 = vmatpush1.bf16.msra.mxu1 %v11600_v55  ;;  %v11746_v61 = vld [vmem:[%s16681_s1 + $0x110] ss:$8 sps:$4 sm:$0xff]   ;;  %v3467_v8 = vpop.permute.xlu1 %3466 }
 0x349   : > { %v2646_v12 = vpop.f32.mrf.mxu0  ;;  %3347 = vmatprep.subr.bf16.mxu0 %v11606_v45  ;;  %3394 = vmatprep.subr.bf16.mxu1 %v11612_v29  ;;  %v2693_v60 = vpop.f32.mrf.mxu1  ;;  %v3332_v7 = vsel %vm3331_vm9, %v3328_v56, %v11636_v27  ;;  %v9251_v56 = vld [vmem:[%s16682_s2 + $0x70] sm:$0xff]  }
 0x34a   : > { %v2701_v13 = vadd.f32 %v2697_v10, %v10691_v30  ;;  %v2698_v31 = vmax.f32 %v2651_v11, %v2691_v54  ;;  %v2652_v59 = vmax.f32 %v2595_v51, %v2646_v12  ;;  %v2704_v40 = vmax.f32 %v2700_v58, 0.0  ;;  %v3465_v27 = vpop.permute.xlu0 %3464 }
 0x34b   : > { %v3469_v9 = vsel %vm3468_vm10, %v3465_v27, %v3467_v8  ;;  %v9256_v27 = vld [vmem:[%s16682_s2] sm:$0xff]  }
 0x34c   : > { %v2705_v63 = vmax.f32 %v2701_v13, 0.0  ;;  %v2702_v0 = vadd.f32 %v2698_v31, %v10685_v62  ;;  %v2699_v36 = vmax.f32 %v2652_v59, %v2693_v60  ;;  %3348 = vmatpush1.bf16.msra.mxu0 %v11618_v46  ;;  %3395 = vmatpush1.bf16.msra.mxu1 %v11669_v18  ;;  %v11790_v54 = vpop.permute.xlu1 %3576 }
 0x34d   : > { %3349 = vmatprep.subr.bf16.mxu0 %v11675_v24  ;;  %3396 = vmatprep.subr.bf16.mxu1 %v11681_v15 }
 0x34e   : > { %v9050_v16 = vpack.c.bf16 %v2705_v63, %v2704_v40  ;;  %v2703_v17 = vadd.f32 %v2699_v36, %v10691_v30  ;;  %v2706_v25 = vmax.f32 %v2702_v0, 0.0 }
 0x350   : > { %2721 = vst.msk [vmem:[#allocation2 + $0x70] sm:$0xff] %vm10703_vm8, %v9050_v16  ;;  %v2707_v28 = vmax.f32 %v2703_v17, 0.0  ;;  %3350 = vmatpush1.bf16.msra.mxu0 %v11690_v1  ;;  %3397 = vmatpush1.bf16.msra.mxu1 %v11696_v2  ;;  %v16737_v17 = vmov 0  }
 0x351   : > { %3351 = vmatprep.subr.bf16.mxu0 %v11702_v42  ;;  %3398 = vmatprep.subr.bf16.mxu1 %v11708_v43 }
 0x352   : > { %v9051_v44 = vpack.c.bf16 %v2707_v28, %v2706_v25  ;;  %v9240_v25 = vld [vmem:[%s16682_s2 + $0x38] sm:$0xff]  }
 0x353   : > { %v11847_v28 = vld [vmem:[#allocation2 + $0x14] ss:$8 sps:$4 sm:$0xff]  }
 0x354   : > { %2722 = vst.msk [vmem:[#allocation2 + $0x78] sm:$0xff] %vm10703_vm8, %v9051_v44  ;;  %3352 = vmatpush1.bf16.msra.mxu0 %v11716_v3  ;;  %3399 = vmatpush1.bf16.msra.mxu1 %v11722_v4  ;;  %v9246_v44 = vld [vmem:[%s16682_s2 + $0x28] sm:$0xff]  }
 0x355   : > { %3367 = vmatprep.subr.bf16.mxu0 %v11728_v49  ;;  %3414 = vmatprep.subr.bf16.mxu1 %v11734_v50 }
 0x358   : > { %3368 = vmatpush2.bf16.msra.mxu0 %v11740_v35  ;;  %3415 = vmatpush2.bf16.msra.mxu1 %v11746_v61 }
 0x359   : > { %3474 = vmatprep.subr.bf16.mxu0 %v11484_v20  ;;  %3517 = vmatprep.subr.bf16.mxu1 %v11490_v21 }
 0x35b   : > { %3370 = vmatmul.mubr.bf16.vlgmr.msra.gmra.mxu0 %v3332_v7  ;;  %3417 = vmatmul.mubr.bf16.vlgmr.msra.gmra.mxu1 %v3332_v7  ;;  %v9254_v7 = vld [vmem:[%s16682_s2 + $0x8] sm:$0xff]  }
 0x35c   : > { %3475 = vmatpush1.bf16.msra.mxu0 %v11496_v41  ;;  %3518 = vmatpush1.bf16.msra.mxu1 %v11502_v47 }
 0x35d   : > { %3476 = vmatprep.subr.bf16.mxu0 %v11508_v19  ;;  %3519 = vmatprep.subr.bf16.mxu1 %v11514_v5 }
 0x35e   : > { %8780 = vmatprep.mubr.msk.bf16.mxu0 %vm710_vm0, %v3467_v8  ;;  %8781 = vmatprep.mubr.msk.bf16.mxu1 %vm710_vm0, %v3467_v8  ;;  %v9255_v8 = vld [vmem:[%s16682_s2 + $0x60] sm:$0xff]  }
 0x360   : > { %3477 = vmatpush1.bf16.msra.mxu0 %v11522_v22  ;;  %3520 = vmatpush1.bf16.msra.mxu1 %v11528_v23 }
 0x361   : > { %3478 = vmatprep.subr.bf16.mxu0 %v11534_v57  ;;  %3521 = vmatprep.subr.bf16.mxu1 %v11540_v6 }
 0x364   : > { %3479 = vmatpush1.bf16.msra.mxu0 %v11546_v48  ;;  %3522 = vmatpush1.bf16.msra.mxu1 %v11552_v14 }
 0x365   : > { %3480 = vmatprep.subr.bf16.mxu0 %v11558_v26  ;;  %3523 = vmatprep.subr.bf16.mxu1 %v11564_v37 }
 0x367   : > { %v2777_v51 = vpop.f32.mrf.mxu0  ;;  %v2820_v53 = vpop.f32.mrf.mxu1 }
 0x368   : > { %3481 = vmatpush1.bf16.msra.mxu0 %v11570_v32  ;;  %3524 = vmatpush1.bf16.msra.mxu1 %v11576_v33 }
 0x369   : > { %3482 = vmatprep.subr.bf16.mxu0 %v11582_v34  ;;  %3525 = vmatprep.subr.bf16.mxu1 %v11588_v38  ;;  %v2779_v58 = vpop.f32.mrf.mxu0  ;;  %v2822_v10 = vpop.f32.mrf.mxu1 }
 0x36c   : > { %3483 = vmatpush1.bf16.msra.mxu0 %v11594_v39  ;;  %3526 = vmatpush1.bf16.msra.mxu1 %v11600_v55 }
 0x36d   : > { %3484 = vmatprep.subr.bf16.mxu0 %v11606_v45  ;;  %3527 = vmatprep.subr.bf16.mxu1 %v11612_v29 }
 0x370   : > { %3485 = vmatpush1.bf16.msra.mxu0 %v11618_v46  ;;  %3528 = vmatpush1.bf16.msra.mxu1 %v11669_v18 }
 0x371   : > { %3486 = vmatprep.subr.bf16.mxu0 %v11675_v24  ;;  %3529 = vmatprep.subr.bf16.mxu1 %v11681_v15 }
 0x374   : > { %3487 = vmatpush1.bf16.msra.mxu0 %v11690_v1  ;;  %3530 = vmatpush1.bf16.msra.mxu1 %v11696_v2 }
 0x375   : > { %3488 = vmatprep.subr.bf16.mxu0 %v11702_v42  ;;  %3531 = vmatprep.subr.bf16.mxu1 %v11708_v43 }
 0x378   : > { %3489 = vmatpush1.bf16.msra.mxu0 %v11716_v3  ;;  %3532 = vmatpush1.bf16.msra.mxu1 %v11722_v4 }
 0x379   : > { %3504 = vmatprep.subr.bf16.mxu0 %v11728_v49  ;;  %3547 = vmatprep.subr.bf16.mxu1 %v11734_v50 }
 0x37c   : > { %3505 = vmatpush2.bf16.msra.mxu0 %v11740_v35  ;;  %3548 = vmatpush2.bf16.msra.mxu1 %v11746_v61 }
 0x37d   : > { %3584 = vmatprep.subr.bf16.mxu0 %v11484_v20  ;;  %3631 = vmatprep.subr.bf16.mxu1 %v11490_v21  ;;  %v2781_v20 = vpop.f32.mrf.mxu0  ;;  %v2824_v21 = vpop.f32.mrf.mxu1 }
 0x37f   : > { %3507 = vmatmul.mubr.bf16.vlgmr.msra.gmra.mxu0 %v3469_v9  ;;  %3550 = vmatmul.mubr.bf16.vlgmr.msra.gmra.mxu1 %v3469_v9  ;;  %v9257_v9 = vld [vmem:[%s16682_s2 + $0xb8] sm:$0xff]  }
 0x380   : > { %3585 = vmatpush1.bf16.msra.mxu0 %v11496_v41  ;;  %3632 = vmatpush1.bf16.msra.mxu1 %v11502_v47  ;;  %v2783_v41 = vpop.f32.mrf.mxu0  ;;  %v2826_v47 = vpop.f32.mrf.mxu1 }
 0x381   : > { %3586 = vmatprep.subr.bf16.mxu0 %v11508_v19  ;;  %3633 = vmatprep.subr.bf16.mxu1 %v11514_v5  ;;  %v2829_v19 = vmax.f32 %v2777_v51, %v2820_v53  ;;  %v2832_v12 = vmax.f32 %v2783_v41, %v2826_v47  ;;  %v9258_v51 = vld [vmem:[%s16682_s2 + $0x58] sm:$0xff]   ;;  %v9259_v53 = vld [vmem:[%s16682_s2 + $0xb0] sm:$0xff]   ;;  %v11939_v47 = vld [vmem:[%s16682_s2 + $0x48] sm:$0xff]  }
 0x382   : > { %8784 = vmatprep.mubr.msk.bf16.mxu0 %vm710_vm0, %v11790_v54  ;;  %8785 = vmatprep.mubr.msk.bf16.mxu1 %vm710_vm0, %v11790_v54  ;;  %vm3578_vm0 = vcmask 1014784  }
 0x384   : > { %3587 = vmatpush1.bf16.msra.mxu0 %v11522_v22  ;;  %3634 = vmatpush1.bf16.msra.mxu1 %v11528_v23  ;;  %v2830_v23 = vmax.f32 %v2779_v58, %v2822_v10  ;;  %v11926_v10 = vld [vmem:[%s16682_s2 + $0x50] sm:$0xff]  }
 0x385   : > { %3588 = vmatprep.subr.bf16.mxu0 %v11534_v57  ;;  %3635 = vmatprep.subr.bf16.mxu1 %v11540_v6 }
 0x388   : > { %3589 = vmatpush1.bf16.msra.mxu0 %v11546_v48  ;;  %3636 = vmatpush1.bf16.msra.mxu1 %v11552_v14  ;;  %v2831_v48 = vmax.f32 %v2781_v20, %v2824_v21  ;;  %v11932_v20 = vld [vmem:[%s16682_s2 + $0xa8] sm:$0xff]  }
 0x389   : > { %3590 = vmatprep.subr.bf16.mxu0 %v11558_v26  ;;  %3637 = vmatprep.subr.bf16.mxu1 %v11564_v37 }
 0x38b   : > { %v2877_v5 = vpop.f32.mrf.mxu0  ;;  %v2924_v22 = vpop.f32.mrf.mxu1 }
 0x38c   : > { %v2886_v11 = vmax.f32 %v2829_v19, %v2877_v5  ;;  %3591 = vmatpush1.bf16.msra.mxu0 %v11570_v32  ;;  %3638 = vmatpush1.bf16.msra.mxu1 %v11576_v33  ;;  %v11946_v19 = vld [vmem:[%s16682_s2 + $0xa0] sm:$0xff]  }
 0x38d   : > { %v2879_v57 = vpop.f32.mrf.mxu0  ;;  %v2926_v6 = vpop.f32.mrf.mxu1  ;;  %3592 = vmatprep.subr.bf16.mxu0 %v11582_v34  ;;  %3639 = vmatprep.subr.bf16.mxu1 %v11588_v38 }
 0x38e   : > { %v2933_v14 = vmax.f32 %v2886_v11, %v2924_v22  ;;  %v2887_v26 = vmax.f32 %v2830_v23, %v2879_v57  ;;  %v11953_v23 = vld [vmem:[%s16682_s2 + $0x40] sm:$0xff]   ;;  %v11960_v11 = vld [vmem:[%s16682_s2 + $0xf8] sm:$0xff]  }
 0x38f   : > { %v2881_v37 = vpop.f32.mrf.mxu0  ;;  %v2928_v13 = vpop.f32.mrf.mxu1 }
 0x390   : > { %v2937_v31 = vadd.f32 %v2933_v14, %v10685_v62  ;;  %v2934_v59 = vmax.f32 %v2887_v26, %v2926_v6  ;;  %v2888_v60 = vmax.f32 %v2831_v48, %v2881_v37  ;;  %3593 = vmatpush1.bf16.msra.mxu0 %v11594_v39  ;;  %3640 = vmatpush1.bf16.msra.mxu1 %v11600_v55  ;;  %v11963_v48 = vld [vmem:[#allocation2 + $0x10] ss:$8 sps:$4 sm:$0xff]  }
 0x391   : > { %v2883_v32 = vpop.f32.mrf.mxu0  ;;  %3594 = vmatprep.subr.bf16.mxu0 %v11606_v45  ;;  %3641 = vmatprep.subr.bf16.mxu1 %v11612_v29  ;;  %v2930_v40 = vpop.f32.mrf.mxu1  ;;  %v11969_v14 = vld [vmem:[%s16682_s2 + $0x158] sm:$0xff]  }
 0x392   : > { %v2938_v33 = vadd.f32 %v2934_v59, %v10691_v30  ;;  %v2935_v34 = vmax.f32 %v2888_v60, %v2928_v13  ;;  %v2889_v38 = vmax.f32 %v2832_v12, %v2883_v32  ;;  %v2941_v63 = vmax.f32 %v2937_v31, 0.0  ;;  %v11971_v12 = vld [vmem:[#allocation2] ss:$8 sps:$4 sm:$0xff]   ;;  %v11975_v31 = vld [vmem:[#allocation2 + $0x24] ss:$8 sps:$4 sm:$0xff]  }
 0x393   : > { %v11979_v32 = vld [vmem:[#allocation2 + $0x34] ss:$8 sps:$4 sm:$0xff]  }
 0x394   : > { %v2942_v0 = vmax.f32 %v2938_v33, 0.0  ;;  %v2939_v36 = vadd.f32 %v2935_v34, %v10685_v62  ;;  %v2936_v16 = vmax.f32 %v2889_v38, %v2930_v40  ;;  %3595 = vmatpush1.bf16.msra.mxu0 %v11618_v46  ;;  %3642 = vmatpush1.bf16.msra.mxu1 %v11669_v18  ;;  %v3575_v18 = vpop.permute.xlu0 %3574  ;;  %v11984_v33 = vld [vmem:[%s16682_s2 + $0xf0] sm:$0xff]  }
 0x395   : > { %3596 = vmatprep.subr.bf16.mxu0 %v11675_v24  ;;  %3643 = vmatprep.subr.bf16.mxu1 %v11681_v15  ;;  %v3579_v24 = vsel %vm3578_vm0, %v3575_v18, %v11790_v54  ;;  %v9237_v15 = vld [vmem:[%s16682_s2 + $0x98] sm:$0xff]   ;;  %v11992_v40 = vld [vmem:[%s16682_s2 + $0x150] sm:$0xff]   ;;  %v12003_v18 = vld [vmem:[%s16682_s2 + $0xe8] sm:$0xff]  }
 0x396   : > { %v9052_v39 = vpack.c.bf16 %v2942_v0, %v2941_v63  ;;  %v2940_v55 = vadd.f32 %v2936_v16, %v10691_v30  ;;  %v2943_v45 = vmax.f32 %v2939_v36, 0.0 }
 0x398   : > { %2958 = vst.msk [vmem:[#allocation2 + $0x80] sm:$0xff] %vm10703_vm8, %v9052_v39  ;;  %v2944_v29 = vmax.f32 %v2940_v55, 0.0  ;;  %3597 = vmatpush1.bf16.msra.mxu0 %v11690_v1  ;;  %3644 = vmatpush1.bf16.msra.mxu1 %v11696_v2  ;;  %v11849_v1 = vld [vmem:[#allocation2 + $0x4] ss:$8 sps:$4 sm:$0xff]   ;;  %v9243_v2 = vld [vmem:[%s16682_s2 + $0x90] sm:$0xff]  }
 0x399   : > { %3598 = vmatprep.subr.bf16.mxu0 %v11702_v42  ;;  %3645 = vmatprep.subr.bf16.mxu1 %v11708_v43  ;;  %v9244_v42 = vld [vmem:[%s16682_s2 + $0x30] sm:$0xff]   ;;  %v9245_v43 = vld [vmem:[%s16682_s2 + $0x88] sm:$0xff]  }
 0x39a   : > { %v9053_v46 = vpack.c.bf16 %v2944_v29, %v2943_v45 }
 0x39c   : > { %2959 = vst.msk [vmem:[#allocation2 + $0x88] sm:$0xff] %vm10703_vm8, %v9053_v46  ;;  %3599 = vmatpush1.bf16.msra.mxu0 %v11716_v3  ;;  %3646 = vmatpush1.bf16.msra.mxu1 %v11722_v4  ;;  %v9247_v3 = vld [vmem:[%s16682_s2 + $0x80] sm:$0xff]  }
 0x39d   : > { %3614 = vmatprep.subr.bf16.mxu0 %v11728_v49  ;;  %3661 = vmatprep.subr.bf16.mxu1 %v11734_v50  ;;  %v9248_v4 = vld [vmem:[%s16682_s2 + $0x20] sm:$0xff]   ;;  %v9249_v49 = vld [vmem:[%s16682_s2 + $0x78] sm:$0xff]  }
 0x39e   : > { %v9250_v50 = vld [vmem:[%s16682_s2 + $0x18] sm:$0xff]  }
 0x3a0   : > { %3615 = vmatpush2.bf16.msra.mxu0 %v11740_v35  ;;  %3662 = vmatpush2.bf16.msra.mxu1 %v11746_v61  ;;  %v9252_v35 = vld [vmem:[%s16682_s2 + $0x10] sm:$0xff]   ;;  %v9253_v61 = vld [vmem:[%s16682_s2 + $0x68] sm:$0xff]  }
 0x3a1   : > { %3790 = vmatprep.subr.bf16.mxu0 %v16737_v17  ;;  %3915 = vmatprep.subr.bf16.mxu1 %v16737_v17 }
 0x3a3   : > { %3617 = vmatmul.mubr.bf16.vlgmr.msra.gmra.mxu0 %v3579_v24  ;;  %3664 = vmatmul.mubr.bf16.vlgmr.msra.gmra.mxu1 %v3579_v24 }
 0x3a4   : > { %3791 = vmatpush1.bf16.msra.mxu0 %v9237_v15  ;;  %8802 = vmatprep.mubr.msk.bf16.mxu0 %vm2737_vm3, %v11847_v28  ;;  %v12010_v15 = vld [vmem:[%s16682_s2 + $0x148] sm:$0xff]  }
 0x3a5   : > { %3916 = vmatpush1.bf16.msra.mxu1 %v9240_v25  ;;  %8817 = vmatprep.mubr.msk.bf16.mxu1 %vm2737_vm3, %v11849_v1 }
 0x3a6   : > { %3792 = vmatprep.subr.bf16.mxu0 %v16737_v17  ;;  %3917 = vmatprep.subr.bf16.mxu1 %v16737_v17 }
 0x3a8   : > { %3793 = vmatpush1.bf16.msra.mxu0 %v9243_v2 }
 0x3a9   : > { %3918 = vmatpush1.bf16.msra.mxu1 %v9244_v42  ;;  %3794 = vmatprep.subr.bf16.mxu0 %v16737_v17 }
 0x3aa   : > { %3919 = vmatprep.subr.bf16.mxu1 %v16737_v17 }
 0x3ac   : > { %3795 = vmatpush1.bf16.msra.mxu0 %v9245_v43 }
 0x3ad   : > { %3920 = vmatpush1.bf16.msra.mxu1 %v9246_v44  ;;  %3796 = vmatprep.subr.bf16.mxu0 %v16737_v17 }
 0x3ae   : > { %3921 = vmatprep.subr.bf16.mxu1 %v16737_v17 }
 0x3af   : > { %v3024_v54 = vpop.f32.mrf.mxu0  ;;  %v3067_v58 = vpop.f32.mrf.mxu1 }
 0x3b0   : > { %3797 = vmatpush1.bf16.msra.mxu0 %v9247_v3  ;;  %v3076_v26 = vmax.f32 %v3024_v54, %v3067_v58  ;;  %v12059_v54 = vld [vmem:[%s16682_s2 + $0x130] sm:$0xff]   ;;  %v12066_v58 = vld [vmem:[%s16682_s2 + $0xc8] sm:$0xff]  }
 0x3b1   : > { %3922 = vmatpush1.bf16.msra.mxu1 %v9248_v4  ;;  %3798 = vmatprep.subr.bf16.mxu0 %v16737_v17  ;;  %v3026_v21 = vpop.f32.mrf.mxu0  ;;  %v3069_v41 = vpop.f32.mrf.mxu1 }
 0x3b2   : > { %3923 = vmatprep.subr.bf16.mxu1 %v16737_v17  ;;  %v3077_v59 = vmax.f32 %v3026_v21, %v3069_v41  ;;  %v12073_v21 = vld [vmem:[%s16682_s2 + $0x128] sm:$0xff]   ;;  %v12080_v41 = vld [vmem:[%s16682_s2 + $0xc0] sm:$0xff]  }
 0x3b3   : > { %v3028_v5 = vpop.f32.mrf.mxu0  ;;  %v3071_v22 = vpop.f32.mrf.mxu1 }
 0x3b4   : > { %3799 = vmatpush1.bf16.msra.mxu0 %v9249_v49  ;;  %v3078_v63 = vmax.f32 %v3028_v5, %v3071_v22  ;;  %v12087_v5 = vld [vmem:[%s16682_s2 + $0x120] sm:$0xff]   ;;  %v12094_v22 = vld [vmem:[%s16682_s2 + $0x118] sm:$0xff]  }
 0x3b5   : > { %3924 = vmatpush1.bf16.msra.mxu1 %v9250_v50  ;;  %3800 = vmatprep.subr.bf16.mxu0 %v16737_v17  ;;  %v3030_v57 = vpop.f32.mrf.mxu0  ;;  %v3073_v6 = vpop.f32.mrf.mxu1  ;;  %v12019_v50 = vld [vmem:[%s16682_s2 + $0xe0] sm:$0xff]  }
 0x3b6   : > { %3925 = vmatprep.subr.bf16.mxu1 %v16737_v17  ;;  %v3079_v55 = vmax.f32 %v3030_v57, %v3073_v6  ;;  %v12101_v57 = vld [vmem:[%s16682_s2 + $0x178] sm:$0xff]   ;;  %v12108_v6 = vld [vmem:[%s16682_s2 + $0x110] sm:$0xff]  }
 0x3b8   : > { %3801 = vmatpush1.bf16.msra.mxu0 %v9251_v56  ;;  %v12026_v56 = vld [vmem:[%s16682_s2 + $0x140] sm:$0xff]  }
 0x3b9   : > { %3926 = vmatpush1.bf16.msra.mxu1 %v9252_v35  ;;  %3802 = vmatprep.subr.bf16.mxu0 %v16737_v17 }
 0x3ba   : > { %3927 = vmatprep.subr.bf16.mxu1 %v16737_v17 }
 0x3bc   : > { %3803 = vmatpush1.bf16.msra.mxu0 %v9253_v61 }
 0x3bd   : > { %3928 = vmatpush1.bf16.msra.mxu1 %v9254_v7  ;;  %3804 = vmatprep.subr.bf16.mxu0 %v16737_v17 }
 0x3be   : > { %3929 = vmatprep.subr.bf16.mxu1 %v16737_v17 }
 0x3c0   : > { %3805 = vmatpush1.bf16.msra.mxu0 %v9255_v8 }
 0x3c1   : > { %3930 = vmatpush1.bf16.msra.mxu1 %v9256_v27  ;;  %3814 = vmatprep.subr.bf16.mxu0 %v16737_v17  ;;  %v12036_v27 = vld [vmem:[%s16682_s2 + $0xd8] sm:$0xff]  }
 0x3c2   : > { %3939 = vmatprep.subr.bf16.mxu1 %v16737_v17 }
 0x3c4   : > { %3815 = vmatpush2.bf16.msra.mxu0 %v9257_v9  ;;  %v12043_v9 = vld [vmem:[%s16682_s2 + $0x138] sm:$0xff]  }
 0x3c5   : > { %3940 = vmatpush2.bf16.msra.mxu1 %v9258_v51  ;;  %3816 = vmatprep.subr.bf16.mxu0 %v16737_v17 }
 0x3c6   : > { %3941 = vmatprep.subr.bf16.mxu1 %v16737_v17 }
 0x3c8   : > { %3817 = vmatpush2.bf16.msra.mxu0 %v9259_v53  ;;  %v12052_v53 = vld [vmem:[%s16682_s2 + $0xd0] sm:$0xff]  }
 0x3c9   : > { %3942 = vmatpush2.bf16.msra.mxu1 %v11926_v10  ;;  %3818 = vmatprep.subr.bf16.mxu0 %v16737_v17 }
 0x3ca   : > { %3943 = vmatprep.subr.bf16.mxu1 %v16737_v17 }
 0x3cc   : > { %3819 = vmatpush2.bf16.msra.mxu0 %v11932_v20 }
 0x3cd   : > { %3944 = vmatpush2.bf16.msra.mxu1 %v11939_v47  ;;  %3820 = vmatprep.subr.bf16.mxu0 %v16737_v17 }
 0x3ce   : > { %3945 = vmatprep.subr.bf16.mxu1 %v16737_v17 }
 0x3d0   : > { %3821 = vmatpush2.bf16.msra.mxu0 %v11946_v19 }
 0x3d1   : > { %3946 = vmatpush2.bf16.msra.mxu1 %v11953_v23  ;;  %4042 = vmatprep.subr.bf16.mxu0 %v16737_v17 }
 0x3d2   : > { %4171 = vmatprep.subr.bf16.mxu1 %v16737_v17 }
 0x3d3   : > { %v3134_v37 = vpop.f32.mrf.mxu0  ;;  %v3181_v13 = vpop.f32.mrf.mxu1  ;;  %3823 = vmatmul.mubr.bf16.vlgmr.msra.gmra.mxu0 %v11963_v48 }
 0x3d4   : > { %v3143_v60 = vmax.f32 %v3076_v26, %v3134_v37  ;;  %3948 = vmatmul.mubr.bf16.vlgmr.msra.gmra.mxu1 %v11971_v12  ;;  %4043 = vmatpush1.bf16.msra.mxu0 %v11960_v11  ;;  %v12115_v26 = vld [vmem:[%s16682_s2 + $0x170] sm:$0xff]   ;;  %v12122_v37 = vld [vmem:[%s16682_s2 + $0x108] sm:$0xff]  }
 0x3d5   : > { %8832 = vmatprep.mubr.msk.bf16.mxu0 %vm2737_vm3, %v11975_v31  ;;  %4172 = vmatpush1.bf16.msra.mxu1 %v11969_v14  ;;  %v3136_v34 = vpop.f32.mrf.mxu0  ;;  %v3183_v38 = vpop.f32.mrf.mxu1 }
 0x3d6   : > { %v3190_v0 = vmax.f32 %v3143_v60, %v3181_v13  ;;  %8847 = vmatprep.mubr.msk.bf16.mxu1 %vm2737_vm3, %v11979_v32  ;;  %v3144_v36 = vmax.f32 %v3077_v59, %v3136_v34  ;;  %4044 = vmatprep.subr.bf16.mxu0 %v16737_v17  ;;  %v12129_v13 = vld [vmem:[%s16682_s2 + $0x168] sm:$0xff]   ;;  %v12136_v59 = vld [vmem:[%s16682_s2 + $0x100] sm:$0xff]  }
 0x3d7   : > { %v3138_v16 = vpop.f32.mrf.mxu0  ;;  %v3185_v39 = vpop.f32.mrf.mxu1  ;;  %4173 = vmatprep.subr.bf16.mxu1 %v16737_v17  ;;  %v12143_v60 = vld [vmem:[%s16682_s2 + $0x160] sm:$0xff]   ;;  %v3957_v34 = vld [vmem:[#allocation2 + $0x28] sm:$0xff] }
 0x3d8   : > { %v3194_v45 = vadd.f32 %v3190_v0, %v10685_v62  ;;  %v3191_v29 = vmax.f32 %v3144_v36, %v3183_v38  ;;  %v3145_v46 = vmax.f32 %v3078_v63, %v3138_v16  ;;  %4045 = vmatpush1.bf16.msra.mxu0 %v11984_v33  ;;  %v4086_v38 = vld [vmem:[#allocation2 + $0x38] sm:$0xff]  ;;  %v12146_v63 = vld [vmem:[#allocation2 + $0x48] sm:$0xff]  ;;  %v3956_v0 = vld [vmem:[#allocation2 + $0x20] sm:$0xff] }
 0x3d9   : > { %4174 = vmatpush1.bf16.msra.mxu1 %v11992_v40  ;;  %v3140_v24 = vpop.f32.mrf.mxu0  ;;  %4046 = vmatprep.subr.bf16.mxu0 %v16737_v17  ;;  %v3187_v43 = vpop.f32.mrf.mxu1  ;;  %v12152_v36 = vld [vmem:[%s16682_s2 + $0x1b8] sm:$0xff]   ;;  %v4085_v16 = vld [vmem:[#allocation2 + $0x30] sm:$0xff] }
 0x3da   : > { %v3195_v25 = vadd.f32 %v3191_v29, %v10691_v30  ;;  %v3192_v2 = vmax.f32 %v3145_v46, %v3185_v39  ;;  %v3146_v42 = vmax.f32 %v3079_v55, %v3140_v24  ;;  %4175 = vmatprep.subr.bf16.mxu1 %v16737_v17  ;;  %v3198_v44 = vmax.f32 %v3194_v45, 0.0  ;;  %16902 = vst [vmem:[#allocation3_spill] sm:$0xff] %v12152_v36  ;;  %v12161_v55 = vld [vmem:[%s16682_s2 + $0x278] sm:$0xff]   ;;  %v12163_v45 = vld [vmem:[#allocation2 + $0x40] sm:$0xff]  ;;  %v12178_v24 = vld [vmem:[%s16682_s2 + $0x1b0] sm:$0xff]  }
 0x3db   : > { %v12155_v39 = vcombine.low %v3956_v0, %v3957_v34  ;;  %16903 = vst [vmem:[#allocation4_spill] sm:$0xff] %v12161_v55  ;;  %v12165_v29 = vcombine.low %v4085_v16, %v4086_v38  ;;  %v12170_v46 = vcombine.high %v12163_v45, %v12146_v63  ;;  %16904 = vst [vmem:[#allocation5_spill] sm:$0xff] %v12178_v24  ;;  %v12245_v34 = vld [vmem:[%s16682_s2 + $0x250] sm:$0xff]   ;;  %v12252_v38 = vld [vmem:[%s16682_s2 + $0x188] sm:$0xff]  }
 0x3dc   : > { %v3199_v3 = vmax.f32 %v3195_v25, 0.0  ;;  %v3196_v4 = vadd.f32 %v3192_v2, %v10685_v62  ;;  %v3193_v49 = vmax.f32 %v3146_v42, %v3187_v43  ;;  %4047 = vmatpush1.bf16.msra.mxu0 %v12003_v18  ;;  %v12186_v25 = vld [vmem:[%s16682_s2 + $0x270] sm:$0xff]   ;;  %v12196_v2 = vld [vmem:[%s16682_s2 + $0x1a8] sm:$0xff]   ;;  %16913 = vst [vmem:[#allocation14_spill] sm:$0xff] %v12245_v34  ;;  %16914 = vst [vmem:[#allocation15_spill] sm:$0xff] %v12252_v38 }
 0x3dd   : > { %4176 = vmatpush1.bf16.msra.mxu1 %v12010_v15  ;;  %4048 = vmatprep.subr.bf16.mxu0 %v16737_v17  ;;  %16905 = vst [vmem:[#allocation6_spill] sm:$0xff] %v12186_v25  ;;  %16906 = vst [vmem:[#allocation7_spill] sm:$0xff] %v12196_v2  ;;  %v12203_v42 = vld [vmem:[%s16682_s2 + $0x268] sm:$0xff]  }
 0x3de   : > { %v9054_v35 = vpack.c.bf16 %v3199_v3, %v3198_v44  ;;  %v3197_v61 = vadd.f32 %v3193_v49, %v10691_v30  ;;  %4177 = vmatprep.subr.bf16.mxu1 %v16737_v17  ;;  %v3200_v7 = vmax.f32 %v3196_v4, 0.0  ;;  %16907 = vst [vmem:[#allocation8_spill] sm:$0xff] %v12203_v42  ;;  %v12217_v3 = vld [vmem:[%s16682_s2 + $0x260] sm:$0xff]   ;;  %v12224_v4 = vld [vmem:[%s16682_s2 + $0x198] sm:$0xff]  }
 0x3df   : > { %16909 = vst [vmem:[#allocation10_spill] sm:$0xff] %v12217_v3  ;;  %16910 = vst [vmem:[#allocation11_spill] sm:$0xff] %v12224_v4 }
 0x3e0   : > { %3215 = vst.msk [vmem:[#allocation2 + $0x90] sm:$0xff] %vm10703_vm8, %v9054_v35  ;;  %v3201_v8 = vmax.f32 %v3197_v61, 0.0  ;;  %4049 = vmatpush1.bf16.msra.mxu0 %v12019_v50  ;;  %v12231_v61 = vld [vmem:[%s16682_s2 + $0x258] sm:$0xff]  }
 0x3e1   : > { %4178 = vmatpush1.bf16.msra.mxu1 %v12026_v56  ;;  %4050 = vmatprep.subr.bf16.mxu0 %v16737_v17  ;;  %16911 = vst [vmem:[#allocation12_spill] sm:$0xff] %v12231_v61 }
 0x3e2   : > { %v9055_v51 = vpack.c.bf16 %v3201_v8, %v3200_v7  ;;  %4179 = vmatprep.subr.bf16.mxu1 %v16737_v17  ;;  %v12238_v7 = vld [vmem:[%s16682_s2 + $0x190] sm:$0xff]  }
 0x3e3   : > { %16912 = vst [vmem:[#allocation13_spill] sm:$0xff] %v12238_v7 }
 0x3e4   : > { %3216 = vst.msk [vmem:[#allocation2 + $0x98] sm:$0xff] %vm10703_vm8, %v9055_v51  ;;  %4051 = vmatpush1.bf16.msra.mxu0 %v12036_v27 }
 0x3e5   : > { %4180 = vmatpush1.bf16.msra.mxu1 %v12043_v9  ;;  %4052 = vmatprep.subr.bf16.mxu0 %v16737_v17 }
 0x3e6   : > { %4181 = vmatprep.subr.bf16.mxu1 %v16737_v17 }
 0x3e8   : > { %4053 = vmatpush1.bf16.msra.mxu0 %v12052_v53 }
 0x3e9   : > { %4182 = vmatpush1.bf16.msra.mxu1 %v12059_v54  ;;  %4054 = vmatprep.subr.bf16.mxu0 %v16737_v17 }
 0x3ea   : > { %4183 = vmatprep.subr.bf16.mxu1 %v16737_v17 }
 0x3ec   : > { %4055 = vmatpush1.bf16.msra.mxu0 %v12066_v58 }
 0x3ed   : > { %4184 = vmatpush1.bf16.msra.mxu1 %v12073_v21  ;;  %4056 = vmatprep.subr.bf16.mxu0 %v16737_v17 }
 0x3ee   : > { %4185 = vmatprep.subr.bf16.mxu1 %v16737_v17 }
 0x3f0   : > { %4057 = vmatpush1.bf16.msra.mxu0 %v12080_v41 }
 0x3f1   : > { %4186 = vmatpush1.bf16.msra.mxu1 %v12087_v5  ;;  %4066 = vmatprep.subr.bf16.mxu0 %v16737_v17 }
 0x3f2   : > { %4195 = vmatprep.subr.bf16.mxu1 %v16737_v17 }
 0x3f4   : > { %4067 = vmatpush2.bf16.msra.mxu0 %v12094_v22 }
 0x3f5   : > { %4196 = vmatpush2.bf16.msra.mxu1 %v12101_v57  ;;  %4068 = vmatprep.subr.bf16.mxu0 %v16737_v17 }
 0x3f6   : > { %4197 = vmatprep.subr.bf16.mxu1 %v16737_v17 }
 0x3f7   : > { %v3271_v43 = vpop.f32.mrf.mxu0  ;;  %v3314_v44 = vpop.f32.mrf.mxu1 }
 0x3f8   : > { %4069 = vmatpush2.bf16.msra.mxu0 %v12108_v6 }
 0x3f9   : > { %4198 = vmatpush2.bf16.msra.mxu1 %v12115_v26  ;;  %4070 = vmatprep.subr.bf16.mxu0 %v16737_v17  ;;  %v3273_v49 = vpop.f32.mrf.mxu0  ;;  %v3316_v35 = vpop.f32.mrf.mxu1 }
 0x3fa   : > { %4199 = vmatprep.subr.bf16.mxu1 %v16737_v17 }
 0x3fb   : > { %v3275_v8 = vpop.f32.mrf.mxu0  ;;  %v3318_v51 = vpop.f32.mrf.mxu1 }
 0x3fc   : > { %4071 = vmatpush2.bf16.msra.mxu0 %v12122_v37 }
 0x3fd   : > { %4200 = vmatpush2.bf16.msra.mxu1 %v12129_v13  ;;  %4072 = vmatprep.subr.bf16.mxu0 %v16737_v17  ;;  %v3277_v0 = vpop.f32.mrf.mxu0  ;;  %v3320_v16 = vpop.f32.mrf.mxu1 }
 0x3fe   : > { %4201 = vmatprep.subr.bf16.mxu1 %v16737_v17 }
 0x400   : > { %4073 = vmatpush2.bf16.msra.mxu0 %v12136_v59 }
 0x401   : > { %4202 = vmatpush2.bf16.msra.mxu1 %v12143_v60  ;;  %4300 = vmatprep.subr.bf16.mxu0 %v16737_v17 }
 0x402   : > { %4415 = vmatprep.subr.bf16.mxu1 %v16737_v17 }
 0x403   : > { %4075 = vmatmul.mubr.bf16.vlgmr.msra.gmra.mxu0 %v12155_v39 }
 0x404   : > { %4204 = vmatmul.mubr.bf16.vlgmr.msra.gmra.mxu1 %v12165_v29  ;;  %4301 = vmatpush1.bf16.msra.mxu0 %v12152_v36  ;;  %v12281_v36 = vld [vmem:[%s16682_s2 + $0x1d8] sm:$0xff]  }
 0x405   : > { %8862 = vmatprep.mubr.msk.bf16.mxu0 %vm2737_vm3, %v12170_v46  ;;  %4416 = vmatpush1.bf16.msra.mxu1 %v12161_v55 }
 0x406   : > { %8875 = vmatprep.mubr.msk.bf16.mxu1 %vm2737_vm3, %v11847_v28  ;;  %4302 = vmatprep.subr.bf16.mxu0 %v16737_v17  ;;  %v12210_v28 = vld [vmem:[%s16682_s2 + $0x1a0] sm:$0xff]  }
 0x407   : > { %4417 = vmatprep.subr.bf16.mxu1 %v16737_v17  ;;  %16908 = vst [vmem:[#allocation9_spill] sm:$0xff] %v12210_v28 }
 0x408   : > { %4303 = vmatpush1.bf16.msra.mxu0 %v12178_v24 }
 0x409   : > { %4418 = vmatpush1.bf16.msra.mxu1 %v12186_v25  ;;  %4304 = vmatprep.subr.bf16.mxu0 %v16737_v17 }
 0x40a   : > { %4419 = vmatprep.subr.bf16.mxu1 %v16737_v17 }
 0x40c   : > { %4305 = vmatpush1.bf16.msra.mxu0 %v12196_v2 }
 0x40d   : > { %4420 = vmatpush1.bf16.msra.mxu1 %v12203_v42  ;;  %4306 = vmatprep.subr.bf16.mxu0 %v16737_v17 }
 0x40e   : > { %4421 = vmatprep.subr.bf16.mxu1 %v16737_v17 }
 0x410   : > { %4307 = vmatpush1.bf16.msra.mxu0 %v12210_v28  ;;  %v3324_v28 = vmax.f32 %v3273_v49, %v3316_v35 }
 0x411   : > { %4422 = vmatpush1.bf16.msra.mxu1 %v12217_v3  ;;  %4308 = vmatprep.subr.bf16.mxu0 %v16737_v17 }
 0x412   : > { %4423 = vmatprep.subr.bf16.mxu1 %v16737_v17 }
 0x414   : > { %4309 = vmatpush1.bf16.msra.mxu0 %v12224_v4  ;;  %v3323_v4 = vmax.f32 %v3271_v43, %v3314_v44  ;;  %v12273_v43 = vld [vmem:[%s16682_s2 + $0x240] sm:$0xff]   ;;  %v3325_v44 = vmax.f32 %v3275_v8, %v3318_v51 }
 0x415   : > { %4424 = vmatpush1.bf16.msra.mxu1 %v12231_v61  ;;  %4310 = vmatprep.subr.bf16.mxu0 %v16737_v17  ;;  %v12259_v61 = vld [vmem:[%s16682_s2 + $0x248] sm:$0xff]  }
 0x416   : > { %4425 = vmatprep.subr.bf16.mxu1 %v16737_v17  ;;  %16915 = vst [vmem:[#allocation16_spill] sm:$0xff] %v12259_v61 }
 0x418   : > { %4311 = vmatpush1.bf16.msra.mxu0 %v12238_v7 }
 0x419   : > { %4426 = vmatpush1.bf16.msra.mxu1 %v12245_v34  ;;  %4312 = vmatprep.subr.bf16.mxu0 %v16737_v17  ;;  %v12266_v34 = vld [vmem:[%s16682_s2 + $0x180] sm:$0xff]  }
 0x41a   : > { %4427 = vmatprep.subr.bf16.mxu1 %v16737_v17 }
 0x41b   : > { %v3371_v7 = vpop.f32.mrf.mxu0  ;;  %v3418_v3 = vpop.f32.mrf.mxu1 }
 0x41c   : > { %v3380_v42 = vmax.f32 %v3323_v4, %v3371_v7  ;;  %4313 = vmatpush1.bf16.msra.mxu0 %v12252_v38  ;;  %v3326_v38 = vmax.f32 %v3277_v0, %v3320_v16 }
 0x41d   : > { %4428 = vmatpush1.bf16.msra.mxu1 %v12259_v61  ;;  %v3373_v2 = vpop.f32.mrf.mxu0  ;;  %v3420_v25 = vpop.f32.mrf.mxu1  ;;  %4314 = vmatprep.subr.bf16.mxu0 %v16737_v17 }
 0x41e   : > { %v3427_v4 = vmax.f32 %v3380_v42, %v3418_v3  ;;  %v3381_v49 = vmax.f32 %v3324_v28, %v3373_v2  ;;  %4429 = vmatprep.subr.bf16.mxu1 %v16737_v17  ;;  %v12288_v2 = vld [vmem:[%s16682_s2 + $0x298] sm:$0xff]  }
 0x41f   : > { %v3375_v35 = vpop.f32.mrf.mxu0  ;;  %v3422_v7 = vpop.f32.mrf.mxu1 }
 0x420   : > { %v3431_v24 = vadd.f32 %v3427_v4, %v10685_v62  ;;  %v3428_v61 = vmax.f32 %v3381_v49, %v3420_v25  ;;  %v3382_v55 = vmax.f32 %v3325_v44, %v3375_v35  ;;  %4315 = vmatpush1.bf16.msra.mxu0 %v12266_v34  ;;  %v12297_v4 = vld [vmem:[%s16682_s2 + $0x1d0] sm:$0xff]   ;;  %v12314_v35 = vld [vmem:[%s16682_s2 + $0x1c8] sm:$0xff]  }
 0x421   : > { %4430 = vmatpush1.bf16.msra.mxu1 %v12273_v43  ;;  %v3377_v42 = vpop.f32.mrf.mxu0  ;;  %4324 = vmatprep.subr.bf16.mxu0 %v16737_v17  ;;  %v3424_v8 = vpop.f32.mrf.mxu1  ;;  %16916 = vst [vmem:[#allocation17_spill] sm:$0xff] %v12297_v4  ;;  %16918 = vst [vmem:[#allocation19_spill] sm:$0xff] %v12314_v35 }
 0x422   : > { %v3432_v25 = vadd.f32 %v3428_v61, %v10691_v30  ;;  %v3429_v28 = vmax.f32 %v3382_v55, %v3422_v7  ;;  %v3383_v3 = vmax.f32 %v3326_v38, %v3377_v42  ;;  %4439 = vmatprep.subr.bf16.mxu1 %v16737_v17  ;;  %v3435_v51 = vmax.f32 %v3431_v24, 0.0  ;;  %v12304_v55 = vld [vmem:[%s16682_s2 + $0x290] sm:$0xff]   ;;  %v12321_v7 = vld [vmem:[%s16682_s2 + $0x288] sm:$0xff]  }
 0x423   : > { %16917 = vst [vmem:[#allocation18_spill] sm:$0xff] %v12304_v55  ;;  %16919 = vst [vmem:[#allocation20_spill] sm:$0xff] %v12321_v7 }
 0x424   : > { %v3436_v0 = vmax.f32 %v3432_v25, 0.0  ;;  %v3433_v16 = vadd.f32 %v3429_v28, %v10685_v62  ;;  %v3430_v44 = vmax.f32 %v3383_v3, %v3424_v8  ;;  %4325 = vmatpush2.bf16.msra.mxu0 %v12281_v36  ;;  %v12330_v25 = vld [vmem:[%s16682_s2 + $0x1c0] sm:$0xff]   ;;  %v12344_v3 = vld [vmem:[%s16682_s2 + $0x218] sm:$0xff]   ;;  %v12348_v8 = vcombine.low %v12163_v45, %v12146_v63  ;;  %v12364_v63 = vld [vmem:[%s16682_s2 + $0x210] sm:$0xff]  }
 0x425   : > { %4440 = vmatpush2.bf16.msra.mxu1 %v12288_v2  ;;  %4326 = vmatprep.subr.bf16.mxu0 %v16737_v17  ;;  %16920 = vst [vmem:[#allocation21_spill] sm:$0xff] %v12330_v25  ;;  %v12337_v28 = vld [vmem:[%s16682_s2 + $0x280] sm:$0xff]   ;;  %16922 = vst [vmem:[#allocation23_spill] sm:$0xff] %v12344_v3  ;;  %v12372_v45 = vld [vmem:[%s16682_s2 + $0x2d0] sm:$0xff]  }
 0x426   : > { %v9056_v24 = vpack.c.bf16 %v3436_v0, %v3435_v51  ;;  %v3434_v61 = vadd.f32 %v3430_v44, %v10691_v30  ;;  %4441 = vmatprep.subr.bf16.mxu1 %v16737_v17  ;;  %v3437_v38 = vmax.f32 %v3433_v16, 0.0  ;;  %16921 = vst [vmem:[#allocation22_spill] sm:$0xff] %v12337_v28  ;;  %v12355_v51 = vld [vmem:[%s16682_s2 + $0x2d8] sm:$0xff]   ;;  %16924 = vst [vmem:[#allocation25_spill] sm:$0xff] %v12364_v63  ;;  %v12389_v0 = vld [vmem:[%s16682_s2 + $0x2c8] sm:$0xff]  }
 0x427   : > { %16923 = vst [vmem:[#allocation24_spill] sm:$0xff] %v12355_v51  ;;  %16925 = vst [vmem:[#allocation26_spill] sm:$0xff] %v12372_v45  ;;  %v12396_v16 = vld [vmem:[%s16682_s2 + $0x200] sm:$0xff]  }
 0x428   : > { %3452 = vst.msk [vmem:[#allocation2 + $0xa0] sm:$0xff] %vm10703_vm8, %v9056_v24  ;;  %v3438_v49 = vmax.f32 %v3434_v61, 0.0  ;;  %4327 = vmatpush2.bf16.msra.mxu0 %v12297_v4  ;;  %16927 = vst [vmem:[#allocation28_spill] sm:$0xff] %v12389_v0  ;;  %v12403_v44 = vld [vmem:[%s16682_s2 + $0x2c0] sm:$0xff]   ;;  %v12410_v24 = vld [vmem:[%s16682_s2 + $0x1f8] sm:$0xff]  }
 0x429   : > { %4442 = vmatpush2.bf16.msra.mxu1 %v12304_v55  ;;  %4328 = vmatprep.subr.bf16.mxu0 %v16737_v17  ;;  %16928 = vst [vmem:[#allocation29_spill] sm:$0xff] %v12396_v16  ;;  %16929 = vst [vmem:[#allocation30_spill] sm:$0xff] %v12403_v44  ;;  %v12417_v61 = vld [vmem:[%s16682_s2 + $0x2b8] sm:$0xff]  }
 0x42a   : > { %v9057_v42 = vpack.c.bf16 %v3438_v49, %v3437_v38  ;;  %4443 = vmatprep.subr.bf16.mxu1 %v16737_v17  ;;  %16930 = vst [vmem:[#allocation31_spill] sm:$0xff] %v12410_v24  ;;  %16931 = vst [vmem:[#allocation32_spill] sm:$0xff] %v12417_v61  ;;  %v12424_v38 = vld [vmem:[%s16682_s2 + $0x1f0] sm:$0xff]  }
 0x42b   : > { %16932 = vst [vmem:[#allocation33_spill] sm:$0xff] %v12424_v38  ;;  %v12431_v49 = vld [vmem:[%s16682_s2 + $0x2b0] sm:$0xff]  }
 0x42c   : > { %3453 = vst.msk [vmem:[#allocation2 + $0xa8] sm:$0xff] %vm10703_vm8, %v9057_v42  ;;  %4329 = vmatpush2.bf16.msra.mxu0 %v12314_v35  ;;  %16933 = vst [vmem:[#allocation34_spill] sm:$0xff] %v12431_v49  ;;  %v12438_v42 = vld [vmem:[%s16682_s2 + $0x1e8] sm:$0xff]  }
 0x42d   : > { %4444 = vmatpush2.bf16.msra.mxu1 %v12321_v7  ;;  %4330 = vmatprep.subr.bf16.mxu0 %v16737_v17  ;;  %16934 = vst [vmem:[#allocation35_spill] sm:$0xff] %v12438_v42 }
 0x42e   : > { %4445 = vmatprep.subr.bf16.mxu1 %v16737_v17 }
 0x430   : > { %4331 = vmatpush2.bf16.msra.mxu0 %v12330_v25 }
 0x431   : > { %4446 = vmatpush2.bf16.msra.mxu1 %v12337_v28  ;;  %4528 = vmatprep.subr.bf16.mxu0 %v16737_v17 }
 0x432   : > { %4641 = vmatprep.subr.bf16.mxu1 %v16737_v17 }
 0x433   : > { %4333 = vmatmul.mubr.bf16.vlgmr.msra.gmra.mxu0 %v12348_v8 }
 0x434   : > { %4448 = vmatmul.mubr.bf16.vlgmr.msra.gmra.mxu1 %v11963_v48  ;;  %4529 = vmatpush1.bf16.msra.mxu0 %v12344_v3 }
 0x435   : > { %8888 = vmatprep.mubr.msk.bf16.mxu0 %vm2737_vm3, %v11849_v1  ;;  %4642 = vmatpush1.bf16.msra.mxu1 %v12355_v51  ;;  %v12382_v1 = vld [vmem:[%s16682_s2 + $0x208] sm:$0xff]  }
 0x436   : > { %8901 = vmatprep.mubr.msk.bf16.mxu1 %vm2737_vm3, %v11975_v31  ;;  %4530 = vmatprep.subr.bf16.mxu0 %v16737_v17  ;;  %16926 = vst [vmem:[#allocation27_spill] sm:$0xff] %v12382_v1 }
 0x437   : > { %4643 = vmatprep.subr.bf16.mxu1 %v16737_v17 }
 0x438   : > { %4531 = vmatpush1.bf16.msra.mxu0 %v12364_v63 }
 0x439   : > { %4644 = vmatpush1.bf16.msra.mxu1 %v12372_v45  ;;  %4532 = vmatprep.subr.bf16.mxu0 %v16737_v17 }
 0x43a   : > { %4645 = vmatprep.subr.bf16.mxu1 %v16737_v17 }
 0x43c   : > { %4533 = vmatpush1.bf16.msra.mxu0 %v12382_v1 }
 0x43d   : > { %4646 = vmatpush1.bf16.msra.mxu1 %v12389_v0  ;;  %4534 = vmatprep.subr.bf16.mxu0 %v16737_v17 }
 0x43e   : > { %4647 = vmatprep.subr.bf16.mxu1 %v16737_v17 }
 0x440   : > { %4535 = vmatpush1.bf16.msra.mxu0 %v12396_v16 }
 0x441   : > { %4648 = vmatpush1.bf16.msra.mxu1 %v12403_v44  ;;  %4536 = vmatprep.subr.bf16.mxu0 %v16737_v17  ;;  %v3551_v44 = vpop.f32.mrf.mxu1 }
 0x442   : > { %4649 = vmatprep.subr.bf16.mxu1 %v16737_v17 }
 0x443   : > { %v3553_v0 = vpop.f32.mrf.mxu1 }
 0x444   : > { %4537 = vmatpush1.bf16.msra.mxu0 %v12410_v24  ;;  %v3508_v24 = vpop.f32.mrf.mxu0 }
 0x445   : > { %4650 = vmatpush1.bf16.msra.mxu1 %v12417_v61  ;;  %4538 = vmatprep.subr.bf16.mxu0 %v16737_v17  ;;  %v12445_v61 = vld [vmem:[%s16682_s2 + $0x2a8] sm:$0xff]   ;;  %v3555_v45 = vpop.f32.mrf.mxu1  ;;  %v3560_v3 = vmax.f32 %v3508_v24, %v3551_v44 }
 0x446   : > { %4651 = vmatprep.subr.bf16.mxu1 %v16737_v17  ;;  %16935 = vst [vmem:[#allocation36_spill] sm:$0xff] %v12445_v61  ;;  %v3510_v16 = vpop.f32.mrf.mxu0 }
 0x447   : > { %v3557_v51 = vpop.f32.mrf.mxu1  ;;  %v3561_v25 = vmax.f32 %v3510_v16, %v3553_v0 }
 0x448   : > { %4539 = vmatpush1.bf16.msra.mxu0 %v12424_v38  ;;  %v12452_v38 = vld [vmem:[%s16682_s2 + $0x1e0] sm:$0xff]   ;;  %v3512_v1 = vpop.f32.mrf.mxu0 }
 0x449   : > { %4652 = vmatpush1.bf16.msra.mxu1 %v12431_v49  ;;  %4540 = vmatprep.subr.bf16.mxu0 %v16737_v17  ;;  %16936 = vst [vmem:[#allocation37_spill] sm:$0xff] %v12452_v38  ;;  %v12459_v49 = vld [vmem:[%s16682_s2 + $0x2a0] sm:$0xff]  }
 0x44a   : > { %4653 = vmatprep.subr.bf16.mxu1 %v16737_v17  ;;  %16937 = vst [vmem:[#allocation38_spill] sm:$0xff] %v12459_v49  ;;  %v3514_v63 = vpop.f32.mrf.mxu0 }
 0x44c   : > { %4541 = vmatpush1.bf16.msra.mxu0 %v12438_v42  ;;  %v12466_v42 = vld [vmem:[%s16682_s2 + $0x238] sm:$0xff]  }
 0x44d   : > { %4654 = vmatpush1.bf16.msra.mxu1 %v12445_v61  ;;  %4542 = vmatprep.subr.bf16.mxu0 %v16737_v17  ;;  %16938 = vst [vmem:[#allocation39_spill] sm:$0xff] %v12466_v42  ;;  %v12473_v61 = vld [vmem:[%s16682_s2 + $0x2f8] sm:$0xff]  }
 0x44e   : > { %4655 = vmatprep.subr.bf16.mxu1 %v16737_v17  ;;  %16939 = vst [vmem:[#allocation40_spill] sm:$0xff] %v12473_v61 }
 0x450   : > { %4543 = vmatpush1.bf16.msra.mxu0 %v12452_v38  ;;  %v12480_v38 = vld [vmem:[%s16682_s2 + $0x230] sm:$0xff]  }
 0x451   : > { %4656 = vmatpush1.bf16.msra.mxu1 %v12459_v49  ;;  %4552 = vmatprep.subr.bf16.mxu0 %v16737_v17  ;;  %16940 = vst [vmem:[#allocation41_spill] sm:$0xff] %v12480_v38  ;;  %v12487_v49 = vld [vmem:[%s16682_s2 + $0x2f0] sm:$0xff]  }
 0x452   : > { %4665 = vmatprep.subr.bf16.mxu1 %v16737_v17  ;;  %16941 = vst [vmem:[#allocation42_spill] sm:$0xff] %v12487_v49 }
 0x454   : > { %4553 = vmatpush2.bf16.msra.mxu0 %v12466_v42  ;;  %v12494_v42 = vld [vmem:[%s16682_s2 + $0x228] sm:$0xff]  }
 0x455   : > { %4666 = vmatpush2.bf16.msra.mxu1 %v12473_v61  ;;  %4554 = vmatprep.subr.bf16.mxu0 %v16737_v17  ;;  %16942 = vst [vmem:[#allocation43_spill] sm:$0xff] %v12494_v42  ;;  %v12501_v61 = vld [vmem:[%s16682_s2 + $0x2e8] sm:$0xff]  }
 0x456   : > { %4667 = vmatprep.subr.bf16.mxu1 %v16737_v17  ;;  %16943 = vst [vmem:[#allocation44_spill] sm:$0xff] %v12501_v61 }
 0x458   : > { %4555 = vmatpush2.bf16.msra.mxu0 %v12480_v38  ;;  %v12508_v38 = vld [vmem:[%s16682_s2 + $0x220] sm:$0xff]  }
 0x459   : > { %4668 = vmatpush2.bf16.msra.mxu1 %v12487_v49  ;;  %4556 = vmatprep.subr.bf16.mxu0 %v16737_v17  ;;  %16944 = vst [vmem:[#allocation45_spill] sm:$0xff] %v12508_v38  ;;  %v12515_v49 = vld [vmem:[%s16682_s2 + $0x2e0] sm:$0xff]  }
 0x45a   : > { %4669 = vmatprep.subr.bf16.mxu1 %v16737_v17  ;;  %16945 = vst [vmem:[#allocation46_spill] sm:$0xff] %v12515_v49 }
 0x45c   : > { %4557 = vmatpush2.bf16.msra.mxu0 %v12494_v42  ;;  %v12522_v42 = vld [vmem:[%s16682_s2 + $0x338] sm:$0xff]  }
 0x45d   : > { %4670 = vmatpush2.bf16.msra.mxu1 %v12501_v61  ;;  %4558 = vmatprep.subr.bf16.mxu0 %v16737_v17  ;;  %16946 = vst [vmem:[#allocation47_spill] sm:$0xff] %v12522_v42  ;;  %v12529_v61 = vld [vmem:[%s16682_s2 + $0x398] sm:$0xff]  }
 0x45e   : > { %4671 = vmatprep.subr.bf16.mxu1 %v16737_v17  ;;  %16947 = vst [vmem:[#allocation48_spill] sm:$0xff] %v12529_v61 }
 0x460   : > { %4559 = vmatpush2.bf16.msra.mxu0 %v12508_v38 }
 0x461   : > { %4672 = vmatpush2.bf16.msra.mxu1 %v12515_v49  ;;  %4756 = vmatprep.subr.bf16.mxu0 %v16737_v17  ;;  %v12538_v49 = vld [vmem:[%s16682_s2 + $0x330] sm:$0xff]  }
 0x462   : > { %4871 = vmatprep.subr.bf16.mxu1 %v16737_v17 }
 0x463   : > { %v3618_v38 = vpop.f32.mrf.mxu0  ;;  %v3665_v28 = vpop.f32.mrf.mxu1  ;;  %4561 = vmatmul.mubr.bf16.vlgmr.msra.gmra.mxu0 %v11971_v12  ;;  %v12546_v12 = vld [vmem:[%s16682_s2 + $0x390] sm:$0xff]  }
 0x464   : > { %v3627_v7 = vmax.f32 %v3560_v3, %v3618_v38  ;;  %4674 = vmatmul.mubr.bf16.vlgmr.msra.gmra.mxu1 %v12155_v39  ;;  %4757 = vmatpush1.bf16.msra.mxu0 %v12522_v42  ;;  %v3562_v3 = vmax.f32 %v3512_v1, %v3555_v45 }
 0x465   : > { %8914 = vmatprep.mubr.msk.bf16.mxu0 %vm2737_vm3, %v11979_v32  ;;  %4872 = vmatpush1.bf16.msra.mxu1 %v12529_v61  ;;  %v3620_v44 = vpop.f32.mrf.mxu0  ;;  %v3667_v24 = vpop.f32.mrf.mxu1  ;;  %v3563_v61 = vmax.f32 %v3514_v63, %v3557_v51 }
 0x466   : > { %v3674_v0 = vmax.f32 %v3627_v7, %v3665_v28  ;;  %8927 = vmatprep.mubr.msk.bf16.mxu1 %vm2737_vm3, %v12170_v46  ;;  %v3628_v16 = vmax.f32 %v3561_v25, %v3620_v44  ;;  %4758 = vmatprep.subr.bf16.mxu0 %v16737_v17  ;;  %v12557_v7 = vld [vmem:[%s16682_s2 + $0x328] sm:$0xff]  }
 0x467   : > { %v3622_v38 = vpop.f32.mrf.mxu0  ;;  %v3669_v42 = vpop.f32.mrf.mxu1  ;;  %4873 = vmatprep.subr.bf16.mxu1 %v16737_v17  ;;  %v12564_v28 = vld [vmem:[%s16682_s2 + $0x388] sm:$0xff]  }
 0x468   : > { %v3678_v35 = vadd.f32 %v3674_v0, %v10685_v62  ;;  %v3675_v55 = vmax.f32 %v3628_v16, %v3667_v24  ;;  %v3629_v4 = vmax.f32 %v3562_v3, %v3622_v38  ;;  %4759 = vmatpush1.bf16.msra.mxu0 %v12538_v49  ;;  %v12573_v16 = vld [vmem:[%s16682_s2 + $0x320] sm:$0xff]  }
 0x469   : > { %4874 = vmatpush1.bf16.msra.mxu1 %v12546_v12  ;;  %v3624_v25 = vpop.f32.mrf.mxu0  ;;  %4760 = vmatprep.subr.bf16.mxu0 %v16737_v17  ;;  %v3671_v1 = vpop.f32.mrf.mxu1 }
 0x46a   : > { %v3679_v51 = vadd.f32 %v3675_v55, %v10691_v30  ;;  %v3676_v63 = vmax.f32 %v3629_v4, %v3669_v42  ;;  %v3630_v45 = vmax.f32 %v3563_v61, %v3624_v25  ;;  %4875 = vmatprep.subr.bf16.mxu1 %v16737_v17  ;;  %v3682_v44 = vmax.f32 %v3678_v35, 0.0  ;;  %v12580_v4 = vld [vmem:[%s16682_s2 + $0x380] sm:$0xff]   ;;  %v12590_v42 = vld [vmem:[%s16682_s2 + $0x318] sm:$0xff]   ;;  %v12606_v25 = vld [vmem:[%s16682_s2 + $0x310] sm:$0xff]  }
 0x46c   : > { %v3683_v24 = vmax.f32 %v3679_v51, 0.0  ;;  %v3680_v3 = vadd.f32 %v3676_v63, %v10685_v62  ;;  %v3677_v0 = vmax.f32 %v3630_v45, %v3671_v1  ;;  %4761 = vmatpush1.bf16.msra.mxu0 %v12557_v7  ;;  %v12613_v51 = vld [vmem:[%s16682_s2 + $0x370] sm:$0xff]   ;;  %v12627_v63 = vld [vmem:[%s16682_s2 + $0x368] sm:$0xff]   ;;  %v12634_v45 = vld [vmem:[%s16682_s2 + $0x300] sm:$0xff]  }
 0x46d   : > { %4876 = vmatpush1.bf16.msra.mxu1 %v12564_v28  ;;  %4762 = vmatprep.subr.bf16.mxu0 %v16737_v17  ;;  %v12641_v1 = vld [vmem:[%s16682_s2 + $0x360] sm:$0xff]  }
 0x46e   : > { %v9058_v55 = vpack.c.bf16 %v3683_v24, %v3682_v44  ;;  %v3681_v62 = vadd.f32 %v3677_v0, %v10691_v30  ;;  %4877 = vmatprep.subr.bf16.mxu1 %v16737_v17  ;;  %v3684_v35 = vmax.f32 %v3680_v3, 0.0  ;;  %v12597_v30 = vld [vmem:[%s16682_s2 + $0x378] sm:$0xff]   ;;  %v12662_v3 = vld [vmem:[%s16682_s2 + $0x350] sm:$0xff]  }
 0x46f   : > { %v12648_v44 = vld [vmem:[%s16682_s2 + $0x358] sm:$0xff]   ;;  %16950 = vst [vmem:[#allocation51_spill] sm:$0xff] %v12662_v3  ;;  %v12669_v0 = vld [vmem:[%s16682_s2 + $0x3b0] sm:$0xff]  }
 0x470   : > { %3699 = vst.msk [vmem:[#allocation2 + $0xb0] sm:$0xff] %vm10703_vm8, %v9058_v55  ;;  %v3685_v61 = vmax.f32 %v3681_v62, 0.0  ;;  %4763 = vmatpush1.bf16.msra.mxu0 %v12573_v16  ;;  %16948 = vst [vmem:[#allocation49_spill] sm:$0xff] %v12648_v44  ;;  %v12655_v24 = vld [vmem:[%s16682_s2 + $0x3b8] sm:$0xff]   ;;  %v12676_v55 = vld [vmem:[%s16682_s2 + $0x348] sm:$0xff]  }
 0x471   : > { %4878 = vmatpush1.bf16.msra.mxu1 %v12580_v4  ;;  %4764 = vmatprep.subr.bf16.mxu0 %v16737_v17  ;;  %16949 = vst [vmem:[#allocation50_spill] sm:$0xff] %v12655_v24  ;;  %16951 = vst [vmem:[#allocation52_spill] sm:$0xff] %v12669_v0  ;;  %v12683_v62 = vld [vmem:[%s16682_s2 + $0x3a8] sm:$0xff]  }
 0x472   : > { %v9059_v38 = vpack.c.bf16 %v3685_v61, %v3684_v35  ;;  %4879 = vmatprep.subr.bf16.mxu1 %v16737_v17  ;;  %16952 = vst [vmem:[#allocation53_spill] sm:$0xff] %v12676_v55  ;;  %16953 = vst [vmem:[#allocation54_spill] sm:$0xff] %v12683_v62  ;;  %v12690_v35 = vld [vmem:[%s16682_s2 + $0x340] sm:$0xff]  }
 0x473   : > { %16954 = vst [vmem:[#allocation55_spill] sm:$0xff] %v12690_v35  ;;  %v12697_v61 = vld [vmem:[%s16682_s2 + $0x3a0] sm:$0xff]  }
 0x474   : > { %3700 = vst.msk [vmem:[#allocation2 + $0xb8] sm:$0xff] %vm10703_vm8, %v9059_v38  ;;  %4765 = vmatpush1.bf16.msra.mxu0 %v12590_v42  ;;  %16955 = vst [vmem:[#allocation56_spill] sm:$0xff] %v12697_v61  ;;  %vm9937_vm8 = vmmov 0  }
 0x475   : > { %4880 = vmatpush1.bf16.msra.mxu1 %v12597_v30  ;;  %4766 = vmatprep.subr.bf16.mxu0 %v16737_v17 }
 0x476   : > { %4881 = vmatprep.subr.bf16.mxu1 %v16737_v17 }
 0x478   : > { %4767 = vmatpush1.bf16.msra.mxu0 %v12606_v25 }
 0x479   : > { %4882 = vmatpush1.bf16.msra.mxu1 %v12613_v51  ;;  %4768 = vmatprep.subr.bf16.mxu0 %v16737_v17 }
 0x47a   : > { %4883 = vmatprep.subr.bf16.mxu1 %v16737_v17 }
 0x47c   : > { %4769 = vmatpush1.bf16.msra.mxu0 %v12620_v52 }
 0x47d   : > { %4884 = vmatpush1.bf16.msra.mxu1 %v12627_v63  ;;  %4770 = vmatprep.subr.bf16.mxu0 %v16737_v17 }
 0x47e   : > { %4885 = vmatprep.subr.bf16.mxu1 %v16737_v17 }
 0x480   : > { %4771 = vmatpush1.bf16.msra.mxu0 %v12634_v45 }
 0x481   : > { %4886 = vmatpush1.bf16.msra.mxu1 %v12641_v1  ;;  %4780 = vmatprep.subr.bf16.mxu0 %v16737_v17 }
 0x482   : > { %4895 = vmatprep.subr.bf16.mxu1 %v16737_v17 }
 0x484   : > { %4781 = vmatpush2.bf16.msra.mxu0 %v12648_v44  ;;  %v12747_v44 = vld [vmem:[%s16682_s2 + $0x88] sm:$0xff]  }
 0x485   : > { %4896 = vmatpush2.bf16.msra.mxu1 %v12655_v24  ;;  %4782 = vmatprep.subr.bf16.mxu0 %v16737_v17 }
 0x486   : > { %4897 = vmatprep.subr.bf16.mxu1 %v16737_v17 }
 0x488   : > { %4783 = vmatpush2.bf16.msra.mxu0 %v12662_v3 }
 0x489   : > { %4898 = vmatpush2.bf16.msra.mxu1 %v12669_v0  ;;  %4784 = vmatprep.subr.bf16.mxu0 %v16737_v17  ;;  %v12722_v0 = vld [vmem:[#allocation2 + $0x14] ss:$8 sps:$4 sm:$0xff]  }
 0x48a   : > { %4899 = vmatprep.subr.bf16.mxu1 %v16737_v17 }
 0x48c   : > { %4785 = vmatpush2.bf16.msra.mxu0 %v12676_v55  ;;  %v12709_v55 = vld [vmem:[%s16682_s2 + $0x98] sm:$0xff]  }
 0x48d   : > { %4900 = vmatpush2.bf16.msra.mxu1 %v12683_v62  ;;  %4786 = vmatprep.subr.bf16.mxu0 %v16737_v17  ;;  %16956 = vst [vmem:[#allocation57_spill] sm:$0xff] %v12709_v55 }
 0x48e   : > { %4901 = vmatprep.subr.bf16.mxu1 %v16737_v17 }
 0x490   : > { %4787 = vmatpush2.bf16.msra.mxu0 %v12690_v35 }
 0x491   : > { %4902 = vmatpush2.bf16.msra.mxu1 %v12697_v61  ;;  %4916 = vmatprep.subr.bf16.mxu0 %v16737_v17 }
 0x492   : > { %4957 = vmatprep.subr.bf16.mxu1 %v16737_v17  ;;  %v12719_v17 = vld [vmem:[%s16682_s2 + $0x38] sm:$0xff]  }
 0x493   : > { %v3824_v38 = vpop.f32.mrf.mxu0  ;;  %4789 = vmatmul.mubr.bf16.vlgmr.msra.gmra.mxu0 %v12165_v29  ;;  %16957 = vst [vmem:[#allocation58_spill] sm:$0xff] %v12719_v17 }
 0x494   : > { %v3949_v62 = vpop.f32.mrf.mxu1  ;;  %4904 = vmatmul.mubr.bf16.vlgmr.msra.gmra.mxu1 %v12348_v8  ;;  %4917 = vmatpush1.bf16.msra.mxu0 %v12709_v55  ;;  %v16958_v55 = vmov 0  }
 0x495   : > { %v12712_v35 = vadd.f32 %v3949_v62, %v3824_v38  ;;  %8928 = vmatprep.mubr.msk.bf16.mxu0 %vm2737_vm3, %v11975_v31  ;;  %4958 = vmatpush1.bf16.msra.mxu1 %v12719_v17  ;;  %v3826_v61 = vpop.f32.mrf.mxu0  ;;  %v12731_v38 = vld [vmem:[%s16682_s2 + $0x90] sm:$0xff]  }
 0x496   : > { %8929 = vmatprep.mubr.msk.bf16.mxu1 %vm2737_vm3, %v12722_v0  ;;  %v3951_v3 = vpop.f32.mrf.mxu1  ;;  %4918 = vmatprep.subr.bf16.mxu0 %v16958_v55  ;;  %v12739_v17 = vld [vmem:[%s16682_s2 + $0x30] sm:$0xff]  }
 0x497   : > { %v3827_v62 = vpop.f32.mrf.mxu0  ;;  %4959 = vmatprep.subr.bf16.mxu1 %v16958_v55 }
 0x498   : > { %v3952_v31 = vpop.f32.mrf.mxu1  ;;  %4919 = vmatpush1.bf16.msra.mxu0 %v12731_v38 }
 0x499   : > { %v12734_v61 = vadd.f32 %v3952_v31, %v3827_v62  ;;  %4960 = vmatpush1.bf16.msra.mxu1 %v12739_v17  ;;  %v3829_v3 = vpop.f32.mrf.mxu0  ;;  %4920 = vmatprep.subr.bf16.mxu0 %v16958_v55  ;;  %v12753_v62 = vld [vmem:[%s16682_s2 + $0x28] sm:$0xff]   ;;  %v12767_v31 = vld [vmem:[%s16682_s2 + $0x20] sm:$0xff]  }
 0x49a   : > { %v3954_v24 = vpop.f32.mrf.mxu1  ;;  %4961 = vmatprep.subr.bf16.mxu1 %v16958_v55  ;;  %16960 = vst [vmem:[#allocation60_spill] sm:$0xff] %v12767_v31  ;;  %v12775_v3 = vld [vmem:[%s16682_s2 + $0x78] sm:$0xff]  }
 0x49b   : > { %v12761_v24 = vld [vmem:[%s16682_s2 + $0x80] sm:$0xff]   ;;  %16961 = vst [vmem:[#allocation61_spill] sm:$0xff] %v12775_v3 }
 0x49c   : > { %4921 = vmatpush1.bf16.msra.mxu0 %v12747_v44  ;;  %16959 = vst [vmem:[#allocation59_spill] sm:$0xff] %v12761_v24 }
 0x49d   : > { %4962 = vmatpush1.bf16.msra.mxu1 %v12753_v62  ;;  %4922 = vmatprep.subr.bf16.mxu0 %v16958_v55 }
 0x49e   : > { %4963 = vmatprep.subr.bf16.mxu1 %v16958_v55 }
 0x4a0   : > { %4923 = vmatpush1.bf16.msra.mxu0 %v12761_v24  ;;  %v12781_v24 = vld [vmem:[%s16682_s2 + $0x18] sm:$0xff]  }
 0x4a1   : > { %4964 = vmatpush1.bf16.msra.mxu1 %v12767_v31  ;;  %4924 = vmatprep.subr.bf16.mxu0 %v16958_v55  ;;  %16962 = vst [vmem:[#allocation62_spill] sm:$0xff] %v12781_v24  ;;  %v12789_v31 = vld [vmem:[%s16682_s2 + $0x70] sm:$0xff]  }
 0x4a2   : > { %4965 = vmatprep.subr.bf16.mxu1 %v16958_v55  ;;  %16963 = vst [vmem:[#allocation63_spill] sm:$0xff] %v12789_v31 }
 0x4a4   : > { %4925 = vmatpush1.bf16.msra.mxu0 %v12775_v3  ;;  %v12795_v3 = vld [vmem:[%s16682_s2 + $0x10] sm:$0xff]  }
 0x4a5   : > { %4966 = vmatpush1.bf16.msra.mxu1 %v12781_v24  ;;  %4926 = vmatprep.subr.bf16.mxu0 %v16958_v55  ;;  %16964 = vst [vmem:[#allocation64_spill] sm:$0xff] %v12795_v3  ;;  %v12803_v24 = vld [vmem:[%s16682_s2 + $0x68] sm:$0xff]  }
 0x4a6   : > { %4967 = vmatprep.subr.bf16.mxu1 %v16958_v55  ;;  %16965 = vst [vmem:[#allocation65_spill] sm:$0xff] %v12803_v24 }
 0x4a8   : > { %4927 = vmatpush1.bf16.msra.mxu0 %v12789_v31  ;;  %v12809_v31 = vld [vmem:[%s16682_s2 + $0x8] sm:$0xff]  }
 0x4a9   : > { %4968 = vmatpush1.bf16.msra.mxu1 %v12795_v3  ;;  %4928 = vmatprep.subr.bf16.mxu0 %v16958_v55  ;;  %16966 = vst [vmem:[#allocation66_spill] sm:$0xff] %v12809_v31  ;;  %v12817_v3 = vld [vmem:[%s16682_s2 + $0x60] sm:$0xff]  }
 0x4aa   : > { %4969 = vmatprep.subr.bf16.mxu1 %v16958_v55  ;;  %16967 = vst [vmem:[#allocation67_spill] sm:$0xff] %v12817_v3 }
 0x4ac   : > { %4929 = vmatpush1.bf16.msra.mxu0 %v12803_v24  ;;  %v12823_v24 = vld [vmem:[%s16682_s2] sm:$0xff]  }
 0x4ad   : > { %4970 = vmatpush1.bf16.msra.mxu1 %v12809_v31  ;;  %4930 = vmatprep.subr.bf16.mxu0 %v16958_v55  ;;  %16968 = vst [vmem:[#allocation68_spill] sm:$0xff] %v12823_v24  ;;  %v12831_v31 = vld [vmem:[%s16682_s2 + $0xb8] sm:$0xff]  }
 0x4ae   : > { %4971 = vmatprep.subr.bf16.mxu1 %v16958_v55 }
 0x4b0   : > { %4931 = vmatpush1.bf16.msra.mxu0 %v12817_v3  ;;  %v12837_v3 = vld [vmem:[%s16682_s2 + $0x58] sm:$0xff]  }
 0x4b1   : > { %4972 = vmatpush1.bf16.msra.mxu1 %v12823_v24  ;;  %4940 = vmatprep.subr.bf16.mxu0 %v16958_v55  ;;  %16969 = vst [vmem:[#allocation69_spill] sm:$0xff] %v12837_v3  ;;  %v12845_v24 = vld [vmem:[%s16682_s2 + $0xb0] sm:$0xff]  }
 0x4b2   : > { %4981 = vmatprep.subr.bf16.mxu1 %v16958_v55  ;;  %16970 = vst [vmem:[#allocation70_spill] sm:$0xff] %v12845_v24 }
 0x4b4   : > { %4941 = vmatpush2.bf16.msra.mxu0 %v12831_v31 }
 0x4b5   : > { %4982 = vmatpush2.bf16.msra.mxu1 %v12837_v3  ;;  %4942 = vmatprep.subr.bf16.mxu0 %v16958_v55 }
 0x4b6   : > { %4983 = vmatprep.subr.bf16.mxu1 %v16958_v55 }
 0x4b8   : > { %4943 = vmatpush2.bf16.msra.mxu0 %v12845_v24 }
 0x4b9   : > { %4984 = vmatpush2.bf16.msra.mxu1 %v11926_v10  ;;  %4944 = vmatprep.subr.bf16.mxu0 %v16958_v55 }
 0x4ba   : > { %4985 = vmatprep.subr.bf16.mxu1 %v16958_v55 }
 0x4bc   : > { %4945 = vmatpush2.bf16.msra.mxu0 %v11932_v20 }
 0x4bd   : > { %4986 = vmatpush2.bf16.msra.mxu1 %v11939_v47  ;;  %4946 = vmatprep.subr.bf16.mxu0 %v16958_v55 }
 0x4be   : > { %4987 = vmatprep.subr.bf16.mxu1 %v16958_v55 }
 0x4c0   : > { %4947 = vmatpush2.bf16.msra.mxu0 %v11946_v19 }
 0x4c1   : > { %4988 = vmatpush2.bf16.msra.mxu1 %v11953_v23  ;;  %4998 = vmatprep.subr.bf16.mxu0 %v16958_v55 }
 0x4c2   : > { %5041 = vmatprep.subr.bf16.mxu1 %v16958_v55 }
 0x4c3   : > { %v4076_v10 = vpop.f32.mrf.mxu0  ;;  %4949 = vmatmul.mubr.bf16.vlgmr.msra.gmra.mxu0 %v12155_v39 }
 0x4c4   : > { %v4083_v24 = vadd.f32 %v4076_v10, %v12712_v35  ;;  %v4205_v20 = vpop.f32.mrf.mxu1  ;;  %4990 = vmatmul.mubr.bf16.vlgmr.msra.gmra.mxu1 %v11963_v48  ;;  %4999 = vmatpush1.bf16.msra.mxu0 %v11960_v11  ;;  %v16983_v10 = vld [vmem:[#allocation14_spill] sm:$0xff] }
 0x4c5   : > { %8930 = vmatprep.mubr.msk.bf16.mxu0 %vm2737_vm3, %v11979_v32  ;;  %5042 = vmatpush1.bf16.msra.mxu1 %v11969_v14  ;;  %v4078_v47 = vpop.f32.mrf.mxu0 }
 0x4c6   : > { %v4212_v19 = vadd.f32 %v4205_v20, %v4083_v24  ;;  %8931 = vmatprep.mubr.msk.bf16.mxu1 %vm2737_vm3, %v12170_v46  ;;  %v4207_v23 = vpop.f32.mrf.mxu1  ;;  %5000 = vmatprep.subr.bf16.mxu0 %v16958_v55  ;;  %v16981_v24 = vld [vmem:[#allocation12_spill] sm:$0xff]  ;;  %v16984_v20 = vld [vmem:[#allocation15_spill] sm:$0xff] }
 0x4c7   : > { %v4079_v3 = vpop.f32.mrf.mxu0  ;;  %5043 = vmatprep.subr.bf16.mxu1 %v16958_v55  ;;  %v16985_v47 = vld [vmem:[#allocation16_spill] sm:$0xff]  ;;  %v16987_v23 = vld [vmem:[#allocation18_spill] sm:$0xff] }
 0x4c8   : > { %v4084_v48 = vadd.f32 %v4079_v3, %v12734_v61  ;;  %v4208_v35 = vpop.f32.mrf.mxu1  ;;  %5001 = vmatpush1.bf16.msra.mxu0 %v11984_v33  ;;  %v12911_v33 = vld [vmem:[#allocation2 + $0x58] sm:$0xff]  ;;  %v16980_v61 = vld [vmem:[#allocation11_spill] sm:$0xff]  ;;  %v16982_v3 = vld [vmem:[#allocation13_spill] sm:$0xff] }
 0x4c9   : > { %5044 = vmatpush1.bf16.msra.mxu1 %v11992_v40  ;;  %v4081_v11 = vpop.f32.mrf.mxu0  ;;  %5002 = vmatprep.subr.bf16.mxu0 %v16958_v55  ;;  %v12916_v40 = vld [vmem:[#allocation2 + $0x50] sm:$0xff] }
 0x4ca   : > { %v4213_v14 = vadd.f32 %v4208_v35, %v4084_v48  ;;  %v4210_v32 = vpop.f32.mrf.mxu1  ;;  %5045 = vmatprep.subr.bf16.mxu1 %v16958_v55  ;;  %v16992_v48 = vld [vmem:[#allocation22_spill] sm:$0xff] }
 0x4cb   : > { %v16993_v32 = vld [vmem:[#allocation23_spill] sm:$0xff] }
 0x4cc   : > { %5003 = vmatpush1.bf16.msra.mxu0 %v12003_v18  ;;  %v12921_v18 = vcombine.high %v12916_v40, %v12911_v33 }
 0x4cd   : > { %5046 = vmatpush1.bf16.msra.mxu1 %v12010_v15  ;;  %5004 = vmatprep.subr.bf16.mxu0 %v16958_v55 }
 0x4ce   : > { %5047 = vmatprep.subr.bf16.mxu1 %v16958_v55  ;;  %16971 = vst [vmem:[#allocation71_spill] sm:$0xff] %v12921_v18 }
 0x4d0   : > { %5005 = vmatpush1.bf16.msra.mxu0 %v12019_v50 }
 0x4d1   : > { %5048 = vmatpush1.bf16.msra.mxu1 %v12026_v56  ;;  %5006 = vmatprep.subr.bf16.mxu0 %v16958_v55 }
 0x4d2   : > { %5049 = vmatprep.subr.bf16.mxu1 %v16958_v55 }
 0x4d4   : > { %5007 = vmatpush1.bf16.msra.mxu0 %v12036_v27  ;;  %v16972_v27 = vld [vmem:[#allocation3_spill] sm:$0xff] }
 0x4d5   : > { %5050 = vmatpush1.bf16.msra.mxu1 %v12043_v9  ;;  %5008 = vmatprep.subr.bf16.mxu0 %v16958_v55  ;;  %v16973_v9 = vld [vmem:[#allocation4_spill] sm:$0xff] }
 0x4d6   : > { %5051 = vmatprep.subr.bf16.mxu1 %v16958_v55 }
 0x4d8   : > { %5009 = vmatpush1.bf16.msra.mxu0 %v12052_v53 }
 0x4d9   : > { %5052 = vmatpush1.bf16.msra.mxu1 %v12059_v54  ;;  %5010 = vmatprep.subr.bf16.mxu0 %v16958_v55  ;;  %v12933_v54 = vld [vmem:[#allocation2 + $0x24] ss:$8 sps:$4 sm:$0xff]  }
 0x4da   : > { %5053 = vmatprep.subr.bf16.mxu1 %v16958_v55 }
 0x4dc   : > { %5011 = vmatpush1.bf16.msra.mxu0 %v12066_v58 }
 0x4dd   : > { %5054 = vmatpush1.bf16.msra.mxu1 %v12073_v21  ;;  %5012 = vmatprep.subr.bf16.mxu0 %v16958_v55 }
 0x4de   : > { %5055 = vmatprep.subr.bf16.mxu1 %v16958_v55 }
 0x4e0   : > { %5013 = vmatpush1.bf16.msra.mxu0 %v12080_v41 }
 0x4e1   : > { %5056 = vmatpush1.bf16.msra.mxu1 %v12087_v5  ;;  %5022 = vmatprep.subr.bf16.mxu0 %v16958_v55 }
 0x4e2   : > { %5065 = vmatprep.subr.bf16.mxu1 %v16958_v55 }
 0x4e4   : > { %5023 = vmatpush2.bf16.msra.mxu0 %v12094_v22  ;;  %v16974_v22 = vld [vmem:[#allocation5_spill] sm:$0xff] }
 0x4e5   : > { %5066 = vmatpush2.bf16.msra.mxu1 %v12101_v57  ;;  %5024 = vmatprep.subr.bf16.mxu0 %v16958_v55  ;;  %v16975_v57 = vld [vmem:[#allocation6_spill] sm:$0xff] }
 0x4e6   : > { %5067 = vmatprep.subr.bf16.mxu1 %v16958_v55 }
 0x4e8   : > { %5025 = vmatpush2.bf16.msra.mxu0 %v12108_v6 }
 0x4e9   : > { %5068 = vmatpush2.bf16.msra.mxu1 %v12115_v26  ;;  %5026 = vmatprep.subr.bf16.mxu0 %v16958_v55 }
 0x4ea   : > { %5069 = vmatprep.subr.bf16.mxu1 %v16958_v55 }
 0x4ec   : > { %5027 = vmatpush2.bf16.msra.mxu0 %v12122_v37  ;;  %v16976_v37 = vld [vmem:[#allocation7_spill] sm:$0xff] }
 0x4ed   : > { %5070 = vmatpush2.bf16.msra.mxu1 %v12129_v13  ;;  %5028 = vmatprep.subr.bf16.mxu0 %v16958_v55  ;;  %v16977_v13 = vld [vmem:[#allocation8_spill] sm:$0xff] }
 0x4ee   : > { %5071 = vmatprep.subr.bf16.mxu1 %v16958_v55 }
 0x4f0   : > { %5029 = vmatpush2.bf16.msra.mxu0 %v12136_v59  ;;  %v16978_v59 = vld [vmem:[#allocation9_spill] sm:$0xff] }
 0x4f1   : > { %5072 = vmatpush2.bf16.msra.mxu1 %v12143_v60  ;;  %5098 = vmatprep.subr.bf16.mxu0 %v16958_v55  ;;  %v16979_v60 = vld [vmem:[#allocation10_spill] sm:$0xff] }
 0x4f2   : > { %5143 = vmatprep.subr.bf16.mxu1 %v16958_v55 }
 0x4f3   : > { %v4334_v15 = vpop.f32.mrf.mxu0  ;;  %5031 = vmatmul.mubr.bf16.vlgmr.msra.gmra.mxu0 %v12165_v29 }
 0x4f4   : > { %v12924_v50 = vadd.f32 %v4334_v15, %v4212_v19  ;;  %v12926_v56 = vpop.f32.mrf.mxu1  ;;  %5074 = vmatmul.mubr.bf16.vlgmr.msra.gmra.mxu1 %v12348_v8  ;;  %5099 = vmatpush1.bf16.msra.mxu0 %v16972_v27  ;;  %v16986_v19 = vld [vmem:[#allocation17_spill] sm:$0xff] }
 0x4f5   : > { %8934 = vmatprep.mubr.msk.bf16.mxu0 %vm2737_vm3, %v12921_v18  ;;  %5144 = vmatpush1.bf16.msra.mxu1 %v16973_v9  ;;  %v4336_v53 = vpop.f32.mrf.mxu0  ;;  %v12998_v27 = vld [vmem:[#allocation2 + $0x34] ss:$8 sps:$4 sm:$0xff]  }
 0x4f6   : > { %8935 = vmatprep.mubr.msk.bf16.mxu1 %vm2737_vm3, %v12933_v54  ;;  %v4451_v58 = vpop.f32.mrf.mxu1  ;;  %5100 = vmatprep.subr.bf16.mxu0 %v16958_v55 }
 0x4f7   : > { %v4337_v21 = vpop.f32.mrf.mxu0  ;;  %5145 = vmatprep.subr.bf16.mxu1 %v16958_v55 }
 0x4f8   : > { %v12939_v41 = vadd.f32 %v4337_v21, %v4213_v14  ;;  %v12941_v5 = vpop.f32.mrf.mxu1  ;;  %5101 = vmatpush1.bf16.msra.mxu0 %v16974_v22  ;;  %v16995_v21 = vld [vmem:[#allocation25_spill] sm:$0xff] }
 0x4f9   : > { %5146 = vmatpush1.bf16.msra.mxu1 %v16975_v57  ;;  %v4339_v6 = vpop.f32.mrf.mxu0  ;;  %5102 = vmatprep.subr.bf16.mxu0 %v16958_v55 }
 0x4fa   : > { %v4454_v26 = vpop.f32.mrf.mxu1  ;;  %5147 = vmatprep.subr.bf16.mxu1 %v16958_v55 }
 0x4fb   : > { %v16997_v26 = vld [vmem:[#allocation27_spill] sm:$0xff] }
 0x4fc   : > { %5103 = vmatpush1.bf16.msra.mxu0 %v16976_v37  ;;  %v16998_v37 = vld [vmem:[#allocation28_spill] sm:$0xff] }
 0x4fd   : > { %5148 = vmatpush1.bf16.msra.mxu1 %v16977_v13  ;;  %5104 = vmatprep.subr.bf16.mxu0 %v16958_v55  ;;  %v17000_v13 = vld [vmem:[#allocation30_spill] sm:$0xff] }
 0x4fe   : > { %5149 = vmatprep.subr.bf16.mxu1 %v16958_v55 }
 0x500   : > { %5105 = vmatpush1.bf16.msra.mxu0 %v16978_v59  ;;  %v17001_v59 = vld [vmem:[#allocation31_spill] sm:$0xff] }
 0x501   : > { %5150 = vmatpush1.bf16.msra.mxu1 %v16979_v60  ;;  %5106 = vmatprep.subr.bf16.mxu0 %v16958_v55  ;;  %v17002_v60 = vld [vmem:[#allocation32_spill] sm:$0xff] }
 0x502   : > { %5151 = vmatprep.subr.bf16.mxu1 %v16958_v55 }
 0x504   : > { %5107 = vmatpush1.bf16.msra.mxu0 %v16980_v61  ;;  %v17003_v61 = vld [vmem:[#allocation33_spill] sm:$0xff] }
 0x505   : > { %5152 = vmatpush1.bf16.msra.mxu1 %v16981_v24  ;;  %5108 = vmatprep.subr.bf16.mxu0 %v16958_v55  ;;  %v17004_v24 = vld [vmem:[#allocation34_spill] sm:$0xff] }
 0x506   : > { %5153 = vmatprep.subr.bf16.mxu1 %v16958_v55 }
 0x508   : > { %5109 = vmatpush1.bf16.msra.mxu0 %v16982_v3  ;;  %v17005_v3 = vld [vmem:[#allocation35_spill] sm:$0xff] }
 0x509   : > { %5154 = vmatpush1.bf16.msra.mxu1 %v16983_v10  ;;  %5110 = vmatprep.subr.bf16.mxu0 %v16958_v55  ;;  %v17006_v10 = vld [vmem:[#allocation36_spill] sm:$0xff] }
 0x50a   : > { %5155 = vmatprep.subr.bf16.mxu1 %v16958_v55 }
 0x50c   : > { %5111 = vmatpush1.bf16.msra.mxu0 %v16984_v20  ;;  %v17007_v20 = vld [vmem:[#allocation37_spill] sm:$0xff] }
 0x50d   : > { %5156 = vmatpush1.bf16.msra.mxu1 %v16985_v47  ;;  %5112 = vmatprep.subr.bf16.mxu0 %v16958_v55  ;;  %v17008_v47 = vld [vmem:[#allocation38_spill] sm:$0xff] }
 0x50e   : > { %5157 = vmatprep.subr.bf16.mxu1 %v16958_v55 }
 0x510   : > { %5113 = vmatpush1.bf16.msra.mxu0 %v12266_v34  ;;  %v16988_v34 = vld [vmem:[#allocation19_spill] sm:$0xff] }
 0x511   : > { %5158 = vmatpush1.bf16.msra.mxu1 %v12273_v43  ;;  %5122 = vmatprep.subr.bf16.mxu0 %v16958_v55  ;;  %v16989_v43 = vld [vmem:[#allocation20_spill] sm:$0xff] }
 0x512   : > { %5167 = vmatprep.subr.bf16.mxu1 %v16958_v55 }
 0x514   : > { %5123 = vmatpush2.bf16.msra.mxu0 %v12281_v36  ;;  %v16990_v36 = vld [vmem:[#allocation21_spill] sm:$0xff] }
 0x515   : > { %5168 = vmatpush2.bf16.msra.mxu1 %v12288_v2  ;;  %5124 = vmatprep.subr.bf16.mxu0 %v16958_v55  ;;  %v12986_v2 = vcombine.low %v12916_v40, %v12911_v33  ;;  %v16994_v33 = vld [vmem:[#allocation24_spill] sm:$0xff] }
 0x516   : > { %5169 = vmatprep.subr.bf16.mxu1 %v16958_v55 }
 0x517   : > { %16991 = vst [vmem:[#allocation3_spill] sm:$0xff] %v12986_v2 }
 0x518   : > { %5125 = vmatpush2.bf16.msra.mxu0 %v16986_v19  ;;  %v17009_v19 = vld [vmem:[#allocation39_spill] sm:$0xff] }
 0x519   : > { %5170 = vmatpush2.bf16.msra.mxu1 %v16987_v23  ;;  %5126 = vmatprep.subr.bf16.mxu0 %v16958_v55  ;;  %v17010_v23 = vld [vmem:[#allocation40_spill] sm:$0xff] }
 0x51a   : > { %5171 = vmatprep.subr.bf16.mxu1 %v16958_v55 }
 0x51c   : > { %5127 = vmatpush2.bf16.msra.mxu0 %v16988_v34  ;;  %v17011_v34 = vld [vmem:[#allocation41_spill] sm:$0xff] }
 0x51d   : > { %5172 = vmatpush2.bf16.msra.mxu1 %v16989_v43  ;;  %5128 = vmatprep.subr.bf16.mxu0 %v16958_v55  ;;  %v17012_v43 = vld [vmem:[#allocation42_spill] sm:$0xff] }
 0x51e   : > { %5173 = vmatprep.subr.bf16.mxu1 %v16958_v55 }
 0x520   : > { %5129 = vmatpush2.bf16.msra.mxu0 %v16990_v36  ;;  %v17013_v36 = vld [vmem:[#allocation43_spill] sm:$0xff] }
 0x521   : > { %5174 = vmatpush2.bf16.msra.mxu1 %v16992_v48  ;;  %5184 = vmatprep.subr.bf16.mxu0 %v16958_v55  ;;  %v17014_v48 = vld [vmem:[#allocation44_spill] sm:$0xff] }
 0x522   : > { %5225 = vmatprep.subr.bf16.mxu1 %v16958_v55 }
 0x523   : > { %v4562_v35 = vpop.f32.mrf.mxu0  ;;  %5131 = vmatmul.mubr.bf16.vlgmr.msra.gmra.mxu0 %v12986_v2 }
 0x524   : > { %v4563_v11 = vadd.f32 %v4562_v35, %v12926_v56  ;;  %v4675_v14 = vpop.f32.mrf.mxu1  ;;  %5176 = vmatmul.mubr.bf16.vlgmr.msra.gmra.mxu1 %v12155_v39  ;;  %5185 = vmatpush1.bf16.msra.mxu0 %v16993_v32  ;;  %v17015_v35 = vld [vmem:[#allocation45_spill] sm:$0xff] }
 0x525   : > { %8936 = vmatprep.mubr.msk.bf16.mxu0 %vm2737_vm3, %v12722_v0  ;;  %5226 = vmatpush1.bf16.msra.mxu1 %v16994_v33  ;;  %v4564_v40 = vpop.f32.mrf.mxu0  ;;  %v16996_v0 = vld [vmem:[#allocation26_spill] sm:$0xff] }
 0x526   : > { %v4682_v15 = vadd.f32 %v4675_v14, %v4563_v11  ;;  %8937 = vmatprep.mubr.msk.bf16.mxu1 %vm2737_vm3, %v12998_v27  ;;  %v4677_v9 = vpop.f32.mrf.mxu1  ;;  %5186 = vmatprep.subr.bf16.mxu0 %v16958_v55  ;;  %v17016_v11 = vld [vmem:[#allocation46_spill] sm:$0xff] }
 0x527   : > { %v4565_v56 = vpop.f32.mrf.mxu0  ;;  %5227 = vmatprep.subr.bf16.mxu1 %v16958_v55  ;;  %v9533_v32 = vld [vmem:[#allocation2 + $0x10] ss:$8 sps:$4 sm:$0xff]   ;;  %v17017_v9 = vld [vmem:[#allocation47_spill] sm:$0xff] }
 0x528   : > { %v4566_v53 = vadd.f32 %v4565_v56, %v12941_v5  ;;  %v4678_v58 = vpop.f32.mrf.mxu1  ;;  %5187 = vmatpush1.bf16.msra.mxu0 %v16995_v21  ;;  %v16999_v5 = vld [vmem:[#allocation29_spill] sm:$0xff]  ;;  %v17018_v56 = vld [vmem:[#allocation48_spill] sm:$0xff] }
 0x529   : > { %5228 = vmatpush1.bf16.msra.mxu1 %v16996_v0  ;;  %v4567_v22 = vpop.f32.mrf.mxu0  ;;  %5188 = vmatprep.subr.bf16.mxu0 %v16958_v55 }
 0x52a   : > { %v4683_v57 = vadd.f32 %v4678_v58, %v4566_v53  ;;  %v4680_v6 = vpop.f32.mrf.mxu1  ;;  %5229 = vmatprep.subr.bf16.mxu1 %v16958_v55 }
 0x52c   : > { %5189 = vmatpush1.bf16.msra.mxu0 %v16997_v26 }
 0x52d   : > { %5230 = vmatpush1.bf16.msra.mxu1 %v16998_v37  ;;  %5190 = vmatprep.subr.bf16.mxu0 %v16958_v55 }
 0x52e   : > { %5231 = vmatprep.subr.bf16.mxu1 %v16958_v55 }
 0x530   : > { %5191 = vmatpush1.bf16.msra.mxu0 %v16999_v5 }
 0x531   : > { %5232 = vmatpush1.bf16.msra.mxu1 %v17000_v13  ;;  %5192 = vmatprep.subr.bf16.mxu0 %v16958_v55 }
 0x532   : > { %5233 = vmatprep.subr.bf16.mxu1 %v16958_v55 }
 0x534   : > { %5193 = vmatpush1.bf16.msra.mxu0 %v17001_v59 }
 0x535   : > { %5234 = vmatpush1.bf16.msra.mxu1 %v17002_v60  ;;  %5194 = vmatprep.subr.bf16.mxu0 %v16958_v55 }
 0x536   : > { %5235 = vmatprep.subr.bf16.mxu1 %v16958_v55 }
 0x538   : > { %5195 = vmatpush1.bf16.msra.mxu0 %v17003_v61 }
 0x539   : > { %5236 = vmatpush1.bf16.msra.mxu1 %v17004_v24  ;;  %5196 = vmatprep.subr.bf16.mxu0 %v16958_v55 }
 0x53a   : > { %5237 = vmatprep.subr.bf16.mxu1 %v16958_v55 }
 0x53c   : > { %5197 = vmatpush1.bf16.msra.mxu0 %v17005_v3 }
 0x53d   : > { %5238 = vmatpush1.bf16.msra.mxu1 %v17006_v10  ;;  %5198 = vmatprep.subr.bf16.mxu0 %v16958_v55  ;;  %v17029_v10 = vld [vmem:[#allocation59_spill] sm:$0xff] }
 0x53e   : > { %5239 = vmatprep.subr.bf16.mxu1 %v16958_v55 }
 0x540   : > { %5199 = vmatpush1.bf16.msra.mxu0 %v17007_v20  ;;  %v17032_v20 = vld [vmem:[#allocation62_spill] sm:$0xff] }
 0x541   : > { %5240 = vmatpush1.bf16.msra.mxu1 %v17008_v47  ;;  %5208 = vmatprep.subr.bf16.mxu0 %v16958_v55  ;;  %v17035_v47 = vld [vmem:[#allocation65_spill] sm:$0xff] }
 0x542   : > { %5249 = vmatprep.subr.bf16.mxu1 %v16958_v55 }
 0x544   : > { %5209 = vmatpush2.bf16.msra.mxu0 %v17009_v19  ;;  %v17036_v19 = vld [vmem:[#allocation66_spill] sm:$0xff] }
 0x545   : > { %5250 = vmatpush2.bf16.msra.mxu1 %v17010_v23  ;;  %5210 = vmatprep.subr.bf16.mxu0 %v16958_v55  ;;  %v17037_v23 = vld [vmem:[#allocation67_spill] sm:$0xff] }
 0x546   : > { %5251 = vmatprep.subr.bf16.mxu1 %v16958_v55 }
 0x548   : > { %5211 = vmatpush2.bf16.msra.mxu0 %v17011_v34  ;;  %v17038_v34 = vld [vmem:[#allocation68_spill] sm:$0xff] }
 0x549   : > { %5252 = vmatpush2.bf16.msra.mxu1 %v17012_v43  ;;  %5212 = vmatprep.subr.bf16.mxu0 %v16958_v55  ;;  %v17039_v43 = vld [vmem:[#allocation69_spill] sm:$0xff] }
 0x54a   : > { %5253 = vmatprep.subr.bf16.mxu1 %v16958_v55 }
 0x54c   : > { %5213 = vmatpush2.bf16.msra.mxu0 %v17013_v36  ;;  %v17040_v36 = vld [vmem:[#allocation70_spill] sm:$0xff] }
 0x54d   : > { %5254 = vmatpush2.bf16.msra.mxu1 %v17014_v48  ;;  %5214 = vmatprep.subr.bf16.mxu0 %v16958_v55  ;;  %v13160_v48 = vld [vmem:[%s16682_s2 + $0x50] sm:$0xff]  }
 0x54e   : > { %5255 = vmatprep.subr.bf16.mxu1 %v16958_v55 }
 0x550   : > { %5215 = vmatpush2.bf16.msra.mxu0 %v17015_v35  ;;  %v13174_v35 = vld [vmem:[%s16682_s2 + $0x48] sm:$0xff]  }
 0x551   : > { %5256 = vmatpush2.bf16.msra.mxu1 %v17016_v11  ;;  %5268 = vmatprep.subr.bf16.mxu0 %v16958_v55  ;;  %v13182_v11 = vld [vmem:[%s16682_s2 + $0xa0] sm:$0xff]  }
 0x552   : > { %5311 = vmatprep.subr.bf16.mxu1 %v16958_v55 }
 0x553   : > { %v4790_v14 = vpop.f32.mrf.mxu0  ;;  %5217 = vmatmul.mubr.bf16.vlgmr.msra.gmra.mxu0 %v9533_v32 }
 0x554   : > { %v4797_v33 = vadd.f32 %v4790_v14, %v4682_v15  ;;  %v4905_v40 = vpop.f32.mrf.mxu1  ;;  %5258 = vmatmul.mubr.bf16.vlgmr.msra.gmra.mxu1 %v12165_v29  ;;  %5269 = vmatpush1.bf16.msra.mxu0 %v17017_v9  ;;  %v13188_v14 = vld [vmem:[%s16682_s2 + $0x40] sm:$0xff]   ;;  %v13199_v9 = vld [vmem:[%s16682_s2 + $0xf8] sm:$0xff]  }
 0x555   : > { %8938 = vmatprep.mubr.msk.bf16.mxu0 %vm2737_vm3, %v12170_v46  ;;  %5312 = vmatpush1.bf16.msra.mxu1 %v17018_v56  ;;  %v4792_v53 = vpop.f32.mrf.mxu0  ;;  %v13207_v56 = vld [vmem:[%s16682_s2 + $0x158] sm:$0xff]  }
 0x556   : > { %v13054_v58 = vadd.f32 %v4905_v40, %v4797_v33  ;;  %8939 = vmatprep.mubr.msk.bf16.mxu1 %vm2737_vm3, %v12921_v18  ;;  %v4907_v21 = vpop.f32.mrf.mxu1  ;;  %5270 = vmatprep.subr.bf16.mxu0 %v16958_v55 }
 0x557   : > { %v4793_v15 = vpop.f32.mrf.mxu0  ;;  %5313 = vmatprep.subr.bf16.mxu1 %v16958_v55 }
 0x558   : > { %v4914_v0 = vmax.f32 %v12924_v50, %v13054_v58  ;;  %v4798_v22 = vadd.f32 %v4793_v15, %v4683_v57  ;;  %v4908_v6 = vpop.f32.mrf.mxu1  ;;  %5271 = vmatpush1.bf16.msra.mxu0 %v12538_v49  ;;  %v17019_v49 = vld [vmem:[#allocation49_spill] sm:$0xff] }
 0x559   : > { %5314 = vmatpush1.bf16.msra.mxu1 %v12546_v12  ;;  %v4795_v26 = vpop.f32.mrf.mxu0  ;;  %5272 = vmatprep.subr.bf16.mxu0 %v16958_v55  ;;  %v17020_v12 = vld [vmem:[#allocation50_spill] sm:$0xff]  ;;  %v13421_v50 = vld [vmem:[%s16682_s2 + $0x270] sm:$0xff]  }
 0x55a   : > { %v13065_v37 = vadd.f32 %v4908_v6, %v4798_v22  ;;  %v4910_v5 = vpop.f32.mrf.mxu1  ;;  %5315 = vmatprep.subr.bf16.mxu1 %v16958_v55 }
 0x55b   : > { %v13220_v5 = vld [vmem:[%s16682_s2 + $0xf0] sm:$0xff]  }
 0x55c   : > { %v4915_v13 = vmax.f32 %v12939_v41, %v13065_v37  ;;  %5273 = vmatpush1.bf16.msra.mxu0 %v12557_v7  ;;  %v17021_v7 = vld [vmem:[#allocation51_spill] sm:$0xff] }
 0x55d   : > { %5316 = vmatpush1.bf16.msra.mxu1 %v12564_v28  ;;  %5274 = vmatprep.subr.bf16.mxu0 %v16958_v55  ;;  %v17022_v28 = vld [vmem:[#allocation52_spill] sm:$0xff]  ;;  %v13448_v41 = vld [vmem:[%s16682_s2 + $0x1a0] sm:$0xff]  }
 0x55e   : > { %5317 = vmatprep.subr.bf16.mxu1 %v16958_v55  ;;  %v13454_v37 = vld [vmem:[%s16682_s2 + $0x260] sm:$0xff]  }
 0x560   : > { %5275 = vmatpush1.bf16.msra.mxu0 %v12573_v16  ;;  %v17023_v16 = vld [vmem:[#allocation53_spill] sm:$0xff] }
 0x561   : > { %5318 = vmatpush1.bf16.msra.mxu1 %v12580_v4  ;;  %5276 = vmatprep.subr.bf16.mxu0 %v16958_v55  ;;  %v17024_v4 = vld [vmem:[#allocation54_spill] sm:$0xff] }
 0x562   : > { %5319 = vmatprep.subr.bf16.mxu1 %v16958_v55 }
 0x564   : > { %5277 = vmatpush1.bf16.msra.mxu0 %v12590_v42  ;;  %v17025_v42 = vld [vmem:[#allocation55_spill] sm:$0xff] }
 0x565   : > { %5320 = vmatpush1.bf16.msra.mxu1 %v12597_v30  ;;  %5278 = vmatprep.subr.bf16.mxu0 %v16958_v55  ;;  %v17026_v30 = vld [vmem:[#allocation56_spill] sm:$0xff] }
 0x566   : > { %5321 = vmatprep.subr.bf16.mxu1 %v16958_v55 }
 0x568   : > { %5279 = vmatpush1.bf16.msra.mxu0 %v12606_v25 }
 0x569   : > { %5322 = vmatpush1.bf16.msra.mxu1 %v12613_v51  ;;  %5280 = vmatprep.subr.bf16.mxu0 %v16958_v55 }
 0x56a   : > { %5323 = vmatprep.subr.bf16.mxu1 %v16958_v55 }
 0x56c   : > { %5281 = vmatpush1.bf16.msra.mxu0 %v12620_v52  ;;  %v17027_v52 = vld [vmem:[#allocation57_spill] sm:$0xff] }
 0x56d   : > { %5324 = vmatpush1.bf16.msra.mxu1 %v12627_v63  ;;  %5282 = vmatprep.subr.bf16.mxu0 %v16958_v55 }
 0x56e   : > { %5325 = vmatprep.subr.bf16.mxu1 %v16958_v55 }
 0x570   : > { %5283 = vmatpush1.bf16.msra.mxu0 %v12634_v45  ;;  %v17028_v45 = vld [vmem:[#allocation58_spill] sm:$0xff] }
 0x571   : > { %5326 = vmatpush1.bf16.msra.mxu1 %v12641_v1  ;;  %5292 = vmatprep.subr.bf16.mxu0 %v16958_v55 }
 0x572   : > { %5335 = vmatprep.subr.bf16.mxu1 %v16958_v55 }
 0x574   : > { %5293 = vmatpush2.bf16.msra.mxu0 %v17019_v49  ;;  %v13226_v49 = vld [vmem:[%s16682_s2 + $0x150] sm:$0xff]  }
 0x575   : > { %5336 = vmatpush2.bf16.msra.mxu1 %v17020_v12  ;;  %5294 = vmatprep.subr.bf16.mxu0 %v16958_v55 }
 0x576   : > { %5337 = vmatprep.subr.bf16.mxu1 %v16958_v55 }
 0x578   : > { %5295 = vmatpush2.bf16.msra.mxu0 %v17021_v7 }
 0x579   : > { %5338 = vmatpush2.bf16.msra.mxu1 %v17022_v28  ;;  %5296 = vmatprep.subr.bf16.mxu0 %v16958_v55 }
 0x57a   : > { %5339 = vmatprep.subr.bf16.mxu1 %v16958_v55 }
 0x57c   : > { %5297 = vmatpush2.bf16.msra.mxu0 %v17023_v16  ;;  %v13236_v16 = vld [vmem:[%s16682_s2 + $0xe8] sm:$0xff]  }
 0x57d   : > { %5340 = vmatpush2.bf16.msra.mxu1 %v17024_v4  ;;  %5298 = vmatprep.subr.bf16.mxu0 %v16958_v55  ;;  %v13242_v4 = vld [vmem:[%s16682_s2 + $0x148] sm:$0xff]  }
 0x57e   : > { %5341 = vmatprep.subr.bf16.mxu1 %v16958_v55 }
 0x580   : > { %5299 = vmatpush2.bf16.msra.mxu0 %v17025_v42  ;;  %v13250_v42 = vld [vmem:[%s16682_s2 + $0xe0] sm:$0xff]  }
 0x581   : > { %5342 = vmatpush2.bf16.msra.mxu1 %v17026_v30  ;;  %5367 = vmatprep.subr.bf16.mxu0 %v16958_v55  ;;  %v13256_v30 = vld [vmem:[%s16682_s2 + $0x140] sm:$0xff]  }
 0x582   : > { %5408 = vmatprep.subr.bf16.mxu1 %v16958_v55 }
 0x583   : > { %v4950_v25 = vpop.f32.mrf.mxu0  ;;  %5301 = vmatmul.mubr.bf16.vlgmr.msra.gmra.mxu0 %v12348_v8 }
 0x584   : > { %v4991_v51 = vpop.f32.mrf.mxu1  ;;  %5344 = vmatmul.mubr.bf16.vlgmr.msra.gmra.mxu1 %v12986_v2  ;;  %5368 = vmatpush1.bf16.msra.mxu0 %v17027_v52  ;;  %v13278_v52 = vld [vmem:[%s16682_s2 + $0xd0] sm:$0xff]  }
 0x585   : > { %v13113_v63 = vadd.f32 %v4991_v51, %v4950_v25  ;;  %8941 = vmatprep.mubr.msk.bf16.mxu0 %vm2737_vm3, %v12998_v27  ;;  %5409 = vmatpush1.bf16.msra.mxu1 %v17028_v45  ;;  %v4952_v1 = vpop.f32.mrf.mxu0  ;;  %v13264_v25 = vld [vmem:[%s16682_s2 + $0xd8] sm:$0xff]   ;;  %v13292_v45 = vld [vmem:[%s16682_s2 + $0xc8] sm:$0xff]  }
 0x586   : > { %8942 = vmatprep.mubr.msk.bf16.mxu1 %vm2737_vm3, %v12933_v54  ;;  %v4993_v57 = vpop.f32.mrf.mxu1  ;;  %5369 = vmatprep.subr.bf16.mxu0 %v16958_v55  ;;  %v13270_v51 = vld [vmem:[%s16682_s2 + $0x138] sm:$0xff]   ;;  %v13298_v1 = vld [vmem:[%s16682_s2 + $0x128] sm:$0xff]  }
 0x587   : > { %v4953_v59 = vpop.f32.mrf.mxu0  ;;  %5410 = vmatprep.subr.bf16.mxu1 %v16958_v55  ;;  %v13306_v57 = vld [vmem:[%s16682_s2 + $0xc0] sm:$0xff]  }
 0x588   : > { %v4994_v60 = vpop.f32.mrf.mxu1  ;;  %5370 = vmatpush1.bf16.msra.mxu0 %v12731_v38  ;;  %v17030_v38 = vld [vmem:[#allocation60_spill] sm:$0xff] }
 0x589   : > { %v13123_v61 = vadd.f32 %v4994_v60, %v4953_v59  ;;  %5411 = vmatpush1.bf16.msra.mxu1 %v12739_v17  ;;  %v4955_v24 = vpop.f32.mrf.mxu0  ;;  %5371 = vmatprep.subr.bf16.mxu0 %v16958_v55  ;;  %v17031_v17 = vld [vmem:[#allocation61_spill] sm:$0xff]  ;;  %v13312_v59 = vld [vmem:[%s16682_s2 + $0x120] sm:$0xff]   ;;  %v13320_v60 = vld [vmem:[%s16682_s2 + $0x118] sm:$0xff]  }
 0x58a   : > { %v4996_v3 = vpop.f32.mrf.mxu1  ;;  %5412 = vmatprep.subr.bf16.mxu1 %v16958_v55  ;;  %v13334_v24 = vld [vmem:[%s16682_s2 + $0x110] sm:$0xff]  }
 0x58b   : > { %v13340_v3 = vld [vmem:[%s16682_s2 + $0x170] sm:$0xff]  }
 0x58c   : > { %5372 = vmatpush1.bf16.msra.mxu0 %v12747_v44  ;;  %v17033_v44 = vld [vmem:[#allocation63_spill] sm:$0xff] }
 0x58d   : > { %5413 = vmatpush1.bf16.msra.mxu1 %v12753_v62  ;;  %5373 = vmatprep.subr.bf16.mxu0 %v16958_v55  ;;  %v17034_v62 = vld [vmem:[#allocation64_spill] sm:$0xff] }
 0x58e   : > { %5414 = vmatprep.subr.bf16.mxu1 %v16958_v55 }
 0x590   : > { %5374 = vmatpush1.bf16.msra.mxu0 %v17029_v10  ;;  %v13348_v10 = vld [vmem:[%s16682_s2 + $0x108] sm:$0xff]  }
 0x591   : > { %5415 = vmatpush1.bf16.msra.mxu1 %v17030_v38  ;;  %5375 = vmatprep.subr.bf16.mxu0 %v16958_v55  ;;  %v13354_v38 = vld [vmem:[%s16682_s2 + $0x168] sm:$0xff]  }
 0x592   : > { %5416 = vmatprep.subr.bf16.mxu1 %v16958_v55 }
 0x594   : > { %5376 = vmatpush1.bf16.msra.mxu0 %v17031_v17  ;;  %v13359_v17 = vld [vmem:[#allocation2 + $0x68] sm:$0xff] }
 0x595   : > { %5417 = vmatpush1.bf16.msra.mxu1 %v17032_v20  ;;  %5377 = vmatprep.subr.bf16.mxu0 %v16958_v55  ;;  %v13364_v20 = vld [vmem:[%s16682_s2 + $0x100] sm:$0xff]  }
 0x596   : > { %5418 = vmatprep.subr.bf16.mxu1 %v16958_v55 }
 0x598   : > { %5378 = vmatpush1.bf16.msra.mxu0 %v17033_v44  ;;  %v13370_v44 = vld [vmem:[%s16682_s2 + $0x160] sm:$0xff]  }
 0x599   : > { %5419 = vmatpush1.bf16.msra.mxu1 %v17034_v62  ;;  %5379 = vmatprep.subr.bf16.mxu0 %v16958_v55  ;;  %v13374_v62 = vld [vmem:[#allocation2 + $0x60] sm:$0xff] }
 0x59a   : > { %5420 = vmatprep.subr.bf16.mxu1 %v16958_v55 }
 0x59c   : > { %5380 = vmatpush1.bf16.msra.mxu0 %v17035_v47  ;;  %v13379_v47 = vcombine.high %v13374_v62, %v13359_v17 }
 0x59d   : > { %5421 = vmatpush1.bf16.msra.mxu1 %v17036_v19  ;;  %5381 = vmatprep.subr.bf16.mxu0 %v16958_v55 }
 0x59e   : > { %5422 = vmatprep.subr.bf16.mxu1 %v16958_v55 }
 0x5a0   : > { %5382 = vmatpush1.bf16.msra.mxu0 %v17037_v23 }
 0x5a1   : > { %5423 = vmatpush1.bf16.msra.mxu1 %v17038_v34  ;;  %5391 = vmatprep.subr.bf16.mxu0 %v16958_v55 }
 0x5a2   : > { %5432 = vmatprep.subr.bf16.mxu1 %v16958_v55 }
 0x5a4   : > { %5392 = vmatpush2.bf16.msra.mxu0 %v12831_v31  ;;  %v13168_v31 = vld [vmem:[%s16682_s2 + $0xa8] sm:$0xff]  }
 0x5a5   : > { %5433 = vmatpush2.bf16.msra.mxu1 %v17039_v43  ;;  %5393 = vmatprep.subr.bf16.mxu0 %v16958_v55  ;;  %v13389_v43 = vld [vmem:[%s16682_s2 + $0x1b8] sm:$0xff]  }
 0x5a6   : > { %5434 = vmatprep.subr.bf16.mxu1 %v16958_v55 }
 0x5a8   : > { %5394 = vmatpush2.bf16.msra.mxu0 %v17040_v36  ;;  %v13397_v36 = vld [vmem:[%s16682_s2 + $0x278] sm:$0xff]  }
 0x5a9   : > { %5435 = vmatpush2.bf16.msra.mxu1 %v13160_v48  ;;  %5395 = vmatprep.subr.bf16.mxu0 %v16958_v55 }
 0x5aa   : > { %5436 = vmatprep.subr.bf16.mxu1 %v16958_v55 }
 0x5ac   : > { %5396 = vmatpush2.bf16.msra.mxu0 %v13168_v31 }
 0x5ad   : > { %5437 = vmatpush2.bf16.msra.mxu1 %v13174_v35  ;;  %5397 = vmatprep.subr.bf16.mxu0 %v16958_v55 }
 0x5ae   : > { %5438 = vmatprep.subr.bf16.mxu1 %v16958_v55 }
 0x5b0   : > { %5398 = vmatpush2.bf16.msra.mxu0 %v13182_v11 }
 0x5b1   : > { %5439 = vmatpush2.bf16.msra.mxu1 %v13188_v14  ;;  %5449 = vmatprep.subr.bf16.mxu0 %v16958_v55 }
 0x5b2   : > { %5492 = vmatprep.subr.bf16.mxu1 %v16958_v55 }
 0x5b3   : > { %v5032_v32 = vpop.f32.mrf.mxu0  ;;  %5400 = vmatmul.mubr.bf16.vlgmr.msra.gmra.mxu0 %v12165_v29 }
 0x5b4   : > { %v5039_v33 = vadd.f32 %v5032_v32, %v13113_v63  ;;  %v5075_v40 = vpop.f32.mrf.mxu1  ;;  %5441 = vmatmul.mubr.bf16.vlgmr.msra.gmra.mxu1 %v12155_v39  ;;  %5450 = vmatpush1.bf16.msra.mxu0 %v13199_v9  ;;  %v13284_v63 = vld [vmem:[%s16682_s2 + $0x130] sm:$0xff]  }
 0x5b5   : > { %8943 = vmatprep.mubr.msk.bf16.mxu0 %vm2737_vm3, %v12170_v46  ;;  %5493 = vmatpush1.bf16.msra.mxu1 %v13207_v56  ;;  %v5034_v53 = vpop.f32.mrf.mxu0 }
 0x5b6   : > { %v13210_v21 = vadd.f32 %v5075_v40, %v5039_v33  ;;  %8944 = vmatprep.mubr.msk.bf16.mxu1 %vm2737_vm3, %v12921_v18  ;;  %v5077_v15 = vpop.f32.mrf.mxu1  ;;  %5451 = vmatprep.subr.bf16.mxu0 %v16958_v55 }
 0x5b7   : > { %v5035_v22 = vpop.f32.mrf.mxu0  ;;  %5494 = vmatprep.subr.bf16.mxu1 %v16958_v55 }
 0x5b8   : > { %v5040_v6 = vadd.f32 %v5035_v22, %v13123_v61  ;;  %v5078_v26 = vpop.f32.mrf.mxu1  ;;  %5452 = vmatpush1.bf16.msra.mxu0 %v13220_v5  ;;  %v13326_v61 = vld [vmem:[%s16682_s2 + $0x178] sm:$0xff]   ;;  %v13415_v22 = vld [vmem:[%s16682_s2 + $0x1b0] sm:$0xff]  }
 0x5b9   : > { %5495 = vmatpush1.bf16.msra.mxu1 %v13226_v49  ;;  %v5037_v12 = vpop.f32.mrf.mxu0  ;;  %5453 = vmatprep.subr.bf16.mxu0 %v16958_v55 }
 0x5ba   : > { %v13230_v7 = vadd.f32 %v5078_v26, %v5040_v6  ;;  %v5080_v28 = vpop.f32.mrf.mxu1  ;;  %5496 = vmatprep.subr.bf16.mxu1 %v16958_v55  ;;  %v13434_v26 = vld [vmem:[%s16682_s2 + $0x1a8] sm:$0xff]  }
 0x5bb   : > { %v13440_v12 = vld [vmem:[%s16682_s2 + $0x268] sm:$0xff]   ;;  %v13476_v28 = vld [vmem:[%s16682_s2 + $0x190] sm:$0xff]  }
 0x5bc   : > { %5454 = vmatpush1.bf16.msra.mxu0 %v13236_v16 }
 0x5bd   : > { %5497 = vmatpush1.bf16.msra.mxu1 %v13242_v4  ;;  %5455 = vmatprep.subr.bf16.mxu0 %v16958_v55 }
 0x5be   : > { %5498 = vmatprep.subr.bf16.mxu1 %v16958_v55 }
 0x5c0   : > { %5456 = vmatpush1.bf16.msra.mxu0 %v13250_v42 }
 0x5c1   : > { %5499 = vmatpush1.bf16.msra.mxu1 %v13256_v30  ;;  %5457 = vmatprep.subr.bf16.mxu0 %v16958_v55 }
 0x5c2   : > { %5500 = vmatprep.subr.bf16.mxu1 %v16958_v55 }
 0x5c4   : > { %5458 = vmatpush1.bf16.msra.mxu0 %v13264_v25 }
 0x5c5   : > { %5501 = vmatpush1.bf16.msra.mxu1 %v13270_v51  ;;  %5459 = vmatprep.subr.bf16.mxu0 %v16958_v55 }
 0x5c6   : > { %5502 = vmatprep.subr.bf16.mxu1 %v16958_v55 }
 0x5c8   : > { %5460 = vmatpush1.bf16.msra.mxu0 %v13278_v52 }
 0x5c9   : > { %5503 = vmatpush1.bf16.msra.mxu1 %v13284_v63  ;;  %5461 = vmatprep.subr.bf16.mxu0 %v16958_v55 }
 0x5ca   : > { %5504 = vmatprep.subr.bf16.mxu1 %v16958_v55 }
 0x5cc   : > { %5462 = vmatpush1.bf16.msra.mxu0 %v13292_v45 }
 0x5cd   : > { %5505 = vmatpush1.bf16.msra.mxu1 %v13298_v1  ;;  %5463 = vmatprep.subr.bf16.mxu0 %v16958_v55 }
 0x5ce   : > { %5506 = vmatprep.subr.bf16.mxu1 %v16958_v55 }
 0x5d0   : > { %5464 = vmatpush1.bf16.msra.mxu0 %v13306_v57 }
 0x5d1   : > { %5507 = vmatpush1.bf16.msra.mxu1 %v13312_v59  ;;  %5473 = vmatprep.subr.bf16.mxu0 %v16958_v55 }
 0x5d2   : > { %5516 = vmatprep.subr.bf16.mxu1 %v16958_v55 }
 0x5d4   : > { %5474 = vmatpush2.bf16.msra.mxu0 %v13320_v60 }
 0x5d5   : > { %5517 = vmatpush2.bf16.msra.mxu1 %v13326_v61  ;;  %5475 = vmatprep.subr.bf16.mxu0 %v16958_v55 }
 0x5d6   : > { %5518 = vmatprep.subr.bf16.mxu1 %v16958_v55 }
 0x5d8   : > { %5476 = vmatpush2.bf16.msra.mxu0 %v13334_v24 }
 0x5d9   : > { %5519 = vmatpush2.bf16.msra.mxu1 %v13340_v3  ;;  %5477 = vmatprep.subr.bf16.mxu0 %v16958_v55 }
 0x5da   : > { %5520 = vmatprep.subr.bf16.mxu1 %v16958_v55 }
 0x5dc   : > { %5478 = vmatpush2.bf16.msra.mxu0 %v13348_v10 }
 0x5dd   : > { %5521 = vmatpush2.bf16.msra.mxu1 %v13354_v38  ;;  %5479 = vmatprep.subr.bf16.mxu0 %v16958_v55 }
 0x5de   : > { %5522 = vmatprep.subr.bf16.mxu1 %v16958_v55 }
 0x5e0   : > { %5480 = vmatpush2.bf16.msra.mxu0 %v13364_v20 }
 0x5e1   : > { %5523 = vmatpush2.bf16.msra.mxu1 %v13370_v44  ;;  %5549 = vmatprep.subr.bf16.mxu0 %v16958_v55 }
 0x5e2   : > { %5592 = vmatprep.subr.bf16.mxu1 %v16958_v55 }
 0x5e3   : > { %v5132_v19 = vpop.f32.mrf.mxu0  ;;  %5482 = vmatmul.mubr.bf16.vlgmr.msra.gmra.mxu0 %v12348_v8 }
 0x5e4   : > { %v5139_v23 = vadd.f32 %v5132_v19, %v13210_v21  ;;  %v13383_v34 = vpop.f32.mrf.mxu1  ;;  %5525 = vmatmul.mubr.bf16.vlgmr.msra.gmra.mxu1 %v12986_v2  ;;  %5550 = vmatpush1.bf16.msra.mxu0 %v13389_v43  ;;  %v13482_v19 = vld [vmem:[%s16682_s2 + $0x250] sm:$0xff]  }
 0x5e5   : > { %8947 = vmatprep.mubr.msk.bf16.mxu0 %vm2737_vm3, %v13379_v47  ;;  %5593 = vmatpush1.bf16.msra.mxu1 %v13397_v36  ;;  %v5134_v32 = vpop.f32.mrf.mxu0 }
 0x5e6   : > { %v13403_v33 = vmax.f32 %v4914_v0, %v5139_v23  ;;  %8948 = vmatprep.mubr.msk.bf16.mxu1 %vm2737_vm3, %v12998_v27  ;;  %v5179_v40 = vpop.f32.mrf.mxu1  ;;  %5551 = vmatprep.subr.bf16.mxu0 %v16958_v55  ;;  %v13490_v23 = vld [vmem:[%s16682_s2 + $0x188] sm:$0xff]  }
 0x5e7   : > { %v5135_v53 = vpop.f32.mrf.mxu0  ;;  %5594 = vmatprep.subr.bf16.mxu1 %v16958_v55  ;;  %17041 = vst [vmem:[#allocation4_spill] sm:$0xff] %v13490_v23  ;;  %v13496_v32 = vld [vmem:[%s16682_s2 + $0x248] sm:$0xff]   ;;  %v13504_v40 = vld [vmem:[%s16682_s2 + $0x180] sm:$0xff]  }
 0x5e8   : > { %v5140_v21 = vadd.f32 %v5135_v53, %v13230_v7  ;;  %v13410_v15 = vpop.f32.mrf.mxu1  ;;  %5552 = vmatpush1.bf16.msra.mxu0 %v13415_v22  ;;  %v13468_v7 = vld [vmem:[%s16682_s2 + $0x258] sm:$0xff]   ;;  %17042 = vst [vmem:[#allocation5_spill] sm:$0xff] %v13496_v32  ;;  %17043 = vst [vmem:[#allocation6_spill] sm:$0xff] %v13504_v40  ;;  %v13510_v53 = vld [vmem:[%s16682_s2 + $0x240] sm:$0xff]  }
 0x5e9   : > { %5595 = vmatpush1.bf16.msra.mxu1 %v13421_v50  ;;  %v5137_v58 = vpop.f32.mrf.mxu0  ;;  %5553 = vmatprep.subr.bf16.mxu0 %v16958_v55  ;;  %17044 = vst [vmem:[#allocation7_spill] sm:$0xff] %v13510_v53 }
 0x5ea   : > { %v13428_v0 = vmax.f32 %v4915_v13, %v5140_v21  ;;  %v5182_v6 = vpop.f32.mrf.mxu1  ;;  %5596 = vmatprep.subr.bf16.mxu1 %v16958_v55  ;;  %v13462_v13 = vld [vmem:[%s16682_s2 + $0x198] sm:$0xff]  }
 0x5eb   : > { %v13518_v21 = vld [vmem:[%s16682_s2 + $0x1d8] sm:$0xff]   ;;  %v13532_v6 = vld [vmem:[%s16682_s2 + $0x1d0] sm:$0xff]  }
 0x5ec   : > { %5554 = vmatpush1.bf16.msra.mxu0 %v13434_v26  ;;  %17045 = vst [vmem:[#allocation8_spill] sm:$0xff] %v13518_v21  ;;  %v13524_v58 = vld [vmem:[%s16682_s2 + $0x298] sm:$0xff]   ;;  %17047 = vst [vmem:[#allocation10_spill] sm:$0xff] %v13532_v6 }
 0x5ed   : > { %5597 = vmatpush1.bf16.msra.mxu1 %v13440_v12  ;;  %5555 = vmatprep.subr.bf16.mxu0 %v16958_v55  ;;  %17046 = vst [vmem:[#allocation9_spill] sm:$0xff] %v13524_v58 }
 0x5ee   : > { %5598 = vmatprep.subr.bf16.mxu1 %v16958_v55 }
 0x5f0   : > { %5556 = vmatpush1.bf16.msra.mxu0 %v13448_v41 }
 0x5f1   : > { %5599 = vmatpush1.bf16.msra.mxu1 %v13454_v37  ;;  %5557 = vmatprep.subr.bf16.mxu0 %v16958_v55 }
 0x5f2   : > { %5600 = vmatprep.subr.bf16.mxu1 %v16958_v55 }
 0x5f4   : > { %5558 = vmatpush1.bf16.msra.mxu0 %v13462_v13 }
 0x5f5   : > { %5601 = vmatpush1.bf16.msra.mxu1 %v13468_v7  ;;  %5559 = vmatprep.subr.bf16.mxu0 %v16958_v55 }
 0x5f6   : > { %5602 = vmatprep.subr.bf16.mxu1 %v16958_v55 }
 0x5f8   : > { %5560 = vmatpush1.bf16.msra.mxu0 %v13476_v28 }
 0x5f9   : > { %5603 = vmatpush1.bf16.msra.mxu1 %v13482_v19  ;;  %5561 = vmatprep.subr.bf16.mxu0 %v16958_v55 }
 0x5fa   : > { %5604 = vmatprep.subr.bf16.mxu1 %v16958_v55 }
 0x5fc   : > { %5562 = vmatpush1.bf16.msra.mxu0 %v13490_v23  ;;  %v13602_v23 = vld [vmem:[%s16682_s2 + $0x210] sm:$0xff]  }
 0x5fd   : > { %5605 = vmatpush1.bf16.msra.mxu1 %v13496_v32  ;;  %5563 = vmatprep.subr.bf16.mxu0 %v16958_v55  ;;  %17055 = vst [vmem:[#allocation18_spill] sm:$0xff] %v13602_v23 }
 0x5fe   : > { %5606 = vmatprep.subr.bf16.mxu1 %v16958_v55 }
 0x600   : > { %5564 = vmatpush1.bf16.msra.mxu0 %v13504_v40 }
 0x601   : > { %5607 = vmatpush1.bf16.msra.mxu1 %v13510_v53  ;;  %5573 = vmatprep.subr.bf16.mxu0 %v16958_v55  ;;  %v13570_v53 = vld [vmem:[%s16682_s2 + $0x280] sm:$0xff]  }
 0x602   : > { %5616 = vmatprep.subr.bf16.mxu1 %v16958_v55  ;;  %17053 = vst [vmem:[#allocation16_spill] sm:$0xff] %v13570_v53 }
 0x604   : > { %5574 = vmatpush2.bf16.msra.mxu0 %v13518_v21  ;;  %v13538_v21 = vld [vmem:[%s16682_s2 + $0x290] sm:$0xff]  }
 0x605   : > { %5617 = vmatpush2.bf16.msra.mxu1 %v13524_v58  ;;  %5575 = vmatprep.subr.bf16.mxu0 %v16958_v55  ;;  %17048 = vst [vmem:[#allocation11_spill] sm:$0xff] %v13538_v21  ;;  %v13546_v58 = vld [vmem:[%s16682_s2 + $0x1c8] sm:$0xff]  }
 0x606   : > { %5618 = vmatprep.subr.bf16.mxu1 %v16958_v55  ;;  %17049 = vst [vmem:[#allocation12_spill] sm:$0xff] %v13546_v58 }
 0x608   : > { %5576 = vmatpush2.bf16.msra.mxu0 %v13532_v6  ;;  %v13552_v6 = vld [vmem:[%s16682_s2 + $0x288] sm:$0xff]  }
 0x609   : > { %5619 = vmatpush2.bf16.msra.mxu1 %v13538_v21  ;;  %5577 = vmatprep.subr.bf16.mxu0 %v16958_v55  ;;  %17050 = vst [vmem:[#allocation13_spill] sm:$0xff] %v13552_v6  ;;  %v13560_v21 = vld [vmem:[%s16682_s2 + $0x1c0] sm:$0xff]  }
 0x60a   : > { %5620 = vmatprep.subr.bf16.mxu1 %v16958_v55  ;;  %17051 = vst [vmem:[#allocation14_spill] sm:$0xff] %v13560_v21 }
 0x60c   : > { %5578 = vmatpush2.bf16.msra.mxu0 %v13546_v58  ;;  %v13565_v58 = vcombine.low %v13374_v62, %v13359_v17  ;;  %v13581_v17 = vld [vmem:[%s16682_s2 + $0x218] sm:$0xff]  }
 0x60d   : > { %5621 = vmatpush2.bf16.msra.mxu1 %v13552_v6  ;;  %5579 = vmatprep.subr.bf16.mxu0 %v16958_v55  ;;  %17054 = vst [vmem:[#allocation17_spill] sm:$0xff] %v13581_v17  ;;  %v13589_v62 = vld [vmem:[%s16682_s2 + $0x2d8] sm:$0xff]  }
 0x60e   : > { %5622 = vmatprep.subr.bf16.mxu1 %v16958_v55  ;;  %17052 = vst [vmem:[#allocation15_spill] sm:$0xff] %v13565_v58 }
 0x610   : > { %5580 = vmatpush2.bf16.msra.mxu0 %v13560_v21 }
 0x611   : > { %5623 = vmatpush2.bf16.msra.mxu1 %v13570_v53  ;;  %5633 = vmatprep.subr.bf16.mxu0 %v16958_v55 }
 0x612   : > { %5674 = vmatprep.subr.bf16.mxu1 %v16958_v55 }
 0x613   : > { %v5218_v6 = vpop.f32.mrf.mxu0  ;;  %5582 = vmatmul.mubr.bf16.vlgmr.msra.gmra.mxu0 %v13565_v58 }
 0x614   : > { %v5219_v21 = vadd.f32 %v5218_v6, %v13383_v34  ;;  %v5259_v40 = vpop.f32.mrf.mxu1  ;;  %5625 = vmatmul.mubr.bf16.vlgmr.msra.gmra.mxu1 %v12165_v29  ;;  %5634 = vmatpush1.bf16.msra.mxu0 %v13581_v17 }
 0x615   : > { %8949 = vmatprep.mubr.msk.bf16.mxu0 %vm2737_vm3, %v12933_v54  ;;  %5675 = vmatpush1.bf16.msra.mxu1 %v13589_v62  ;;  %v5220_v34 = vpop.f32.mrf.mxu0 }
 0x616   : > { %v13592_v6 = vadd.f32 %v5259_v40, %v5219_v21  ;;  %8950 = vmatprep.mubr.msk.bf16.mxu1 %vm2737_vm3, %v12170_v46  ;;  %v5261_v53 = vpop.f32.mrf.mxu1  ;;  %5635 = vmatprep.subr.bf16.mxu0 %v16958_v55  ;;  %v13608_v40 = vld [vmem:[%s16682_s2 + $0x2d0] sm:$0xff]   ;;  %v13624_v34 = vld [vmem:[%s16682_s2 + $0x2c8] sm:$0xff]  }
 0x617   : > { %v5221_v17 = vpop.f32.mrf.mxu0  ;;  %5676 = vmatprep.subr.bf16.mxu1 %v16958_v55  ;;  %17056 = vst [vmem:[#allocation19_spill] sm:$0xff] %v13608_v40  ;;  %17058 = vst [vmem:[#allocation21_spill] sm:$0xff] %v13624_v34 }
 0x618   : > { %v5222_v54 = vadd.f32 %v5221_v17, %v13410_v15  ;;  %v5262_v32 = vpop.f32.mrf.mxu1  ;;  %5636 = vmatpush1.bf16.msra.mxu0 %v13602_v23  ;;  %v13618_v17 = vld [vmem:[%s16682_s2 + $0x208] sm:$0xff]  }
 0x619   : > { %5677 = vmatpush1.bf16.msra.mxu1 %v13608_v40  ;;  %v5223_v53 = vpop.f32.mrf.mxu0  ;;  %5637 = vmatprep.subr.bf16.mxu0 %v16958_v55  ;;  %17057 = vst [vmem:[#allocation20_spill] sm:$0xff] %v13618_v17 }
 0x61a   : > { %v13612_v21 = vadd.f32 %v5262_v32, %v5222_v54  ;;  %v5264_v15 = vpop.f32.mrf.mxu1  ;;  %5678 = vmatprep.subr.bf16.mxu1 %v16958_v55  ;;  %v13632_v32 = vld [vmem:[%s16682_s2 + $0x200] sm:$0xff]   ;;  %v13646_v53 = vld [vmem:[%s16682_s2 + $0x1f8] sm:$0xff]  }
 0x61b   : > { %17059 = vst [vmem:[#allocation22_spill] sm:$0xff] %v13632_v32  ;;  %v13638_v54 = vld [vmem:[%s16682_s2 + $0x2c0] sm:$0xff]   ;;  %17061 = vst [vmem:[#allocation24_spill] sm:$0xff] %v13646_v53  ;;  %v13652_v15 = vld [vmem:[%s16682_s2 + $0x2b8] sm:$0xff]  }
 0x61c   : > { %5638 = vmatpush1.bf16.msra.mxu0 %v13618_v17  ;;  %17060 = vst [vmem:[#allocation23_spill] sm:$0xff] %v13638_v54  ;;  %17062 = vst [vmem:[#allocation25_spill] sm:$0xff] %v13652_v15 }
 0x61d   : > { %5679 = vmatpush1.bf16.msra.mxu1 %v13624_v34  ;;  %5639 = vmatprep.subr.bf16.mxu0 %v16958_v55 }
 0x61e   : > { %5680 = vmatprep.subr.bf16.mxu1 %v16958_v55 }
 0x620   : > { %5640 = vmatpush1.bf16.msra.mxu0 %v13632_v32 }
 0x621   : > { %5681 = vmatpush1.bf16.msra.mxu1 %v13638_v54  ;;  %5641 = vmatprep.subr.bf16.mxu0 %v16958_v55  ;;  %v13660_v54 = vld [vmem:[%s16682_s2 + $0x1f0] sm:$0xff]  }
 0x622   : > { %5682 = vmatprep.subr.bf16.mxu1 %v16958_v55  ;;  %17063 = vst [vmem:[#allocation26_spill] sm:$0xff] %v13660_v54 }
 0x624   : > { %5642 = vmatpush1.bf16.msra.mxu0 %v13646_v53  ;;  %v13666_v53 = vld [vmem:[%s16682_s2 + $0x2b0] sm:$0xff]  }
 0x625   : > { %5683 = vmatpush1.bf16.msra.mxu1 %v13652_v15  ;;  %5643 = vmatprep.subr.bf16.mxu0 %v16958_v55  ;;  %17064 = vst [vmem:[#allocation27_spill] sm:$0xff] %v13666_v53  ;;  %v13674_v15 = vld [vmem:[%s16682_s2 + $0x1e8] sm:$0xff]  }
 0x626   : > { %5684 = vmatprep.subr.bf16.mxu1 %v16958_v55  ;;  %17065 = vst [vmem:[#allocation28_spill] sm:$0xff] %v13674_v15 }
 0x628   : > { %5644 = vmatpush1.bf16.msra.mxu0 %v13660_v54  ;;  %v13680_v54 = vld [vmem:[%s16682_s2 + $0x2a8] sm:$0xff]  }
 0x629   : > { %5685 = vmatpush1.bf16.msra.mxu1 %v13666_v53  ;;  %5645 = vmatprep.subr.bf16.mxu0 %v16958_v55  ;;  %17066 = vst [vmem:[#allocation29_spill] sm:$0xff] %v13680_v54  ;;  %v13688_v53 = vld [vmem:[%s16682_s2 + $0x1e0] sm:$0xff]  }
 0x62a   : > { %5686 = vmatprep.subr.bf16.mxu1 %v16958_v55  ;;  %17067 = vst [vmem:[#allocation30_spill] sm:$0xff] %v13688_v53 }
 0x62c   : > { %5646 = vmatpush1.bf16.msra.mxu0 %v13674_v15  ;;  %v13694_v15 = vld [vmem:[%s16682_s2 + $0x2a0] sm:$0xff]  }
 0x62d   : > { %5687 = vmatpush1.bf16.msra.mxu1 %v13680_v54  ;;  %5647 = vmatprep.subr.bf16.mxu0 %v16958_v55  ;;  %17068 = vst [vmem:[#allocation31_spill] sm:$0xff] %v13694_v15  ;;  %v13702_v54 = vld [vmem:[%s16682_s2 + $0x238] sm:$0xff]  }
 0x62e   : > { %5688 = vmatprep.subr.bf16.mxu1 %v16958_v55  ;;  %17069 = vst [vmem:[#allocation32_spill] sm:$0xff] %v13702_v54 }
 0x630   : > { %5648 = vmatpush1.bf16.msra.mxu0 %v13688_v53  ;;  %v13708_v53 = vld [vmem:[%s16682_s2 + $0x2f8] sm:$0xff]  }
 0x631   : > { %5689 = vmatpush1.bf16.msra.mxu1 %v13694_v15  ;;  %5657 = vmatprep.subr.bf16.mxu0 %v16958_v55  ;;  %17070 = vst [vmem:[#allocation33_spill] sm:$0xff] %v13708_v53  ;;  %v13716_v15 = vld [vmem:[%s16682_s2 + $0x230] sm:$0xff]  }
 0x632   : > { %5698 = vmatprep.subr.bf16.mxu1 %v16958_v55  ;;  %17071 = vst [vmem:[#allocation34_spill] sm:$0xff] %v13716_v15 }
 0x634   : > { %5658 = vmatpush2.bf16.msra.mxu0 %v13702_v54  ;;  %v13722_v54 = vld [vmem:[%s16682_s2 + $0x2f0] sm:$0xff]  }
 0x635   : > { %5699 = vmatpush2.bf16.msra.mxu1 %v13708_v53  ;;  %5659 = vmatprep.subr.bf16.mxu0 %v16958_v55  ;;  %17072 = vst [vmem:[#allocation35_spill] sm:$0xff] %v13722_v54  ;;  %v13730_v53 = vld [vmem:[%s16682_s2 + $0x228] sm:$0xff]  }
 0x636   : > { %5700 = vmatprep.subr.bf16.mxu1 %v16958_v55  ;;  %17073 = vst [vmem:[#allocation36_spill] sm:$0xff] %v13730_v53 }
 0x638   : > { %5660 = vmatpush2.bf16.msra.mxu0 %v13716_v15  ;;  %v13736_v15 = vld [vmem:[%s16682_s2 + $0x2e8] sm:$0xff]  }
 0x639   : > { %5701 = vmatpush2.bf16.msra.mxu1 %v13722_v54  ;;  %5661 = vmatprep.subr.bf16.mxu0 %v16958_v55  ;;  %17074 = vst [vmem:[#allocation37_spill] sm:$0xff] %v13736_v15  ;;  %v13744_v54 = vld [vmem:[%s16682_s2 + $0x220] sm:$0xff]  }
 0x63a   : > { %5702 = vmatprep.subr.bf16.mxu1 %v16958_v55  ;;  %17075 = vst [vmem:[#allocation38_spill] sm:$0xff] %v13744_v54 }
 0x63c   : > { %5662 = vmatpush2.bf16.msra.mxu0 %v13730_v53  ;;  %v13750_v53 = vld [vmem:[%s16682_s2 + $0x2e0] sm:$0xff]  }
 0x63d   : > { %5703 = vmatpush2.bf16.msra.mxu1 %v13736_v15  ;;  %5663 = vmatprep.subr.bf16.mxu0 %v16958_v55  ;;  %17076 = vst [vmem:[#allocation39_spill] sm:$0xff] %v13750_v53 }
 0x63e   : > { %5704 = vmatprep.subr.bf16.mxu1 %v16958_v55 }
 0x640   : > { %5664 = vmatpush2.bf16.msra.mxu0 %v13744_v54  ;;  %v13761_v54 = vld [vmem:[%s16682_s2 + $0x338] sm:$0xff]  }
 0x641   : > { %5705 = vmatpush2.bf16.msra.mxu1 %v13750_v53  ;;  %5717 = vmatprep.subr.bf16.mxu0 %v16958_v55  ;;  %17077 = vst [vmem:[#allocation40_spill] sm:$0xff] %v13761_v54  ;;  %v13769_v53 = vld [vmem:[%s16682_s2 + $0x398] sm:$0xff]  }
 0x642   : > { %5760 = vmatprep.subr.bf16.mxu1 %v16958_v55  ;;  %17078 = vst [vmem:[#allocation41_spill] sm:$0xff] %v13769_v53 }
 0x643   : > { %v5302_v15 = vpop.f32.mrf.mxu0  ;;  %5666 = vmatmul.mubr.bf16.vlgmr.msra.gmra.mxu0 %v12155_v39 }
 0x644   : > { %v5309_v32 = vadd.f32 %v5302_v15, %v13592_v6  ;;  %v5345_v34 = vpop.f32.mrf.mxu1  ;;  %5707 = vmatmul.mubr.bf16.vlgmr.msra.gmra.mxu1 %v12348_v8  ;;  %5718 = vmatpush1.bf16.msra.mxu0 %v13761_v54 }
 0x645   : > { %8951 = vmatprep.mubr.msk.bf16.mxu0 %vm2737_vm3, %v12921_v18  ;;  %5761 = vmatpush1.bf16.msra.mxu1 %v13769_v53  ;;  %v5304_v39 = vpop.f32.mrf.mxu0  ;;  %v13781_v53 = vld [vmem:[%s16682_s2 + $0x330] sm:$0xff]  }
 0x646   : > { %v5352_v6 = vadd.f32 %v5345_v34, %v5309_v32  ;;  %8952 = vmatprep.mubr.msk.bf16.mxu1 %vm2737_vm3, %v13379_v47  ;;  %v5347_v15 = vpop.f32.mrf.mxu1  ;;  %5719 = vmatprep.subr.bf16.mxu0 %v16958_v55  ;;  %v8940_v34 = vld [vmem:[%s16685_s5] ss:$0 sm:$0xff]  ;;  %v13790_v32 = vld [vmem:[%s16682_s2 + $0x390] sm:$0xff]  }
 0x647   : > { %v5305_v17 = vpop.f32.mrf.mxu0  ;;  %5762 = vmatprep.subr.bf16.mxu1 %v16958_v55  ;;  %v13799_v15 = vld [vmem:[%s16682_s2 + $0x328] sm:$0xff]  }
 0x648   : > { %v5354_v54 = vmax.f32 %v13403_v33, %v5352_v6  ;;  %v5310_v40 = vadd.f32 %v5305_v17, %v13612_v21  ;;  %v5348_v23 = vpop.f32.mrf.mxu1  ;;  %5720 = vmatpush1.bf16.msra.mxu0 %v13781_v53 }
 0x649   : > { %5763 = vmatpush1.bf16.msra.mxu1 %v13790_v32  ;;  %v5307_v33 = vpop.f32.mrf.mxu0  ;;  %5721 = vmatprep.subr.bf16.mxu0 %v16958_v55 }
 0x64a   : > { %v5353_v21 = vadd.f32 %v5348_v23, %v5310_v40  ;;  %v5350_v17 = vpop.f32.mrf.mxu1  ;;  %5764 = vmatprep.subr.bf16.mxu1 %v16958_v55  ;;  %v5362_v39 = vadd.f32 %v8940_v34, %v5354_v54  ;;  %v13805_v33 = vld [vmem:[%s16682_s2 + $0x388] sm:$0xff]   ;;  %v13813_v54 = vld [vmem:[%s16682_s2 + $0x320] sm:$0xff]  }
 0x64b   : > { %v13829_v17 = vld [vmem:[%s16682_s2 + $0x318] sm:$0xff]  }
 0x64c   : > { %v5355_v6 = vmax.f32 %v13428_v0, %v5353_v21  ;;  %5722 = vmatpush1.bf16.msra.mxu0 %v13799_v15  ;;  %v5364_v0 = vmax.f32 %v5362_v39, 0.0  ;;  %v13819_v21 = vld [vmem:[%s16682_s2 + $0x380] sm:$0xff]   ;;  %17081 = vst [vmem:[#allocation44_spill] sm:$0xff] %v13829_v17  ;;  %v13835_v39 = vld [vmem:[%s16682_s2 + $0x378] sm:$0xff]  }
 0x64d   : > { %5765 = vmatpush1.bf16.msra.mxu1 %v13805_v33  ;;  %5723 = vmatprep.subr.bf16.mxu0 %v16958_v55  ;;  %17079 = vst [vmem:[#allocation42_spill] sm:$0xff] %v13819_v21  ;;  %17082 = vst [vmem:[#allocation45_spill] sm:$0xff] %v13835_v39 }
 0x64e   : > { %v5363_v23 = vadd.f32 %v8940_v34, %v5355_v6  ;;  %5766 = vmatprep.subr.bf16.mxu1 %v16958_v55  ;;  %v13843_v6 = vld [vmem:[%s16682_s2 + $0x310] sm:$0xff]  }
 0x64f   : > { %17083 = vst [vmem:[#allocation46_spill] sm:$0xff] %v13843_v6 }
 0x650   : > { %v5365_v40 = vmax.f32 %v5363_v23, 0.0  ;;  %5724 = vmatpush1.bf16.msra.mxu0 %v13813_v54  ;;  %v13849_v23 = vld [vmem:[%s16682_s2 + $0x370] sm:$0xff]  }
 0x651   : > { %5767 = vmatpush1.bf16.msra.mxu1 %v13819_v21  ;;  %5725 = vmatprep.subr.bf16.mxu0 %v16958_v55  ;;  %17084 = vst [vmem:[#allocation47_spill] sm:$0xff] %v13849_v23 }
 0x652   : > { %v13823_v34 = vpack.c.bf16 %v5365_v40, %v5364_v0  ;;  %5768 = vmatprep.subr.bf16.mxu1 %v16958_v55  ;;  %v13857_v0 = vld [vmem:[%s16682_s2 + $0x308] sm:$0xff]  }
 0x653   : > { %17085 = vst [vmem:[#allocation48_spill] sm:$0xff] %v13857_v0  ;;  %v13863_v40 = vld [vmem:[%s16682_s2 + $0x368] sm:$0xff]  }
 0x654   : > { %17080 = vst [vmem:[#allocation43_spill] sm:$0xff] %v13823_v34  ;;  %5726 = vmatpush1.bf16.msra.mxu0 %v13829_v17  ;;  %17086 = vst [vmem:[#allocation49_spill] sm:$0xff] %v13863_v40  ;;  %v13871_v34 = vld [vmem:[%s16682_s2 + $0x300] sm:$0xff]  }
 0x655   : > { %5769 = vmatpush1.bf16.msra.mxu1 %v13835_v39  ;;  %5727 = vmatprep.subr.bf16.mxu0 %v16958_v55  ;;  %17087 = vst [vmem:[#allocation50_spill] sm:$0xff] %v13871_v34 }
 0x656   : > { %5770 = vmatprep.subr.bf16.mxu1 %v16958_v55 }
 0x658   : > { %5728 = vmatpush1.bf16.msra.mxu0 %v13843_v6 }
 0x659   : > { %5771 = vmatpush1.bf16.msra.mxu1 %v13849_v23  ;;  %5729 = vmatprep.subr.bf16.mxu0 %v16958_v55 }
 0x65a   : > { %5772 = vmatprep.subr.bf16.mxu1 %v16958_v55 }
 0x65c   : > { %5730 = vmatpush1.bf16.msra.mxu0 %v13857_v0  ;;  %v13877_v0 = vld [vmem:[%s16682_s2 + $0x360] sm:$0xff]  }
 0x65d   : > { %5773 = vmatpush1.bf16.msra.mxu1 %v13863_v40  ;;  %5731 = vmatprep.subr.bf16.mxu0 %v16958_v55  ;;  %17088 = vst [vmem:[#allocation51_spill] sm:$0xff] %v13877_v0  ;;  %v13885_v40 = vld [vmem:[%s16682_s2 + $0x358] sm:$0xff]  }
 0x65e   : > { %5774 = vmatprep.subr.bf16.mxu1 %v16958_v55  ;;  %17089 = vst [vmem:[#allocation52_spill] sm:$0xff] %v13885_v40 }
 0x660   : > { %5732 = vmatpush1.bf16.msra.mxu0 %v13871_v34  ;;  %v13891_v34 = vld [vmem:[%s16682_s2 + $0x3b8] sm:$0xff]  }
 0x661   : > { %5775 = vmatpush1.bf16.msra.mxu1 %v13877_v0  ;;  %5741 = vmatprep.subr.bf16.mxu0 %v16958_v55  ;;  %17090 = vst [vmem:[#allocation53_spill] sm:$0xff] %v13891_v34  ;;  %v13899_v0 = vld [vmem:[%s16682_s2 + $0x350] sm:$0xff]  }
 0x662   : > { %5784 = vmatprep.subr.bf16.mxu1 %v16958_v55  ;;  %17091 = vst [vmem:[#allocation54_spill] sm:$0xff] %v13899_v0 }
 0x664   : > { %5742 = vmatpush2.bf16.msra.mxu0 %v13885_v40  ;;  %v13905_v40 = vld [vmem:[%s16682_s2 + $0x3b0] sm:$0xff]  }
 0x665   : > { %5785 = vmatpush2.bf16.msra.mxu1 %v13891_v34  ;;  %5743 = vmatprep.subr.bf16.mxu0 %v16958_v55  ;;  %17092 = vst [vmem:[#allocation55_spill] sm:$0xff] %v13905_v40  ;;  %v13913_v34 = vld [vmem:[%s16682_s2 + $0x348] sm:$0xff]  }
 0x666   : > { %5786 = vmatprep.subr.bf16.mxu1 %v16958_v55  ;;  %17093 = vst [vmem:[#allocation56_spill] sm:$0xff] %v13913_v34 }
 0x668   : > { %5744 = vmatpush2.bf16.msra.mxu0 %v13899_v0  ;;  %v13919_v0 = vld [vmem:[%s16682_s2 + $0x3a8] sm:$0xff]  }
 0x669   : > { %5787 = vmatpush2.bf16.msra.mxu1 %v13905_v40  ;;  %5745 = vmatprep.subr.bf16.mxu0 %v16958_v55  ;;  %17094 = vst [vmem:[#allocation57_spill] sm:$0xff] %v13919_v0  ;;  %v13927_v40 = vld [vmem:[%s16682_s2 + $0x340] sm:$0xff]  }
 0x66a   : > { %5788 = vmatprep.subr.bf16.mxu1 %v16958_v55  ;;  %17095 = vst [vmem:[#allocation58_spill] sm:$0xff] %v13927_v40 }
 0x66c   : > { %5746 = vmatpush2.bf16.msra.mxu0 %v13913_v34  ;;  %v13933_v34 = vld [vmem:[%s16682_s2 + $0x3a0] sm:$0xff]  }
 0x66d   : > { %5789 = vmatpush2.bf16.msra.mxu1 %v13919_v0  ;;  %5747 = vmatprep.subr.bf16.mxu0 %v16958_v55  ;;  %17096 = vst [vmem:[#allocation59_spill] sm:$0xff] %v13933_v34 }
 0x66e   : > { %5790 = vmatprep.subr.bf16.mxu1 %v16958_v55 }
 0x670   : > { %5748 = vmatpush2.bf16.msra.mxu0 %v13927_v40  ;;  %v9635_v40 = vld [vmem:[%s16682_s2 + $0x98] sm:$0xff]  }
 0x671   : > { %5791 = vmatpush2.bf16.msra.mxu1 %v13933_v34  ;;  %5805 = vmatprep.subr.bf16.mxu0 %v16958_v55  ;;  %v13950_v34 = vld [vmem:[%s16682_s2 + $0x38] sm:$0xff]  }
 0x672   : > { %5846 = vmatprep.subr.bf16.mxu1 %v16958_v55  ;;  %17097 = vst [vmem:[#allocation60_spill] sm:$0xff] %v13950_v34 }
 0x673   : > { %v5401_v0 = vpop.f32.mrf.mxu0  ;;  %5750 = vmatmul.mubr.bf16.vlgmr.msra.gmra.mxu0 %v12986_v2 }
 0x674   : > { %v5442_v23 = vpop.f32.mrf.mxu1  ;;  %5793 = vmatmul.mubr.bf16.vlgmr.msra.gmra.mxu1 %v13565_v58  ;;  %5806 = vmatpush1.bf16.msra.mxu0 %v9635_v40 }
 0x675   : > { %v13943_v6 = vadd.f32 %v5442_v23, %v5401_v0  ;;  %8953 = vmatprep.mubr.msk.bf16.mxu0 %vm2737_vm3, %v12170_v46  ;;  %5847 = vmatpush1.bf16.msra.mxu1 %v13950_v34  ;;  %v5403_v39 = vpop.f32.mrf.mxu0  ;;  %v9637_v0 = vld [vmem:[%s16682_s2 + $0x90] sm:$0xff]   ;;  %v9639_v34 = vld [vmem:[%s16682_s2 + $0x88] sm:$0xff]  }
 0x676   : > { %8954 = vmatprep.mubr.msk.bf16.mxu1 %vm2737_vm3, %v12998_v27  ;;  %v5444_v17 = vpop.f32.mrf.mxu1  ;;  %5807 = vmatprep.subr.bf16.mxu0 %v16958_v55  ;;  %v13965_v39 = vld [vmem:[%s16682_s2 + $0x30] sm:$0xff]  }
 0x677   : > { %v5404_v40 = vpop.f32.mrf.mxu0  ;;  %5848 = vmatprep.subr.bf16.mxu1 %v16958_v55 }
 0x678   : > { %v5445_v23 = vpop.f32.mrf.mxu1  ;;  %5808 = vmatpush1.bf16.msra.mxu0 %v9637_v0  ;;  %v9643_v0 = vld [vmem:[%s16682_s2 + $0x78] sm:$0xff]  }
 0x679   : > { %v13960_v21 = vadd.f32 %v5445_v23, %v5404_v40  ;;  %5849 = vmatpush1.bf16.msra.mxu1 %v13965_v39  ;;  %v5406_v27 = vpop.f32.mrf.mxu0  ;;  %5809 = vmatprep.subr.bf16.mxu0 %v16958_v55  ;;  %v13976_v40 = vld [vmem:[%s16682_s2 + $0x28] sm:$0xff]   ;;  %v9641_v23 = vld [vmem:[%s16682_s2 + $0x80] sm:$0xff]  }
 0x67a   : > { %v5447_v17 = vpop.f32.mrf.mxu1  ;;  %5850 = vmatprep.subr.bf16.mxu1 %v16958_v55  ;;  %v13998_v27 = vld [vmem:[%s16682_s2 + $0x18] sm:$0xff]  }
 0x67b   : > { %v9645_v17 = vld [vmem:[%s16682_s2 + $0x70] sm:$0xff]  }
 0x67c   : > { %5810 = vmatpush1.bf16.msra.mxu0 %v9639_v34  ;;  %v13987_v34 = vld [vmem:[%s16682_s2 + $0x20] sm:$0xff]  }
 0x67d   : > { %5851 = vmatpush1.bf16.msra.mxu1 %v13976_v40  ;;  %5811 = vmatprep.subr.bf16.mxu0 %v16958_v55 }
 0x67e   : > { %5852 = vmatprep.subr.bf16.mxu1 %v16958_v55 }
 0x680   : > { %5812 = vmatpush1.bf16.msra.mxu0 %v9641_v23  ;;  %v14009_v23 = vld [vmem:[%s16682_s2 + $0x10] sm:$0xff]  }
 0x681   : > { %5853 = vmatpush1.bf16.msra.mxu1 %v13987_v34  ;;  %5813 = vmatprep.subr.bf16.mxu0 %v16958_v55  ;;  %17098 = vst [vmem:[#allocation61_spill] sm:$0xff] %v14009_v23 }
 0x682   : > { %5854 = vmatprep.subr.bf16.mxu1 %v16958_v55 }
 0x684   : > { %5814 = vmatpush1.bf16.msra.mxu0 %v9643_v0  ;;  %v9647_v0 = vld [vmem:[%s16682_s2 + $0x68] sm:$0xff]  }
 0x685   : > { %5855 = vmatpush1.bf16.msra.mxu1 %v13998_v27  ;;  %5815 = vmatprep.subr.bf16.mxu0 %v16958_v55 }
 0x686   : > { %5856 = vmatprep.subr.bf16.mxu1 %v16958_v55 }
 0x688   : > { %5816 = vmatpush1.bf16.msra.mxu0 %v9645_v17  ;;  %v14020_v17 = vld [vmem:[%s16682_s2 + $0x8] sm:$0xff]  }
 0x689   : > { %5857 = vmatpush1.bf16.msra.mxu1 %v14009_v23  ;;  %5817 = vmatprep.subr.bf16.mxu0 %v16958_v55  ;;  %17099 = vst [vmem:[#allocation62_spill] sm:$0xff] %v14020_v17  ;;  %v9649_v23 = vld [vmem:[%s16682_s2 + $0x60] sm:$0xff]  }
 0x68a   : > { %5858 = vmatprep.subr.bf16.mxu1 %v16958_v55 }
 0x68c   : > { %5818 = vmatpush1.bf16.msra.mxu0 %v9647_v0  ;;  %v14031_v0 = vld [vmem:[%s16682_s2] sm:$0xff]  }
 0x68d   : > { %5859 = vmatpush1.bf16.msra.mxu1 %v14020_v17  ;;  %5819 = vmatprep.subr.bf16.mxu0 %v16958_v55  ;;  %17100 = vst [vmem:[#allocation63_spill] sm:$0xff] %v14031_v0  ;;  %v9651_v17 = vld [vmem:[%s16682_s2 + $0xb8] sm:$0xff]  }
 0x68e   : > { %5860 = vmatprep.subr.bf16.mxu1 %v16958_v55 }
 0x690   : > { %5820 = vmatpush1.bf16.msra.mxu0 %v9649_v23  ;;  %v14042_v23 = vld [vmem:[%s16682_s2 + $0x58] sm:$0xff]  }
 0x691   : > { %5861 = vmatpush1.bf16.msra.mxu1 %v14031_v0  ;;  %5829 = vmatprep.subr.bf16.mxu0 %v16958_v55  ;;  %v9653_v0 = vld [vmem:[%s16682_s2 + $0xb0] sm:$0xff]  }
 0x692   : > { %5870 = vmatprep.subr.bf16.mxu1 %v16958_v55 }
 0x694   : > { %5830 = vmatpush2.bf16.msra.mxu0 %v9651_v17 }
 0x695   : > { %5871 = vmatpush2.bf16.msra.mxu1 %v14042_v23  ;;  %5831 = vmatprep.subr.bf16.mxu0 %v16958_v55 }
 0x696   : > { %5872 = vmatprep.subr.bf16.mxu1 %v16958_v55 }
 0x698   : > { %5832 = vmatpush2.bf16.msra.mxu0 %v9653_v0 }
 0x699   : > { %5873 = vmatpush2.bf16.msra.mxu1 %v13160_v48  ;;  %5833 = vmatprep.subr.bf16.mxu0 %v16958_v55 }
 0x69a   : > { %5874 = vmatprep.subr.bf16.mxu1 %v16958_v55 }
 0x69c   : > { %5834 = vmatpush2.bf16.msra.mxu0 %v13168_v31 }
 0x69d   : > { %5875 = vmatpush2.bf16.msra.mxu1 %v13174_v35  ;;  %5835 = vmatprep.subr.bf16.mxu0 %v16958_v55 }
 0x69e   : > { %5876 = vmatprep.subr.bf16.mxu1 %v16958_v55 }
 0x6a0   : > { %5836 = vmatpush2.bf16.msra.mxu0 %v13182_v11 }
 0x6a1   : > { %5877 = vmatpush2.bf16.msra.mxu1 %v13188_v14  ;;  %5887 = vmatprep.subr.bf16.mxu0 %v16958_v55 }
 0x6a2   : > { %5930 = vmatprep.subr.bf16.mxu1 %v16958_v55 }
 0x6a3   : > { %v5483_v48 = vpop.f32.mrf.mxu0  ;;  %5838 = vmatmul.mubr.bf16.vlgmr.msra.gmra.mxu0 %v12348_v8 }
 0x6a4   : > { %v5490_v17 = vadd.f32 %v5483_v48, %v13943_v6  ;;  %v5526_v31 = vpop.f32.mrf.mxu1  ;;  %5879 = vmatmul.mubr.bf16.vlgmr.msra.gmra.mxu1 %v12165_v29  ;;  %5888 = vmatpush1.bf16.msra.mxu0 %v13199_v9 }
 0x6a5   : > { %8955 = vmatprep.mubr.msk.bf16.mxu0 %vm2737_vm3, %v12921_v18  ;;  %5931 = vmatpush1.bf16.msra.mxu1 %v13207_v56  ;;  %v5485_v35 = vpop.f32.mrf.mxu0 }
 0x6a6   : > { %v5533_v11 = vadd.f32 %v5526_v31, %v5490_v17  ;;  %8956 = vmatprep.mubr.msk.bf16.mxu1 %vm2737_vm3, %v13379_v47  ;;  %v5528_v14 = vpop.f32.mrf.mxu1  ;;  %5889 = vmatprep.subr.bf16.mxu0 %v16958_v55 }
 0x6a7   : > { %v5486_v0 = vpop.f32.mrf.mxu0  ;;  %5932 = vmatprep.subr.bf16.mxu1 %v16958_v55  ;;  %v17115_v14 = vld [vmem:[#allocation19_spill] sm:$0xff] }
 0x6a8   : > { %v5491_v6 = vadd.f32 %v5486_v0, %v13960_v21  ;;  %v5529_v48 = vpop.f32.mrf.mxu1  ;;  %5890 = vmatpush1.bf16.msra.mxu0 %v13220_v5  ;;  %v14113_v5 = vld [vmem:[#allocation2 + $0x78] sm:$0xff] }
 0x6a9   : > { %5933 = vmatpush1.bf16.msra.mxu1 %v13226_v49  ;;  %v5488_v9 = vpop.f32.mrf.mxu0  ;;  %5891 = vmatprep.subr.bf16.mxu0 %v16958_v55  ;;  %v5973_v49 = vld [vmem:[#allocation2 + $0x70] sm:$0xff] }
 0x6aa   : > { %v5534_v56 = vadd.f32 %v5529_v48, %v5491_v6  ;;  %v5531_v17 = vpop.f32.mrf.mxu1  ;;  %5934 = vmatprep.subr.bf16.mxu1 %v16958_v55  ;;  %v17116_v48 = vld [vmem:[#allocation20_spill] sm:$0xff]  ;;  %v17117_v9 = vld [vmem:[#allocation21_spill] sm:$0xff] }
 0x6ab   : > { %v17119_v17 = vld [vmem:[#allocation23_spill] sm:$0xff] }
 0x6ac   : > { %5892 = vmatpush1.bf16.msra.mxu0 %v13236_v16  ;;  %v14120_v16 = vcombine.high %v5973_v49, %v14113_v5 }
 0x6ad   : > { %5935 = vmatpush1.bf16.msra.mxu1 %v13242_v4  ;;  %5893 = vmatprep.subr.bf16.mxu0 %v16958_v55 }
 0x6ae   : > { %5936 = vmatprep.subr.bf16.mxu1 %v16958_v55 }
 0x6b0   : > { %5894 = vmatpush1.bf16.msra.mxu0 %v13250_v42 }
 0x6b1   : > { %5937 = vmatpush1.bf16.msra.mxu1 %v13256_v30  ;;  %5895 = vmatprep.subr.bf16.mxu0 %v16958_v55 }
 0x6b2   : > { %5938 = vmatprep.subr.bf16.mxu1 %v16958_v55 }
 0x6b4   : > { %5896 = vmatpush1.bf16.msra.mxu0 %v13264_v25 }
 0x6b5   : > { %5939 = vmatpush1.bf16.msra.mxu1 %v13270_v51  ;;  %5897 = vmatprep.subr.bf16.mxu0 %v16958_v55 }
 0x6b6   : > { %5940 = vmatprep.subr.bf16.mxu1 %v16958_v55 }
 0x6b8   : > { %5898 = vmatpush1.bf16.msra.mxu0 %v13278_v52 }
 0x6b9   : > { %5941 = vmatpush1.bf16.msra.mxu1 %v13284_v63  ;;  %5899 = vmatprep.subr.bf16.mxu0 %v16958_v55 }
 0x6ba   : > { %5942 = vmatprep.subr.bf16.mxu1 %v16958_v55 }
 0x6bc   : > { %5900 = vmatpush1.bf16.msra.mxu0 %v13292_v45 }
 0x6bd   : > { %5943 = vmatpush1.bf16.msra.mxu1 %v13298_v1  ;;  %5901 = vmatprep.subr.bf16.mxu0 %v16958_v55 }
 0x6be   : > { %5944 = vmatprep.subr.bf16.mxu1 %v16958_v55 }
 0x6c0   : > { %5902 = vmatpush1.bf16.msra.mxu0 %v13306_v57 }
 0x6c1   : > { %5945 = vmatpush1.bf16.msra.mxu1 %v13312_v59  ;;  %5911 = vmatprep.subr.bf16.mxu0 %v16958_v55  ;;  %v17101_v59 = vld [vmem:[#allocation4_spill] sm:$0xff] }
 0x6c2   : > { %5954 = vmatprep.subr.bf16.mxu1 %v16958_v55 }
 0x6c4   : > { %5912 = vmatpush2.bf16.msra.mxu0 %v13320_v60  ;;  %v17102_v60 = vld [vmem:[#allocation5_spill] sm:$0xff] }
 0x6c5   : > { %5955 = vmatpush2.bf16.msra.mxu1 %v13326_v61  ;;  %5913 = vmatprep.subr.bf16.mxu0 %v16958_v55  ;;  %v17103_v61 = vld [vmem:[#allocation6_spill] sm:$0xff] }
 0x6c6   : > { %5956 = vmatprep.subr.bf16.mxu1 %v16958_v55 }
 0x6c8   : > { %5914 = vmatpush2.bf16.msra.mxu0 %v13334_v24  ;;  %v17104_v24 = vld [vmem:[#allocation7_spill] sm:$0xff] }
 0x6c9   : > { %5957 = vmatpush2.bf16.msra.mxu1 %v13340_v3  ;;  %5915 = vmatprep.subr.bf16.mxu0 %v16958_v55  ;;  %v17105_v3 = vld [vmem:[#allocation8_spill] sm:$0xff] }
 0x6ca   : > { %5958 = vmatprep.subr.bf16.mxu1 %v16958_v55 }
 0x6cc   : > { %5916 = vmatpush2.bf16.msra.mxu0 %v13348_v10  ;;  %v17106_v10 = vld [vmem:[#allocation9_spill] sm:$0xff] }
 0x6cd   : > { %5959 = vmatpush2.bf16.msra.mxu1 %v13354_v38  ;;  %5917 = vmatprep.subr.bf16.mxu0 %v16958_v55  ;;  %v17107_v38 = vld [vmem:[#allocation10_spill] sm:$0xff] }
 0x6ce   : > { %5960 = vmatprep.subr.bf16.mxu1 %v16958_v55 }
 0x6d0   : > { %5918 = vmatpush2.bf16.msra.mxu0 %v13364_v20  ;;  %v17108_v20 = vld [vmem:[#allocation11_spill] sm:$0xff] }
 0x6d1   : > { %5961 = vmatpush2.bf16.msra.mxu1 %v13370_v44  ;;  %5987 = vmatprep.subr.bf16.mxu0 %v16958_v55  ;;  %v17109_v44 = vld [vmem:[#allocation12_spill] sm:$0xff] }
 0x6d2   : > { %6032 = vmatprep.subr.bf16.mxu1 %v16958_v55 }
 0x6d3   : > { %v5583_v4 = vpop.f32.mrf.mxu0  ;;  %5920 = vmatmul.mubr.bf16.vlgmr.msra.gmra.mxu0 %v12986_v2 }
 0x6d4   : > { %v14123_v42 = vadd.f32 %v5583_v4, %v5533_v11  ;;  %v5626_v30 = vpop.f32.mrf.mxu1  ;;  %5963 = vmatmul.mubr.bf16.vlgmr.msra.gmra.mxu1 %v13565_v58  ;;  %5988 = vmatpush1.bf16.msra.mxu0 %v13389_v43  ;;  %v17110_v43 = vld [vmem:[#allocation13_spill] sm:$0xff]  ;;  %v17114_v11 = vld [vmem:[#allocation18_spill] sm:$0xff] }
 0x6d5   : > { %8959 = vmatprep.mubr.msk.bf16.mxu0 %vm2737_vm3, %v14120_v16  ;;  %6033 = vmatpush1.bf16.msra.mxu1 %v13397_v36  ;;  %v5585_v25 = vpop.f32.mrf.mxu0  ;;  %v17111_v36 = vld [vmem:[#allocation14_spill] sm:$0xff] }
 0x6d6   : > { %8960 = vmatprep.mubr.msk.bf16.mxu1 %vm2737_vm3, %v12170_v46  ;;  %v5628_v51 = vpop.f32.mrf.mxu1  ;;  %5989 = vmatprep.subr.bf16.mxu0 %v16958_v55  ;;  %v17122_v4 = vld [vmem:[#allocation26_spill] sm:$0xff]  ;;  %v17124_v25 = vld [vmem:[#allocation28_spill] sm:$0xff] }
 0x6d7   : > { %v5586_v52 = vpop.f32.mrf.mxu0  ;;  %6034 = vmatprep.subr.bf16.mxu1 %v16958_v55  ;;  %v17125_v51 = vld [vmem:[#allocation29_spill] sm:$0xff] }
 0x6d8   : > { %v14134_v63 = vadd.f32 %v5586_v52, %v5534_v56  ;;  %v14136_v45 = vpop.f32.mrf.mxu1  ;;  %5990 = vmatpush1.bf16.msra.mxu0 %v13415_v22  ;;  %v14180_v22 = vcombine.low %v5973_v49, %v14113_v5  ;;  %v17118_v56 = vld [vmem:[#allocation22_spill] sm:$0xff]  ;;  %v17120_v5 = vld [vmem:[#allocation24_spill] sm:$0xff]  ;;  %v17121_v49 = vld [vmem:[#allocation25_spill] sm:$0xff] }
 0x6d9   : > { %6035 = vmatpush1.bf16.msra.mxu1 %v13421_v50  ;;  %v5588_v1 = vpop.f32.mrf.mxu0  ;;  %5991 = vmatprep.subr.bf16.mxu0 %v16958_v55  ;;  %v17112_v50 = vld [vmem:[#allocation16_spill] sm:$0xff]  ;;  %v17126_v52 = vld [vmem:[#allocation30_spill] sm:$0xff] }
 0x6da   : > { %v5631_v57 = vpop.f32.mrf.mxu1  ;;  %6036 = vmatprep.subr.bf16.mxu1 %v16958_v55  ;;  %v17128_v1 = vld [vmem:[#allocation32_spill] sm:$0xff] }
 0x6db   : > { %v17129_v57 = vld [vmem:[#allocation33_spill] sm:$0xff] }
 0x6dc   : > { %5992 = vmatpush1.bf16.msra.mxu0 %v13434_v26 }
 0x6dd   : > { %6037 = vmatpush1.bf16.msra.mxu1 %v13440_v12  ;;  %5993 = vmatprep.subr.bf16.mxu0 %v16958_v55 }
 0x6de   : > { %6038 = vmatprep.subr.bf16.mxu1 %v16958_v55 }
 0x6e0   : > { %5994 = vmatpush1.bf16.msra.mxu0 %v13448_v41 }
 0x6e1   : > { %6039 = vmatpush1.bf16.msra.mxu1 %v13454_v37  ;;  %5995 = vmatprep.subr.bf16.mxu0 %v16958_v55  ;;  %v17113_v37 = vld [vmem:[#allocation17_spill] sm:$0xff] }
 0x6e2   : > { %6040 = vmatprep.subr.bf16.mxu1 %v16958_v55 }
 0x6e4   : > { %5996 = vmatpush1.bf16.msra.mxu0 %v13462_v13  ;;  %v9654_v13 = vld [vmem:[#allocation2 + $0x34] ss:$8 sps:$4 sm:$0xff]  }
 0x6e5   : > { %6041 = vmatpush1.bf16.msra.mxu1 %v13468_v7  ;;  %5997 = vmatprep.subr.bf16.mxu0 %v16958_v55 }
 0x6e6   : > { %6042 = vmatprep.subr.bf16.mxu1 %v16958_v55 }
 0x6e8   : > { %5998 = vmatpush1.bf16.msra.mxu0 %v13476_v28 }
 0x6e9   : > { %6043 = vmatpush1.bf16.msra.mxu1 %v13482_v19  ;;  %5999 = vmatprep.subr.bf16.mxu0 %v16958_v55 }
 0x6ea   : > { %6044 = vmatprep.subr.bf16.mxu1 %v16958_v55 }
 0x6ec   : > { %6000 = vmatpush1.bf16.msra.mxu0 %v17101_v59  ;;  %v17130_v59 = vld [vmem:[#allocation34_spill] sm:$0xff] }
 0x6ed   : > { %6045 = vmatpush1.bf16.msra.mxu1 %v17102_v60  ;;  %6001 = vmatprep.subr.bf16.mxu0 %v16958_v55  ;;  %v17131_v60 = vld [vmem:[#allocation35_spill] sm:$0xff] }
 0x6ee   : > { %6046 = vmatprep.subr.bf16.mxu1 %v16958_v55 }
 0x6f0   : > { %6002 = vmatpush1.bf16.msra.mxu0 %v17103_v61  ;;  %v17132_v61 = vld [vmem:[#allocation36_spill] sm:$0xff] }
 0x6f1   : > { %6047 = vmatpush1.bf16.msra.mxu1 %v17104_v24  ;;  %6011 = vmatprep.subr.bf16.mxu0 %v16958_v55  ;;  %v17133_v24 = vld [vmem:[#allocation37_spill] sm:$0xff] }
 0x6f2   : > { %6056 = vmatprep.subr.bf16.mxu1 %v16958_v55 }
 0x6f4   : > { %6012 = vmatpush2.bf16.msra.mxu0 %v17105_v3  ;;  %v17134_v3 = vld [vmem:[#allocation38_spill] sm:$0xff] }
 0x6f5   : > { %6057 = vmatpush2.bf16.msra.mxu1 %v17106_v10  ;;  %6013 = vmatprep.subr.bf16.mxu0 %v16958_v55  ;;  %v17135_v10 = vld [vmem:[#allocation39_spill] sm:$0xff] }
 0x6f6   : > { %6058 = vmatprep.subr.bf16.mxu1 %v16958_v55 }
 0x6f8   : > { %6014 = vmatpush2.bf16.msra.mxu0 %v17107_v38 }
 0x6f9   : > { %6059 = vmatpush2.bf16.msra.mxu1 %v17108_v20  ;;  %6015 = vmatprep.subr.bf16.mxu0 %v16958_v55 }
 0x6fa   : > { %6060 = vmatprep.subr.bf16.mxu1 %v16958_v55 }
 0x6fc   : > { %6016 = vmatpush2.bf16.msra.mxu0 %v17109_v44 }
 0x6fd   : > { %6061 = vmatpush2.bf16.msra.mxu1 %v17110_v43  ;;  %6017 = vmatprep.subr.bf16.mxu0 %v16958_v55  ;;  %v17136_v43 = vld [vmem:[#allocation40_spill] sm:$0xff] }
 0x6fe   : > { %6062 = vmatprep.subr.bf16.mxu1 %v16958_v55 }
 0x700   : > { %6018 = vmatpush2.bf16.msra.mxu0 %v17111_v36  ;;  %v17137_v36 = vld [vmem:[#allocation41_spill] sm:$0xff] }
 0x701   : > { %6063 = vmatpush2.bf16.msra.mxu1 %v17112_v50  ;;  %6073 = vmatprep.subr.bf16.mxu0 %v16958_v55 }
 0x702   : > { %6114 = vmatprep.subr.bf16.mxu1 %v16958_v55 }
 0x703   : > { %v5667_v26 = vpop.f32.mrf.mxu0  ;;  %6020 = vmatmul.mubr.bf16.vlgmr.msra.gmra.mxu0 %v14180_v22 }
 0x704   : > { %v5668_v12 = vadd.f32 %v5667_v26, %v5626_v30  ;;  %v5708_v41 = vpop.f32.mrf.mxu1  ;;  %6065 = vmatmul.mubr.bf16.vlgmr.msra.gmra.mxu1 %v12348_v8  ;;  %6074 = vmatpush1.bf16.msra.mxu0 %v17113_v37  ;;  %v17123_v30 = vld [vmem:[#allocation27_spill] sm:$0xff] }
 0x705   : > { %8961 = vmatprep.mubr.msk.bf16.mxu0 %vm2737_vm3, %v9654_v13  ;;  %6115 = vmatpush1.bf16.msra.mxu1 %v13589_v62  ;;  %v5669_v7 = vpop.f32.mrf.mxu0 }
 0x706   : > { %v5715_v28 = vadd.f32 %v5708_v41, %v5668_v12  ;;  %8962 = vmatprep.mubr.msk.bf16.mxu1 %vm2737_vm3, %v12921_v18  ;;  %v5710_v19 = vpop.f32.mrf.mxu1  ;;  %6075 = vmatprep.subr.bf16.mxu0 %v16958_v55 }
 0x707   : > { %v5670_v21 = vpop.f32.mrf.mxu0  ;;  %6116 = vmatprep.subr.bf16.mxu1 %v16958_v55 }
 0x708   : > { %v5671_v31 = vadd.f32 %v5670_v21, %v14136_v45  ;;  %v5711_v35 = vpop.f32.mrf.mxu1  ;;  %6076 = vmatpush1.bf16.msra.mxu0 %v17114_v11  ;;  %v17127_v45 = vld [vmem:[#allocation31_spill] sm:$0xff]  ;;  %v17145_v11 = vld [vmem:[#allocation50_spill] sm:$0xff] }
 0x709   : > { %6117 = vmatpush1.bf16.msra.mxu1 %v17115_v14  ;;  %v5672_v0 = vpop.f32.mrf.mxu0  ;;  %6077 = vmatprep.subr.bf16.mxu0 %v16958_v55  ;;  %v17146_v14 = vld [vmem:[#allocation51_spill] sm:$0xff] }
 0x70a   : > { %v5716_v62 = vadd.f32 %v5711_v35, %v5671_v31  ;;  %v5713_v6 = vpop.f32.mrf.mxu1  ;;  %6118 = vmatprep.subr.bf16.mxu1 %v16958_v55  ;;  %v17140_v31 = vld [vmem:[#allocation45_spill] sm:$0xff]  ;;  %v17147_v0 = vld [vmem:[#allocation52_spill] sm:$0xff] }
 0x70b   : > { %v17144_v35 = vld [vmem:[#allocation49_spill] sm:$0xff]  ;;  %v17149_v6 = vld [vmem:[#allocation54_spill] sm:$0xff] }
 0x70c   : > { %6078 = vmatpush1.bf16.msra.mxu0 %v17116_v48  ;;  %v17150_v48 = vld [vmem:[#allocation55_spill] sm:$0xff] }
 0x70d   : > { %6119 = vmatpush1.bf16.msra.mxu1 %v17117_v9  ;;  %6079 = vmatprep.subr.bf16.mxu0 %v16958_v55  ;;  %v17151_v9 = vld [vmem:[#allocation56_spill] sm:$0xff] }
 0x70e   : > { %6120 = vmatprep.subr.bf16.mxu1 %v16958_v55 }
 0x710   : > { %6080 = vmatpush1.bf16.msra.mxu0 %v17118_v56  ;;  %v17152_v56 = vld [vmem:[#allocation57_spill] sm:$0xff] }
 0x711   : > { %6121 = vmatpush1.bf16.msra.mxu1 %v17119_v17  ;;  %6081 = vmatprep.subr.bf16.mxu0 %v16958_v55  ;;  %v17153_v17 = vld [vmem:[#allocation58_spill] sm:$0xff] }
 0x712   : > { %6122 = vmatprep.subr.bf16.mxu1 %v16958_v55 }
 0x714   : > { %6082 = vmatpush1.bf16.msra.mxu0 %v17120_v5  ;;  %v17154_v5 = vld [vmem:[#allocation59_spill] sm:$0xff] }
 0x715   : > { %6123 = vmatpush1.bf16.msra.mxu1 %v17121_v49  ;;  %6083 = vmatprep.subr.bf16.mxu0 %v16958_v55  ;;  %v9367_v49 = vld [vmem:[%s16683_s3 + $0x18] sm:$0xff]  }
 0x716   : > { %6124 = vmatprep.subr.bf16.mxu1 %v16958_v55 }
 0x718   : > { %6084 = vmatpush1.bf16.msra.mxu0 %v17122_v4  ;;  %v16816_v4 = vmov 0.0  }
 0x719   : > { %6125 = vmatpush1.bf16.msra.mxu1 %v17123_v30  ;;  %6085 = vmatprep.subr.bf16.mxu0 %v16958_v55 }
 0x71a   : > { %6126 = vmatprep.subr.bf16.mxu1 %v16958_v55 }
 0x71c   : > { %6086 = vmatpush1.bf16.msra.mxu0 %v17124_v25 }
 0x71d   : > { %6127 = vmatpush1.bf16.msra.mxu1 %v17125_v51  ;;  %6087 = vmatprep.subr.bf16.mxu0 %v16958_v55 }
 0x71e   : > { %6128 = vmatprep.subr.bf16.mxu1 %v16958_v55 }
 0x720   : > { %6088 = vmatpush1.bf16.msra.mxu0 %v17126_v52 }
 0x721   : > { %6129 = vmatpush1.bf16.msra.mxu1 %v17127_v45  ;;  %6097 = vmatprep.subr.bf16.mxu0 %v16958_v55  ;;  %v9368_v45 = vld [vmem:[%s16683_s3 + $0x10] sm:$0xff]  }
 0x722   : > { %6138 = vmatprep.subr.bf16.mxu1 %v16958_v55 }
 0x724   : > { %6098 = vmatpush2.bf16.msra.mxu0 %v17128_v1 }
 0x725   : > { %6139 = vmatpush2.bf16.msra.mxu1 %v17129_v57  ;;  %6099 = vmatprep.subr.bf16.mxu0 %v16958_v55 }
 0x726   : > { %6140 = vmatprep.subr.bf16.mxu1 %v16958_v55 }
 0x728   : > { %6100 = vmatpush2.bf16.msra.mxu0 %v17130_v59 }
 0x729   : > { %6141 = vmatpush2.bf16.msra.mxu1 %v17131_v60  ;;  %6101 = vmatprep.subr.bf16.mxu0 %v16958_v55 }
 0x72a   : > { %6142 = vmatprep.subr.bf16.mxu1 %v16958_v55 }
 0x72c   : > { %6102 = vmatpush2.bf16.msra.mxu0 %v17132_v61 }
 0x72d   : > { %6143 = vmatpush2.bf16.msra.mxu1 %v17133_v24  ;;  %6103 = vmatprep.subr.bf16.mxu0 %v16958_v55  ;;  %v9369_v24 = vld [vmem:[%s16683_s3 + $0x8] sm:$0xff]  }
 0x72e   : > { %6144 = vmatprep.subr.bf16.mxu1 %v16958_v55 }
 0x730   : > { %6104 = vmatpush2.bf16.msra.mxu0 %v17134_v3 }
 0x731   : > { %6145 = vmatpush2.bf16.msra.mxu1 %v17135_v10  ;;  %6157 = vmatprep.subr.bf16.mxu0 %v16958_v55  ;;  %v9370_v10 = vld [vmem:[%s16683_s3] sm:$0xff]  }
 0x732   : > { %6200 = vmatprep.subr.bf16.mxu1 %v16958_v55 }
 0x733   : > { %v5751_v38 = vpop.f32.mrf.mxu0  ;;  %6106 = vmatmul.mubr.bf16.vlgmr.msra.gmra.mxu0 %v12165_v29 }
 0x734   : > { %v5758_v20 = vadd.f32 %v5751_v38, %v5715_v28  ;;  %v5794_v44 = vpop.f32.mrf.mxu1  ;;  %6147 = vmatmul.mubr.bf16.vlgmr.msra.gmra.mxu1 %v12986_v2  ;;  %6158 = vmatpush1.bf16.msra.mxu0 %v17136_v43  ;;  %v17155_v38 = vld [vmem:[#allocation43_spill] sm:$0xff]  ;;  %v17158_v43 = vld [vmem:[#allocation62_spill] sm:$0xff] }
 0x735   : > { %8963 = vmatprep.mubr.msk.bf16.mxu0 %vm2737_vm3, %v13379_v47  ;;  %6201 = vmatpush1.bf16.msra.mxu1 %v17137_v36  ;;  %v5753_v50 = vpop.f32.mrf.mxu0 }
 0x736   : > { %v14245_v26 = vadd.f32 %v5794_v44, %v5758_v20  ;;  %8964 = vmatprep.mubr.msk.bf16.mxu1 %vm2737_vm3, %v14120_v16  ;;  %v5796_v12 = vpop.f32.mrf.mxu1  ;;  %6159 = vmatprep.subr.bf16.mxu0 %v16958_v55  ;;  %v17156_v20 = vld [vmem:[#allocation60_spill] sm:$0xff]  ;;  %v17157_v44 = vld [vmem:[#allocation61_spill] sm:$0xff] }
 0x737   : > { %v5754_v29 = vpop.f32.mrf.mxu0  ;;  %6202 = vmatprep.subr.bf16.mxu1 %v16958_v55 }
 0x738   : > { %v5803_v41 = vmax.f32 %v14123_v42, %v14245_v26  ;;  %v5759_v37 = vadd.f32 %v5754_v29, %v5716_v62  ;;  %v5797_v13 = vpop.f32.mrf.mxu1  ;;  %6160 = vmatpush1.bf16.msra.mxu0 %v13781_v53  ;;  %v17138_v53 = vld [vmem:[#allocation42_spill] sm:$0xff]  ;;  %v17148_v62 = vld [vmem:[#allocation53_spill] sm:$0xff] }
 0x739   : > { %6203 = vmatpush1.bf16.msra.mxu1 %v13790_v32  ;;  %v5756_v7 = vpop.f32.mrf.mxu0  ;;  %6161 = vmatprep.subr.bf16.mxu0 %v16958_v55  ;;  %v17139_v32 = vld [vmem:[#allocation44_spill] sm:$0xff] }
 0x73a   : > { %v14256_v28 = vadd.f32 %v5797_v13, %v5759_v37  ;;  %v5799_v19 = vpop.f32.mrf.mxu1  ;;  %6204 = vmatprep.subr.bf16.mxu1 %v16958_v55  ;;  %v14348_v7 = vld [vmem:[%s16682_s2 + $0x50] sm:$0xff]  }
 0x73c   : > { %v5804_v21 = vmax.f32 %v14134_v63, %v14256_v28  ;;  %6162 = vmatpush1.bf16.msra.mxu0 %v13799_v15  ;;  %v17141_v15 = vld [vmem:[#allocation46_spill] sm:$0xff]  ;;  %v14496_v28 = vld [vmem:[%s16682_s2 + $0x270] sm:$0xff]  }
 0x73d   : > { %6205 = vmatpush1.bf16.msra.mxu1 %v13805_v33  ;;  %6163 = vmatprep.subr.bf16.mxu0 %v16958_v55  ;;  %v17142_v33 = vld [vmem:[#allocation47_spill] sm:$0xff]  ;;  %v14487_v63 = vld [vmem:[%s16682_s2 + $0x278] sm:$0xff]  }
 0x73e   : > { %6206 = vmatprep.subr.bf16.mxu1 %v16958_v55 }
 0x740   : > { %6164 = vmatpush1.bf16.msra.mxu0 %v13813_v54  ;;  %v17143_v54 = vld [vmem:[#allocation48_spill] sm:$0xff] }
 0x741   : > { %6207 = vmatpush1.bf16.msra.mxu1 %v17138_v53  ;;  %6165 = vmatprep.subr.bf16.mxu0 %v16958_v55 }
 0x742   : > { %6208 = vmatprep.subr.bf16.mxu1 %v16958_v55 }
 0x744   : > { %6166 = vmatpush1.bf16.msra.mxu0 %v17139_v32 }
 0x745   : > { %6209 = vmatpush1.bf16.msra.mxu1 %v17140_v31  ;;  %6167 = vmatprep.subr.bf16.mxu0 %v16958_v55  ;;  %v14362_v31 = vld [vmem:[%s16682_s2 + $0x40] sm:$0xff]  }
 0x746   : > { %6210 = vmatprep.subr.bf16.mxu1 %v16958_v55 }
 0x748   : > { %6168 = vmatpush1.bf16.msra.mxu0 %v17141_v15  ;;  %v9371_v15 = vld [vmem:[%s16683_s3 + $0x38] sm:$0xff]  }
 0x749   : > { %6211 = vmatpush1.bf16.msra.mxu1 %v17142_v33  ;;  %6169 = vmatprep.subr.bf16.mxu0 %v16958_v55  ;;  %v14373_v33 = vld [vmem:[%s16682_s2 + $0x158] sm:$0xff]  }
 0x74a   : > { %6212 = vmatprep.subr.bf16.mxu1 %v16958_v55 }
 0x74c   : > { %6170 = vmatpush1.bf16.msra.mxu0 %v17143_v54  ;;  %v9372_v54 = vld [vmem:[%s16683_s3 + $0x30] sm:$0xff]  }
 0x74d   : > { %6213 = vmatpush1.bf16.msra.mxu1 %v17144_v35  ;;  %6171 = vmatprep.subr.bf16.mxu0 %v16958_v55  ;;  %v14386_v35 = vld [vmem:[%s16682_s2 + $0x150] sm:$0xff]  }
 0x74e   : > { %6214 = vmatprep.subr.bf16.mxu1 %v16958_v55 }
 0x750   : > { %6172 = vmatpush1.bf16.msra.mxu0 %v17145_v11  ;;  %v9373_v11 = vld [vmem:[%s16683_s3 + $0x28] sm:$0xff]  }
 0x751   : > { %6215 = vmatpush1.bf16.msra.mxu1 %v17146_v14  ;;  %6181 = vmatprep.subr.bf16.mxu0 %v16958_v55  ;;  %v14397_v14 = vld [vmem:[%s16682_s2 + $0x148] sm:$0xff]  }
 0x752   : > { %6224 = vmatprep.subr.bf16.mxu1 %v16958_v55 }
 0x754   : > { %6182 = vmatpush2.bf16.msra.mxu0 %v17147_v0  ;;  %v9374_v0 = vld [vmem:[%s16683_s3 + $0x20] sm:$0xff]  }
 0x755   : > { %6225 = vmatpush2.bf16.msra.mxu1 %v17148_v62  ;;  %6183 = vmatprep.subr.bf16.mxu0 %v16958_v55  ;;  %v14408_v62 = vld [vmem:[%s16682_s2 + $0x140] sm:$0xff]  }
 0x756   : > { %6226 = vmatprep.subr.bf16.mxu1 %v16958_v55 }
 0x758   : > { %6184 = vmatpush2.bf16.msra.mxu0 %v17149_v6  ;;  %v14416_v6 = vld [vmem:[%s16682_s2 + $0x138] sm:$0xff]  }
 0x759   : > { %6227 = vmatpush2.bf16.msra.mxu1 %v17150_v48  ;;  %6185 = vmatprep.subr.bf16.mxu0 %v16958_v55  ;;  %v14423_v48 = vld [vmem:[%s16682_s2 + $0x130] sm:$0xff]  }
 0x75a   : > { %6228 = vmatprep.subr.bf16.mxu1 %v16958_v55 }
 0x75c   : > { %6186 = vmatpush2.bf16.msra.mxu0 %v17151_v9  ;;  %v14430_v9 = vld [vmem:[%s16682_s2 + $0x128] sm:$0xff]  }
 0x75d   : > { %6229 = vmatpush2.bf16.msra.mxu1 %v17152_v56  ;;  %6187 = vmatprep.subr.bf16.mxu0 %v16958_v55  ;;  %v14437_v56 = vld [vmem:[%s16682_s2 + $0x120] sm:$0xff]  }
 0x75e   : > { %6230 = vmatprep.subr.bf16.mxu1 %v16958_v55 }
 0x760   : > { %6188 = vmatpush2.bf16.msra.mxu0 %v17153_v17 }
 0x761   : > { %6231 = vmatpush2.bf16.msra.mxu1 %v17154_v5  ;;  %9080 = vmatprep.subr.bf16.mxu0 %v16816_v4 }
 0x762   : > { %9092 = vmatprep.subr.bf16.mxu1 %v16816_v4 }
 0x763   : > { %v5839_v30 = vpop.f32.mrf.mxu0  ;;  %6190 = vmatmul.mubr.bf16.vlgmr.msra.gmra.mxu0 %v13565_v58 }
 0x764   : > { %v5880_v25 = vpop.f32.mrf.mxu1  ;;  %6233 = vmatmul.mubr.bf16.vlgmr.msra.gmra.mxu1 %v14180_v22  ;;  %9088 = vmatprep.mubr.msk.bf16.mxu0 %vm9937_vm8, %v16816_v4 }
 0x765   : > { %v5881_v51 = vadd.f32 %v5880_v25, %v5839_v30  ;;  %9093 = vmatpush3.bf16.msra.mxu1 %v9367_v49  ;;  %v5841_v52 = vpop.f32.mrf.mxu0  ;;  %9100 = vmatprep.mubr.msk.bf16.mxu1 %vm9937_vm8, %v16816_v4  ;;  %v14446_v30 = vld [vmem:[%s16682_s2 + $0x178] sm:$0xff]  }
 0x766   : > { %v5882_v1 = vpop.f32.mrf.mxu1  ;;  %9094 = vmatprep.subr.bf16.mxu1 %v16816_v4  ;;  %9081 = vmatpush3.bf16.msra.mxu0 %v9371_v15  ;;  %v14597_v15 = vld [vmem:[%s16682_s2 + $0x2c0] sm:$0xff]  }
 0x767   : > { %v5842_v57 = vpop.f32.mrf.mxu0  ;;  %9082 = vmatprep.subr.bf16.mxu0 %v16816_v4 }
 0x768   : > { %v5883_v59 = vpop.f32.mrf.mxu1 }
 0x769   : > { %v5884_v60 = vadd.f32 %v5883_v59, %v5842_v57  ;;  %9095 = vmatpush3.bf16.msra.mxu1 %v9368_v45  ;;  %v5844_v61 = vpop.f32.mrf.mxu0  ;;  %v14460_v59 = vld [vmem:[%s16682_s2 + $0x170] sm:$0xff]  }
 0x76a   : > { %v5885_v3 = vpop.f32.mrf.mxu1  ;;  %9096 = vmatprep.subr.bf16.mxu1 %v16816_v4  ;;  %9083 = vmatpush3.bf16.msra.mxu0 %v9372_v54  ;;  %v14479_v61 = vld [vmem:[%s16682_s2 + $0x160] sm:$0xff]   ;;  %v14604_v54 = vld [vmem:[%s16682_s2 + $0x2b8] sm:$0xff]  }
 0x76b   : > { %9084 = vmatprep.subr.bf16.mxu0 %v16816_v4  ;;  %v14517_v3 = vld [vmem:[%s16682_s2 + $0x258] sm:$0xff]  }
 0x76d   : > { %9097 = vmatpush3.bf16.msra.mxu1 %v9369_v24  ;;  %v14510_v24 = vld [vmem:[%s16682_s2 + $0x260] sm:$0xff]  }
 0x76e   : > { %9098 = vmatprep.subr.bf16.mxu1 %v16816_v4  ;;  %9085 = vmatpush3.bf16.msra.mxu0 %v9373_v11  ;;  %v14611_v11 = vld [vmem:[%s16682_s2 + $0x2b0] sm:$0xff]  }
 0x76f   : > { %9086 = vmatprep.subr.bf16.mxu0 %v16816_v4  ;;  %v14763_v4 = vld [vmem:[%s16682_s2 + $0x68] sm:$0xff]  }
 0x770   : > { %17164 = vst [vmem:[#allocation68_spill] sm:$0xff] %v14763_v4 }
 0x771   : > { %9099 = vmatpush3.bf16.msra.mxu1 %v9370_v10  ;;  %v14524_v10 = vld [vmem:[%s16682_s2 + $0x250] sm:$0xff]  }
 0x772   : > { %6427 = vmatprep.subr.bf16.mxu1 %v16958_v55  ;;  %9087 = vmatpush3.bf16.msra.mxu0 %v9374_v0  ;;  %v14618_v0 = vld [vmem:[%s16682_s2 + $0x2a8] sm:$0xff]  }
 0x773   : > { %6386 = vmatprep.subr.bf16.mxu0 %v16958_v55 }
 0x774   : > { %9101 = vmatmul.mubr.msk.bf16.vlgmr.msra.gmra.mxu1 %vm2737_vm3, %v17155_v38  ;;  %v14531_v38 = vld [vmem:[%s16682_s2 + $0x248] sm:$0xff]  }
 0x775   : > { %6428 = vmatpush1.bf16.msra.mxu1 %v17156_v20  ;;  %8976 = vmatprep.mubr.msk.bf16.mxu1 %vm2737_vm3, %v12170_v46  ;;  %v14538_v20 = vld [vmem:[%s16682_s2 + $0x240] sm:$0xff]  }
 0x776   : > { %6429 = vmatprep.subr.bf16.mxu1 %v16958_v55 }
 0x779   : > { %6430 = vmatpush1.bf16.msra.mxu1 %v13965_v39  ;;  %v17159_v39 = vld [vmem:[#allocation63_spill] sm:$0xff] }
 0x77a   : > { %6431 = vmatprep.subr.bf16.mxu1 %v16958_v55 }
 0x77d   : > { %6432 = vmatpush1.bf16.msra.mxu1 %v13976_v40 }
 0x77e   : > { %6433 = vmatprep.subr.bf16.mxu1 %v16958_v55 }
 0x781   : > { %6434 = vmatpush1.bf16.msra.mxu1 %v13987_v34 }
 0x782   : > { %6435 = vmatprep.subr.bf16.mxu1 %v16958_v55 }
 0x785   : > { %6436 = vmatpush1.bf16.msra.mxu1 %v13998_v27 }
 0x786   : > { %6437 = vmatprep.subr.bf16.mxu1 %v16958_v55 }
 0x789   : > { %6438 = vmatpush1.bf16.msra.mxu1 %v17157_v44 }
 0x78a   : > { %6439 = vmatprep.subr.bf16.mxu1 %v16958_v55 }
 0x78d   : > { %6440 = vmatpush1.bf16.msra.mxu1 %v17158_v43 }
 0x78e   : > { %6441 = vmatprep.subr.bf16.mxu1 %v16958_v55 }
 0x791   : > { %6442 = vmatpush1.bf16.msra.mxu1 %v17159_v39  ;;  %v14545_v39 = vld [vmem:[%s16682_s2 + $0x298] sm:$0xff]  }
 0x792   : > { %6451 = vmatprep.subr.bf16.mxu1 %v16958_v55 }
 0x793   : > { %v5921_v40 = vpop.f32.mrf.mxu0 }
 0x794   : > { %v5928_v34 = vadd.f32 %v5921_v40, %v5881_v51  ;;  %v5964_v36 = vpop.f32.mrf.mxu1 }
 0x795   : > { %6452 = vmatpush2.bf16.msra.mxu1 %v14042_v23  ;;  %v5923_v27 = vpop.f32.mrf.mxu0  ;;  %v14355_v23 = vld [vmem:[%s16682_s2 + $0x48] sm:$0xff]  }
 0x796   : > { %v5971_v50 = vadd.f32 %v5964_v36, %v5928_v34  ;;  %v5966_v12 = vpop.f32.mrf.mxu1  ;;  %6453 = vmatprep.subr.bf16.mxu1 %v16958_v55 }
 0x797   : > { %v5924_v29 = vpop.f32.mrf.mxu0 }
 0x798   : > { %v5929_v37 = vadd.f32 %v5924_v29, %v5884_v60  ;;  %v5967_v13 = vpop.f32.mrf.mxu1 }
 0x799   : > { %6454 = vmatpush2.bf16.msra.mxu1 %v14348_v7  ;;  %v5926_v19 = vpop.f32.mrf.mxu0 }
 0x79a   : > { %v5972_v53 = vadd.f32 %v5967_v13, %v5929_v37  ;;  %v5969_v32 = vpop.f32.mrf.mxu1  ;;  %6455 = vmatprep.subr.bf16.mxu1 %v16958_v55  ;;  %v14559_v37 = vld [vmem:[%s16682_s2 + $0x288] sm:$0xff]   ;;  %v14566_v13 = vld [vmem:[%s16682_s2 + $0x280] sm:$0xff]   ;;  %v14574_v19 = vld [vmem:[%s16682_s2 + $0x2d8] sm:$0xff]  }
 0x79b   : > { %v14590_v32 = vld [vmem:[%s16682_s2 + $0x2c8] sm:$0xff]  }
 0x79d   : > { %6456 = vmatpush2.bf16.msra.mxu1 %v14355_v23 }
 0x79e   : > { %6457 = vmatprep.subr.bf16.mxu1 %v16958_v55 }
 0x7a1   : > { %6458 = vmatpush2.bf16.msra.mxu1 %v14362_v31 }
 0x7a2   : > { %6511 = vmatprep.subr.bf16.mxu1 %v16958_v55 }
 0x7a4   : > { %6460 = vmatmul.mubr.bf16.vlgmr.msra.gmra.mxu1 %v12348_v8 }
 0x7a5   : > { %6512 = vmatpush1.bf16.msra.mxu1 %v14373_v33  ;;  %8978 = vmatprep.mubr.msk.bf16.mxu1 %vm2737_vm3, %v14120_v16 }
 0x7a6   : > { %6513 = vmatprep.subr.bf16.mxu1 %v16958_v55 }
 0x7a9   : > { %6514 = vmatpush1.bf16.msra.mxu1 %v14386_v35 }
 0x7aa   : > { %6515 = vmatprep.subr.bf16.mxu1 %v16958_v55 }
 0x7ad   : > { %6516 = vmatpush1.bf16.msra.mxu1 %v14397_v14 }
 0x7ae   : > { %6517 = vmatprep.subr.bf16.mxu1 %v16958_v55 }
 0x7b1   : > { %6518 = vmatpush1.bf16.msra.mxu1 %v14408_v62 }
 0x7b2   : > { %6519 = vmatprep.subr.bf16.mxu1 %v16958_v55 }
 0x7b5   : > { %6520 = vmatpush1.bf16.msra.mxu1 %v14416_v6 }
 0x7b6   : > { %6521 = vmatprep.subr.bf16.mxu1 %v16958_v55 }
 0x7b9   : > { %6522 = vmatpush1.bf16.msra.mxu1 %v14423_v48 }
 0x7ba   : > { %6523 = vmatprep.subr.bf16.mxu1 %v16958_v55 }
 0x7bd   : > { %6524 = vmatpush1.bf16.msra.mxu1 %v14430_v9 }
 0x7be   : > { %6525 = vmatprep.subr.bf16.mxu1 %v16958_v55 }
 0x7c1   : > { %6526 = vmatpush1.bf16.msra.mxu1 %v14437_v56 }
 0x7c2   : > { %6535 = vmatprep.subr.bf16.mxu1 %v16958_v55 }
 0x7c3   : > { %v6021_v17 = vpop.f32.mrf.mxu0 }
 0x7c4   : > { %v6028_v5 = vadd.f32 %v6021_v17, %v5971_v50  ;;  %v14441_v49 = vpop.f32.mrf.mxu1  ;;  %v14552_v50 = vld [vmem:[%s16682_s2 + $0x290] sm:$0xff]  }
 0x7c5   : > { %6536 = vmatpush2.bf16.msra.mxu1 %v14446_v30  ;;  %v6023_v25 = vpop.f32.mrf.mxu0 }
 0x7c6   : > { %v14452_v51 = vmax.f32 %v5803_v41, %v6028_v5  ;;  %v6068_v52 = vpop.f32.mrf.mxu1  ;;  %6537 = vmatprep.subr.bf16.mxu1 %v16958_v55  ;;  %v14472_v41 = vld [vmem:[%s16682_s2 + $0x168] sm:$0xff]   ;;  %v14626_v5 = vld [vmem:[%s16682_s2 + $0x2a0] sm:$0xff]  }
 0x7c7   : > { %v6024_v45 = vpop.f32.mrf.mxu0 }
 0x7c8   : > { %v6029_v1 = vadd.f32 %v6024_v45, %v5972_v53  ;;  %v14455_v57 = vpop.f32.mrf.mxu1  ;;  %v14583_v53 = vld [vmem:[%s16682_s2 + $0x2d0] sm:$0xff]  }
 0x7c9   : > { %6538 = vmatpush2.bf16.msra.mxu1 %v14460_v59  ;;  %v6026_v60 = vpop.f32.mrf.mxu0 }
 0x7ca   : > { %v14466_v42 = vmax.f32 %v5804_v21, %v6029_v1  ;;  %v6071_v26 = vpop.f32.mrf.mxu1  ;;  %6539 = vmatprep.subr.bf16.mxu1 %v16958_v55  ;;  %v14503_v21 = vld [vmem:[%s16682_s2 + $0x268] sm:$0xff]  }
 0x7cd   : > { %6540 = vmatpush2.bf16.msra.mxu1 %v14472_v41 }
 0x7ce   : > { %6541 = vmatprep.subr.bf16.mxu1 %v16958_v55 }
 0x7d1   : > { %6542 = vmatpush2.bf16.msra.mxu1 %v14479_v61 }
 0x7d2   : > { %6611 = vmatprep.subr.bf16.mxu1 %v16958_v55 }
 0x7d4   : > { %6544 = vmatmul.mubr.bf16.vlgmr.msra.gmra.mxu1 %v14180_v22 }
 0x7d5   : > { %6612 = vmatpush1.bf16.msra.mxu1 %v14487_v63  ;;  %8982 = vmatprep.mubr.msk.bf16.mxu1 %vm2737_vm3, %v12921_v18 }
 0x7d6   : > { %6613 = vmatprep.subr.bf16.mxu1 %v16958_v55 }
 0x7d9   : > { %6614 = vmatpush1.bf16.msra.mxu1 %v14496_v28 }
 0x7da   : > { %6615 = vmatprep.subr.bf16.mxu1 %v16958_v55 }
 0x7dd   : > { %6616 = vmatpush1.bf16.msra.mxu1 %v14503_v21 }
 0x7de   : > { %6617 = vmatprep.subr.bf16.mxu1 %v16958_v55 }
 0x7e1   : > { %6618 = vmatpush1.bf16.msra.mxu1 %v14510_v24 }
 0x7e2   : > { %6619 = vmatprep.subr.bf16.mxu1 %v16958_v55 }
 0x7e5   : > { %6620 = vmatpush1.bf16.msra.mxu1 %v14517_v3 }
 0x7e6   : > { %6621 = vmatprep.subr.bf16.mxu1 %v16958_v55 }
 0x7e9   : > { %6622 = vmatpush1.bf16.msra.mxu1 %v14524_v10 }
 0x7ea   : > { %6623 = vmatprep.subr.bf16.mxu1 %v16958_v55 }
 0x7ed   : > { %6624 = vmatpush1.bf16.msra.mxu1 %v14531_v38 }
 0x7ee   : > { %6625 = vmatprep.subr.bf16.mxu1 %v16958_v55 }
 0x7f1   : > { %6626 = vmatpush1.bf16.msra.mxu1 %v14538_v20 }
 0x7f2   : > { %6635 = vmatprep.subr.bf16.mxu1 %v16958_v55 }
 0x7f3   : > { %v6107_v44 = vpop.f32.mrf.mxu0 }
 0x7f4   : > { %v6148_v43 = vpop.f32.mrf.mxu1  ;;  %v6108_v17 = vadd.f32 %v6107_v44, %v14441_v49  ;;  %v14634_v49 = vld [vmem:[%s16682_s2 + $0x2f8] sm:$0xff]  }
 0x7f5   : > { %6636 = vmatpush2.bf16.msra.mxu1 %v14545_v39  ;;  %v6109_v40 = vpop.f32.mrf.mxu0 }
 0x7f6   : > { %v6150_v34 = vpop.f32.mrf.mxu1  ;;  %6637 = vmatprep.subr.bf16.mxu1 %v16958_v55  ;;  %v6155_v25 = vadd.f32 %v6148_v43, %v6108_v17 }
 0x7f7   : > { %v6110_v36 = vpop.f32.mrf.mxu0 }
 0x7f8   : > { %v6151_v27 = vpop.f32.mrf.mxu1  ;;  %v6111_v52 = vadd.f32 %v6110_v36, %v14455_v57 }
 0x7f9   : > { %6638 = vmatpush2.bf16.msra.mxu1 %v14552_v50  ;;  %v6112_v12 = vpop.f32.mrf.mxu0 }
 0x7fa   : > { %v6153_v29 = vpop.f32.mrf.mxu1  ;;  %6639 = vmatprep.subr.bf16.mxu1 %v16958_v55  ;;  %v6156_v44 = vadd.f32 %v6151_v27, %v6111_v52  ;;  %v9692_v27 = vld [vmem:[%s16685_s5] ss:$0 sm:$0xff] }
 0x7fb   : > { %v14642_v29 = vld [vmem:[%s16682_s2 + $0x2f0] sm:$0xff]  }
 0x7fd   : > { %6640 = vmatpush2.bf16.msra.mxu1 %v14559_v37 }
 0x7fe   : > { %6641 = vmatprep.subr.bf16.mxu1 %v16958_v55 }
 0x801   : > { %6642 = vmatpush2.bf16.msra.mxu1 %v14566_v13 }
 0x802   : > { %6693 = vmatprep.subr.bf16.mxu1 %v16958_v55 }
 0x804   : > { %6644 = vmatmul.mubr.bf16.vlgmr.msra.gmra.mxu1 %v12986_v2 }
 0x805   : > { %6694 = vmatpush1.bf16.msra.mxu1 %v14574_v19  ;;  %8984 = vmatprep.mubr.msk.bf16.mxu1 %vm2737_vm3, %v13379_v47 }
 0x806   : > { %6695 = vmatprep.subr.bf16.mxu1 %v16958_v55 }
 0x809   : > { %6696 = vmatpush1.bf16.msra.mxu1 %v14583_v53 }
 0x80a   : > { %6697 = vmatprep.subr.bf16.mxu1 %v16958_v55 }
 0x80d   : > { %6698 = vmatpush1.bf16.msra.mxu1 %v14590_v32 }
 0x80e   : > { %6699 = vmatprep.subr.bf16.mxu1 %v16958_v55 }
 0x811   : > { %6700 = vmatpush1.bf16.msra.mxu1 %v14597_v15 }
 0x812   : > { %6701 = vmatprep.subr.bf16.mxu1 %v16958_v55 }
 0x815   : > { %6702 = vmatpush1.bf16.msra.mxu1 %v14604_v54 }
 0x816   : > { %6703 = vmatprep.subr.bf16.mxu1 %v16958_v55 }
 0x819   : > { %6704 = vmatpush1.bf16.msra.mxu1 %v14611_v11 }
 0x81a   : > { %6705 = vmatprep.subr.bf16.mxu1 %v16958_v55 }
 0x81d   : > { %6706 = vmatpush1.bf16.msra.mxu1 %v14618_v0 }
 0x81e   : > { %6707 = vmatprep.subr.bf16.mxu1 %v16958_v55 }
 0x821   : > { %6708 = vmatpush1.bf16.msra.mxu1 %v14626_v5 }
 0x822   : > { %6717 = vmatprep.subr.bf16.mxu1 %v16958_v55 }
 0x823   : > { %v6191_v45 = vpop.f32.mrf.mxu0 }
 0x824   : > { %v6198_v1 = vadd.f32 %v6191_v45, %v6155_v25  ;;  %v6234_v60 = vpop.f32.mrf.mxu1 }
 0x825   : > { %6718 = vmatpush2.bf16.msra.mxu1 %v14634_v49  ;;  %v6193_v26 = vpop.f32.mrf.mxu0 }
 0x826   : > { %v6241_v40 = vadd.f32 %v6234_v60, %v6198_v1  ;;  %v6236_v34 = vpop.f32.mrf.mxu1  ;;  %6719 = vmatprep.subr.bf16.mxu1 %v16958_v55  ;;  %v14653_v1 = vld [vmem:[%s16682_s2 + $0x2e8] sm:$0xff]  }
 0x827   : > { %v6194_v43 = vpop.f32.mrf.mxu0 }
 0x828   : > { %v6243_v57 = vmax.f32 %v14452_v51, %v6241_v40  ;;  %v6199_v36 = vadd.f32 %v6194_v43, %v6156_v44  ;;  %v6237_v12 = vpop.f32.mrf.mxu1  ;;  %v14660_v40 = vld [vmem:[%s16682_s2 + $0x2e0] sm:$0xff]  }
 0x829   : > { %6720 = vmatpush2.bf16.msra.mxu1 %v14642_v29  ;;  %v6196_v17 = vpop.f32.mrf.mxu0  ;;  %v14668_v43 = vld [vmem:[#allocation2 + $0x84] ss:$8 sps:$4 sm:$0xff]  }
 0x82a   : > { %v6242_v25 = vadd.f32 %v6237_v12, %v6199_v36  ;;  %v6239_v45 = vpop.f32.mrf.mxu1  ;;  %6721 = vmatprep.subr.bf16.mxu1 %v16958_v55  ;;  %v6245_v52 = vadd.f32 %v9692_v27, %v6243_v57  ;;  %v14673_v57 = vld [vmem:[%s16682_s2 + $0x98] sm:$0xff]  }
 0x82b   : > { %v14679_v36 = vld [vmem:[%s16682_s2 + $0x398] sm:$0xff]   ;;  %v14699_v45 = vld [vmem:[%s16682_s2 + $0x390] sm:$0xff]  }
 0x82c   : > { %v6244_v51 = vmax.f32 %v14466_v42, %v6242_v25  ;;  %v6247_v26 = vmax.f32 %v6245_v52, 0.0  ;;  %v14693_v25 = vld [vmem:[%s16682_s2 + $0x90] sm:$0xff]   ;;  %v14707_v52 = vld [vmem:[%s16682_s2 + $0x88] sm:$0xff]  }
 0x82d   : > { %6722 = vmatpush2.bf16.msra.mxu1 %v14653_v1 }
 0x82e   : > { %v6246_v60 = vadd.f32 %v9692_v27, %v6244_v51  ;;  %6723 = vmatprep.subr.bf16.mxu1 %v16958_v55  ;;  %v14713_v51 = vld [vmem:[%s16682_s2 + $0x388] sm:$0xff]  }
 0x830   : > { %v6248_v44 = vmax.f32 %v6246_v60, 0.0  ;;  %v14721_v60 = vld [vmem:[%s16682_s2 + $0x80] sm:$0xff]  }
 0x831   : > { %6724 = vmatpush2.bf16.msra.mxu1 %v14660_v40 }
 0x832   : > { %v6249_v42 = vpack.c.bf16 %v6248_v44, %v6247_v26  ;;  %6779 = vmatprep.subr.bf16.mxu1 %v16958_v55  ;;  %v14727_v26 = vld [vmem:[%s16682_s2 + $0x380] sm:$0xff]   ;;  %v14735_v44 = vld [vmem:[%s16682_s2 + $0x78] sm:$0xff]  }
 0x834   : > { %v14664_v34 = vpop.f32.mrf.mxu1  ;;  %6726 = vmatmul.mubr.bf16.vlgmr.msra.gmra.mxu1 %v13565_v58  ;;  %9089 = vmatmul.mubr.msk.bf16.vlgmr.msra.gmra.mxu0 %vm2737_vm3, %v6249_v42  ;;  %v14741_v42 = vld [vmem:[%s16682_s2 + $0x378] sm:$0xff]  }
 0x835   : > { %17160 = vst [vmem:[#allocation64_spill] sm:$0xff] %v14664_v34  ;;  %6387 = vmatpush1.bf16.msra.mxu0 %v14673_v57  ;;  %6780 = vmatpush1.bf16.msra.mxu1 %v14679_v36  ;;  %v14777_v34 = vld [vmem:[%s16682_s2 + $0x60] sm:$0xff]  }
 0x836   : > { %8986 = vmatprep.mubr.msk.bf16.mxu1 %vm2737_vm3, %v14668_v43  ;;  %v9102_v12 = vpop.f32.mrf.mxu1  ;;  %8975 = vmatprep.mubr.msk.bf16.mxu0 %vm2737_vm3, %v12921_v18  ;;  %17166 = vst [vmem:[#allocation70_spill] sm:$0xff] %v14777_v34 }
 0x837   : > { %6388 = vmatprep.subr.bf16.mxu0 %v16958_v55  ;;  %6781 = vmatprep.subr.bf16.mxu1 %v16958_v55  ;;  %v14749_v12 = vld [vmem:[%s16682_s2 + $0x70] sm:$0xff]  }
 0x838   : > { %v14688_v17 = vpop.f32.mrf.mxu1  ;;  %17162 = vst [vmem:[#allocation66_spill] sm:$0xff] %v14749_v12 }
 0x839   : > { %17161 = vst [vmem:[#allocation65_spill] sm:$0xff] %v14688_v17  ;;  %6389 = vmatpush1.bf16.msra.mxu0 %v14693_v25  ;;  %6782 = vmatpush1.bf16.msra.mxu1 %v14699_v45  ;;  %v14769_v17 = vld [vmem:[%s16682_s2 + $0x368] sm:$0xff]  }
 0x83a   : > { %v9103_v27 = vpop.f32.mrf.mxu1  ;;  %6390 = vmatprep.subr.bf16.mxu0 %v16958_v55  ;;  %6783 = vmatprep.subr.bf16.mxu1 %v16958_v55  ;;  %17165 = vst [vmem:[#allocation69_spill] sm:$0xff] %v14769_v17 }
 0x83b   : > { %v14755_v27 = vld [vmem:[%s16682_s2 + $0x370] sm:$0xff]  }
 0x83c   : > { %17163 = vst [vmem:[#allocation67_spill] sm:$0xff] %v14755_v27 }
 0x83d   : > { %6391 = vmatpush1.bf16.msra.mxu0 %v14707_v52  ;;  %6784 = vmatpush1.bf16.msra.mxu1 %v14713_v51 }
 0x83e   : > { %6392 = vmatprep.subr.bf16.mxu0 %v16958_v55  ;;  %6785 = vmatprep.subr.bf16.mxu1 %v16958_v55 }
 0x841   : > { %6393 = vmatpush1.bf16.msra.mxu0 %v14721_v60  ;;  %6786 = vmatpush1.bf16.msra.mxu1 %v14727_v26 }
 0x842   : > { %6394 = vmatprep.subr.bf16.mxu0 %v16958_v55  ;;  %6787 = vmatprep.subr.bf16.mxu1 %v16958_v55 }
 0x845   : > { %6395 = vmatpush1.bf16.msra.mxu0 %v14735_v44  ;;  %6788 = vmatpush1.bf16.msra.mxu1 %v14741_v42 }
 0x846   : > { %6396 = vmatprep.subr.bf16.mxu0 %v16958_v55  ;;  %6789 = vmatprep.subr.bf16.mxu1 %v16958_v55 }
 0x849   : > { %6397 = vmatpush1.bf16.msra.mxu0 %v14749_v12  ;;  %6790 = vmatpush1.bf16.msra.mxu1 %v14755_v27 }
 0x84a   : > { %6398 = vmatprep.subr.bf16.mxu0 %v16958_v55  ;;  %6791 = vmatprep.subr.bf16.mxu1 %v16958_v55 }
 0x84d   : > { %6399 = vmatpush1.bf16.msra.mxu0 %v14763_v4  ;;  %6792 = vmatpush1.bf16.msra.mxu1 %v14769_v17  ;;  %v14783_v4 = vld [vmem:[%s16682_s2 + $0x360] sm:$0xff]   ;;  %v14791_v17 = vld [vmem:[%s16682_s2 + $0xb8] sm:$0xff]  }
 0x84e   : > { %6400 = vmatprep.subr.bf16.mxu0 %v16958_v55  ;;  %6793 = vmatprep.subr.bf16.mxu1 %v16958_v55  ;;  %17167 = vst [vmem:[#allocation4_spill] sm:$0xff] %v14783_v4  ;;  %17168 = vst [vmem:[#allocation5_spill] sm:$0xff] %v14791_v17 }
 0x851   : > { %6401 = vmatpush1.bf16.msra.mxu0 %v14777_v34  ;;  %6794 = vmatpush1.bf16.msra.mxu1 %v14783_v4  ;;  %v14797_v34 = vld [vmem:[%s16682_s2 + $0x3b8] sm:$0xff]   ;;  %v14805_v4 = vld [vmem:[%s16682_s2 + $0xb0] sm:$0xff]  }
 0x852   : > { %6410 = vmatprep.subr.bf16.mxu0 %v16958_v55  ;;  %6803 = vmatprep.subr.bf16.mxu1 %v16958_v55  ;;  %17169 = vst [vmem:[#allocation6_spill] sm:$0xff] %v14797_v34  ;;  %17170 = vst [vmem:[#allocation7_spill] sm:$0xff] %v14805_v4 }
 0x855   : > { %6411 = vmatpush2.bf16.msra.mxu0 %v14791_v17  ;;  %6804 = vmatpush2.bf16.msra.mxu1 %v14797_v34  ;;  %v14811_v17 = vld [vmem:[%s16682_s2 + $0x3b0] sm:$0xff]   ;;  %v14819_v34 = vld [vmem:[%s16682_s2 + $0xa8] sm:$0xff]  }
 0x856   : > { %6412 = vmatprep.subr.bf16.mxu0 %v16958_v55  ;;  %6805 = vmatprep.subr.bf16.mxu1 %v16958_v55  ;;  %17171 = vst [vmem:[#allocation8_spill] sm:$0xff] %v14811_v17  ;;  %17172 = vst [vmem:[#allocation9_spill] sm:$0xff] %v14819_v34 }
 0x859   : > { %6413 = vmatpush2.bf16.msra.mxu0 %v14805_v4  ;;  %6806 = vmatpush2.bf16.msra.mxu1 %v14811_v17  ;;  %v14825_v4 = vld [vmem:[%s16682_s2 + $0x3a8] sm:$0xff]   ;;  %v14833_v17 = vld [vmem:[%s16682_s2 + $0xa0] sm:$0xff]  }
 0x85a   : > { %6414 = vmatprep.subr.bf16.mxu0 %v16958_v55  ;;  %6807 = vmatprep.subr.bf16.mxu1 %v16958_v55  ;;  %17173 = vst [vmem:[#allocation10_spill] sm:$0xff] %v14825_v4  ;;  %17174 = vst [vmem:[#allocation11_spill] sm:$0xff] %v14833_v17 }
 0x85d   : > { %6415 = vmatpush2.bf16.msra.mxu0 %v14819_v34  ;;  %6808 = vmatpush2.bf16.msra.mxu1 %v14825_v4  ;;  %v14839_v34 = vld [vmem:[%s16682_s2 + $0x3a0] sm:$0xff]  }
 0x85e   : > { %6416 = vmatprep.subr.bf16.mxu0 %v16958_v55  ;;  %6809 = vmatprep.subr.bf16.mxu1 %v16958_v55  ;;  %17175 = vst [vmem:[#allocation12_spill] sm:$0xff] %v14839_v34  ;;  %v14843_v4 = vld [vmem:[#allocation2 + $0x80] ss:$8 sps:$4 sm:$0xff]  }
 0x85f   : > { %17176 = vst [vmem:[#allocation13_spill] sm:$0xff] %v14843_v4 }
 0x861   : > { %6417 = vmatpush2.bf16.msra.mxu0 %v14833_v17  ;;  %6810 = vmatpush2.bf16.msra.mxu1 %v14839_v34  ;;  %v14853_v17 = vld [vmem:[%s16682_s2 + $0xf8] sm:$0xff]  }
 0x862   : > { %6468 = vmatprep.subr.bf16.mxu0 %v16958_v55  ;;  %6865 = vmatprep.subr.bf16.mxu1 %v16958_v55  ;;  %17178 = vst [vmem:[#allocation16_spill] sm:$0xff] %v14853_v17  ;;  %v9720_v34 = vld [vmem:[%s16682_s2 + $0x38] sm:$0xff]  }
 0x864   : > { %6419 = vmatmul.mubr.bf16.vlgmr.msra.gmra.mxu0 %v12986_v2  ;;  %v14847_v27 = vpop.f32.mrf.mxu1  ;;  %6812 = vmatmul.mubr.bf16.vlgmr.msra.gmra.mxu1 %v14843_v4 }
 0x865   : > { %17177 = vst [vmem:[#allocation14_spill] sm:$0xff] %v14847_v27  ;;  %6469 = vmatpush1.bf16.msra.mxu0 %v14853_v17  ;;  %8977 = vmatprep.mubr.msk.bf16.mxu0 %vm2737_vm3, %v13379_v47  ;;  %v14870_v17 = vld [vmem:[%s16682_s2 + $0xf0] sm:$0xff]  }
 0x866   : > { %6866 = vmatpush1.bf16.msra.mxu1 %v9720_v34  ;;  %8988 = vmatprep.mubr.msk.bf16.mxu1 %vm2737_vm3, %v12921_v18  ;;  %v6463_v27 = vpop.f32.mrf.mxu1  ;;  %17179 = vst [vmem:[#allocation17_spill] sm:$0xff] %v14870_v17  ;;  %v9722_v34 = vld [vmem:[%s16682_s2 + $0x30] sm:$0xff]  }
 0x867   : > { %6470 = vmatprep.subr.bf16.mxu0 %v16958_v55  ;;  %6867 = vmatprep.subr.bf16.mxu1 %v16958_v55  ;;  %v14881_v27 = vld [vmem:[%s16682_s2 + $0xe8] sm:$0xff]  }
 0x868   : > { %v14865_v12 = vpop.f32.mrf.mxu1 }
 0x869   : > { %6471 = vmatpush1.bf16.msra.mxu0 %v14870_v17  ;;  %v9724_v17 = vld [vmem:[%s16682_s2 + $0x28] sm:$0xff]  }
 0x86a   : > { %6868 = vmatpush1.bf16.msra.mxu1 %v9722_v34  ;;  %v6466_v18 = vpop.f32.mrf.mxu1  ;;  %6472 = vmatprep.subr.bf16.mxu0 %v16958_v55  ;;  %v9726_v34 = vld [vmem:[%s16682_s2 + $0x20] sm:$0xff]  }
 0x86b   : > { %6869 = vmatprep.subr.bf16.mxu1 %v16958_v55  ;;  %v14892_v18 = vld [vmem:[%s16682_s2 + $0xe0] sm:$0xff]  }
 0x86c   : > { %17180 = vst [vmem:[#allocation18_spill] sm:$0xff] %v14892_v18 }
 0x86d   : > { %6473 = vmatpush1.bf16.msra.mxu0 %v14881_v27 }
 0x86e   : > { %6870 = vmatpush1.bf16.msra.mxu1 %v9724_v17  ;;  %6474 = vmatprep.subr.bf16.mxu0 %v16958_v55  ;;  %v14903_v17 = vld [vmem:[%s16682_s2 + $0xd8] sm:$0xff]  }
 0x86f   : > { %6871 = vmatprep.subr.bf16.mxu1 %v16958_v55  ;;  %17181 = vst [vmem:[#allocation19_spill] sm:$0xff] %v14903_v17 }
 0x871   : > { %6475 = vmatpush1.bf16.msra.mxu0 %v14892_v18  ;;  %v9728_v18 = vld [vmem:[%s16682_s2 + $0x18] sm:$0xff]  }
 0x872   : > { %6872 = vmatpush1.bf16.msra.mxu1 %v9726_v34  ;;  %6476 = vmatprep.subr.bf16.mxu0 %v16958_v55  ;;  %v14914_v34 = vld [vmem:[%s16682_s2 + $0xd0] sm:$0xff]  }
 0x873   : > { %6873 = vmatprep.subr.bf16.mxu1 %v16958_v55  ;;  %17182 = vst [vmem:[#allocation20_spill] sm:$0xff] %v14914_v34 }
 0x875   : > { %6477 = vmatpush1.bf16.msra.mxu0 %v14903_v17  ;;  %v9730_v17 = vld [vmem:[%s16682_s2 + $0x10] sm:$0xff]  }
 0x876   : > { %6874 = vmatpush1.bf16.msra.mxu1 %v9728_v18  ;;  %6478 = vmatprep.subr.bf16.mxu0 %v16958_v55  ;;  %v14925_v18 = vld [vmem:[%s16682_s2 + $0xc8] sm:$0xff]  }
 0x877   : > { %6875 = vmatprep.subr.bf16.mxu1 %v16958_v55  ;;  %17183 = vst [vmem:[#allocation21_spill] sm:$0xff] %v14925_v18 }
 0x879   : > { %6479 = vmatpush1.bf16.msra.mxu0 %v14914_v34  ;;  %v9732_v34 = vld [vmem:[%s16682_s2 + $0x8] sm:$0xff]  }
 0x87a   : > { %6876 = vmatpush1.bf16.msra.mxu1 %v9730_v17  ;;  %6480 = vmatprep.subr.bf16.mxu0 %v16958_v55  ;;  %v14936_v17 = vld [vmem:[%s16682_s2 + $0xc0] sm:$0xff]  }
 0x87b   : > { %6877 = vmatprep.subr.bf16.mxu1 %v16958_v55  ;;  %17184 = vst [vmem:[#allocation22_spill] sm:$0xff] %v14936_v17 }
 0x87d   : > { %6481 = vmatpush1.bf16.msra.mxu0 %v14925_v18  ;;  %v9734_v18 = vld [vmem:[%s16682_s2] sm:$0xff]  }
 0x87e   : > { %6878 = vmatpush1.bf16.msra.mxu1 %v9732_v34  ;;  %6482 = vmatprep.subr.bf16.mxu0 %v16958_v55  ;;  %v14947_v34 = vld [vmem:[%s16682_s2 + $0x118] sm:$0xff]  }
 0x87f   : > { %6879 = vmatprep.subr.bf16.mxu1 %v16958_v55 }
 0x881   : > { %6483 = vmatpush1.bf16.msra.mxu0 %v14936_v17  ;;  %v9736_v17 = vld [vmem:[%s16682_s2 + $0x58] sm:$0xff]  }
 0x882   : > { %6880 = vmatpush1.bf16.msra.mxu1 %v9734_v18  ;;  %6492 = vmatprep.subr.bf16.mxu0 %v16958_v55  ;;  %v14958_v18 = vld [vmem:[%s16682_s2 + $0x110] sm:$0xff]  }
 0x883   : > { %6889 = vmatprep.subr.bf16.mxu1 %v16958_v55 }
 0x885   : > { %6493 = vmatpush2.bf16.msra.mxu0 %v14947_v34 }
 0x886   : > { %6890 = vmatpush2.bf16.msra.mxu1 %v9736_v17  ;;  %6494 = vmatprep.subr.bf16.mxu0 %v16958_v55  ;;  %v14967_v17 = vld [vmem:[%s16682_s2 + $0x108] sm:$0xff]  }
 0x887   : > { %6891 = vmatprep.subr.bf16.mxu1 %v16958_v55  ;;  %17185 = vst [vmem:[#allocation23_spill] sm:$0xff] %v14967_v17 }
 0x889   : > { %6495 = vmatpush2.bf16.msra.mxu0 %v14958_v18 }
 0x88a   : > { %6892 = vmatpush2.bf16.msra.mxu1 %v14348_v7  ;;  %6496 = vmatprep.subr.bf16.mxu0 %v16958_v55  ;;  %v14976_v7 = vld [vmem:[%s16682_s2 + $0x100] sm:$0xff]  }
 0x88b   : > { %6893 = vmatprep.subr.bf16.mxu1 %v16958_v55 }
 0x88d   : > { %6497 = vmatpush2.bf16.msra.mxu0 %v14967_v17  ;;  %v14989_v17 = vld [vmem:[%s16682_s2 + $0x1b8] sm:$0xff]  }
 0x88e   : > { %6894 = vmatpush2.bf16.msra.mxu1 %v14355_v23  ;;  %6498 = vmatprep.subr.bf16.mxu0 %v16958_v55 }
 0x88f   : > { %6895 = vmatprep.subr.bf16.mxu1 %v16958_v55 }
 0x891   : > { %6499 = vmatpush2.bf16.msra.mxu0 %v14976_v7 }
 0x892   : > { %6896 = vmatpush2.bf16.msra.mxu1 %v14362_v31  ;;  %6568 = vmatprep.subr.bf16.mxu0 %v16958_v55 }
 0x893   : > { %6949 = vmatprep.subr.bf16.mxu1 %v16958_v55 }
 0x894   : > { %6501 = vmatmul.mubr.bf16.vlgmr.msra.gmra.mxu0 %v13565_v58  ;;  %v14983_v23 = vpop.f32.mrf.mxu1 }
 0x895   : > { %17186 = vst [vmem:[#allocation24_spill] sm:$0xff] %v14983_v23  ;;  %6898 = vmatmul.mubr.bf16.vlgmr.msra.gmra.mxu1 %v12986_v2  ;;  %6569 = vmatpush1.bf16.msra.mxu0 %v14989_v17  ;;  %v15004_v2 = vld [vmem:[%s16682_s2 + $0x1b0] sm:$0xff]  }
 0x896   : > { %8981 = vmatprep.mubr.msk.bf16.mxu0 %vm2737_vm3, %v14668_v43  ;;  %6950 = vmatpush1.bf16.msra.mxu1 %v14373_v33  ;;  %v6547_v31 = vpop.f32.mrf.mxu1 }
 0x897   : > { %8990 = vmatprep.mubr.msk.bf16.mxu1 %vm2737_vm3, %v14668_v43  ;;  %6570 = vmatprep.subr.bf16.mxu0 %v16958_v55  ;;  %v15013_v31 = vld [vmem:[%s16682_s2 + $0x1a8] sm:$0xff]  }
 0x898   : > { %v14998_v23 = vpop.f32.mrf.mxu1  ;;  %6951 = vmatprep.subr.bf16.mxu1 %v16958_v55 }
 0x899   : > { %6571 = vmatpush1.bf16.msra.mxu0 %v15004_v2 }
 0x89a   : > { %6952 = vmatpush1.bf16.msra.mxu1 %v14386_v35  ;;  %v6550_v33 = vpop.f32.mrf.mxu1  ;;  %6572 = vmatprep.subr.bf16.mxu0 %v16958_v55  ;;  %v15022_v35 = vld [vmem:[%s16682_s2 + $0x1a0] sm:$0xff]  }
 0x89b   : > { %6953 = vmatprep.subr.bf16.mxu1 %v16958_v55  ;;  %v15107_v33 = vld [vmem:[%s16682_s2 + $0x218] sm:$0xff]  }
 0x89d   : > { %6573 = vmatpush1.bf16.msra.mxu0 %v15013_v31 }
 0x89e   : > { %6954 = vmatpush1.bf16.msra.mxu1 %v14397_v14  ;;  %6574 = vmatprep.subr.bf16.mxu0 %v16958_v55  ;;  %v15031_v14 = vld [vmem:[%s16682_s2 + $0x198] sm:$0xff]  }
 0x89f   : > { %6955 = vmatprep.subr.bf16.mxu1 %v16958_v55 }
 0x8a1   : > { %6575 = vmatpush1.bf16.msra.mxu0 %v15022_v35 }
 0x8a2   : > { %6956 = vmatpush1.bf16.msra.mxu1 %v14408_v62  ;;  %6576 = vmatprep.subr.bf16.mxu0 %v16958_v55  ;;  %v15040_v62 = vld [vmem:[%s16682_s2 + $0x190] sm:$0xff]  }
 0x8a3   : > { %6957 = vmatprep.subr.bf16.mxu1 %v16958_v55 }
 0x8a5   : > { %6577 = vmatpush1.bf16.msra.mxu0 %v15031_v14 }
 0x8a6   : > { %6958 = vmatpush1.bf16.msra.mxu1 %v14416_v6  ;;  %6578 = vmatprep.subr.bf16.mxu0 %v16958_v55  ;;  %v15049_v6 = vld [vmem:[%s16682_s2 + $0x188] sm:$0xff]  }
 0x8a7   : > { %6959 = vmatprep.subr.bf16.mxu1 %v16958_v55 }
 0x8a9   : > { %6579 = vmatpush1.bf16.msra.mxu0 %v15040_v62 }
 0x8aa   : > { %6960 = vmatpush1.bf16.msra.mxu1 %v14423_v48  ;;  %6580 = vmatprep.subr.bf16.mxu0 %v16958_v55  ;;  %v15058_v48 = vld [vmem:[%s16682_s2 + $0x180] sm:$0xff]  }
 0x8ab   : > { %6961 = vmatprep.subr.bf16.mxu1 %v16958_v55 }
 0x8ad   : > { %6581 = vmatpush1.bf16.msra.mxu0 %v15049_v6 }
 0x8ae   : > { %6962 = vmatpush1.bf16.msra.mxu1 %v14430_v9  ;;  %6582 = vmatprep.subr.bf16.mxu0 %v16958_v55  ;;  %v15067_v9 = vld [vmem:[%s16682_s2 + $0x1d8] sm:$0xff]  }
 0x8af   : > { %6963 = vmatprep.subr.bf16.mxu1 %v16958_v55 }
 0x8b1   : > { %6583 = vmatpush1.bf16.msra.mxu0 %v15058_v48 }
 0x8b2   : > { %6964 = vmatpush1.bf16.msra.mxu1 %v14437_v56  ;;  %6592 = vmatprep.subr.bf16.mxu0 %v16958_v55  ;;  %v15076_v56 = vld [vmem:[%s16682_s2 + $0x1d0] sm:$0xff]  }
 0x8b3   : > { %6973 = vmatprep.subr.bf16.mxu1 %v16958_v55 }
 0x8b5   : > { %6593 = vmatpush2.bf16.msra.mxu0 %v15067_v9 }
 0x8b6   : > { %6974 = vmatpush2.bf16.msra.mxu1 %v14446_v30  ;;  %6594 = vmatprep.subr.bf16.mxu0 %v16958_v55  ;;  %v15085_v30 = vld [vmem:[%s16682_s2 + $0x1c8] sm:$0xff]  }
 0x8b7   : > { %6975 = vmatprep.subr.bf16.mxu1 %v16958_v55 }
 0x8b9   : > { %6595 = vmatpush2.bf16.msra.mxu0 %v15076_v56 }
 0x8ba   : > { %6976 = vmatpush2.bf16.msra.mxu1 %v14460_v59  ;;  %6596 = vmatprep.subr.bf16.mxu0 %v16958_v55  ;;  %v15094_v59 = vld [vmem:[%s16682_s2 + $0x1c0] sm:$0xff]  }
 0x8bb   : > { %6977 = vmatprep.subr.bf16.mxu1 %v16958_v55 }
 0x8bd   : > { %6597 = vmatpush2.bf16.msra.mxu0 %v15085_v30 }
 0x8be   : > { %6978 = vmatpush2.bf16.msra.mxu1 %v14472_v41  ;;  %6598 = vmatprep.subr.bf16.mxu0 %v16958_v55 }
 0x8bf   : > { %6979 = vmatprep.subr.bf16.mxu1 %v16958_v55 }
 0x8c1   : > { %6599 = vmatpush2.bf16.msra.mxu0 %v15094_v59 }
 0x8c2   : > { %6980 = vmatpush2.bf16.msra.mxu1 %v14479_v61  ;;  %6652 = vmatprep.subr.bf16.mxu0 %v16958_v55 }
 0x8c3   : > { %7051 = vmatprep.subr.bf16.mxu1 %v16958_v55 }
 0x8c4   : > { %6601 = vmatmul.mubr.bf16.vlgmr.msra.gmra.mxu0 %v14843_v4  ;;  %v15101_v41 = vpop.f32.mrf.mxu1 }
 0x8c5   : > { %17187 = vst [vmem:[#allocation25_spill] sm:$0xff] %v15101_v41  ;;  %6982 = vmatmul.mubr.bf16.vlgmr.msra.gmra.mxu1 %v14843_v4  ;;  %6653 = vmatpush1.bf16.msra.mxu0 %v15107_v33  ;;  %v15122_v4 = vld [vmem:[%s16682_s2 + $0x210] sm:$0xff]  }
 0x8c6   : > { %8983 = vmatprep.mubr.msk.bf16.mxu0 %vm2737_vm3, %v12170_v46  ;;  %7052 = vmatpush1.bf16.msra.mxu1 %v14487_v63  ;;  %v6647_v61 = vpop.f32.mrf.mxu1  ;;  %v15131_v63 = vld [vmem:[%s16682_s2 + $0x208] sm:$0xff]  }
 0x8c7   : > { %8994 = vmatprep.mubr.msk.bf16.mxu1 %vm2737_vm3, %v13379_v47  ;;  %6654 = vmatprep.subr.bf16.mxu0 %v16958_v55 }
 0x8c8   : > { %v15116_v41 = vpop.f32.mrf.mxu1  ;;  %7053 = vmatprep.subr.bf16.mxu1 %v16958_v55 }
 0x8c9   : > { %6655 = vmatpush1.bf16.msra.mxu0 %v15122_v4 }
 0x8ca   : > { %7054 = vmatpush1.bf16.msra.mxu1 %v14496_v28  ;;  %v6650_v46 = vpop.f32.mrf.mxu1  ;;  %6656 = vmatprep.subr.bf16.mxu0 %v16958_v55  ;;  %v15140_v28 = vld [vmem:[%s16682_s2 + $0x200] sm:$0xff]  }
 0x8cb   : > { %7055 = vmatprep.subr.bf16.mxu1 %v16958_v55  ;;  %v15227_v46 = vld [vmem:[%s16682_s2 + $0x338] sm:$0xff]  }
 0x8cc   : > { %17190 = vst [vmem:[#allocation28_spill] sm:$0xff] %v15227_v46 }
 0x8cd   : > { %6657 = vmatpush1.bf16.msra.mxu0 %v15131_v63 }
 0x8ce   : > { %7056 = vmatpush1.bf16.msra.mxu1 %v14503_v21  ;;  %6658 = vmatprep.subr.bf16.mxu0 %v16958_v55  ;;  %v15149_v21 = vld [vmem:[%s16682_s2 + $0x1f8] sm:$0xff]  }
 0x8cf   : > { %7057 = vmatprep.subr.bf16.mxu1 %v16958_v55 }
 0x8d1   : > { %6659 = vmatpush1.bf16.msra.mxu0 %v15140_v28 }
 0x8d2   : > { %7058 = vmatpush1.bf16.msra.mxu1 %v14510_v24  ;;  %6660 = vmatprep.subr.bf16.mxu0 %v16958_v55  ;;  %v15158_v24 = vld [vmem:[%s16682_s2 + $0x1f0] sm:$0xff]  }
 0x8d3   : > { %7059 = vmatprep.subr.bf16.mxu1 %v16958_v55 }
 0x8d5   : > { %6661 = vmatpush1.bf16.msra.mxu0 %v15149_v21 }
 0x8d6   : > { %7060 = vmatpush1.bf16.msra.mxu1 %v14517_v3  ;;  %6662 = vmatprep.subr.bf16.mxu0 %v16958_v55  ;;  %v15167_v3 = vld [vmem:[%s16682_s2 + $0x1e8] sm:$0xff]  }
 0x8d7   : > { %7061 = vmatprep.subr.bf16.mxu1 %v16958_v55 }
 0x8d9   : > { %6663 = vmatpush1.bf16.msra.mxu0 %v15158_v24 }
 0x8da   : > { %7062 = vmatpush1.bf16.msra.mxu1 %v14524_v10  ;;  %6664 = vmatprep.subr.bf16.mxu0 %v16958_v55  ;;  %v15176_v10 = vld [vmem:[%s16682_s2 + $0x1e0] sm:$0xff]  }
 0x8db   : > { %7063 = vmatprep.subr.bf16.mxu1 %v16958_v55 }
 0x8dd   : > { %6665 = vmatpush1.bf16.msra.mxu0 %v15167_v3 }
 0x8de   : > { %7064 = vmatpush1.bf16.msra.mxu1 %v14531_v38  ;;  %6666 = vmatprep.subr.bf16.mxu0 %v16958_v55  ;;  %v15185_v38 = vld [vmem:[%s16682_s2 + $0x238] sm:$0xff]  }
 0x8df   : > { %7065 = vmatprep.subr.bf16.mxu1 %v16958_v55 }
 0x8e1   : > { %6667 = vmatpush1.bf16.msra.mxu0 %v15176_v10 }
 0x8e2   : > { %7066 = vmatpush1.bf16.msra.mxu1 %v14538_v20  ;;  %6676 = vmatprep.subr.bf16.mxu0 %v16958_v55  ;;  %v15194_v20 = vld [vmem:[%s16682_s2 + $0x230] sm:$0xff]  }
 0x8e3   : > { %7075 = vmatprep.subr.bf16.mxu1 %v16958_v55 }
 0x8e5   : > { %6677 = vmatpush2.bf16.msra.mxu0 %v15185_v38 }
 0x8e6   : > { %7076 = vmatpush2.bf16.msra.mxu1 %v14545_v39  ;;  %6678 = vmatprep.subr.bf16.mxu0 %v16958_v55  ;;  %v15203_v39 = vld [vmem:[%s16682_s2 + $0x228] sm:$0xff]  }
 0x8e7   : > { %7077 = vmatprep.subr.bf16.mxu1 %v16958_v55 }
 0x8e9   : > { %6679 = vmatpush2.bf16.msra.mxu0 %v15194_v20 }
 0x8ea   : > { %7078 = vmatpush2.bf16.msra.mxu1 %v14552_v50  ;;  %6680 = vmatprep.subr.bf16.mxu0 %v16958_v55  ;;  %v15212_v50 = vld [vmem:[%s16682_s2 + $0x220] sm:$0xff]  }
 0x8eb   : > { %7079 = vmatprep.subr.bf16.mxu1 %v16958_v55 }
 0x8ed   : > { %6681 = vmatpush2.bf16.msra.mxu0 %v15203_v39 }
 0x8ee   : > { %7080 = vmatpush2.bf16.msra.mxu1 %v14559_v37  ;;  %6682 = vmatprep.subr.bf16.mxu0 %v16958_v55 }
 0x8ef   : > { %7081 = vmatprep.subr.bf16.mxu1 %v16958_v55 }
 0x8f1   : > { %6683 = vmatpush2.bf16.msra.mxu0 %v15212_v50 }
 0x8f2   : > { %7082 = vmatpush2.bf16.msra.mxu1 %v14566_v13  ;;  %6736 = vmatprep.subr.bf16.mxu0 %v16958_v55 }
 0x8f3   : > { %7133 = vmatprep.subr.bf16.mxu1 %v16958_v55 }
 0x8f4   : > { %6685 = vmatmul.mubr.bf16.vlgmr.msra.gmra.mxu0 %v12348_v8  ;;  %v15219_v37 = vpop.f32.mrf.mxu1  ;;  %v15221_v61 = vpop.f32.mrf.mxu0 }
 0x8f5   : > { %17188 = vst [vmem:[#allocation26_spill] sm:$0xff] %v15219_v37  ;;  %17189 = vst [vmem:[#allocation27_spill] sm:$0xff] %v15221_v61  ;;  %7084 = vmatmul.mubr.bf16.vlgmr.msra.gmra.mxu1 %v13565_v58  ;;  %6737 = vmatpush1.bf16.msra.mxu0 %v15227_v46  ;;  %v15244_v46 = vld [vmem:[%s16682_s2 + $0x330] sm:$0xff]  }
 0x8f6   : > { %8985 = vmatprep.mubr.msk.bf16.mxu0 %vm2737_vm3, %v14120_v16  ;;  %7134 = vmatpush1.bf16.msra.mxu1 %v14574_v19  ;;  %v6729_v13 = vpop.f32.mrf.mxu1  ;;  %v9090_v8 = vpop.f32.mrf.mxu0 }
 0x8f7   : > { %8996 = vmatprep.mubr.msk.bf16.mxu1 %vm2737_vm3, %v14120_v16  ;;  %6738 = vmatprep.subr.bf16.mxu0 %v16958_v55  ;;  %v15253_v8 = vld [vmem:[%s16682_s2 + $0x328] sm:$0xff]  }
 0x8f8   : > { %v15236_v61 = vpop.f32.mrf.mxu1  ;;  %7135 = vmatprep.subr.bf16.mxu1 %v16958_v55  ;;  %v15239_v37 = vpop.f32.mrf.mxu0  ;;  %17192 = vst [vmem:[#allocation30_spill] sm:$0xff] %v15253_v8 }
 0x8f9   : > { %17191 = vst [vmem:[#allocation29_spill] sm:$0xff] %v15239_v37  ;;  %6739 = vmatpush1.bf16.msra.mxu0 %v15244_v46 }
 0x8fa   : > { %7136 = vmatpush1.bf16.msra.mxu1 %v14583_v53  ;;  %v6732_v19 = vpop.f32.mrf.mxu1  ;;  %v9091_v13 = vpop.f32.mrf.mxu0  ;;  %6740 = vmatprep.subr.bf16.mxu0 %v16958_v55  ;;  %v15262_v53 = vld [vmem:[%s16682_s2 + $0x320] sm:$0xff]  }
 0x8fb   : > { %7137 = vmatprep.subr.bf16.mxu1 %v16958_v55  ;;  %17193 = vst [vmem:[#allocation31_spill] sm:$0xff] %v15262_v53  ;;  %v15345_v13 = vld [vmem:[#allocation2 + $0x94] ss:$8 sps:$4 sm:$0xff]  }
 0x8fd   : > { %6741 = vmatpush1.bf16.msra.mxu0 %v15253_v8  ;;  %v17218_v8 = vld [vmem:[#allocation16_spill] sm:$0xff] }
 0x8fe   : > { %7138 = vmatpush1.bf16.msra.mxu1 %v14590_v32  ;;  %6742 = vmatprep.subr.bf16.mxu0 %v16958_v55  ;;  %v15271_v32 = vld [vmem:[%s16682_s2 + $0x318] sm:$0xff]  }
 0x8ff   : > { %7139 = vmatprep.subr.bf16.mxu1 %v16958_v55  ;;  %17194 = vst [vmem:[#allocation32_spill] sm:$0xff] %v15271_v32 }
 0x901   : > { %6743 = vmatpush1.bf16.msra.mxu0 %v15262_v53 }
 0x902   : > { %7140 = vmatpush1.bf16.msra.mxu1 %v14597_v15  ;;  %6744 = vmatprep.subr.bf16.mxu0 %v16958_v55  ;;  %v15280_v15 = vld [vmem:[%s16682_s2 + $0x310] sm:$0xff]  }
 0x903   : > { %7141 = vmatprep.subr.bf16.mxu1 %v16958_v55  ;;  %17195 = vst [vmem:[#allocation33_spill] sm:$0xff] %v15280_v15 }
 0x905   : > { %6745 = vmatpush1.bf16.msra.mxu0 %v15271_v32 }
 0x906   : > { %7142 = vmatpush1.bf16.msra.mxu1 %v14604_v54  ;;  %6746 = vmatprep.subr.bf16.mxu0 %v16958_v55  ;;  %v15289_v54 = vld [vmem:[%s16682_s2 + $0x308] sm:$0xff]  }
 0x907   : > { %7143 = vmatprep.subr.bf16.mxu1 %v16958_v55  ;;  %17196 = vst [vmem:[#allocation34_spill] sm:$0xff] %v15289_v54 }
 0x909   : > { %6747 = vmatpush1.bf16.msra.mxu0 %v15280_v15  ;;  %v15400_v15 = vld [vmem:[#allocation2 + $0x90] ss:$8 sps:$4 sm:$0xff]  }
 0x90a   : > { %7144 = vmatpush1.bf16.msra.mxu1 %v14611_v11  ;;  %6748 = vmatprep.subr.bf16.mxu0 %v16958_v55  ;;  %v15298_v11 = vld [vmem:[%s16682_s2 + $0x300] sm:$0xff]  }
 0x90b   : > { %7145 = vmatprep.subr.bf16.mxu1 %v16958_v55  ;;  %17197 = vst [vmem:[#allocation35_spill] sm:$0xff] %v15298_v11 }
 0x90d   : > { %6749 = vmatpush1.bf16.msra.mxu0 %v15289_v54  ;;  %v17216_v54 = vld [vmem:[#allocation14_spill] sm:$0xff] }
 0x90e   : > { %7146 = vmatpush1.bf16.msra.mxu1 %v14618_v0  ;;  %6750 = vmatprep.subr.bf16.mxu0 %v16958_v55  ;;  %v15307_v0 = vld [vmem:[%s16682_s2 + $0x358] sm:$0xff]  }
 0x90f   : > { %7147 = vmatprep.subr.bf16.mxu1 %v16958_v55  ;;  %17198 = vst [vmem:[#allocation36_spill] sm:$0xff] %v15307_v0 }
 0x911   : > { %6751 = vmatpush1.bf16.msra.mxu0 %v15298_v11  ;;  %v17215_v11 = vld [vmem:[#allocation12_spill] sm:$0xff] }
 0x912   : > { %7148 = vmatpush1.bf16.msra.mxu1 %v14626_v5  ;;  %6760 = vmatprep.subr.bf16.mxu0 %v16958_v55  ;;  %v15316_v5 = vld [vmem:[%s16682_s2 + $0x350] sm:$0xff]  }
 0x913   : > { %7157 = vmatprep.subr.bf16.mxu1 %v16958_v55  ;;  %17199 = vst [vmem:[#allocation37_spill] sm:$0xff] %v15316_v5 }
 0x915   : > { %6761 = vmatpush2.bf16.msra.mxu0 %v15307_v0 }
 0x916   : > { %7158 = vmatpush2.bf16.msra.mxu1 %v14634_v49  ;;  %6762 = vmatprep.subr.bf16.mxu0 %v16958_v55  ;;  %v15325_v49 = vld [vmem:[%s16682_s2 + $0x348] sm:$0xff]  }
 0x917   : > { %7159 = vmatprep.subr.bf16.mxu1 %v16958_v55  ;;  %17200 = vst [vmem:[#allocation38_spill] sm:$0xff] %v15325_v49 }
 0x919   : > { %6763 = vmatpush2.bf16.msra.mxu0 %v15316_v5 }
 0x91a   : > { %7160 = vmatpush2.bf16.msra.mxu1 %v14642_v29  ;;  %6764 = vmatprep.subr.bf16.mxu0 %v16958_v55  ;;  %v15334_v29 = vld [vmem:[%s16682_s2 + $0x340] sm:$0xff]  }
 0x91b   : > { %7161 = vmatprep.subr.bf16.mxu1 %v16958_v55  ;;  %17201 = vst [vmem:[#allocation39_spill] sm:$0xff] %v15334_v29 }
 0x91d   : > { %6765 = vmatpush2.bf16.msra.mxu0 %v15325_v49 }
 0x91e   : > { %7162 = vmatpush2.bf16.msra.mxu1 %v14653_v1  ;;  %6766 = vmatprep.subr.bf16.mxu0 %v16958_v55 }
 0x91f   : > { %7163 = vmatprep.subr.bf16.mxu1 %v16958_v55 }
 0x921   : > { %6767 = vmatpush2.bf16.msra.mxu0 %v15334_v29 }
 0x922   : > { %7164 = vmatpush2.bf16.msra.mxu1 %v14660_v40  ;;  %6824 = vmatprep.subr.bf16.mxu0 %v16958_v55 }
 0x923   : > { %7219 = vmatprep.subr.bf16.mxu1 %v16958_v55 }
 0x924   : > { %v6420_v19 = vpop.f32.mrf.mxu0  ;;  %6769 = vmatmul.mubr.bf16.vlgmr.msra.gmra.mxu0 %v14180_v22  ;;  %v15341_v1 = vpop.f32.mrf.mxu1 }
 0x925   : > { %7166 = vmatmul.mubr.bf16.vlgmr.msra.gmra.mxu1 %v14180_v22  ;;  %6825 = vmatpush1.bf16.msra.mxu0 %v14673_v57 }
 0x926   : > { %8987 = vmatprep.mubr.msk.bf16.mxu0 %vm2737_vm3, %v13379_v47  ;;  %7220 = vmatpush1.bf16.msra.mxu1 %v14679_v36  ;;  %v6422_v40 = vpop.f32.mrf.mxu0  ;;  %v6815_v37 = vpop.f32.mrf.mxu1  ;;  %v17202_v36 = vld [vmem:[#allocation66_spill] sm:$0xff] }
 0x927   : > { %8998 = vmatprep.mubr.msk.bf16.mxu1 %vm2737_vm3, %v15345_v13  ;;  %6826 = vmatprep.subr.bf16.mxu0 %v16958_v55  ;;  %v17207_v37 = vld [vmem:[#allocation4_spill] sm:$0xff]  ;;  %v17210_v40 = vld [vmem:[#allocation7_spill] sm:$0xff] }
 0x928   : > { %v6423_v29 = vpop.f32.mrf.mxu0  ;;  %v15353_v49 = vpop.f32.mrf.mxu1  ;;  %7221 = vmatprep.subr.bf16.mxu1 %v16958_v55 }
 0x929   : > { %6827 = vmatpush1.bf16.msra.mxu0 %v14693_v25 }
 0x92a   : > { %7222 = vmatpush1.bf16.msra.mxu1 %v14699_v45  ;;  %v6425_v5 = vpop.f32.mrf.mxu0  ;;  %v6818_v0 = vpop.f32.mrf.mxu1  ;;  %6828 = vmatprep.subr.bf16.mxu0 %v16958_v55  ;;  %v17203_v45 = vld [vmem:[#allocation67_spill] sm:$0xff] }
 0x92b   : > { %7223 = vmatprep.subr.bf16.mxu1 %v16958_v55  ;;  %v17208_v0 = vld [vmem:[#allocation5_spill] sm:$0xff]  ;;  %v17209_v5 = vld [vmem:[#allocation6_spill] sm:$0xff] }
 0x92d   : > { %6829 = vmatpush1.bf16.msra.mxu0 %v14707_v52 }
 0x92e   : > { %7224 = vmatpush1.bf16.msra.mxu1 %v14713_v51  ;;  %6830 = vmatprep.subr.bf16.mxu0 %v16958_v55  ;;  %v17204_v51 = vld [vmem:[#allocation68_spill] sm:$0xff] }
 0x92f   : > { %7225 = vmatprep.subr.bf16.mxu1 %v16958_v55 }
 0x931   : > { %6831 = vmatpush1.bf16.msra.mxu0 %v14721_v60 }
 0x932   : > { %7226 = vmatpush1.bf16.msra.mxu1 %v14727_v26  ;;  %6832 = vmatprep.subr.bf16.mxu0 %v16958_v55  ;;  %v17205_v26 = vld [vmem:[#allocation69_spill] sm:$0xff] }
 0x933   : > { %7227 = vmatprep.subr.bf16.mxu1 %v16958_v55 }
 0x935   : > { %6833 = vmatpush1.bf16.msra.mxu0 %v14735_v44 }
 0x936   : > { %7228 = vmatpush1.bf16.msra.mxu1 %v14741_v42  ;;  %6834 = vmatprep.subr.bf16.mxu0 %v16958_v55  ;;  %v17206_v42 = vld [vmem:[#allocation70_spill] sm:$0xff] }
 0x937   : > { %7229 = vmatprep.subr.bf16.mxu1 %v16958_v55 }
 0x939   : > { %6835 = vmatpush1.bf16.msra.mxu0 %v17202_v36 }
 0x93a   : > { %7230 = vmatpush1.bf16.msra.mxu1 %v17203_v45  ;;  %6836 = vmatprep.subr.bf16.mxu0 %v16958_v55  ;;  %v17211_v45 = vld [vmem:[#allocation8_spill] sm:$0xff] }
 0x93b   : > { %7231 = vmatprep.subr.bf16.mxu1 %v16958_v55 }
 0x93d   : > { %6837 = vmatpush1.bf16.msra.mxu0 %v17204_v51 }
 0x93e   : > { %7232 = vmatpush1.bf16.msra.mxu1 %v17205_v26  ;;  %6838 = vmatprep.subr.bf16.mxu0 %v16958_v55  ;;  %v17212_v26 = vld [vmem:[#allocation9_spill] sm:$0xff] }
 0x93f   : > { %7233 = vmatprep.subr.bf16.mxu1 %v16958_v55 }
 0x941   : > { %6839 = vmatpush1.bf16.msra.mxu0 %v17206_v42 }
 0x942   : > { %7234 = vmatpush1.bf16.msra.mxu1 %v17207_v37  ;;  %6848 = vmatprep.subr.bf16.mxu0 %v16958_v55  ;;  %v17213_v37 = vld [vmem:[#allocation10_spill] sm:$0xff] }
 0x943   : > { %7243 = vmatprep.subr.bf16.mxu1 %v16958_v55 }
 0x945   : > { %6849 = vmatpush2.bf16.msra.mxu0 %v17208_v0 }
 0x946   : > { %7244 = vmatpush2.bf16.msra.mxu1 %v17209_v5  ;;  %6850 = vmatprep.subr.bf16.mxu0 %v16958_v55  ;;  %v17214_v5 = vld [vmem:[#allocation11_spill] sm:$0xff] }
 0x947   : > { %7245 = vmatprep.subr.bf16.mxu1 %v16958_v55 }
 0x949   : > { %6851 = vmatpush2.bf16.msra.mxu0 %v17210_v40 }
 0x94a   : > { %7246 = vmatpush2.bf16.msra.mxu1 %v17211_v45  ;;  %6852 = vmatprep.subr.bf16.mxu0 %v16958_v55  ;;  %v6462_v45 = vadd.f32 %v17216_v54, %v6420_v19 }
 0x94b   : > { %7247 = vmatprep.subr.bf16.mxu1 %v16958_v55 }
 0x94d   : > { %6853 = vmatpush2.bf16.msra.mxu0 %v17212_v26 }
 0x94e   : > { %7248 = vmatpush2.bf16.msra.mxu1 %v17213_v37  ;;  %6854 = vmatprep.subr.bf16.mxu0 %v16958_v55 }
 0x94f   : > { %7249 = vmatprep.subr.bf16.mxu1 %v16958_v55 }
 0x951   : > { %6855 = vmatpush2.bf16.msra.mxu0 %v17214_v5 }
 0x952   : > { %7250 = vmatpush2.bf16.msra.mxu1 %v17215_v11  ;;  %6906 = vmatprep.subr.bf16.mxu0 %v16958_v55  ;;  %v6465_v11 = vadd.f32 %v14865_v12, %v6423_v29  ;;  %v17220_v29 = vld [vmem:[#allocation18_spill] sm:$0xff] }
 0x953   : > { %7339 = vmatprep.subr.bf16.mxu1 %v16958_v55 }
 0x954   : > { %v6502_v32 = vpop.f32.mrf.mxu0  ;;  %6857 = vmatmul.mubr.bf16.vlgmr.msra.gmra.mxu0 %v13565_v58  ;;  %v17219_v58 = vld [vmem:[#allocation17_spill] sm:$0xff] }
 0x955   : > { %v6509_v37 = vadd.f32 %v6502_v32, %v6462_v45  ;;  %v15404_v53 = vpop.f32.mrf.mxu1  ;;  %7252 = vmatmul.mubr.bf16.vlgmr.msra.gmra.mxu1 %v15400_v15  ;;  %6907 = vmatpush1.bf16.msra.mxu0 %v17218_v8 }
 0x956   : > { %17217 = vst [vmem:[#allocation40_spill] sm:$0xff] %v15404_v53  ;;  %8989 = vmatprep.mubr.msk.bf16.mxu0 %vm2737_vm3, %v14120_v16  ;;  %7340 = vmatpush1.bf16.msra.mxu1 %v14673_v57  ;;  %v6504_v54 = vpop.f32.mrf.mxu0 }
 0x957   : > { %9004 = vmatprep.mubr.msk.bf16.mxu1 %vm2737_vm3, %v14120_v16  ;;  %v6901_v19 = vpop.f32.mrf.mxu1  ;;  %6908 = vmatprep.subr.bf16.mxu0 %v16958_v55 }
 0x958   : > { %v6505_v32 = vpop.f32.mrf.mxu0  ;;  %7341 = vmatprep.subr.bf16.mxu1 %v16958_v55 }
 0x959   : > { %v6510_v45 = vadd.f32 %v6505_v32, %v6465_v11  ;;  %v15416_v53 = vpop.f32.mrf.mxu1  ;;  %6909 = vmatpush1.bf16.msra.mxu0 %v17219_v58 }
 0x95a   : > { %7342 = vmatpush1.bf16.msra.mxu1 %v14693_v25  ;;  %v6507_v57 = vpop.f32.mrf.mxu0  ;;  %6910 = vmatprep.subr.bf16.mxu0 %v16958_v55  ;;  %v17221_v25 = vld [vmem:[#allocation19_spill] sm:$0xff] }
 0x95b   : > { %v6904_v12 = vpop.f32.mrf.mxu1  ;;  %7343 = vmatprep.subr.bf16.mxu1 %v16958_v55  ;;  %v6553_v54 = vadd.f32 %v14998_v23, %v6510_v45  ;;  %v17228_v23 = vld [vmem:[#allocation71_spill] sm:$0xff] }
 0x95d   : > { %6911 = vmatpush1.bf16.msra.mxu0 %v14881_v27 }
 0x95e   : > { %7344 = vmatpush1.bf16.msra.mxu1 %v14707_v52  ;;  %6912 = vmatprep.subr.bf16.mxu0 %v16958_v55  ;;  %v17222_v52 = vld [vmem:[#allocation20_spill] sm:$0xff] }
 0x95f   : > { %7345 = vmatprep.subr.bf16.mxu1 %v16958_v55 }
 0x961   : > { %6913 = vmatpush1.bf16.msra.mxu0 %v17220_v29 }
 0x962   : > { %7346 = vmatpush1.bf16.msra.mxu1 %v14721_v60  ;;  %6914 = vmatprep.subr.bf16.mxu0 %v16958_v55  ;;  %v17223_v60 = vld [vmem:[#allocation21_spill] sm:$0xff] }
 0x963   : > { %7347 = vmatprep.subr.bf16.mxu1 %v16958_v55 }
 0x965   : > { %6915 = vmatpush1.bf16.msra.mxu0 %v17221_v25 }
 0x966   : > { %7348 = vmatpush1.bf16.msra.mxu1 %v14735_v44  ;;  %6916 = vmatprep.subr.bf16.mxu0 %v16958_v55  ;;  %v17224_v44 = vld [vmem:[#allocation22_spill] sm:$0xff] }
 0x967   : > { %7349 = vmatprep.subr.bf16.mxu1 %v16958_v55 }
 0x969   : > { %6917 = vmatpush1.bf16.msra.mxu0 %v17222_v52 }
 0x96a   : > { %7350 = vmatpush1.bf16.msra.mxu1 %v17202_v36  ;;  %6918 = vmatprep.subr.bf16.mxu0 %v16958_v55  ;;  %v17225_v36 = vld [vmem:[#allocation23_spill] sm:$0xff] }
 0x96b   : > { %7351 = vmatprep.subr.bf16.mxu1 %v16958_v55 }
 0x96d   : > { %6919 = vmatpush1.bf16.msra.mxu0 %v17223_v60 }
 0x96e   : > { %7352 = vmatpush1.bf16.msra.mxu1 %v17204_v51  ;;  %6920 = vmatprep.subr.bf16.mxu0 %v16958_v55  ;;  %v17226_v51 = vld [vmem:[#allocation24_spill] sm:$0xff] }
 0x96f   : > { %7353 = vmatprep.subr.bf16.mxu1 %v16958_v55 }
 0x971   : > { %6921 = vmatpush1.bf16.msra.mxu0 %v17224_v44 }
 0x972   : > { %7354 = vmatpush1.bf16.msra.mxu1 %v17206_v42  ;;  %6930 = vmatprep.subr.bf16.mxu0 %v16958_v55  ;;  %v6552_v42 = vadd.f32 %v17226_v51, %v6509_v37 }
 0x973   : > { %7363 = vmatprep.subr.bf16.mxu1 %v16958_v55 }
 0x975   : > { %6931 = vmatpush2.bf16.msra.mxu0 %v14947_v34 }
 0x976   : > { %7364 = vmatpush2.bf16.msra.mxu1 %v17208_v0  ;;  %6932 = vmatprep.subr.bf16.mxu0 %v16958_v55 }
 0x977   : > { %7365 = vmatprep.subr.bf16.mxu1 %v16958_v55 }
 0x979   : > { %6933 = vmatpush2.bf16.msra.mxu0 %v14958_v18 }
 0x97a   : > { %7366 = vmatpush2.bf16.msra.mxu1 %v17210_v40  ;;  %6934 = vmatprep.subr.bf16.mxu0 %v16958_v55 }
 0x97b   : > { %7367 = vmatprep.subr.bf16.mxu1 %v16958_v55 }
 0x97d   : > { %6935 = vmatpush2.bf16.msra.mxu0 %v17225_v36 }
 0x97e   : > { %7368 = vmatpush2.bf16.msra.mxu1 %v17212_v26  ;;  %6936 = vmatprep.subr.bf16.mxu0 %v16958_v55 }
 0x97f   : > { %7369 = vmatprep.subr.bf16.mxu1 %v16958_v55 }
 0x981   : > { %6937 = vmatpush2.bf16.msra.mxu0 %v14976_v7 }
 0x982   : > { %7370 = vmatpush2.bf16.msra.mxu1 %v17214_v5  ;;  %7006 = vmatprep.subr.bf16.mxu0 %v16958_v55 }
 0x983   : > { %7421 = vmatprep.subr.bf16.mxu1 %v16958_v55 }
 0x984   : > { %v6602_v0 = vpop.f32.mrf.mxu0  ;;  %6939 = vmatmul.mubr.bf16.vlgmr.msra.gmra.mxu0 %v14180_v22 }
 0x985   : > { %v15464_v40 = vadd.f32 %v6602_v0, %v6552_v42  ;;  %v15466_v26 = vpop.f32.mrf.mxu1  ;;  %7372 = vmatmul.mubr.bf16.vlgmr.msra.gmra.mxu1 %v14180_v22  ;;  %7007 = vmatpush1.bf16.msra.mxu0 %v14989_v17 }
 0x986   : > { %8993 = vmatprep.mubr.msk.bf16.mxu0 %vm2737_vm3, %v15345_v13  ;;  %7422 = vmatpush1.bf16.msra.mxu1 %v17218_v8  ;;  %v6604_v5 = vpop.f32.mrf.mxu0 }
 0x987   : > { %9006 = vmatprep.mubr.msk.bf16.mxu1 %vm2737_vm3, %v14668_v43  ;;  %v6985_v37 = vpop.f32.mrf.mxu1  ;;  %7008 = vmatprep.subr.bf16.mxu0 %v16958_v55  ;;  %v17233_v5 = vld [vmem:[#allocation30_spill] sm:$0xff] }
 0x988   : > { %v6605_v11 = vpop.f32.mrf.mxu0  ;;  %7423 = vmatprep.subr.bf16.mxu1 %v16958_v55 }
 0x989   : > { %v15478_v19 = vadd.f32 %v6605_v11, %v6553_v54  ;;  %v15480_v32 = vpop.f32.mrf.mxu1  ;;  %7009 = vmatpush1.bf16.msra.mxu0 %v15004_v2  ;;  %v17243_v54 = vmov 0.0   ;;  %v15662_v11 = vld [vmem:[#allocation2 + $0x80] ss:$8 sps:$4 sm:$0xff]  }
 0x98a   : > { %7424 = vmatpush1.bf16.msra.mxu1 %v17219_v58  ;;  %v6607_v8 = vpop.f32.mrf.mxu0  ;;  %7010 = vmatprep.subr.bf16.mxu0 %v16958_v55 }
 0x98b   : > { %v6988_v43 = vpop.f32.mrf.mxu1  ;;  %7425 = vmatprep.subr.bf16.mxu1 %v16958_v55 }
 0x98d   : > { %7011 = vmatpush1.bf16.msra.mxu0 %v15013_v31 }
 0x98e   : > { %7426 = vmatpush1.bf16.msra.mxu1 %v14881_v27  ;;  %7012 = vmatprep.subr.bf16.mxu0 %v16958_v55 }
 0x98f   : > { %7427 = vmatprep.subr.bf16.mxu1 %v16958_v55 }
 0x991   : > { %7013 = vmatpush1.bf16.msra.mxu0 %v15022_v35 }
 0x992   : > { %7428 = vmatpush1.bf16.msra.mxu1 %v17220_v29  ;;  %7014 = vmatprep.subr.bf16.mxu0 %v16958_v55 }
 0x993   : > { %7429 = vmatprep.subr.bf16.mxu1 %v16958_v55 }
 0x995   : > { %7015 = vmatpush1.bf16.msra.mxu0 %v15031_v14 }
 0x996   : > { %7430 = vmatpush1.bf16.msra.mxu1 %v17221_v25  ;;  %7016 = vmatprep.subr.bf16.mxu0 %v16958_v55  ;;  %v17232_v25 = vld [vmem:[#allocation28_spill] sm:$0xff] }
 0x997   : > { %7431 = vmatprep.subr.bf16.mxu1 %v16958_v55 }
 0x999   : > { %7017 = vmatpush1.bf16.msra.mxu0 %v15040_v62 }
 0x99a   : > { %7432 = vmatpush1.bf16.msra.mxu1 %v17222_v52  ;;  %7018 = vmatprep.subr.bf16.mxu0 %v16958_v55 }
 0x99b   : > { %7433 = vmatprep.subr.bf16.mxu1 %v16958_v55 }
 0x99d   : > { %7019 = vmatpush1.bf16.msra.mxu0 %v15049_v6 }
 0x99e   : > { %7434 = vmatpush1.bf16.msra.mxu1 %v17223_v60  ;;  %7020 = vmatprep.subr.bf16.mxu0 %v16958_v55 }
 0x99f   : > { %7435 = vmatprep.subr.bf16.mxu1 %v16958_v55 }
 0x9a1   : > { %7021 = vmatpush1.bf16.msra.mxu0 %v15058_v48 }
 0x9a2   : > { %7436 = vmatpush1.bf16.msra.mxu1 %v17224_v44  ;;  %7030 = vmatprep.subr.bf16.mxu0 %v16958_v55 }
 0x9a3   : > { %7445 = vmatprep.subr.bf16.mxu1 %v16958_v55 }
 0x9a5   : > { %7031 = vmatpush2.bf16.msra.mxu0 %v15067_v9 }
 0x9a6   : > { %7446 = vmatpush2.bf16.msra.mxu1 %v14947_v34  ;;  %7032 = vmatprep.subr.bf16.mxu0 %v16958_v55  ;;  %v17227_v34 = vld [vmem:[#allocation13_spill] sm:$0xff] }
 0x9a7   : > { %7447 = vmatprep.subr.bf16.mxu1 %v16958_v55 }
 0x9a9   : > { %7033 = vmatpush2.bf16.msra.mxu0 %v15076_v56 }
 0x9aa   : > { %7448 = vmatpush2.bf16.msra.mxu1 %v14958_v18  ;;  %7034 = vmatprep.subr.bf16.mxu0 %v16958_v55  ;;  %v15531_v18 = vld [vmem:[#allocation2 + $0xa4] ss:$8 sps:$4 sm:$0xff]  }
 0x9ab   : > { %7449 = vmatprep.subr.bf16.mxu1 %v16958_v55 }
 0x9ad   : > { %7035 = vmatpush2.bf16.msra.mxu0 %v15085_v30 }
 0x9ae   : > { %7450 = vmatpush2.bf16.msra.mxu1 %v17225_v36  ;;  %7036 = vmatprep.subr.bf16.mxu0 %v16958_v55 }
 0x9af   : > { %7451 = vmatprep.subr.bf16.mxu1 %v16958_v55 }
 0x9b1   : > { %7037 = vmatpush2.bf16.msra.mxu0 %v15094_v59 }
 0x9b2   : > { %7452 = vmatpush2.bf16.msra.mxu1 %v14976_v7  ;;  %7092 = vmatprep.subr.bf16.mxu0 %v16958_v55 }
 0x9b3   : > { %7521 = vmatprep.subr.bf16.mxu1 %v16958_v55 }
 0x9b4   : > { %v6686_v58 = vpop.f32.mrf.mxu0  ;;  %7039 = vmatmul.mubr.bf16.vlgmr.msra.gmra.mxu0 %v15400_v15 }
 0x9b5   : > { %v15527_v27 = vpop.f32.mrf.mxu1  ;;  %7454 = vmatmul.mubr.bf16.vlgmr.msra.gmra.mxu1 %v17227_v34  ;;  %7093 = vmatpush1.bf16.msra.mxu0 %v15107_v33 }
 0x9b6   : > { %8995 = vmatprep.mubr.msk.bf16.mxu0 %vm2737_vm3, %v17228_v23  ;;  %7522 = vmatpush1.bf16.msra.mxu1 %v14989_v17  ;;  %v6688_v7 = vpop.f32.mrf.mxu0 }
 0x9b7   : > { %9010 = vmatprep.mubr.msk.bf16.mxu1 %vm2737_vm3, %v15531_v18  ;;  %v7087_v45 = vpop.f32.mrf.mxu1  ;;  %7094 = vmatprep.subr.bf16.mxu0 %v16958_v55 }
 0x9b8   : > { %v6689_v57 = vpop.f32.mrf.mxu0  ;;  %7523 = vmatprep.subr.bf16.mxu1 %v16958_v55 }
 0x9b9   : > { %v15540_v12 = vpop.f32.mrf.mxu1  ;;  %7095 = vmatpush1.bf16.msra.mxu0 %v15122_v4 }
 0x9ba   : > { %7524 = vmatpush1.bf16.msra.mxu1 %v15004_v2  ;;  %v6691_v29 = vpop.f32.mrf.mxu0  ;;  %7096 = vmatprep.subr.bf16.mxu0 %v16958_v55  ;;  %v17229_v2 = vld [vmem:[#allocation25_spill] sm:$0xff] }
 0x9bb   : > { %v7090_v17 = vpop.f32.mrf.mxu1  ;;  %7525 = vmatprep.subr.bf16.mxu1 %v16958_v55 }
 0x9bd   : > { %7097 = vmatpush1.bf16.msra.mxu0 %v15131_v63 }
 0x9be   : > { %7526 = vmatpush1.bf16.msra.mxu1 %v15013_v31  ;;  %7098 = vmatprep.subr.bf16.mxu0 %v16958_v55  ;;  %v6687_v31 = vadd.f32 %v6686_v58, %v17229_v2  ;;  %v9778_v2 = vld [vmem:[%s16682_s2 + $0x98] sm:$0xff]  }
 0x9bf   : > { %7527 = vmatprep.subr.bf16.mxu1 %v16958_v55 }
 0x9c1   : > { %7099 = vmatpush1.bf16.msra.mxu0 %v15140_v28 }
 0x9c2   : > { %7528 = vmatpush1.bf16.msra.mxu1 %v15022_v35  ;;  %7100 = vmatprep.subr.bf16.mxu0 %v16958_v55  ;;  %v15586_v35 = vld [vmem:[#allocation2 + $0xa0] ss:$8 sps:$4 sm:$0xff]  }
 0x9c3   : > { %7529 = vmatprep.subr.bf16.mxu1 %v16958_v55 }
 0x9c5   : > { %7101 = vmatpush1.bf16.msra.mxu0 %v15149_v21 }
 0x9c6   : > { %7530 = vmatpush1.bf16.msra.mxu1 %v15031_v14  ;;  %7102 = vmatprep.subr.bf16.mxu0 %v16958_v55  ;;  %v6690_v14 = vadd.f32 %v6689_v57, %v15116_v41 }
 0x9c7   : > { %7531 = vmatprep.subr.bf16.mxu1 %v16958_v55 }
 0x9c8   : > { %v6735_v44 = vadd.f32 %v15236_v61, %v6690_v14 }
 0x9c9   : > { %7103 = vmatpush1.bf16.msra.mxu0 %v15158_v24 }
 0x9ca   : > { %7532 = vmatpush1.bf16.msra.mxu1 %v15040_v62  ;;  %7104 = vmatprep.subr.bf16.mxu0 %v16958_v55  ;;  %v17230_v62 = vld [vmem:[#allocation26_spill] sm:$0xff] }
 0x9cb   : > { %7533 = vmatprep.subr.bf16.mxu1 %v16958_v55 }
 0x9cd   : > { %7105 = vmatpush1.bf16.msra.mxu0 %v15167_v3 }
 0x9ce   : > { %7534 = vmatpush1.bf16.msra.mxu1 %v15049_v6  ;;  %7106 = vmatprep.subr.bf16.mxu0 %v16958_v55  ;;  %v6734_v6 = vadd.f32 %v17230_v62, %v6687_v31 }
 0x9cf   : > { %7535 = vmatprep.subr.bf16.mxu1 %v16958_v55 }
 0x9d1   : > { %7107 = vmatpush1.bf16.msra.mxu0 %v15176_v10 }
 0x9d2   : > { %7536 = vmatpush1.bf16.msra.mxu1 %v15058_v48  ;;  %7116 = vmatprep.subr.bf16.mxu0 %v16958_v55 }
 0x9d3   : > { %7545 = vmatprep.subr.bf16.mxu1 %v16958_v55 }
 0x9d5   : > { %7117 = vmatpush2.bf16.msra.mxu0 %v15185_v38 }
 0x9d6   : > { %7546 = vmatpush2.bf16.msra.mxu1 %v15067_v9  ;;  %7118 = vmatprep.subr.bf16.mxu0 %v16958_v55  ;;  %v17231_v9 = vld [vmem:[#allocation3_spill] sm:$0xff] }
 0x9d7   : > { %7547 = vmatprep.subr.bf16.mxu1 %v16958_v55 }
 0x9d9   : > { %7119 = vmatpush2.bf16.msra.mxu0 %v15194_v20 }
 0x9da   : > { %7548 = vmatpush2.bf16.msra.mxu1 %v15076_v56  ;;  %7120 = vmatprep.subr.bf16.mxu0 %v16958_v55 }
 0x9db   : > { %7549 = vmatprep.subr.bf16.mxu1 %v16958_v55 }
 0x9dd   : > { %7121 = vmatpush2.bf16.msra.mxu0 %v15203_v39 }
 0x9de   : > { %7550 = vmatpush2.bf16.msra.mxu1 %v15085_v30  ;;  %7122 = vmatprep.subr.bf16.mxu0 %v16958_v55 }
 0x9df   : > { %7551 = vmatprep.subr.bf16.mxu1 %v16958_v55 }
 0x9e1   : > { %7123 = vmatpush2.bf16.msra.mxu0 %v15212_v50 }
 0x9e2   : > { %7552 = vmatpush2.bf16.msra.mxu1 %v15094_v59  ;;  %7176 = vmatprep.subr.bf16.mxu0 %v16958_v55  ;;  %v15596_v59 = vld [vmem:[#allocation2 + $0x84] ss:$8 sps:$4 sm:$0xff]  }
 0x9e3   : > { %7605 = vmatprep.subr.bf16.mxu1 %v16958_v55 }
 0x9e4   : > { %v6770_v48 = vpop.f32.mrf.mxu0  ;;  %7125 = vmatmul.mubr.bf16.vlgmr.msra.gmra.mxu0 %v17231_v9 }
 0x9e5   : > { %v6777_v56 = vadd.f32 %v6770_v48, %v6734_v6  ;;  %v15592_v30 = vpop.f32.mrf.mxu1  ;;  %7554 = vmatmul.mubr.bf16.vlgmr.msra.gmra.mxu1 %v15586_v35  ;;  %7177 = vmatpush1.bf16.msra.mxu0 %v17232_v25 }
 0x9e6   : > { %8997 = vmatprep.mubr.msk.bf16.mxu0 %vm2737_vm3, %v15596_v59  ;;  %7606 = vmatpush1.bf16.msra.mxu1 %v15107_v33  ;;  %v6772_v41 = vpop.f32.mrf.mxu0 }
 0x9e7   : > { %v15602_v52 = vadd.f32 %v15341_v1, %v6777_v56  ;;  %9012 = vmatprep.mubr.msk.bf16.mxu1 %vm2737_vm3, %v13379_v47  ;;  %v7169_v60 = vpop.f32.mrf.mxu1  ;;  %7178 = vmatprep.subr.bf16.mxu0 %v16958_v55  ;;  %v9779_v56 = vld [vmem:[%s16682_s2 + $0x90] sm:$0xff]  }
 0x9e8   : > { %v6773_v36 = vpop.f32.mrf.mxu0  ;;  %7607 = vmatprep.subr.bf16.mxu1 %v16958_v55  ;;  %v9781_v60 = vld [vmem:[%s16682_s2 + $0x80] sm:$0xff]  }
 0x9e9   : > { %v6778_v51 = vadd.f32 %v6773_v36, %v6735_v44  ;;  %v15609_v42 = vpop.f32.mrf.mxu1  ;;  %7179 = vmatpush1.bf16.msra.mxu0 %v15244_v46  ;;  %v6822_v33 = vmax.f32 %v15464_v40, %v15602_v52  ;;  %v9387_v44 = vld [vmem:[%s16683_s3 + $0x58] sm:$0xff]  }
 0x9ea   : > { %7608 = vmatpush1.bf16.msra.mxu1 %v15122_v4  ;;  %v6775_v1 = vpop.f32.mrf.mxu0  ;;  %7180 = vmatprep.subr.bf16.mxu0 %v16958_v55  ;;  %v17234_v4 = vld [vmem:[#allocation31_spill] sm:$0xff]  ;;  %v9782_v36 = vld [vmem:[%s16682_s2 + $0x78] sm:$0xff]  }
 0x9eb   : > { %v15617_v61 = vadd.f32 %v15353_v49, %v6778_v51  ;;  %v7172_v0 = vpop.f32.mrf.mxu1  ;;  %7609 = vmatprep.subr.bf16.mxu1 %v16958_v55  ;;  %v17235_v49 = vld [vmem:[#allocation32_spill] sm:$0xff]  ;;  %v9388_v51 = vld [vmem:[%s16683_s3 + $0x50] sm:$0xff]  }
 0x9ec   : > { %v9783_v1 = vld [vmem:[%s16682_s2 + $0x70] sm:$0xff]   ;;  %v9389_v0 = vld [vmem:[%s16683_s3 + $0x48] sm:$0xff]  }
 0x9ed   : > { %7181 = vmatpush1.bf16.msra.mxu0 %v17233_v5  ;;  %v6823_v37 = vmax.f32 %v15478_v19, %v15617_v61  ;;  %v9794_v19 = vld [vmem:[%s16682_s2 + $0xd8] sm:$0xff]   ;;  %v9795_v61 = vld [vmem:[%s16682_s2 + $0xd0] sm:$0xff]  }
 0x9ee   : > { %7610 = vmatpush1.bf16.msra.mxu1 %v15131_v63  ;;  %7182 = vmatprep.subr.bf16.mxu0 %v16958_v55  ;;  %v17236_v63 = vld [vmem:[#allocation33_spill] sm:$0xff] }
 0x9ef   : > { %7611 = vmatprep.subr.bf16.mxu1 %v16958_v55 }
 0x9f1   : > { %7183 = vmatpush1.bf16.msra.mxu0 %v17234_v4 }
 0x9f2   : > { %7612 = vmatpush1.bf16.msra.mxu1 %v15140_v28  ;;  %7184 = vmatprep.subr.bf16.mxu0 %v16958_v55  ;;  %v17237_v28 = vld [vmem:[#allocation34_spill] sm:$0xff] }
 0x9f3   : > { %7613 = vmatprep.subr.bf16.mxu1 %v16958_v55 }
 0x9f5   : > { %7185 = vmatpush1.bf16.msra.mxu0 %v17235_v49 }
 0x9f6   : > { %7614 = vmatpush1.bf16.msra.mxu1 %v15149_v21  ;;  %7186 = vmatprep.subr.bf16.mxu0 %v16958_v55  ;;  %v17238_v21 = vld [vmem:[#allocation35_spill] sm:$0xff] }
 0x9f7   : > { %7615 = vmatprep.subr.bf16.mxu1 %v16958_v55 }
 0x9f9   : > { %7187 = vmatpush1.bf16.msra.mxu0 %v17236_v63 }
 0x9fa   : > { %7616 = vmatpush1.bf16.msra.mxu1 %v15158_v24  ;;  %7188 = vmatprep.subr.bf16.mxu0 %v16958_v55  ;;  %v17239_v24 = vld [vmem:[#allocation36_spill] sm:$0xff] }
 0x9fb   : > { %7617 = vmatprep.subr.bf16.mxu1 %v16958_v55 }
 0x9fd   : > { %7189 = vmatpush1.bf16.msra.mxu0 %v17237_v28 }
 0x9fe   : > { %7618 = vmatpush1.bf16.msra.mxu1 %v15167_v3  ;;  %7190 = vmatprep.subr.bf16.mxu0 %v16958_v55  ;;  %v17240_v3 = vld [vmem:[#allocation37_spill] sm:$0xff] }
 0x9ff   : > { %7619 = vmatprep.subr.bf16.mxu1 %v16958_v55 }
 0xa01   : > { %7191 = vmatpush1.bf16.msra.mxu0 %v17238_v21 }
 0xa02   : > { %7620 = vmatpush1.bf16.msra.mxu1 %v15176_v10  ;;  %7200 = vmatprep.subr.bf16.mxu0 %v16958_v55  ;;  %v17241_v10 = vld [vmem:[#allocation38_spill] sm:$0xff] }
 0xa03   : > { %7629 = vmatprep.subr.bf16.mxu1 %v16958_v55 }
 0xa05   : > { %7201 = vmatpush2.bf16.msra.mxu0 %v17239_v24 }
 0xa06   : > { %7630 = vmatpush2.bf16.msra.mxu1 %v15185_v38  ;;  %7202 = vmatprep.subr.bf16.mxu0 %v16958_v55  ;;  %v17242_v38 = vld [vmem:[#allocation39_spill] sm:$0xff] }
 0xa07   : > { %7631 = vmatprep.subr.bf16.mxu1 %v16958_v55 }
 0xa09   : > { %7203 = vmatpush2.bf16.msra.mxu0 %v17240_v3 }
 0xa0a   : > { %7632 = vmatpush2.bf16.msra.mxu1 %v15194_v20  ;;  %7204 = vmatprep.subr.bf16.mxu0 %v16958_v55 }
 0xa0b   : > { %7633 = vmatprep.subr.bf16.mxu1 %v16958_v55 }
 0xa0d   : > { %7205 = vmatpush2.bf16.msra.mxu0 %v17241_v10 }
 0xa0e   : > { %7634 = vmatpush2.bf16.msra.mxu1 %v15203_v39  ;;  %7206 = vmatprep.subr.bf16.mxu0 %v16958_v55  ;;  %v17244_v39 = vld [vmem:[#allocation15_spill] sm:$0xff] }
 0xa0f   : > { %7635 = vmatprep.subr.bf16.mxu1 %v16958_v55 }
 0xa11   : > { %7207 = vmatpush2.bf16.msra.mxu0 %v17242_v38 }
 0xa12   : > { %7636 = vmatpush2.bf16.msra.mxu1 %v15212_v50  ;;  %9104 = vmatprep.subr.bf16.mxu0 %v17243_v54 }
 0xa13   : > { %7689 = vmatprep.subr.bf16.mxu1 %v16958_v55 }
 0xa14   : > { %v6858_v20 = vpop.f32.mrf.mxu0  ;;  %7209 = vmatmul.mubr.bf16.vlgmr.msra.gmra.mxu0 %v15662_v11 }
 0xa15   : > { %v15665_v8 = vpop.f32.mrf.mxu1  ;;  %7638 = vmatmul.mubr.bf16.vlgmr.msra.gmra.mxu1 %v17244_v39  ;;  %9112 = vmatprep.mubr.msk.bf16.mxu0 %vm9937_vm8, %v17243_v54 }
 0xa16   : > { %7690 = vmatpush1.bf16.msra.mxu1 %v17232_v25  ;;  %9014 = vmatprep.mubr.msk.bf16.mxu1 %vm2737_vm3, %v15345_v13  ;;  %v6860_v50 = vpop.f32.mrf.mxu0 }
 0xa17   : > { %v7255_v43 = vpop.f32.mrf.mxu1  ;;  %7691 = vmatprep.subr.bf16.mxu1 %v16958_v55  ;;  %9105 = vmatpush3.bf16.msra.mxu0 %v9387_v44  ;;  %v9790_v50 = vld [vmem:[%s16682_s2 + $0xf8] sm:$0xff]  }
 0xa18   : > { %v6861_v58 = vpop.f32.mrf.mxu0  ;;  %9106 = vmatprep.subr.bf16.mxu0 %v17243_v54 }
 0xa19   : > { %v15674_v34 = vpop.f32.mrf.mxu1  ;;  %v6903_v14 = vadd.f32 %v15416_v53, %v6861_v58  ;;  %v9780_v53 = vld [vmem:[%s16682_s2 + $0x88] sm:$0xff]  }
 0xa1a   : > { %7692 = vmatpush1.bf16.msra.mxu1 %v15244_v46  ;;  %v6863_v23 = vpop.f32.mrf.mxu0  ;;  %v17245_v46 = vld [vmem:[#allocation40_spill] sm:$0xff] }
 0xa1b   : > { %v7258_v7 = vpop.f32.mrf.mxu1  ;;  %7693 = vmatprep.subr.bf16.mxu1 %v16958_v55  ;;  %v6900_v45 = vadd.f32 %v17245_v46, %v6858_v20  ;;  %9107 = vmatpush3.bf16.msra.mxu0 %v9388_v51 }
 0xa1c   : > { %9108 = vmatprep.subr.bf16.mxu0 %v17243_v54 }
 0xa1e   : > { %7694 = vmatpush1.bf16.msra.mxu1 %v17233_v5  ;;  %v9784_v5 = vld [vmem:[%s16682_s2 + $0x68] sm:$0xff]  }
 0xa1f   : > { %7695 = vmatprep.subr.bf16.mxu1 %v16958_v55  ;;  %9109 = vmatpush3.bf16.msra.mxu0 %v9389_v0  ;;  %v9805_v0 = vld [vmem:[%s16682_s2 + $0x1a0] sm:$0xff]  }
 0xa20   : > { %9110 = vmatprep.subr.bf16.mxu0 %v17243_v54 }
 0xa22   : > { %7696 = vmatpush1.bf16.msra.mxu1 %v17234_v4  ;;  %v9390_v4 = vld [vmem:[%s16683_s3 + $0x40] sm:$0xff]  }
 0xa23   : > { %7697 = vmatprep.subr.bf16.mxu1 %v16958_v55  ;;  %9111 = vmatpush3.bf16.msra.mxu0 %v9390_v4  ;;  %v9807_v4 = vld [vmem:[%s16682_s2 + $0x190] sm:$0xff]  }
 0xa24   : > { %7380 = vmatprep.subr.bf16.mxu0 %v16958_v55 }
 0xa26   : > { %7698 = vmatpush1.bf16.msra.mxu1 %v17235_v49  ;;  %v9785_v49 = vld [vmem:[%s16682_s2 + $0x60] sm:$0xff]  }
 0xa27   : > { %7699 = vmatprep.subr.bf16.mxu1 %v16958_v55 }
 0xa2a   : > { %7700 = vmatpush1.bf16.msra.mxu1 %v17236_v63  ;;  %v9786_v63 = vld [vmem:[%s16682_s2 + $0xb8] sm:$0xff]  }
 0xa2b   : > { %7701 = vmatprep.subr.bf16.mxu1 %v16958_v55 }
 0xa2e   : > { %7702 = vmatpush1.bf16.msra.mxu1 %v17237_v28  ;;  %v9787_v28 = vld [vmem:[%s16682_s2 + $0xb0] sm:$0xff]  }
 0xa2f   : > { %7703 = vmatprep.subr.bf16.mxu1 %v16958_v55 }
 0xa32   : > { %7704 = vmatpush1.bf16.msra.mxu1 %v17238_v21  ;;  %v9788_v21 = vld [vmem:[%s16682_s2 + $0xa8] sm:$0xff]  }
 0xa33   : > { %7713 = vmatprep.subr.bf16.mxu1 %v16958_v55 }
 0xa36   : > { %7714 = vmatpush2.bf16.msra.mxu1 %v17239_v24  ;;  %v9789_v24 = vld [vmem:[%s16682_s2 + $0xa0] sm:$0xff]  }
 0xa37   : > { %7715 = vmatprep.subr.bf16.mxu1 %v16958_v55 }
 0xa3a   : > { %7716 = vmatpush2.bf16.msra.mxu1 %v17240_v3 }
 0xa3b   : > { %7717 = vmatprep.subr.bf16.mxu1 %v16958_v55 }
 0xa3e   : > { %7718 = vmatpush2.bf16.msra.mxu1 %v17241_v10 }
 0xa3f   : > { %7719 = vmatprep.subr.bf16.mxu1 %v16958_v55 }
 0xa42   : > { %7720 = vmatpush2.bf16.msra.mxu1 %v17242_v38 }
 0xa43   : > { %7777 = vmatprep.subr.bf16.mxu1 %v16958_v55 }
 0xa44   : > { %v6940_v57 = vpop.f32.mrf.mxu0 }
 0xa45   : > { %v6947_v29 = vadd.f32 %v6940_v57, %v6900_v45  ;;  %v15699_v17 = vpop.f32.mrf.mxu1  ;;  %7722 = vmatmul.mubr.bf16.vlgmr.msra.gmra.mxu1 %v15400_v15  ;;  %v9791_v57 = vld [vmem:[%s16682_s2 + $0xf0] sm:$0xff]  }
 0xa46   : > { %7778 = vmatpush1.bf16.msra.mxu1 %v9778_v2  ;;  %9016 = vmatprep.mubr.msk.bf16.mxu1 %vm2737_vm3, %v15596_v59  ;;  %v6942_v31 = vpop.f32.mrf.mxu0  ;;  %v9798_v2 = vld [vmem:[%s16682_s2 + $0x118] sm:$0xff]  }
 0xa47   : > { %v7375_v62 = vpop.f32.mrf.mxu1  ;;  %7779 = vmatprep.subr.bf16.mxu1 %v16958_v55  ;;  %v6990_v3 = vadd.f32 %v15466_v26, %v6947_v29  ;;  %v9797_v29 = vld [vmem:[%s16682_s2 + $0xc0] sm:$0xff]   ;;  %v9799_v31 = vld [vmem:[%s16682_s2 + $0x110] sm:$0xff]  }
 0xa48   : > { %v6943_v6 = vpop.f32.mrf.mxu0  ;;  %v9801_v62 = vld [vmem:[%s16682_s2 + $0x100] sm:$0xff]  }
 0xa49   : > { %v6948_v48 = vadd.f32 %v6943_v6, %v6903_v14  ;;  %v15709_v9 = vpop.f32.mrf.mxu1  ;;  %v9800_v14 = vld [vmem:[%s16682_s2 + $0x108] sm:$0xff]  }
 0xa4a   : > { %7780 = vmatpush1.bf16.msra.mxu1 %v9779_v56  ;;  %v6945_v25 = vpop.f32.mrf.mxu0 }
 0xa4b   : > { %v7378_v41 = vpop.f32.mrf.mxu1  ;;  %7781 = vmatprep.subr.bf16.mxu1 %v16958_v55  ;;  %v6991_v23 = vadd.f32 %v15480_v32, %v6948_v48  ;;  %v9792_v32 = vld [vmem:[%s16682_s2 + $0xe8] sm:$0xff]   ;;  %v15838_v48 = vld [vmem:[#allocation2 + $0xb4] ss:$8 sps:$4 sm:$0xff]  }
 0xa4c   : > { %17246 = vst [vmem:[#allocation41_spill] sm:$0xff] %v15838_v48  ;;  %v9802_v25 = vld [vmem:[%s16682_s2 + $0x1b8] sm:$0xff]  }
 0xa4e   : > { %7782 = vmatpush1.bf16.msra.mxu1 %v9780_v53 }
 0xa4f   : > { %7783 = vmatprep.subr.bf16.mxu1 %v16958_v55 }
 0xa52   : > { %7784 = vmatpush1.bf16.msra.mxu1 %v9781_v60 }
 0xa53   : > { %7785 = vmatprep.subr.bf16.mxu1 %v16958_v55 }
 0xa56   : > { %7786 = vmatpush1.bf16.msra.mxu1 %v9782_v36  ;;  %v9803_v36 = vld [vmem:[%s16682_s2 + $0x1b0] sm:$0xff]  }
 0xa57   : > { %7787 = vmatprep.subr.bf16.mxu1 %v16958_v55 }
 0xa5a   : > { %7788 = vmatpush1.bf16.msra.mxu1 %v9783_v1  ;;  %v9804_v1 = vld [vmem:[%s16682_s2 + $0x1a8] sm:$0xff]  }
 0xa5b   : > { %7789 = vmatprep.subr.bf16.mxu1 %v16958_v55 }
 0xa5e   : > { %7790 = vmatpush1.bf16.msra.mxu1 %v9784_v5  ;;  %v9806_v5 = vld [vmem:[%s16682_s2 + $0x198] sm:$0xff]  }
 0xa5f   : > { %7791 = vmatprep.subr.bf16.mxu1 %v16958_v55 }
 0xa62   : > { %7792 = vmatpush1.bf16.msra.mxu1 %v9785_v49  ;;  %v9808_v49 = vld [vmem:[%s16682_s2 + $0x188] sm:$0xff]  }
 0xa63   : > { %7801 = vmatprep.subr.bf16.mxu1 %v16958_v55 }
 0xa66   : > { %7802 = vmatpush2.bf16.msra.mxu1 %v9786_v63  ;;  %v9809_v63 = vld [vmem:[%s16682_s2 + $0x180] sm:$0xff]  }
 0xa67   : > { %7803 = vmatprep.subr.bf16.mxu1 %v16958_v55 }
 0xa6a   : > { %7804 = vmatpush2.bf16.msra.mxu1 %v9787_v28  ;;  %v9810_v28 = vld [vmem:[%s16682_s2 + $0x1d8] sm:$0xff]  }
 0xa6b   : > { %7805 = vmatprep.subr.bf16.mxu1 %v16958_v55 }
 0xa6e   : > { %7806 = vmatpush2.bf16.msra.mxu1 %v9788_v21  ;;  %v9811_v21 = vld [vmem:[%s16682_s2 + $0x1d0] sm:$0xff]  }
 0xa6f   : > { %7807 = vmatprep.subr.bf16.mxu1 %v16958_v55 }
 0xa72   : > { %7808 = vmatpush2.bf16.msra.mxu1 %v9789_v24  ;;  %v9812_v24 = vld [vmem:[%s16682_s2 + $0x1c8] sm:$0xff]  }
 0xa73   : > { %7859 = vmatprep.subr.bf16.mxu1 %v16958_v55 }
 0xa74   : > { %v7040_v10 = vpop.f32.mrf.mxu0 }
 0xa75   : > { %v7047_v38 = vadd.f32 %v7040_v10, %v6990_v3  ;;  %v15772_v20 = vpop.f32.mrf.mxu1  ;;  %7810 = vmatmul.mubr.bf16.vlgmr.msra.gmra.mxu1 %v15662_v11  ;;  %v9813_v10 = vld [vmem:[%s16682_s2 + $0x1c0] sm:$0xff]  }
 0xa76   : > { %7860 = vmatpush1.bf16.msra.mxu1 %v9790_v50  ;;  %9018 = vmatprep.mubr.msk.bf16.mxu1 %vm2737_vm3, %v15345_v13  ;;  %v7042_v43 = vpop.f32.mrf.mxu0 }
 0xa77   : > { %v15783_v26 = vmax.f32 %v6822_v33, %v7047_v38  ;;  %v7457_v58 = vpop.f32.mrf.mxu1  ;;  %7861 = vmatprep.subr.bf16.mxu1 %v16958_v55  ;;  %v9793_v33 = vld [vmem:[%s16682_s2 + $0xe0] sm:$0xff]   ;;  %v15895_v38 = vld [vmem:[#allocation2 + $0xb0] ss:$8 sps:$4 sm:$0xff]  }
 0xa78   : > { %v7043_v7 = vpop.f32.mrf.mxu0  ;;  %17249 = vst [vmem:[#allocation45_spill] sm:$0xff] %v15895_v38 }
 0xa79   : > { %v7048_v46 = vadd.f32 %v7043_v7, %v6991_v23  ;;  %v15787_v45 = vpop.f32.mrf.mxu1 }
 0xa7a   : > { %7862 = vmatpush1.bf16.msra.mxu1 %v9791_v57  ;;  %v7045_v13 = vpop.f32.mrf.mxu0 }
 0xa7b   : > { %v15795_v40 = vmax.f32 %v6823_v37, %v7048_v46  ;;  %v7460_v52 = vpop.f32.mrf.mxu1  ;;  %7863 = vmatprep.subr.bf16.mxu1 %v16958_v55  ;;  %v9796_v37 = vld [vmem:[%s16682_s2 + $0xc8] sm:$0xff]  }
 0xa7e   : > { %7864 = vmatpush1.bf16.msra.mxu1 %v9792_v32 }
 0xa7f   : > { %7865 = vmatprep.subr.bf16.mxu1 %v16958_v55 }
 0xa82   : > { %7866 = vmatpush1.bf16.msra.mxu1 %v9793_v33 }
 0xa83   : > { %7867 = vmatprep.subr.bf16.mxu1 %v16958_v55 }
 0xa86   : > { %7868 = vmatpush1.bf16.msra.mxu1 %v9794_v19  ;;  %v9815_v19 = vld [vmem:[%s16682_s2 + $0x210] sm:$0xff]  }
 0xa87   : > { %7869 = vmatprep.subr.bf16.mxu1 %v16958_v55 }
 0xa8a   : > { %7870 = vmatpush1.bf16.msra.mxu1 %v9795_v61 }
 0xa8b   : > { %7871 = vmatprep.subr.bf16.mxu1 %v16958_v55 }
 0xa8e   : > { %7872 = vmatpush1.bf16.msra.mxu1 %v9796_v37 }
 0xa8f   : > { %7873 = vmatprep.subr.bf16.mxu1 %v16958_v55 }
 0xa92   : > { %7874 = vmatpush1.bf16.msra.mxu1 %v9797_v29 }
 0xa93   : > { %7883 = vmatprep.subr.bf16.mxu1 %v16958_v55 }
 0xa96   : > { %7884 = vmatpush2.bf16.msra.mxu1 %v9798_v2  ;;  %v9817_v2 = vld [vmem:[%s16682_s2 + $0x208] sm:$0xff]  }
 0xa97   : > { %7885 = vmatprep.subr.bf16.mxu1 %v16958_v55 }
 0xa9a   : > { %7886 = vmatpush2.bf16.msra.mxu1 %v9799_v31 }
 0xa9b   : > { %7887 = vmatprep.subr.bf16.mxu1 %v16958_v55 }
 0xa9e   : > { %7888 = vmatpush2.bf16.msra.mxu1 %v9800_v14 }
 0xa9f   : > { %7889 = vmatprep.subr.bf16.mxu1 %v16958_v55 }
 0xaa2   : > { %7890 = vmatpush2.bf16.msra.mxu1 %v9801_v62  ;;  %v9818_v62 = vld [vmem:[%s16682_s2 + $0x200] sm:$0xff]  }
 0xaa3   : > { %7959 = vmatprep.subr.bf16.mxu1 %v16958_v55 }
 0xaa4   : > { %v7126_v6 = vpop.f32.mrf.mxu0 }
 0xaa5   : > { %v15840_v56 = vpop.f32.mrf.mxu1  ;;  %7892 = vmatmul.mubr.bf16.vlgmr.msra.gmra.mxu1 %v15400_v15  ;;  %v7127_v3 = vadd.f32 %v7126_v6, %v15527_v27  ;;  %v9814_v27 = vld [vmem:[%s16682_s2 + $0x218] sm:$0xff]  }
 0xaa6   : > { %17247 = vst [vmem:[#allocation42_spill] sm:$0xff] %v15840_v56  ;;  %7960 = vmatpush1.bf16.msra.mxu1 %v9802_v25  ;;  %9022 = vmatprep.mubr.msk.bf16.mxu1 %vm2737_vm3, %v15838_v48  ;;  %v7128_v41 = vpop.f32.mrf.mxu0  ;;  %v9820_v25 = vld [vmem:[%s16682_s2 + $0x1f8] sm:$0xff]   ;;  %v16371_v56 = vld [vmem:[%s16682_s2 + $0x2f0] sm:$0xff]  }
 0xaa7   : > { %v7557_v53 = vpop.f32.mrf.mxu1  ;;  %7961 = vmatprep.subr.bf16.mxu1 %v16958_v55  ;;  %v7174_v43 = vadd.f32 %v15592_v30, %v7127_v3  ;;  %v15952_v41 = vld [vmem:[%s16682_s2 + $0x30] sm:$0xff]   ;;  %v9836_v3 = vld [vmem:[%s16682_s2 + $0x338] sm:$0xff]   ;;  %17264 = vst [vmem:[#allocation43_spill] sm:$0xff] %v16371_v56 }
 0xaa8   : > { %v7129_v60 = vpop.f32.mrf.mxu0  ;;  %v9822_v53 = vld [vmem:[%s16682_s2 + $0x1f0] sm:$0xff]  }
 0xaa9   : > { %v15849_v44 = vpop.f32.mrf.mxu1  ;;  %v7130_v50 = vadd.f32 %v7129_v60, %v15540_v12  ;;  %v9824_v60 = vld [vmem:[%s16682_s2 + $0x1e8] sm:$0xff]  }
 0xaaa   : > { %17248 = vst [vmem:[#allocation44_spill] sm:$0xff] %v15849_v44  ;;  %7962 = vmatpush1.bf16.msra.mxu1 %v9803_v36  ;;  %v7131_v15 = vpop.f32.mrf.mxu0  ;;  %v15974_v36 = vld [vmem:[%s16682_s2 + $0x20] sm:$0xff]   ;;  %v16362_v44 = vld [vmem:[%s16682_s2 + $0x2f8] sm:$0xff]  }
 0xaab   : > { %v7560_v51 = vpop.f32.mrf.mxu1  ;;  %7963 = vmatprep.subr.bf16.mxu1 %v16958_v55  ;;  %v7175_v57 = vadd.f32 %v15609_v42, %v7130_v50  ;;  %v15922_v42 = vld [vmem:[%s16685_s5] ss:$0 sm:$0xff]  ;;  %17262 = vst [vmem:[#allocation58_spill] sm:$0xff] %v16362_v44 }
 0xaac   : > { %17250 = vst [vmem:[#allocation46_spill] sm:$0xff] %v15922_v42  ;;  %v9826_v15 = vld [vmem:[%s16682_s2 + $0x1e0] sm:$0xff]   ;;  %v15985_v51 = vld [vmem:[%s16682_s2 + $0x18] sm:$0xff]  }
 0xaae   : > { %7964 = vmatpush1.bf16.msra.mxu1 %v9804_v1  ;;  %v9828_v1 = vld [vmem:[%s16682_s2 + $0x238] sm:$0xff]  }
 0xaaf   : > { %7965 = vmatprep.subr.bf16.mxu1 %v16958_v55 }
 0xab2   : > { %7966 = vmatpush1.bf16.msra.mxu1 %v9805_v0  ;;  %v15996_v0 = vld [vmem:[%s16682_s2 + $0x10] sm:$0xff]  }
 0xab3   : > { %7967 = vmatprep.subr.bf16.mxu1 %v16958_v55 }
 0xab6   : > { %7968 = vmatpush1.bf16.msra.mxu1 %v9806_v5  ;;  %v9830_v5 = vld [vmem:[%s16682_s2 + $0x230] sm:$0xff]  }
 0xab7   : > { %7969 = vmatprep.subr.bf16.mxu1 %v16958_v55 }
 0xaba   : > { %7970 = vmatpush1.bf16.msra.mxu1 %v9807_v4  ;;  %v16007_v4 = vld [vmem:[%s16682_s2 + $0x8] sm:$0xff]  }
 0xabb   : > { %7971 = vmatprep.subr.bf16.mxu1 %v16958_v55 }
 0xabe   : > { %7972 = vmatpush1.bf16.msra.mxu1 %v9808_v49  ;;  %v9832_v49 = vld [vmem:[%s16682_s2 + $0x228] sm:$0xff]  }
 0xabf   : > { %7973 = vmatprep.subr.bf16.mxu1 %v16958_v55 }
 0xac2   : > { %7974 = vmatpush1.bf16.msra.mxu1 %v9809_v63  ;;  %v16018_v63 = vld [vmem:[%s16682_s2] sm:$0xff]  }
 0xac3   : > { %7983 = vmatprep.subr.bf16.mxu1 %v16958_v55 }
 0xac6   : > { %7984 = vmatpush2.bf16.msra.mxu1 %v9810_v28  ;;  %v9834_v28 = vld [vmem:[%s16682_s2 + $0x220] sm:$0xff]  }
 0xac7   : > { %7985 = vmatprep.subr.bf16.mxu1 %v16958_v55 }
 0xaca   : > { %7986 = vmatpush2.bf16.msra.mxu1 %v9811_v21 }
 0xacb   : > { %7987 = vmatprep.subr.bf16.mxu1 %v16958_v55 }
 0xace   : > { %7988 = vmatpush2.bf16.msra.mxu1 %v9812_v24  ;;  %v16032_v24 = vld [vmem:[%s16682_s2 + $0x58] sm:$0xff]  }
 0xacf   : > { %7989 = vmatprep.subr.bf16.mxu1 %v16958_v55 }
 0xad2   : > { %7990 = vmatpush2.bf16.msra.mxu1 %v9813_v10 }
 0xad3   : > { %8045 = vmatprep.subr.bf16.mxu1 %v16958_v55 }
 0xad4   : > { %v7210_v58 = vpop.f32.mrf.mxu0 }
 0xad5   : > { %v7217_v23 = vadd.f32 %v7210_v58, %v7174_v43  ;;  %v15900_v7 = vpop.f32.mrf.mxu1  ;;  %7992 = vmatmul.mubr.bf16.vlgmr.msra.gmra.mxu1 %v15895_v38  ;;  %v16047_v43 = vld [vmem:[%s16682_s2 + $0x50] sm:$0xff]  }
 0xad6   : > { %8046 = vmatpush1.bf16.msra.mxu1 %v9814_v27  ;;  %9024 = vmatprep.mubr.msk.bf16.mxu1 %vm2737_vm3, %v14120_v16  ;;  %v7212_v46 = vpop.f32.mrf.mxu0  ;;  %v9838_v58 = vld [vmem:[%s16682_s2 + $0x330] sm:$0xff]   ;;  %v16058_v27 = vld [vmem:[%s16682_s2 + $0x48] sm:$0xff]  }
 0xad7   : > { %v7260_v12 = vadd.f32 %v15665_v8, %v7217_v23  ;;  %v7641_v30 = vpop.f32.mrf.mxu1  ;;  %8047 = vmatprep.subr.bf16.mxu1 %v16958_v55  ;;  %v9840_v46 = vld [vmem:[%s16682_s2 + $0x328] sm:$0xff]  }
 0xad8   : > { %v7213_v13 = vpop.f32.mrf.mxu0  ;;  %v9842_v30 = vld [vmem:[%s16682_s2 + $0x320] sm:$0xff]  }
 0xad9   : > { %v7262_v52 = vmax.f32 %v15783_v26, %v7260_v12  ;;  %v7218_v32 = vadd.f32 %v7213_v13, %v7175_v57  ;;  %v15912_v33 = vpop.f32.mrf.mxu1  ;;  %v16069_v12 = vld [vmem:[%s16682_s2 + $0x40] sm:$0xff]   ;;  %v16081_v57 = vld [vmem:[%s16682_s2 + $0x158] sm:$0xff]  }
 0xada   : > { %8048 = vmatpush1.bf16.msra.mxu1 %v9815_v19  ;;  %v7215_v61 = vpop.f32.mrf.mxu0  ;;  %v16084_v13 = vld [vmem:[#allocation2 + $0x94] ss:$8 sps:$4 sm:$0xff]   ;;  %v16107_v19 = vld [vmem:[%s16682_s2 + $0x148] sm:$0xff]  }
 0xadb   : > { %v7261_v37 = vadd.f32 %v15674_v34, %v7218_v32  ;;  %v7644_v8 = vpop.f32.mrf.mxu1  ;;  %8049 = vmatprep.subr.bf16.mxu1 %v16958_v55  ;;  %v7264_v26 = vadd.f32 %v15922_v42, %v7262_v52  ;;  %v9845_v52 = vld [vmem:[%s16682_s2 + $0x318] sm:$0xff]   ;;  %v9847_v32 = vld [vmem:[%s16682_s2 + $0x310] sm:$0xff]   ;;  %v9849_v61 = vld [vmem:[%s16682_s2 + $0x308] sm:$0xff]  }
 0xadc   : > { %v9851_v8 = vld [vmem:[%s16682_s2 + $0x300] sm:$0xff]  }
 0xadd   : > { %v7263_v29 = vmax.f32 %v15795_v40, %v7261_v37  ;;  %v7266_v34 = vmax.f32 %v7264_v26, 0.0  ;;  %v15939_v40 = vld [vmem:[%s16682_s2 + $0x38] sm:$0xff]   ;;  %v16118_v37 = vld [vmem:[%s16682_s2 + $0x140] sm:$0xff]  }
 0xade   : > { %8050 = vmatpush1.bf16.msra.mxu1 %v9817_v2  ;;  %v16129_v26 = vld [vmem:[%s16682_s2 + $0x138] sm:$0xff]   ;;  %v16140_v2 = vld [vmem:[%s16682_s2 + $0x130] sm:$0xff]  }
 0xadf   : > { %v7265_v31 = vadd.f32 %v15922_v42, %v7263_v29  ;;  %8051 = vmatprep.subr.bf16.mxu1 %v16958_v55  ;;  %v9853_v29 = vld [vmem:[%s16682_s2 + $0x358] sm:$0xff]   ;;  %v16311_v42 = vld [vmem:[%s16682_s2 + $0x2d0] sm:$0xff]  }
 0xae1   : > { %v7267_v14 = vmax.f32 %v7265_v31, 0.0  ;;  %v9855_v31 = vld [vmem:[%s16682_s2 + $0x350] sm:$0xff]  }
 0xae2   : > { %8052 = vmatpush1.bf16.msra.mxu1 %v9818_v62  ;;  %v16162_v62 = vld [vmem:[%s16682_s2 + $0x120] sm:$0xff]  }
 0xae3   : > { %v7268_v6 = vpack.c.bf16 %v7267_v14, %v7266_v34  ;;  %8053 = vmatprep.subr.bf16.mxu1 %v16958_v55  ;;  %v16151_v34 = vld [vmem:[%s16682_s2 + $0x128] sm:$0xff]  }
 0xae4   : > { %v9857_v14 = vld [vmem:[%s16682_s2 + $0x348] sm:$0xff]  }
 0xae5   : > { %9113 = vmatmul.mubr.msk.bf16.vlgmr.msra.gmra.mxu0 %vm2737_vm3, %v7268_v6  ;;  %v9859_v6 = vld [vmem:[%s16682_s2 + $0x340] sm:$0xff]  }
 0xae6   : > { %7381 = vmatpush1.bf16.msra.mxu0 %v15939_v40  ;;  %8054 = vmatpush1.bf16.msra.mxu1 %v9820_v25 }
 0xae7   : > { %9005 = vmatprep.mubr.msk.bf16.mxu0 %vm2737_vm3, %v13379_v47  ;;  %7382 = vmatprep.subr.bf16.mxu0 %v16958_v55  ;;  %v15963_v47 = vld [vmem:[%s16682_s2 + $0x28] sm:$0xff]  }
 0xae8   : > { %8055 = vmatprep.subr.bf16.mxu1 %v16958_v55 }
 0xaea   : > { %7383 = vmatpush1.bf16.msra.mxu0 %v15952_v41  ;;  %8056 = vmatpush1.bf16.msra.mxu1 %v9822_v53  ;;  %v16176_v53 = vld [vmem:[%s16682_s2 + $0x178] sm:$0xff]  }
 0xaeb   : > { %7384 = vmatprep.subr.bf16.mxu0 %v16958_v55  ;;  %8057 = vmatprep.subr.bf16.mxu1 %v16958_v55 }
 0xaee   : > { %7385 = vmatpush1.bf16.msra.mxu0 %v15963_v47  ;;  %8058 = vmatpush1.bf16.msra.mxu1 %v9824_v60 }
 0xaef   : > { %7386 = vmatprep.subr.bf16.mxu0 %v16958_v55  ;;  %8059 = vmatprep.subr.bf16.mxu1 %v16958_v55 }
 0xaf2   : > { %7387 = vmatpush1.bf16.msra.mxu0 %v15974_v36  ;;  %8060 = vmatpush1.bf16.msra.mxu1 %v9826_v15 }
 0xaf3   : > { %7388 = vmatprep.subr.bf16.mxu0 %v16958_v55  ;;  %8069 = vmatprep.subr.bf16.mxu1 %v16958_v55 }
 0xaf6   : > { %7389 = vmatpush1.bf16.msra.mxu0 %v15985_v51  ;;  %8070 = vmatpush2.bf16.msra.mxu1 %v9828_v1  ;;  %v16187_v1 = vld [vmem:[%s16682_s2 + $0x170] sm:$0xff]  }
 0xaf7   : > { %7390 = vmatprep.subr.bf16.mxu0 %v16958_v55  ;;  %8071 = vmatprep.subr.bf16.mxu1 %v16958_v55 }
 0xafa   : > { %7391 = vmatpush1.bf16.msra.mxu0 %v15996_v0  ;;  %8072 = vmatpush2.bf16.msra.mxu1 %v9830_v5 }
 0xafb   : > { %7392 = vmatprep.subr.bf16.mxu0 %v16958_v55  ;;  %8073 = vmatprep.subr.bf16.mxu1 %v16958_v55 }
 0xafe   : > { %7393 = vmatpush1.bf16.msra.mxu0 %v16007_v4  ;;  %8074 = vmatpush2.bf16.msra.mxu1 %v9832_v49  ;;  %v16194_v49 = vld [vmem:[%s16682_s2 + $0x168] sm:$0xff]  }
 0xaff   : > { %7394 = vmatprep.subr.bf16.mxu0 %v16958_v55  ;;  %8075 = vmatprep.subr.bf16.mxu1 %v16958_v55 }
 0xb02   : > { %7395 = vmatpush1.bf16.msra.mxu0 %v16018_v63  ;;  %8076 = vmatpush2.bf16.msra.mxu1 %v9834_v28  ;;  %v16201_v28 = vld [vmem:[%s16682_s2 + $0x160] sm:$0xff]  }
 0xb03   : > { %7404 = vmatprep.subr.bf16.mxu0 %v16958_v55  ;;  %8129 = vmatprep.subr.bf16.mxu1 %v16958_v55 }
 0xb05   : > { %v16026_v21 = vpop.f32.mrf.mxu1  ;;  %8078 = vmatmul.mubr.bf16.vlgmr.msra.gmra.mxu1 %v14180_v22 }
 0xb06   : > { %17251 = vst [vmem:[#allocation47_spill] sm:$0xff] %v16026_v21  ;;  %7405 = vmatpush2.bf16.msra.mxu0 %v16032_v24  ;;  %8130 = vmatpush1.bf16.msra.mxu1 %v9836_v3  ;;  %v16205_v3 = vld [vmem:[#allocation2 + $0x90] ss:$8 sps:$4 sm:$0xff]  }
 0xb07   : > { %9026 = vmatprep.mubr.msk.bf16.mxu1 %vm2737_vm3, %v15531_v18  ;;  %v7725_v10 = vpop.f32.mrf.mxu1  ;;  %7406 = vmatprep.subr.bf16.mxu0 %v16958_v55  ;;  %17255 = vst [vmem:[#allocation51_spill] sm:$0xff] %v16205_v3 }
 0xb08   : > { %8131 = vmatprep.subr.bf16.mxu1 %v16958_v55  ;;  %v16211_v10 = vld [vmem:[%s16682_s2 + $0x278] sm:$0xff]  }
 0xb09   : > { %v16042_v50 = vpop.f32.mrf.mxu1 }
 0xb0a   : > { %17252 = vst [vmem:[#allocation48_spill] sm:$0xff] %v16042_v50  ;;  %7407 = vmatpush2.bf16.msra.mxu0 %v16047_v43  ;;  %8132 = vmatpush1.bf16.msra.mxu1 %v9838_v58  ;;  %v16220_v58 = vld [vmem:[%s16682_s2 + $0x270] sm:$0xff]  }
 0xb0b   : > { %v7728_v23 = vpop.f32.mrf.mxu1  ;;  %7408 = vmatprep.subr.bf16.mxu0 %v16958_v55  ;;  %8133 = vmatprep.subr.bf16.mxu1 %v16958_v55 }
 0xb0c   : > { %v16227_v23 = vld [vmem:[%s16682_s2 + $0x268] sm:$0xff]  }
 0xb0e   : > { %7409 = vmatpush2.bf16.msra.mxu0 %v16058_v27  ;;  %8134 = vmatpush1.bf16.msra.mxu1 %v9840_v46  ;;  %v16234_v46 = vld [vmem:[%s16682_s2 + $0x260] sm:$0xff]  }
 0xb0f   : > { %7410 = vmatprep.subr.bf16.mxu0 %v16958_v55  ;;  %8135 = vmatprep.subr.bf16.mxu1 %v16958_v55 }
 0xb12   : > { %7411 = vmatpush2.bf16.msra.mxu0 %v16069_v12  ;;  %8136 = vmatpush1.bf16.msra.mxu1 %v9842_v30  ;;  %v16241_v30 = vld [vmem:[%s16682_s2 + $0x258] sm:$0xff]  }
 0xb13   : > { %7464 = vmatprep.subr.bf16.mxu0 %v16958_v55  ;;  %8137 = vmatprep.subr.bf16.mxu1 %v16958_v55 }
 0xb15   : > { %7413 = vmatmul.mubr.bf16.vlgmr.msra.gmra.mxu0 %v17244_v39  ;;  %v16096_v39 = vld [vmem:[%s16682_s2 + $0x150] sm:$0xff]  }
 0xb16   : > { %7465 = vmatpush1.bf16.msra.mxu0 %v16081_v57  ;;  %9007 = vmatprep.mubr.msk.bf16.mxu0 %vm2737_vm3, %v16084_v13 }
 0xb17   : > { %8138 = vmatpush1.bf16.msra.mxu1 %v9845_v52  ;;  %7466 = vmatprep.subr.bf16.mxu0 %v16958_v55  ;;  %v16248_v52 = vld [vmem:[%s16682_s2 + $0x250] sm:$0xff]  }
 0xb18   : > { %8139 = vmatprep.subr.bf16.mxu1 %v16958_v55 }
 0xb1a   : > { %7467 = vmatpush1.bf16.msra.mxu0 %v16096_v39 }
 0xb1b   : > { %8140 = vmatpush1.bf16.msra.mxu1 %v9847_v32  ;;  %7468 = vmatprep.subr.bf16.mxu0 %v16958_v55  ;;  %v16255_v32 = vld [vmem:[%s16682_s2 + $0x248] sm:$0xff]  }
 0xb1c   : > { %8141 = vmatprep.subr.bf16.mxu1 %v16958_v55 }
 0xb1e   : > { %7469 = vmatpush1.bf16.msra.mxu0 %v16107_v19 }
 0xb1f   : > { %8142 = vmatpush1.bf16.msra.mxu1 %v9849_v61  ;;  %7470 = vmatprep.subr.bf16.mxu0 %v16958_v55  ;;  %v16262_v61 = vld [vmem:[%s16682_s2 + $0x240] sm:$0xff]  }
 0xb20   : > { %8143 = vmatprep.subr.bf16.mxu1 %v16958_v55 }
 0xb22   : > { %7471 = vmatpush1.bf16.msra.mxu0 %v16118_v37 }
 0xb23   : > { %8144 = vmatpush1.bf16.msra.mxu1 %v9851_v8  ;;  %7472 = vmatprep.subr.bf16.mxu0 %v16958_v55 }
 0xb24   : > { %8153 = vmatprep.subr.bf16.mxu1 %v16958_v55 }
 0xb26   : > { %7473 = vmatpush1.bf16.msra.mxu0 %v16129_v26 }
 0xb27   : > { %8154 = vmatpush2.bf16.msra.mxu1 %v9853_v29  ;;  %7474 = vmatprep.subr.bf16.mxu0 %v16958_v55  ;;  %v16271_v29 = vld [vmem:[%s16682_s2 + $0x298] sm:$0xff]  }
 0xb28   : > { %8155 = vmatprep.subr.bf16.mxu1 %v16958_v55 }
 0xb2a   : > { %7475 = vmatpush1.bf16.msra.mxu0 %v16140_v2 }
 0xb2b   : > { %8156 = vmatpush2.bf16.msra.mxu1 %v9855_v31  ;;  %7476 = vmatprep.subr.bf16.mxu0 %v16958_v55 }
 0xb2c   : > { %8157 = vmatprep.subr.bf16.mxu1 %v16958_v55 }
 0xb2e   : > { %7477 = vmatpush1.bf16.msra.mxu0 %v16151_v34 }
 0xb2f   : > { %8158 = vmatpush2.bf16.msra.mxu1 %v9857_v14  ;;  %7478 = vmatprep.subr.bf16.mxu0 %v16958_v55 }
 0xb30   : > { %8159 = vmatprep.subr.bf16.mxu1 %v16958_v55 }
 0xb32   : > { %7479 = vmatpush1.bf16.msra.mxu0 %v16162_v62 }
 0xb33   : > { %8160 = vmatpush2.bf16.msra.mxu1 %v9859_v6  ;;  %7488 = vmatprep.subr.bf16.mxu0 %v16958_v55  ;;  %v16280_v6 = vld [vmem:[%s16682_s2 + $0x290] sm:$0xff]  }
 0xb34   : > { %9116 = vmatprep.subr.bf16.mxu1 %v17243_v54 }
 0xb35   : > { %v16170_v25 = vpop.f32.mrf.mxu1 }
 0xb36   : > { %17253 = vst [vmem:[#allocation49_spill] sm:$0xff] %v16170_v25  ;;  %8162 = vmatmul.mubr.bf16.vlgmr.msra.gmra.mxu1 %v15586_v35  ;;  %7489 = vmatpush2.bf16.msra.mxu0 %v16176_v53  ;;  %v16353_v25 = vld [vmem:[%s16682_s2 + $0x2a0] sm:$0xff]  }
 0xb37   : > { %v7813_v60 = vpop.f32.mrf.mxu1  ;;  %7490 = vmatprep.subr.bf16.mxu0 %v16958_v55  ;;  %9124 = vmatprep.mubr.msk.bf16.mxu1 %vm9937_vm8, %v17243_v54  ;;  %v16318_v54 = vld [vmem:[%s16682_s2 + $0x2c8] sm:$0xff]   ;;  %17260 = vst [vmem:[#allocation56_spill] sm:$0xff] %v16353_v25 }
 0xb39   : > { %v16182_v15 = vpop.f32.mrf.mxu1 }
 0xb3a   : > { %17254 = vst [vmem:[#allocation50_spill] sm:$0xff] %v16182_v15  ;;  %7491 = vmatpush2.bf16.msra.mxu0 %v16187_v1  ;;  %v16346_v15 = vld [vmem:[%s16682_s2 + $0x2a8] sm:$0xff]  }
 0xb3b   : > { %v7816_v5 = vpop.f32.mrf.mxu1  ;;  %7492 = vmatprep.subr.bf16.mxu0 %v16958_v55  ;;  %17259 = vst [vmem:[#allocation55_spill] sm:$0xff] %v16346_v15 }
 0xb3c   : > { %v16287_v5 = vld [vmem:[%s16682_s2 + $0x288] sm:$0xff]  }
 0xb3e   : > { %7493 = vmatpush2.bf16.msra.mxu0 %v16194_v49 }
 0xb3f   : > { %7494 = vmatprep.subr.bf16.mxu0 %v16958_v55 }
 0xb42   : > { %7495 = vmatpush2.bf16.msra.mxu0 %v16201_v28 }
 0xb43   : > { %7564 = vmatprep.subr.bf16.mxu0 %v16958_v55 }
 0xb45   : > { %7497 = vmatmul.mubr.bf16.vlgmr.msra.gmra.mxu0 %v16205_v3  ;;  %v16378_v3 = vld [vmem:[%s16682_s2 + $0x2e8] sm:$0xff]  }
 0xb46   : > { %7565 = vmatpush1.bf16.msra.mxu0 %v16211_v10  ;;  %9011 = vmatprep.mubr.msk.bf16.mxu0 %vm2737_vm3, %v14120_v16  ;;  %17265 = vst [vmem:[#allocation60_spill] sm:$0xff] %v16378_v3 }
 0xb47   : > { %7566 = vmatprep.subr.bf16.mxu0 %v16958_v55 }
 0xb4a   : > { %7567 = vmatpush1.bf16.msra.mxu0 %v16220_v58 }
 0xb4b   : > { %7568 = vmatprep.subr.bf16.mxu0 %v16958_v55 }
 0xb4e   : > { %7569 = vmatpush1.bf16.msra.mxu0 %v16227_v23 }
 0xb4f   : > { %7570 = vmatprep.subr.bf16.mxu0 %v16958_v55 }
 0xb52   : > { %7571 = vmatpush1.bf16.msra.mxu0 %v16234_v46 }
 0xb53   : > { %7572 = vmatprep.subr.bf16.mxu0 %v16958_v55 }
 0xb56   : > { %7573 = vmatpush1.bf16.msra.mxu0 %v16241_v30 }
 0xb57   : > { %7574 = vmatprep.subr.bf16.mxu0 %v16958_v55 }
 0xb5a   : > { %7575 = vmatpush1.bf16.msra.mxu0 %v16248_v52 }
 0xb5b   : > { %7576 = vmatprep.subr.bf16.mxu0 %v16958_v55 }
 0xb5e   : > { %7577 = vmatpush1.bf16.msra.mxu0 %v16255_v32 }
 0xb5f   : > { %7578 = vmatprep.subr.bf16.mxu0 %v16958_v55 }
 0xb62   : > { %7579 = vmatpush1.bf16.msra.mxu0 %v16262_v61 }
 0xb63   : > { %7588 = vmatprep.subr.bf16.mxu0 %v16958_v55 }
 0xb65   : > { %v16266_v8 = vpop.f32.mrf.mxu1 }
 0xb66   : > { %17256 = vst [vmem:[#allocation52_spill] sm:$0xff] %v16266_v8  ;;  %7589 = vmatpush2.bf16.msra.mxu0 %v16271_v29  ;;  %v16339_v8 = vld [vmem:[%s16682_s2 + $0x2b0] sm:$0xff]  }
 0xb67   : > { %v7895_v31 = vpop.f32.mrf.mxu1  ;;  %7590 = vmatprep.subr.bf16.mxu0 %v16958_v55  ;;  %17258 = vst [vmem:[#allocation54_spill] sm:$0xff] %v16339_v8 }
 0xb68   : > { %v16294_v31 = vld [vmem:[%s16682_s2 + $0x280] sm:$0xff]  }
 0xb69   : > { %v16275_v14 = vpop.f32.mrf.mxu1 }
 0xb6a   : > { %17257 = vst [vmem:[#allocation53_spill] sm:$0xff] %v16275_v14  ;;  %7591 = vmatpush2.bf16.msra.mxu0 %v16280_v6  ;;  %v16332_v14 = vld [vmem:[%s16682_s2 + $0x2b8] sm:$0xff]  }
 0xb6b   : > { %v7898_v60 = vpop.f32.mrf.mxu1  ;;  %7592 = vmatprep.subr.bf16.mxu0 %v16958_v55 }
 0xb6c   : > { %v16302_v60 = vld [vmem:[%s16682_s2 + $0x2d8] sm:$0xff]  }
 0xb6e   : > { %7593 = vmatpush2.bf16.msra.mxu0 %v16287_v5 }
 0xb6f   : > { %7594 = vmatprep.subr.bf16.mxu0 %v16958_v55 }
 0xb72   : > { %7595 = vmatpush2.bf16.msra.mxu0 %v16294_v31 }
 0xb73   : > { %7646 = vmatprep.subr.bf16.mxu0 %v16958_v55 }
 0xb75   : > { %7597 = vmatmul.mubr.bf16.vlgmr.msra.gmra.mxu0 %v14180_v22 }
 0xb76   : > { %7647 = vmatpush1.bf16.msra.mxu0 %v16302_v60  ;;  %9013 = vmatprep.mubr.msk.bf16.mxu0 %vm2737_vm3, %v15596_v59  ;;  %v16325_v59 = vld [vmem:[%s16682_s2 + $0x2c0] sm:$0xff]  }
 0xb77   : > { %7648 = vmatprep.subr.bf16.mxu0 %v16958_v55 }
 0xb7a   : > { %7649 = vmatpush1.bf16.msra.mxu0 %v16311_v42 }
 0xb7b   : > { %7650 = vmatprep.subr.bf16.mxu0 %v16958_v55 }
 0xb7e   : > { %7651 = vmatpush1.bf16.msra.mxu0 %v16318_v54 }
 0xb7f   : > { %7652 = vmatprep.subr.bf16.mxu0 %v16958_v55 }
 0xb82   : > { %7653 = vmatpush1.bf16.msra.mxu0 %v16325_v59 }
 0xb83   : > { %7654 = vmatprep.subr.bf16.mxu0 %v16958_v55 }
 0xb86   : > { %7655 = vmatpush1.bf16.msra.mxu0 %v16332_v14 }
 0xb87   : > { %7656 = vmatprep.subr.bf16.mxu0 %v16958_v55 }
 0xb8a   : > { %7657 = vmatpush1.bf16.msra.mxu0 %v16339_v8 }
 0xb8b   : > { %7658 = vmatprep.subr.bf16.mxu0 %v16958_v55 }
 0xb8e   : > { %7659 = vmatpush1.bf16.msra.mxu0 %v16346_v15 }
 0xb8f   : > { %7660 = vmatprep.subr.bf16.mxu0 %v16958_v55 }
 0xb92   : > { %7661 = vmatpush1.bf16.msra.mxu0 %v16353_v25  ;;  %v17270_v25 = vld [vmem:[#allocation29_spill] sm:$0xff] }
 0xb93   : > { %7670 = vmatprep.subr.bf16.mxu0 %v16958_v55 }
 0xb95   : > { %v16357_v38 = vpop.f32.mrf.mxu1 }
 0xb96   : > { %17261 = vst [vmem:[#allocation57_spill] sm:$0xff] %v16357_v38  ;;  %7671 = vmatpush2.bf16.msra.mxu0 %v16362_v44 }
 0xb97   : > { %v7995_v50 = vpop.f32.mrf.mxu1  ;;  %7672 = vmatprep.subr.bf16.mxu0 %v16958_v55 }
 0xb98   : > { %v16385_v50 = vld [vmem:[%s16682_s2 + $0x2e0] sm:$0xff]  }
 0xb99   : > { %v16366_v48 = vpop.f32.mrf.mxu1  ;;  %17266 = vst [vmem:[#allocation61_spill] sm:$0xff] %v16385_v50 }
 0xb9a   : > { %17263 = vst [vmem:[#allocation59_spill] sm:$0xff] %v16366_v48  ;;  %7673 = vmatpush2.bf16.msra.mxu0 %v16371_v56  ;;  %v17268_v48 = vld [vmem:[#allocation64_spill] sm:$0xff] }
 0xb9b   : > { %v7998_v38 = vpop.f32.mrf.mxu1  ;;  %7674 = vmatprep.subr.bf16.mxu0 %v16958_v55 }
 0xb9c   : > { %v17267_v38 = vld [vmem:[#allocation27_spill] sm:$0xff] }
 0xb9d   : > { %v6380_v21 = vadd.f32 %v17268_v48, %v17267_v38  ;;  %v17271_v48 = vld [vmem:[#allocation65_spill] sm:$0xff] }
 0xb9e   : > { %7675 = vmatpush2.bf16.msra.mxu0 %v16378_v3  ;;  %v16397_v3 = vld [vmem:[%s16682_s2 + $0x398] sm:$0xff]   ;;  %v6383_v38 = vadd.f32 %v17271_v48, %v17270_v25  ;;  %v16424_v25 = vld [vmem:[%s16682_s2 + $0x380] sm:$0xff]   ;;  %v16445_v48 = vld [vmem:[%s16682_s2 + $0x368] sm:$0xff]  }
 0xb9f   : > { %7676 = vmatprep.subr.bf16.mxu0 %v16958_v55  ;;  %17274 = vst [vmem:[#allocation67_spill] sm:$0xff] %v16445_v48 }
 0xba2   : > { %7677 = vmatpush2.bf16.msra.mxu0 %v16385_v50 }
 0xba3   : > { %7732 = vmatprep.subr.bf16.mxu0 %v16958_v55 }
 0xba5   : > { %7679 = vmatmul.mubr.bf16.vlgmr.msra.gmra.mxu0 %v15662_v11  ;;  %v7330_v56 = vpop.f32.mrf.mxu0 }
 0xba6   : > { %v16392_v44 = vadd.f32 %v7330_v56, %v6380_v21  ;;  %7733 = vmatpush1.bf16.msra.mxu0 %v16397_v3  ;;  %9015 = vmatprep.mubr.msk.bf16.mxu0 %vm2737_vm3, %v15531_v18  ;;  %v16410_v56 = vld [vmem:[%s16682_s2 + $0x390] sm:$0xff]   ;;  %v16417_v18 = vld [vmem:[%s16682_s2 + $0x388] sm:$0xff]  }
 0xba7   : > { %v9114_v50 = vpop.f32.mrf.mxu0  ;;  %7734 = vmatprep.subr.bf16.mxu0 %v16958_v55 }
 0xba8   : > { %17269 = vst [vmem:[#allocation62_spill] sm:$0xff] %v16392_v44  ;;  %v16438_v50 = vld [vmem:[%s16682_s2 + $0x370] sm:$0xff]  }
 0xba9   : > { %v7333_v15 = vpop.f32.mrf.mxu0  ;;  %17273 = vst [vmem:[#allocation66_spill] sm:$0xff] %v16438_v50 }
 0xbaa   : > { %v16405_v8 = vadd.f32 %v7333_v15, %v6383_v38  ;;  %7735 = vmatpush1.bf16.msra.mxu0 %v16410_v56  ;;  %v16431_v15 = vld [vmem:[%s16682_s2 + $0x378] sm:$0xff]   ;;  %v16452_v38 = vld [vmem:[%s16682_s2 + $0x360] sm:$0xff]  }
 0xbab   : > { %v9115_v21 = vpop.f32.mrf.mxu0  ;;  %7736 = vmatprep.subr.bf16.mxu0 %v16958_v55  ;;  %17275 = vst [vmem:[#allocation68_spill] sm:$0xff] %v16452_v38 }
 0xbac   : > { %17272 = vst [vmem:[#allocation63_spill] sm:$0xff] %v16405_v8  ;;  %v16461_v8 = vld [vmem:[%s16682_s2 + $0x3b8] sm:$0xff]  }
 0xbae   : > { %7737 = vmatpush1.bf16.msra.mxu0 %v16417_v18 }
 0xbaf   : > { %7738 = vmatprep.subr.bf16.mxu0 %v16958_v55 }
 0xbb2   : > { %7739 = vmatpush1.bf16.msra.mxu0 %v16424_v25 }
 0xbb3   : > { %7740 = vmatprep.subr.bf16.mxu0 %v16958_v55 }
 0xbb6   : > { %7741 = vmatpush1.bf16.msra.mxu0 %v16431_v15 }
 0xbb7   : > { %7742 = vmatprep.subr.bf16.mxu0 %v16958_v55 }
 0xbba   : > { %7743 = vmatpush1.bf16.msra.mxu0 %v16438_v50  ;;  %v16477_v50 = vld [vmem:[%s16682_s2 + $0x3a8] sm:$0xff]  }
 0xbbb   : > { %7744 = vmatprep.subr.bf16.mxu0 %v16958_v55  ;;  %17279 = vst [vmem:[#allocation5_spill] sm:$0xff] %v16477_v50 }
 0xbbe   : > { %7745 = vmatpush1.bf16.msra.mxu0 %v16445_v48 }
 0xbbf   : > { %7746 = vmatprep.subr.bf16.mxu0 %v16958_v55 }
 0xbc2   : > { %7747 = vmatpush1.bf16.msra.mxu0 %v16452_v38  ;;  %v16470_v38 = vld [vmem:[%s16682_s2 + $0x3b0] sm:$0xff]  }
 0xbc3   : > { %7756 = vmatprep.subr.bf16.mxu0 %v16958_v55  ;;  %17278 = vst [vmem:[#allocation4_spill] sm:$0xff] %v16470_v38 }
 0xbc5   : > { %v16456_v21 = vpop.f32.mrf.mxu1 }
 0xbc6   : > { %17276 = vst [vmem:[#allocation69_spill] sm:$0xff] %v16456_v21  ;;  %7757 = vmatpush2.bf16.msra.mxu0 %v16461_v8 }
 0xbc7   : > { %v8081_v44 = vpop.f32.mrf.mxu1  ;;  %7758 = vmatprep.subr.bf16.mxu0 %v16958_v55 }
 0xbc8   : > { %v16484_v44 = vld [vmem:[%s16682_s2 + $0x3a0] sm:$0xff]  }
 0xbc9   : > { %v16465_v48 = vpop.f32.mrf.mxu1 }
 0xbca   : > { %17277 = vst [vmem:[#allocation70_spill] sm:$0xff] %v16465_v48  ;;  %7759 = vmatpush2.bf16.msra.mxu0 %v16470_v38 }
 0xbcb   : > { %v8084_v21 = vpop.f32.mrf.mxu1  ;;  %7760 = vmatprep.subr.bf16.mxu0 %v16958_v55 }
 0xbce   : > { %7761 = vmatpush2.bf16.msra.mxu0 %v16477_v50 }
 0xbcf   : > { %7762 = vmatprep.subr.bf16.mxu0 %v16958_v55 }
 0xbd2   : > { %7763 = vmatpush2.bf16.msra.mxu0 %v16484_v44 }
 0xbd3   : > { %7818 = vmatprep.subr.bf16.mxu0 %v16958_v55 }
 0xbd5   : > { %v7414_v21 = vpop.f32.mrf.mxu0  ;;  %7765 = vmatmul.mubr.bf16.vlgmr.msra.gmra.mxu0 %v15586_v35 }
 0xbd6   : > { %7819 = vmatpush1.bf16.msra.mxu0 %v15939_v40  ;;  %9017 = vmatprep.mubr.msk.bf16.mxu0 %vm2737_vm3, %v14120_v16 }
 0xbd7   : > { %v7416_v48 = vpop.f32.mrf.mxu0  ;;  %7820 = vmatprep.subr.bf16.mxu0 %v16958_v55 }
 0xbd8   : > { %v17293_v48 = vld [vmem:[#allocation66_spill] sm:$0xff] }
 0xbd9   : > { %v7417_v50 = vpop.f32.mrf.mxu0 }
 0xbda   : > { %7821 = vmatpush1.bf16.msra.mxu0 %v15952_v41 }
 0xbdb   : > { %v7419_v38 = vpop.f32.mrf.mxu0  ;;  %7822 = vmatprep.subr.bf16.mxu0 %v16958_v55 }
 0xbdc   : > { %v17295_v38 = vld [vmem:[#allocation68_spill] sm:$0xff] }
 0xbde   : > { %7823 = vmatpush1.bf16.msra.mxu0 %v15963_v47  ;;  %v7415_v47 = vadd.f32 %v7414_v21, %v15699_v17  ;;  %v17298_v21 = vld [vmem:[#allocation45_spill] sm:$0xff] }
 0xbdf   : > { %7824 = vmatprep.subr.bf16.mxu0 %v16958_v55 }
 0xbe2   : > { %7825 = vmatpush1.bf16.msra.mxu0 %v15974_v36  ;;  %v7418_v36 = vadd.f32 %v7417_v50, %v15709_v9 }
 0xbe3   : > { %7826 = vmatprep.subr.bf16.mxu0 %v16958_v55 }
 0xbe4   : > { %v7463_v17 = vadd.f32 %v15787_v45, %v7418_v36  ;;  %v9903_v45 = vld [vmem:[#allocation2 + $0x84] ss:$8 sps:$4 sm:$0xff]   ;;  %v17299_v36 = vld [vmem:[#allocation49_spill] sm:$0xff] }
 0xbe6   : > { %7827 = vmatpush1.bf16.msra.mxu0 %v15985_v51  ;;  %v7462_v51 = vadd.f32 %v15772_v20, %v7415_v47  ;;  %v9902_v20 = vld [vmem:[#allocation2 + $0xa0] ss:$8 sps:$4 sm:$0xff]  }
 0xbe7   : > { %7828 = vmatprep.subr.bf16.mxu0 %v16958_v55 }
 0xbea   : > { %7829 = vmatpush1.bf16.msra.mxu0 %v15996_v0 }
 0xbeb   : > { %7830 = vmatprep.subr.bf16.mxu0 %v16958_v55 }
 0xbee   : > { %7831 = vmatpush1.bf16.msra.mxu0 %v16007_v4 }
 0xbef   : > { %7832 = vmatprep.subr.bf16.mxu0 %v16958_v55 }
 0xbf2   : > { %7833 = vmatpush1.bf16.msra.mxu0 %v16018_v63  ;;  %v9901_v63 = vld [vmem:[#allocation2 + $0xa4] ss:$8 sps:$4 sm:$0xff]  }
 0xbf3   : > { %7842 = vmatprep.subr.bf16.mxu0 %v16958_v55 }
 0xbf6   : > { %v16507_v16 = vpop.f32.mrf.mxu1  ;;  %7843 = vmatpush2.bf16.msra.mxu0 %v16032_v24 }
 0xbf7   : > { %7844 = vmatprep.subr.bf16.mxu0 %v16958_v55 }
 0xbf8   : > { %v8165_v35 = vpop.f32.mrf.mxu1 }
 0xbfa   : > { %v16511_v40 = vpop.f32.mrf.mxu1  ;;  %7845 = vmatpush2.bf16.msra.mxu0 %v16047_v43 }
 0xbfb   : > { %7846 = vmatprep.subr.bf16.mxu0 %v16958_v55 }
 0xbfc   : > { %v8168_v41 = vpop.f32.mrf.mxu1 }
 0xbfe   : > { %7847 = vmatpush2.bf16.msra.mxu0 %v16058_v27 }
 0xbff   : > { %7848 = vmatprep.subr.bf16.mxu0 %v16958_v55 }
 0xc02   : > { %7849 = vmatpush2.bf16.msra.mxu0 %v16069_v12 }
 0xc03   : > { %7902 = vmatprep.subr.bf16.mxu0 %v16958_v55 }
 0xc05   : > { %v7498_v0 = vpop.f32.mrf.mxu0  ;;  %7851 = vmatmul.mubr.bf16.vlgmr.msra.gmra.mxu0 %v14180_v22 }
 0xc06   : > { %v16523_v4 = vadd.f32 %v7498_v0, %v7462_v51  ;;  %7903 = vmatpush1.bf16.msra.mxu0 %v16081_v57  ;;  %9019 = vmatprep.mubr.msk.bf16.mxu0 %vm2737_vm3, %v9901_v63  ;;  %v17300_v51 = vld [vmem:[#allocation50_spill] sm:$0xff] }
 0xc07   : > { %v7500_v24 = vpop.f32.mrf.mxu0  ;;  %7904 = vmatprep.subr.bf16.mxu0 %v16958_v55 }
 0xc09   : > { %v7501_v43 = vpop.f32.mrf.mxu0 }
 0xc0a   : > { %v16529_v27 = vadd.f32 %v7501_v43, %v7463_v17  ;;  %7905 = vmatpush1.bf16.msra.mxu0 %v16096_v39 }
 0xc0b   : > { %v7503_v9 = vpop.f32.mrf.mxu0  ;;  %7906 = vmatprep.subr.bf16.mxu0 %v16958_v55 }
 0xc0e   : > { %7907 = vmatpush1.bf16.msra.mxu0 %v16107_v19 }
 0xc0f   : > { %7908 = vmatprep.subr.bf16.mxu0 %v16958_v55 }
 0xc12   : > { %7909 = vmatpush1.bf16.msra.mxu0 %v16118_v37 }
 0xc13   : > { %7910 = vmatprep.subr.bf16.mxu0 %v16958_v55 }
 0xc16   : > { %7911 = vmatpush1.bf16.msra.mxu0 %v16129_v26 }
 0xc17   : > { %7912 = vmatprep.subr.bf16.mxu0 %v16958_v55 }
 0xc1a   : > { %7913 = vmatpush1.bf16.msra.mxu0 %v16140_v2 }
 0xc1b   : > { %7914 = vmatprep.subr.bf16.mxu0 %v16958_v55 }
 0xc1e   : > { %7915 = vmatpush1.bf16.msra.mxu0 %v16151_v34 }
 0xc1f   : > { %7916 = vmatprep.subr.bf16.mxu0 %v16958_v55 }
 0xc22   : > { %7917 = vmatpush1.bf16.msra.mxu0 %v16162_v62 }
 0xc23   : > { %7926 = vmatprep.subr.bf16.mxu0 %v16958_v55 }
 0xc26   : > { %7927 = vmatpush2.bf16.msra.mxu0 %v16176_v53 }
 0xc27   : > { %7928 = vmatprep.subr.bf16.mxu0 %v16958_v55 }
 0xc2a   : > { %7929 = vmatpush2.bf16.msra.mxu0 %v16187_v1 }
 0xc2b   : > { %7930 = vmatprep.subr.bf16.mxu0 %v16958_v55 }
 0xc2e   : > { %7931 = vmatpush2.bf16.msra.mxu0 %v16194_v49  ;;  %v17286_v49 = vld [vmem:[#allocation61_spill] sm:$0xff] }
 0xc2f   : > { %7932 = vmatprep.subr.bf16.mxu0 %v16958_v55 }
 0xc32   : > { %7933 = vmatpush2.bf16.msra.mxu0 %v16201_v28  ;;  %v17287_v28 = vld [vmem:[#allocation47_spill] sm:$0xff] }
 0xc33   : > { %8004 = vmatprep.subr.bf16.mxu0 %v16958_v55 }
 0xc35   : > { %v7598_v22 = vpop.f32.mrf.mxu0  ;;  %7935 = vmatmul.mubr.bf16.vlgmr.msra.gmra.mxu0 %v9902_v20 }
 0xc36   : > { %8005 = vmatpush1.bf16.msra.mxu0 %v16211_v10  ;;  %9023 = vmatprep.mubr.msk.bf16.mxu0 %vm2737_vm3, %v9903_v45  ;;  %v7640_v19 = vadd.f32 %v15900_v7, %v7598_v22  ;;  %v17281_v7 = vld [vmem:[#allocation55_spill] sm:$0xff] }
 0xc37   : > { %v7600_v12 = vpop.f32.mrf.mxu0  ;;  %8006 = vmatprep.subr.bf16.mxu0 %v16958_v55 }
 0xc39   : > { %v7601_v57 = vpop.f32.mrf.mxu0 }
 0xc3a   : > { %8007 = vmatpush1.bf16.msra.mxu0 %v16220_v58  ;;  %v7643_v34 = vadd.f32 %v15912_v33, %v7601_v57  ;;  %v17282_v33 = vld [vmem:[#allocation56_spill] sm:$0xff]  ;;  %v17304_v57 = vld [vmem:[#allocation59_spill] sm:$0xff] }
 0xc3b   : > { %v7603_v39 = vpop.f32.mrf.mxu0  ;;  %8008 = vmatprep.subr.bf16.mxu0 %v16958_v55 }
 0xc3e   : > { %8009 = vmatpush1.bf16.msra.mxu0 %v16227_v23  ;;  %v17288_v23 = vld [vmem:[#allocation51_spill] sm:$0xff] }
 0xc3f   : > { %8010 = vmatprep.subr.bf16.mxu0 %v16958_v55 }
 0xc42   : > { %8011 = vmatpush1.bf16.msra.mxu0 %v16234_v46  ;;  %v17289_v46 = vld [vmem:[#allocation42_spill] sm:$0xff] }
 0xc43   : > { %8012 = vmatprep.subr.bf16.mxu0 %v16958_v55 }
 0xc46   : > { %8013 = vmatpush1.bf16.msra.mxu0 %v16241_v30  ;;  %v7562_v30 = vadd.f32 %v17289_v46, %v16523_v4  ;;  %v17301_v4 = vld [vmem:[#allocation52_spill] sm:$0xff] }
 0xc47   : > { %8014 = vmatprep.subr.bf16.mxu0 %v16958_v55 }
 0xc4a   : > { %8015 = vmatpush1.bf16.msra.mxu0 %v16248_v52 }
 0xc4b   : > { %8016 = vmatprep.subr.bf16.mxu0 %v16958_v55 }
 0xc4e   : > { %8017 = vmatpush1.bf16.msra.mxu0 %v16255_v32  ;;  %v17290_v32 = vld [vmem:[#allocation41_spill] sm:$0xff] }
 0xc4f   : > { %8018 = vmatprep.subr.bf16.mxu0 %v16958_v55 }
 0xc52   : > { %8019 = vmatpush1.bf16.msra.mxu0 %v16262_v61 }
 0xc53   : > { %8028 = vmatprep.subr.bf16.mxu0 %v16958_v55 }
 0xc56   : > { %8029 = vmatpush2.bf16.msra.mxu0 %v16271_v29 }
 0xc57   : > { %8030 = vmatprep.subr.bf16.mxu0 %v16958_v55 }
 0xc5a   : > { %8031 = vmatpush2.bf16.msra.mxu0 %v16280_v6 }
 0xc5b   : > { %8032 = vmatprep.subr.bf16.mxu0 %v16958_v55 }
 0xc5e   : > { %8033 = vmatpush2.bf16.msra.mxu0 %v16287_v5 }
 0xc5f   : > { %8034 = vmatprep.subr.bf16.mxu0 %v16958_v55 }
 0xc62   : > { %8035 = vmatpush2.bf16.msra.mxu0 %v16294_v31  ;;  %v17292_v31 = vld [vmem:[#allocation44_spill] sm:$0xff] }
 0xc63   : > { %8086 = vmatprep.subr.bf16.mxu0 %v16958_v55 }
 0xc65   : > { %v7680_v37 = vpop.f32.mrf.mxu0  ;;  %8037 = vmatmul.mubr.bf16.vlgmr.msra.gmra.mxu0 %v15662_v11  ;;  %v17280_v11 = vld [vmem:[#allocation54_spill] sm:$0xff] }
 0xc66   : > { %v7687_v26 = vadd.f32 %v7680_v37, %v7640_v19  ;;  %8087 = vmatpush1.bf16.msra.mxu0 %v16302_v60  ;;  %9025 = vmatprep.mubr.msk.bf16.mxu0 %vm2737_vm3, %v16084_v13  ;;  %v17285_v13 = vld [vmem:[#allocation60_spill] sm:$0xff]  ;;  %v7563_v60 = vadd.f32 %v17292_v31, %v16529_v27  ;;  %v17302_v27 = vld [vmem:[#allocation57_spill] sm:$0xff]  ;;  %v9391_v37 = vld [vmem:[%s16683_s3 + $0x78] sm:$0xff]  }
 0xc67   : > { %v7682_v2 = vpop.f32.mrf.mxu0  ;;  %8088 = vmatprep.subr.bf16.mxu0 %v16958_v55  ;;  %9117 = vmatpush3.bf16.msra.mxu1 %v9391_v37 }
 0xc68   : > { %v7730_v10 = vadd.f32 %v17287_v28, %v7687_v26  ;;  %v17305_v26 = vmov 0.0   ;;  %v9392_v2 = vld [vmem:[%s16683_s3 + $0x70] sm:$0xff]  }
 0xc69   : > { %v7683_v62 = vpop.f32.mrf.mxu0  ;;  %9118 = vmatprep.subr.bf16.mxu1 %v17305_v26 }
 0xc6a   : > { %v7688_v53 = vadd.f32 %v7683_v62, %v7643_v34  ;;  %8089 = vmatpush1.bf16.msra.mxu0 %v16311_v42  ;;  %v17284_v42 = vld [vmem:[#allocation43_spill] sm:$0xff]  ;;  %v9393_v34 = vld [vmem:[%s16683_s3 + $0x68] sm:$0xff]  }
 0xc6b   : > { %v7685_v1 = vpop.f32.mrf.mxu0  ;;  %8090 = vmatprep.subr.bf16.mxu0 %v16958_v55  ;;  %9119 = vmatpush3.bf16.msra.mxu1 %v9392_v2  ;;  %v9394_v62 = vld [vmem:[%s16683_s3 + $0x60] sm:$0xff]  }
 0xc6c   : > { %9120 = vmatprep.subr.bf16.mxu1 %v17305_v26 }
 0xc6e   : > { %8091 = vmatpush1.bf16.msra.mxu0 %v16318_v54  ;;  %v17283_v54 = vld [vmem:[#allocation58_spill] sm:$0xff] }
 0xc6f   : > { %8092 = vmatprep.subr.bf16.mxu0 %v16958_v55  ;;  %9121 = vmatpush3.bf16.msra.mxu1 %v9393_v34 }
 0xc70   : > { %9122 = vmatprep.subr.bf16.mxu1 %v17305_v26 }
 0xc72   : > { %8093 = vmatpush1.bf16.msra.mxu0 %v16325_v59 }
 0xc73   : > { %8094 = vmatprep.subr.bf16.mxu0 %v16958_v55  ;;  %9123 = vmatpush3.bf16.msra.mxu1 %v9394_v62 }
 0xc76   : > { %8095 = vmatpush1.bf16.msra.mxu0 %v16332_v14  ;;  %v17291_v14 = vld [vmem:[#allocation48_spill] sm:$0xff] }
 0xc77   : > { %8096 = vmatprep.subr.bf16.mxu0 %v16958_v55  ;;  %v7731_v6 = vadd.f32 %v17291_v14, %v7688_v53 }
 0xc7a   : > { %8097 = vmatpush1.bf16.msra.mxu0 %v17280_v11 }
 0xc7b   : > { %8098 = vmatprep.subr.bf16.mxu0 %v16958_v55 }
 0xc7e   : > { %8099 = vmatpush1.bf16.msra.mxu0 %v17281_v7 }
 0xc7f   : > { %8100 = vmatprep.subr.bf16.mxu0 %v16958_v55 }
 0xc82   : > { %8101 = vmatpush1.bf16.msra.mxu0 %v17282_v33 }
 0xc83   : > { %8110 = vmatprep.subr.bf16.mxu0 %v16958_v55 }
 0xc86   : > { %8111 = vmatpush2.bf16.msra.mxu0 %v17283_v54 }
 0xc87   : > { %8112 = vmatprep.subr.bf16.mxu0 %v16958_v55 }
 0xc8a   : > { %8113 = vmatpush2.bf16.msra.mxu0 %v17284_v42 }
 0xc8b   : > { %8114 = vmatprep.subr.bf16.mxu0 %v16958_v55 }
 0xc8e   : > { %8115 = vmatpush2.bf16.msra.mxu0 %v17285_v13 }
 0xc8f   : > { %8116 = vmatprep.subr.bf16.mxu0 %v16958_v55 }
 0xc92   : > { %8117 = vmatpush2.bf16.msra.mxu0 %v17286_v49  ;;  %v17306_v49 = vld [vmem:[#allocation69_spill] sm:$0xff] }
 0xc93   : > { %8172 = vmatprep.subr.bf16.mxu0 %v16958_v55 }
 0xc95   : > { %v7766_v58 = vpop.f32.mrf.mxu0  ;;  %8119 = vmatmul.mubr.bf16.vlgmr.msra.gmra.mxu0 %v17288_v23 }
 0xc96   : > { %v7773_v52 = vadd.f32 %v7766_v58, %v7730_v10  ;;  %8173 = vmatpush1.bf16.msra.mxu0 %v16397_v3  ;;  %9027 = vmatprep.mubr.msk.bf16.mxu0 %vm2737_vm3, %v17290_v32  ;;  %v17307_v58 = vld [vmem:[#allocation70_spill] sm:$0xff] }
 0xc97   : > { %v7768_v61 = vpop.f32.mrf.mxu0  ;;  %8174 = vmatprep.subr.bf16.mxu0 %v16958_v55 }
 0xc98   : > { %v7775_v29 = vmax.f32 %v7562_v30, %v7773_v52 }
 0xc99   : > { %v7769_v5 = vpop.f32.mrf.mxu0 }
 0xc9a   : > { %v7774_v59 = vadd.f32 %v7769_v5, %v7731_v6  ;;  %8175 = vmatpush1.bf16.msra.mxu0 %v16410_v56  ;;  %v17294_v56 = vld [vmem:[#allocation67_spill] sm:$0xff] }
 0xc9b   : > { %v7771_v50 = vpop.f32.mrf.mxu0  ;;  %8176 = vmatprep.subr.bf16.mxu0 %v16958_v55 }
 0xc9c   : > { %v7776_v3 = vmax.f32 %v7563_v60, %v7774_v59  ;;  %v17308_v60 = vld [vmem:[#allocation46_spill] sm:$0xff] }
 0xc9e   : > { %8177 = vmatpush1.bf16.msra.mxu0 %v16417_v18  ;;  %v17296_v18 = vld [vmem:[#allocation4_spill] sm:$0xff] }
 0xc9f   : > { %8178 = vmatprep.subr.bf16.mxu0 %v16958_v55 }
 0xca2   : > { %8179 = vmatpush1.bf16.msra.mxu0 %v16424_v25  ;;  %v17297_v25 = vld [vmem:[#allocation5_spill] sm:$0xff] }
 0xca3   : > { %8180 = vmatprep.subr.bf16.mxu0 %v16958_v55 }
 0xca6   : > { %8181 = vmatpush1.bf16.msra.mxu0 %v16431_v15 }
 0xca7   : > { %8182 = vmatprep.subr.bf16.mxu0 %v16958_v55 }
 0xcaa   : > { %8183 = vmatpush1.bf16.msra.mxu0 %v17293_v48 }
 0xcab   : > { %8184 = vmatprep.subr.bf16.mxu0 %v16958_v55 }
 0xcae   : > { %8185 = vmatpush1.bf16.msra.mxu0 %v17294_v56 }
 0xcaf   : > { %8186 = vmatprep.subr.bf16.mxu0 %v16958_v55 }
 0xcb2   : > { %8187 = vmatpush1.bf16.msra.mxu0 %v17295_v38 }
 0xcb3   : > { %8196 = vmatprep.subr.bf16.mxu0 %v16958_v55 }
 0xcb6   : > { %8197 = vmatpush2.bf16.msra.mxu0 %v16461_v8 }
 0xcb7   : > { %8198 = vmatprep.subr.bf16.mxu0 %v16958_v55 }
 0xcba   : > { %8199 = vmatpush2.bf16.msra.mxu0 %v17296_v18  ;;  %v9033_v18 = vld [vmem:[%s16686_s6] ss:$0 sm:$0xff] }
 0xcbb   : > { %8200 = vmatprep.subr.bf16.mxu0 %v16958_v55 }
 0xcbe   : > { %8201 = vmatpush2.bf16.msra.mxu0 %v17297_v25  ;;  %v17309_v25 = vld [vmem:[#allocation62_spill] sm:$0xff] }
 0xcbf   : > { %8202 = vmatprep.subr.bf16.mxu0 %v16958_v55  ;;  %v17303_v55 = vld [vmem:[#allocation53_spill] sm:$0xff] }
 0xcc2   : > { %8203 = vmatpush2.bf16.msra.mxu0 %v16484_v44 }
 0xcc5   : > { %v7852_v15 = vpop.f32.mrf.mxu0  ;;  %8205 = vmatmul.mubr.bf16.vlgmr.msra.gmra.mxu0 %v17298_v21 }
 0xcc6   : > { %v7853_v8 = vadd.f32 %v7852_v15, %v17299_v36 }
 0xcc7   : > { %v7854_v35 = vpop.f32.mrf.mxu0 }
 0xcc8   : > { %v7900_v63 = vadd.f32 %v17301_v4, %v7853_v8 }
 0xcc9   : > { %v7855_v41 = vpop.f32.mrf.mxu0 }
 0xcca   : > { %v7856_v0 = vadd.f32 %v7855_v41, %v17300_v51  ;;  %v17310_v41 = vld [vmem:[#allocation63_spill] sm:$0xff] }
 0xccb   : > { %v7857_v47 = vpop.f32.mrf.mxu0 }
 0xccc   : > { %v7901_v22 = vadd.f32 %v17303_v55, %v7856_v0 }
 0xcf5   : > { %v7936_v24 = vpop.f32.mrf.mxu0 }
 0xcf6   : > { %v7943_v17 = vadd.f32 %v7936_v24, %v7900_v63 }
 0xcf7   : > { %v7938_v43 = vpop.f32.mrf.mxu0 }
 0xcf8   : > { %v8000_v9 = vadd.f32 %v17302_v27, %v7943_v17 }
 0xcf9   : > { %v7939_v44 = vpop.f32.mrf.mxu0 }
 0xcfa   : > { %v7944_v20 = vadd.f32 %v7939_v44, %v7901_v22  ;;  %v8002_v45 = vmax.f32 %v7775_v29, %v8000_v9 }
 0xcfb   : > { %v7941_v12 = vpop.f32.mrf.mxu0 }
 0xcfc   : > { %v8001_v39 = vadd.f32 %v17304_v57, %v7944_v20 }
 0xcfe   : > { %v8003_v19 = vmax.f32 %v7776_v3, %v8001_v39 }
 0xd25   : > { %v8038_v53 = vpop.f32.mrf.mxu0 }
 0xd26   : > { %v8080_v28 = vadd.f32 %v17306_v49, %v8038_v53 }
 0xd27   : > { %v8040_v1 = vpop.f32.mrf.mxu0 }
 0xd29   : > { %v8041_v11 = vpop.f32.mrf.mxu0 }
 0xd2a   : > { %v8083_v23 = vadd.f32 %v17307_v58, %v8041_v11 }
 0xd2b   : > { %v8043_v7 = vpop.f32.mrf.mxu0 }
 0xd55   : > { %v8120_v33 = vpop.f32.mrf.mxu0 }
 0xd56   : > { %v8127_v10 = vadd.f32 %v8120_v33, %v8080_v28 }
 0xd57   : > { %v8122_v54 = vpop.f32.mrf.mxu0 }
 0xd58   : > { %v8170_v30 = vadd.f32 %v16507_v16, %v8127_v10 }
 0xd59   : > { %v8123_v42 = vpop.f32.mrf.mxu0 }
 0xd5a   : > { %v8128_v46 = vadd.f32 %v8123_v42, %v8083_v23 }
 0xd5b   : > { %v8125_v13 = vpop.f32.mrf.mxu0 }
 0xd5c   : > { %v8171_v14 = vadd.f32 %v16511_v40, %v8128_v46 }
 0xd85   : > { %v8206_v52 = vpop.f32.mrf.mxu0 }
 0xd86   : > { %v8213_v32 = vadd.f32 %v8206_v52, %v8170_v30 }
 0xd87   : > { %v8208_v61 = vpop.f32.mrf.mxu0 }
 0xd88   : > { %v8215_v29 = vmax.f32 %v8002_v45, %v8213_v32 }
 0xd89   : > { %v8209_v6 = vpop.f32.mrf.mxu0 }
 0xd8a   : > { %v8214_v5 = vadd.f32 %v8209_v6, %v8171_v14  ;;  %v8217_v59 = vadd.f32 %v17308_v60, %v8215_v29 }
 0xd8b   : > { %v8211_v31 = vpop.f32.mrf.mxu0 }
 0xd8c   : > { %v8216_v50 = vmax.f32 %v8003_v19, %v8214_v5  ;;  %v8219_v48 = vmax.f32 %v8217_v59, 0.0 }
 0xd8e   : > { %v8218_v3 = vadd.f32 %v17308_v60, %v8216_v50 }
 0xd90   : > { %v8220_v56 = vmax.f32 %v8218_v3, 0.0 }
 0xd92   : > { %v8221_v38 = vpack.c.bf16 %v8220_v56, %v8219_v48 }
 0xd94   : > { %9125 = vmatmul.mubr.msk.bf16.vlgmr.msra.gmra.mxu1 %vm2737_vm3, %v8221_v38 }
 0xe54   : > { %v8283_v16 = vpop.f32.mrf.mxu1 }
 0xe55   : > { %v8290_v40 = vadd.f32 %v8283_v16, %v17309_v25 }
 0xe56   : > { %v9126_v15 = vpop.f32.mrf.mxu1 }
 0xe57   : > { %v8299_v21 = vadd.f32 %v9033_v18, %v8290_v40 }
 0xe58   : > { %v8286_v35 = vpop.f32.mrf.mxu1 }
 0xe59   : > { %v8291_v47 = vadd.f32 %v8286_v35, %v17310_v41  ;;  %8301 = vmax.xlane.f32.xlu0 %v8299_v21 }
 0xe5a   : > { %v9127_v36 = vpop.f32.mrf.mxu1 }
 0xe5b   : > { %v8300_v8 = vadd.f32 %v9033_v18, %v8291_v47 }
 0xe5d   : > { %8303 = vmax.xlane.f32.xlu1 %v8300_v8 }
 0xee2   : > { %v8302_v51 = vpop.xlane.xlu0 %8301 }
 0xee3   : > { %v8305_v0 = vsub.f32 %v8299_v21, %v8302_v51 }
 0xee5   : > { %v8307_v4 = vmul.f32 1.442695, %v8305_v0 }
 0xee6   : > { %v8304_v63 = vpop.xlane.xlu1 %8303 }
 0xee7   : > { %9395 = vpow2.f32 %v8307_v4  ;;  %v8306_v24 = vsub.f32 %v8300_v8, %v8304_v63 }
 0xee9   : > { %v8309_v17 = vmul.f32 1.442695, %v8306_v24 }
 0xeeb   : > { %9397 = vpow2.f32 %v8309_v17 }
 0xef4   : > { %v9396_v43 = vpop.eup %9395 }
 0xef5   : > { %8311 = vadd.xlane.f32.xlu0 %v9396_v43 }
 0xef8   : > { %v9398_v27 = vpop.eup %9397 }
 0xef9   : > { %8313 = vadd.xlane.f32.xlu0 %v9398_v27 }
 0xf7e   : > { %v8312_v9 = vpop.xlane.xlu0 %8311 }
 0xf7f   : > { %9399 = vlog2.f32 %v8312_v9 }
 0xf82   : > { %v8314_v55 = vpop.xlane.xlu0 %8313 }
 0xf83   : > { %9401 = vlog2.f32 %v8314_v55 }
 0xf8c   : > { %v9400_v22 = vpop.eup %9399 }
 0xf8d   : > { %v8316_v44 = vmul.f32 0.6931472, %v9400_v22 }
 0xf8f   : > { %v8319_v20 = vsub.f32 %v8305_v0, %v8316_v44 }
 0xf90   : > { %v9402_v45 = vpop.eup %9401 }
 0xf91   : > { %8321 = vst [vmem:[%s283_s27] sm:$0xff] %v8319_v20  ;;  %v8318_v12 = vmul.f32 0.6931472, %v9402_v45 }
 0xf93   : > { %v8320_v57 = vsub.f32 %v8306_v24, %v8318_v12 }
 0xf95   : > { %8322 = vst [vmem:[%s283_s27 + $0x8] sm:$0xff] %v8320_v57 }
 0xf96 PF: > { %s17_s24 = sadd.s32 1, %s9910_s24  }
 0xf97   : > { %p14_p4 = scmp.ge.s32.totalorder %s17_s24, 4  }
 0xf99   :  { %16 = sbr.rel (!%p14_p4) target bundleno = 1 (0x1), region = 102 }

</bundles_post_ra>
